<compile_context>
chip_gen: v5e
topology: v5e:2x2
jax: 0.10.0
libtpu: 0.0.40
codegen_flags: <defaults>
</compile_context>

<pallas_src>
import math
import jax
import jax.numpy as jnp
from jax.experimental import pallas as pl
from jax.experimental.pallas import tpu as pltpu


# ----------------------------------------------------------------------------
# Pallas kernels
# ----------------------------------------------------------------------------

def _make_linear_kernel(act: str):
    """y = act(x @ w_t + b). Weights may be bf16; activations are down-cast to
    the weight dtype for the MXU, accumulation stays f32."""
    def kernel(x_ref, wt_ref, b_ref, o_ref):
        x = x_ref[...].astype(wt_ref.dtype)
        y = jnp.dot(x, wt_ref[...], preferred_element_type=jnp.float32)
        y = y + b_ref[...]                       # (1, N) broadcasts over rows
        if act == "leaky_relu":
            y = jnp.where(y >= 0, y, 0.01 * y)   # PyTorch default negative_slope
        elif act == "tanh":
            y = jnp.tanh(y)
        o_ref[...] = y.astype(o_ref.dtype)
    return kernel


def conv_as_matmul(patches, wct, bc):
    """im2col conv: (B*124, 66) @ (66, 32) + bias, LeakyReLU.
    Single shot, output kept at its true 32-lane width (no 128 padding)."""
    M = patches.shape[0]
    N = wct.shape[1]
    return pl.pallas_call(
        _make_linear_kernel("leaky_relu"),
        out_shape=jax.ShapeDtypeStruct((M, N), jnp.float32),
    )(patches, wct, bc)


def fc1_linear(x, w1t, b1, *, tile_n=512):
    """fc_H[0]: (B, 3968) @ (3968, 1024-padded) + bias, LeakyReLU.
    Weight is pre-transposed / pre-padded bf16; grid over output-column tiles
    marked 'parallel' so v7x's two TensorCores each take one 512-wide tile."""
    M, K = x.shape
    Np = w1t.shape[1]
    n_tiles = Np // tile_n
    return pl.pallas_call(
        _make_linear_kernel("leaky_relu"),
        out_shape=jax.ShapeDtypeStruct((M, Np), jnp.float32),
        grid_spec=pltpu.PrefetchScalarGridSpec(
            num_scalar_prefetch=0,
            grid=(n_tiles,),
            in_specs=[
                pl.BlockSpec((M, K), lambda j: (0, 0)),        # activations (full)
                pl.BlockSpec((K, tile_n), lambda j: (0, j)),   # weight column tile
                pl.BlockSpec((1, tile_n), lambda j: (0, j)),   # bias tile
            ],
            out_specs=pl.BlockSpec((M, tile_n), lambda j: (0, j)),
        ),
        compiler_params=pltpu.CompilerParams(
            dimension_semantics=("parallel",),
            vmem_limit_bytes=32 * 1024 * 1024,
        ),
    )(x, w1t, b1)


def _fused_tail_kernel(h1_ref, w2t_ref, b2_ref,
                       g_ref, wgt_ref, bg_ref,
                       e_ref, wet_ref, be_ref,
                       og_ref, oe_ref):
    """fc_H[3] + linear_gcn + linear_encoder + attention combine, fused.

    All projected widths are padded to 128 lanes; padded columns are exactly
    zero (zero weight cols + zero bias, leaky_relu(0)=tanh(0)=0), so the
    row-wise dot products over the full 128 lanes are correct.
    """
    # fc2 (leaky_relu) — h1 is the padded (B, 1024) fc1 output, W2t is bf16.
    h2 = jnp.dot(h1_ref[...].astype(w2t_ref.dtype), w2t_ref[...],
                 preferred_element_type=jnp.float32) + b2_ref[...]
    h2 = jnp.where(h2 >= 0, h2, 0.01 * h2)                      # (B, 128)

    # linear_gcn / linear_encoder (tanh)
    g = jnp.tanh(jnp.dot(g_ref[...], wgt_ref[...],
                         preferred_element_type=jnp.float32) + bg_ref[...])
    e = jnp.tanh(jnp.dot(e_ref[...], wet_ref[...],
                         preferred_element_type=jnp.float32) + be_ref[...])

    # diag(proj @ h2.T) == row-wise dot products
    a_g = jnp.sum(g * h2, axis=1, keepdims=True)                # (B, 1)
    a_e = jnp.sum(e * h2, axis=1, keepdims=True)                # (B, 1)

    # 2-way softmax + scaling of the ORIGINAL features
    m = jnp.maximum(a_g, a_e)
    eg = jnp.exp(a_g - m)
    ee = jnp.exp(a_e - m)
    denom = eg + ee
    og_ref[...] = g_ref[...] * (eg / denom)
    oe_ref[...] = e_ref[...] * (ee / denom)


def fused_tail(h1, w2t, b2, ld_gcn, wgt, bg, ld_enc, wet, be):
    out_shapes = (
        jax.ShapeDtypeStruct(ld_gcn.shape, ld_gcn.dtype),
        jax.ShapeDtypeStruct(ld_enc.shape, ld_enc.dtype),
    )
    return pl.pallas_call(_fused_tail_kernel, out_shape=out_shapes)(
        h1, w2t, b2, ld_gcn, wgt, bg, ld_enc, wet, be
    )


# ----------------------------------------------------------------------------
# Parameter construction (deterministic, xavier-uniform style)
# Weights are stored already transposed / padded / permuted / (bf16) for Pallas.
# ----------------------------------------------------------------------------

def xavier_uniform(key, shape, gain=1.0):
    fan_out, fan_in = shape[0], shape[1]
    a = gain * math.sqrt(6.0 / (fan_in + fan_out))
    return jax.random.uniform(key, shape, jnp.float32, -a, a)


def init_params(key, in_ft_gcn, in_ft_encoder, out_ft):
    assert out_ft == 100, "out_ft must be 100 for the diagonal matmul to type-check"
    gain_lrelu = math.sqrt(2.0 / (1.0 + 0.01 ** 2))
    gain_tanh = 5.0 / 3.0
    ks = jax.random.split(key, 6)

    W_OUT, CH = 124, 32          # inferred conv output width / channels
    N1, N1P = 1000, 1024         # fc1 out, padded to lane multiple
    N2, N2P = 100, 128           # fc2 / gcn / encoder out, padded

    # Embedding H (padding_idx=0 -> zero row, as PyTorch does)
    H = xavier_uniform(ks[0], (645, 1140)).at[0].set(0.0)

    # inferred CNN conv: Conv2d(1, 32, kernel=(2,33), stride=(1,9))
    Wc = xavier_uniform(ks[1], (CH, 66))
    Wct = jnp.asarray(Wc.T)                                  # (66, 32)
    bc = jnp.zeros((1, CH), jnp.float32)

    # fc_H[0]: Linear(3968, 1000). Permute input columns from PyTorch's NCHW
    # flatten order (c*124 + w) to the Pallas conv output order (w*32 + c),
    # transpose, pad N 1000->1024, cast to bf16.
    W1 = xavier_uniform(ks[2], (N1, 3968), gain=gain_lrelu)
    W1 = W1.reshape(N1, CH, W_OUT).transpose(0, 2, 1).reshape(N1, 3968)
    W1t = (jnp.zeros((3968, N1P), jnp.float32)
           .at[:, :N1].set(W1.T).astype(jnp.bfloat16))
    b1 = jnp.zeros((1, N1P), jnp.float32)

    # fc_H[3]: Linear(1000, 100). Pad K 1000->1024 and N 100->128, cast bf16.
    W2 = xavier_uniform(ks[3], (N2, N1), gain=gain_lrelu)
    W2t = (jnp.zeros((N1P, N2P), jnp.float32)
           .at[:N1, :N2].set(W2.T).astype(jnp.bfloat16))
    b2 = jnp.zeros((1, N2P), jnp.float32)

    # linear_gcn / linear_encoder (small -> keep f32), pad N 100->128.
    Wg = xavier_uniform(ks[4], (N2, in_ft_gcn), gain=gain_tanh)
    Wgt = jnp.zeros((in_ft_gcn, N2P), jnp.float32).at[:, :N2].set(Wg.T)
    bg = jnp.zeros((1, N2P), jnp.float32)

    We = xavier_uniform(ks[5], (N2, in_ft_encoder), gain=gain_tanh)
    Wet = jnp.zeros((in_ft_encoder, N2P), jnp.float32).at[:, :N2].set(We.T)
    be = jnp.zeros((1, N2P), jnp.float32)

    return {
        "H": H, "Wct": Wct, "bc": bc,
        "W1t": W1t, "b1": b1,
        "W2t": W2t, "b2": b2,
        "Wgt": Wgt, "bg": bg,
        "Wet": Wet, "be": be,
    }


# ----------------------------------------------------------------------------
# Forward pass
# ----------------------------------------------------------------------------

def attention_forward(params, ld_gcn, ld_encoder, x, y):
    B = x.shape[0]
    H = params["H"]

    # Embedding lookups + concat, viewed as NCHW (B, 1, 2, 1140)
    emb_x = H[x]                # (B, 1140)
    emb_y = H[y + 240]          # (B, 1140)
    img = jnp.stack([emb_x, emb_y], axis=1)        # (B, 2, 1140)

    # im2col for inferred Conv2d(1, 32, kernel=(2,33), stride=(1,9)) -> W_out = 124
    w_out, kw, stride = 124, 33, 9
    cols = jnp.arange(w_out)[:, None] * stride + jnp.arange(kw)[None, :]       # (124, 33)
    patches = img[:, :, cols]                                                  # (B, 2, 124, 33)
    patches = jnp.transpose(patches, (0, 2, 1, 3)).reshape(B * w_out, 2 * kw)  # (B*124, 66)

    # conv as matmul (Pallas) + LeakyReLU — output stays 32 wide
    conv = conv_as_matmul(patches, params["Wct"], params["bc"])   # (B*124, 32)
    # Plain reshape (no transpose): feature order (w, c) matches permuted W1.
    conv = conv.reshape(B, w_out * 32)                            # (B, 3968)

    # fc_H[0] (Dropout = identity); output kept padded to 1024 lanes
    h1 = fc1_linear(conv, params["W1t"], params["b1"])            # (B, 1024)

    # fc_H[3] + linear_gcn + linear_encoder + softmax combine, fused in one call
    out_gcn, out_enc = fused_tail(
        h1, params["W2t"], params["b2"],
        ld_gcn, params["Wgt"], params["bg"],
        ld_encoder, params["Wet"], params["be"],
    )
    return out_gcn, out_enc


# ----------------------------------------------------------------------------
# Main
# ----------------------------------------------------------------------------

if __name__ == "__main__":
    B = 4
    in_ft_gcn = 32
    in_ft_encoder = 48
    out_ft = 100            # required: matmul with fc_H output (100-dim) diagonal

    key = jax.random.PRNGKey(0)
    kp, kx, ky, kg, ke = jax.random.split(key, 5)

    params = init_params(kp, in_ft_gcn, in_ft_encoder, out_ft)

    x = jax.random.randint(kx, (B,), 0, 645, dtype=jnp.int32)
    y = jax.random.randint(ky, (B,), 0, 405, dtype=jnp.int32)   # y + 240 < 645
    ld_gcn = jax.random.normal(kg, (B, in_ft_gcn), jnp.float32)
    ld_encoder = jax.random.normal(ke, (B, in_ft_encoder), jnp.float32)

    out_gcn, out_enc = jax.jit(attention_forward)(params, ld_gcn, ld_encoder, x, y)
    jax.block_until_ready((out_gcn, out_enc))

    assert out_gcn.shape == (B, in_ft_gcn)
    assert out_enc.shape == (B, in_ft_encoder)
    print("KERNEL_OK")
</pallas_src>

<mosaic_0001>
module attributes {stable_mosaic.version = 11 : i64} {
  func.func @kernel(%arg0: memref<496x66xf32, #tpu.memory_space<vmem>>, %arg1: memref<66x32xf32, #tpu.memory_space<vmem>>, %arg2: memref<1x32xf32, #tpu.memory_space<vmem>>, %arg3: memref<496x32xf32, #tpu.memory_space<vmem>>) attributes {dimension_semantics = [], scalar_prefetch = 0 : i64, scratch_operands = 0 : i64, tpu.core_type = #tpu.core_type<tc>} {
    %c0 = arith.constant 0 : index
    %c0_0 = arith.constant 0 : index
    %0 = vector.load %arg0[%c0, %c0_0] : memref<496x66xf32, #tpu.memory_space<vmem>>, vector<496x66xf32>
    %c0_1 = arith.constant 0 : index
    %c0_2 = arith.constant 0 : index
    %1 = vector.load %arg1[%c0_1, %c0_2] : memref<66x32xf32, #tpu.memory_space<vmem>>, vector<66x32xf32>
    %cst = arith.constant dense<0.000000e+00> : vector<496x32xf32>
    %2 = tpu.matmul %0, %1, %cst {dimension_numbers = #tpu.dot_dimension_numbers<[1], [0], [0], [1], [0, 0, 1, 1], [], []>} : vector<496x66xf32>, vector<66x32xf32>, vector<496x32xf32> -> vector<496x32xf32>
    %c0_3 = arith.constant 0 : index
    %c0_4 = arith.constant 0 : index
    %3 = vector.load %arg2[%c0_3, %c0_4] : memref<1x32xf32, #tpu.memory_space<vmem>>, vector<1x32xf32>
    %4 = vector.broadcast %3 : vector<1x32xf32> to vector<496x32xf32>
    %5 = arith.addf %2, %4 : vector<496x32xf32>
    %cst_5 = arith.constant 0.000000e+00 : f32
    %6 = vector.broadcast %cst_5 : f32 to vector<496x32xf32>
    %7 = arith.cmpf oge, %5, %6 : vector<496x32xf32>
    %cst_6 = arith.constant 0.00999999977 : f32
    %8 = vector.broadcast %cst_6 : f32 to vector<496x32xf32>
    %9 = arith.mulf %8, %5 : vector<496x32xf32>
    %10 = arith.select %7, %5, %9 : vector<496x32xi1>, vector<496x32xf32>
    %c0_7 = arith.constant 0 : index
    %c0_8 = arith.constant 0 : index
    %11 = vector.load %arg3[%c0_7, %c0_8] : memref<496x32xf32, #tpu.memory_space<vmem>>, vector<496x32xf32>
    tpu.vector_store %arg3[%c0_7, %c0_8], %10 {strides = array<i32>} : memref<496x32xf32, #tpu.memory_space<vmem>>, vector<496x32xf32>,
    return
  }
}

module attributes {stable_mosaic.version = 11 : i64} {
  func.func @kernel(%arg0: i32, %arg1: memref<4x3968xf32, #tpu.memory_space<vmem>>, %arg2: memref<3968x512xbf16, #tpu.memory_space<vmem>>, %arg3: memref<1x512xf32, #tpu.memory_space<vmem>>, %arg4: memref<4x512xf32, #tpu.memory_space<vmem>>) attributes {dimension_semantics = [#tpu.dimension_semantics<parallel>], iteration_bounds = array<i64: 2>, scalar_prefetch = 0 : i64, scratch_operands = 0 : i64, tpu.core_type = #tpu.core_type<tc>, window_params = [{pipeline_mode = #tpu.pipeline_mode<synchronous>, transform_indices = @transform_0, window_bounds = array<i64: 4, 3968>}, {transform_indices = @transform_1, window_bounds = array<i64: 3968, 512>}, {transform_indices = @transform_2, window_bounds = array<i64: 1, 512>}, {transform_indices = @transform_3, window_bounds = array<i64: 4, 512>}]} {
    %c0 = arith.constant 0 : index
    %c0_0 = arith.constant 0 : index
    %0 = vector.load %arg1[%c0, %c0_0] : memref<4x3968xf32, #tpu.memory_space<vmem>>, vector<4x3968xf32>
    %1 = arith.truncf %0 : vector<4x3968xf32> to vector<4x3968xbf16>
    %c0_1 = arith.constant 0 : index
    %c0_2 = arith.constant 0 : index
    %2 = vector.load %arg2[%c0_1, %c0_2] : memref<3968x512xbf16, #tpu.memory_space<vmem>>, vector<3968x512xbf16>
    %cst = arith.constant dense<0.000000e+00> : vector<4x512xf32>
    %3 = tpu.matmul %1, %2, %cst {dimension_numbers = #tpu.dot_dimension_numbers<[1], [0], [0], [1], [0, 0, 1, 1], [], []>} : vector<4x3968xbf16>, vector<3968x512xbf16>, vector<4x512xf32> -> vector<4x512xf32>
    %c0_3 = arith.constant 0 : index
    %c0_4 = arith.constant 0 : index
    %4 = vector.load %arg3[%c0_3, %c0_4] : memref<1x512xf32, #tpu.memory_space<vmem>>, vector<1x512xf32>
    %5 = vector.broadcast %4 : vector<1x512xf32> to vector<4x512xf32>
    %6 = arith.addf %3, %5 : vector<4x512xf32>
    %cst_5 = arith.constant 0.000000e+00 : f32
    %7 = vector.broadcast %cst_5 : f32 to vector<4x512xf32>
    %8 = arith.cmpf oge, %6, %7 : vector<4x512xf32>
    %cst_6 = arith.constant 0.00999999977 : f32
    %9 = vector.broadcast %cst_6 : f32 to vector<4x512xf32>
    %10 = arith.mulf %9, %6 : vector<4x512xf32>
    %11 = arith.select %8, %6, %10 : vector<4x512xi1>, vector<4x512xf32>
    %c0_7 = arith.constant 0 : index
    %c0_8 = arith.constant 0 : index
    %12 = vector.load %arg4[%c0_7, %c0_8] : memref<4x512xf32, #tpu.memory_space<vmem>>, vector<4x512xf32>
    tpu.vector_store %arg4[%c0_7, %c0_8], %11 {strides = array<i32>} : memref<4x512xf32, #tpu.memory_space<vmem>>, vector<4x512xf32>,
    return
  }
  func.func @transform_0(%arg0: i32) -> (i32, i32) {
    %c0_i32 = arith.constant 0 : i32
    %c0_i32_0 = arith.constant 0 : i32
    %c0_i32_1 = arith.constant 0 : i32
    return %c0_i32, %c0_i32_0 : i32, i32
  }
  func.func @transform_1(%arg0: i32) -> (i32, i32) {
    %c0_i32 = arith.constant 0 : i32
    %c0_i32_0 = arith.constant 0 : i32
    return %c0_i32, %arg0 : i32, i32
  }
  func.func @transform_2(%arg0: i32) -> (i32, i32) {
    %c0_i32 = arith.constant 0 : i32
    %c0_i32_0 = arith.constant 0 : i32
    return %c0_i32, %arg0 : i32, i32
  }
  func.func @transform_3(%arg0: i32) -> (i32, i32) {
    %c0_i32 = arith.constant 0 : i32
    %c0_i32_0 = arith.constant 0 : i32
    return %c0_i32, %arg0 : i32, i32
  }
}

module attributes {stable_mosaic.version = 11 : i64} {
  func.func @_fused_tail_kernel(%arg0: memref<4x1024xf32, #tpu.memory_space<vmem>>, %arg1: memref<1024x128xbf16, #tpu.memory_space<vmem>>, %arg2: memref<1x128xf32, #tpu.memory_space<vmem>>, %arg3: memref<4x32xf32, #tpu.memory_space<vmem>>, %arg4: memref<32x128xf32, #tpu.memory_space<vmem>>, %arg5: memref<1x128xf32, #tpu.memory_space<vmem>>, %arg6: memref<4x48xf32, #tpu.memory_space<vmem>>, %arg7: memref<48x128xf32, #tpu.memory_space<vmem>>, %arg8: memref<1x128xf32, #tpu.memory_space<vmem>>, %arg9: memref<4x32xf32, #tpu.memory_space<vmem>>, %arg10: memref<4x48xf32, #tpu.memory_space<vmem>>) attributes {dimension_semantics = [], scalar_prefetch = 0 : i64, scratch_operands = 0 : i64, tpu.core_type = #tpu.core_type<tc>} {
    %c0 = arith.constant 0 : index
    %c0_0 = arith.constant 0 : index
    %0 = vector.load %arg0[%c0, %c0_0] : memref<4x1024xf32, #tpu.memory_space<vmem>>, vector<4x1024xf32>
    %1 = arith.truncf %0 : vector<4x1024xf32> to vector<4x1024xbf16>
    %c0_1 = arith.constant 0 : index
    %c0_2 = arith.constant 0 : index
    %2 = vector.load %arg1[%c0_1, %c0_2] : memref<1024x128xbf16, #tpu.memory_space<vmem>>, vector<1024x128xbf16>
    %cst = arith.constant dense<0.000000e+00> : vector<4x128xf32>
    %3 = tpu.matmul %1, %2, %cst {dimension_numbers = #tpu.dot_dimension_numbers<[1], [0], [0], [1], [0, 0, 1, 1], [], []>} : vector<4x1024xbf16>, vector<1024x128xbf16>, vector<4x128xf32> -> vector<4x128xf32>
    %c0_3 = arith.constant 0 : index
    %c0_4 = arith.constant 0 : index
    %4 = vector.load %arg2[%c0_3, %c0_4] : memref<1x128xf32, #tpu.memory_space<vmem>>, vector<1x128xf32>
    %5 = vector.broadcast %4 : vector<1x128xf32> to vector<4x128xf32>
    %6 = arith.addf %3, %5 : vector<4x128xf32>
    %cst_5 = arith.constant 0.000000e+00 : f32
    %7 = vector.broadcast %cst_5 : f32 to vector<4x128xf32>
    %8 = arith.cmpf oge, %6, %7 : vector<4x128xf32>
    %cst_6 = arith.constant 0.00999999977 : f32
    %9 = vector.broadcast %cst_6 : f32 to vector<4x128xf32>
    %10 = arith.mulf %9, %6 : vector<4x128xf32>
    %11 = arith.select %8, %6, %10 : vector<4x128xi1>, vector<4x128xf32>
    %c0_7 = arith.constant 0 : index
    %c0_8 = arith.constant 0 : index
    %12 = vector.load %arg3[%c0_7, %c0_8] : memref<4x32xf32, #tpu.memory_space<vmem>>, vector<4x32xf32>
    %c0_9 = arith.constant 0 : index
    %c0_10 = arith.constant 0 : index
    %13 = vector.load %arg4[%c0_9, %c0_10] : memref<32x128xf32, #tpu.memory_space<vmem>>, vector<32x128xf32>
    %cst_11 = arith.constant dense<0.000000e+00> : vector<4x128xf32>
    %14 = tpu.matmul %12, %13, %cst_11 {dimension_numbers = #tpu.dot_dimension_numbers<[1], [0], [0], [1], [0, 0, 1, 1], [], []>} : vector<4x32xf32>, vector<32x128xf32>, vector<4x128xf32> -> vector<4x128xf32>
    %c0_12 = arith.constant 0 : index
    %c0_13 = arith.constant 0 : index
    %15 = vector.load %arg5[%c0_12, %c0_13] : memref<1x128xf32, #tpu.memory_space<vmem>>, vector<1x128xf32>
    %16 = vector.broadcast %15 : vector<1x128xf32> to vector<4x128xf32>
    %17 = arith.addf %14, %16 : vector<4x128xf32>
    %18 = math.tanh %17 : vector<4x128xf32>
    %c0_14 = arith.constant 0 : index
    %c0_15 = arith.constant 0 : index
    %19 = vector.load %arg6[%c0_14, %c0_15] : memref<4x48xf32, #tpu.memory_space<vmem>>, vector<4x48xf32>
    %c0_16 = arith.constant 0 : index
    %c0_17 = arith.constant 0 : index
    %20 = vector.load %arg7[%c0_16, %c0_17] : memref<48x128xf32, #tpu.memory_space<vmem>>, vector<48x128xf32>
    %cst_18 = arith.constant dense<0.000000e+00> : vector<4x128xf32>
    %21 = tpu.matmul %19, %20, %cst_18 {dimension_numbers = #tpu.dot_dimension_numbers<[1], [0], [0], [1], [0, 0, 1, 1], [], []>} : vector<4x48xf32>, vector<48x128xf32>, vector<4x128xf32> -> vector<4x128xf32>
    %c0_19 = arith.constant 0 : index
    %c0_20 = arith.constant 0 : index
    %22 = vector.load %arg8[%c0_19, %c0_20] : memref<1x128xf32, #tpu.memory_space<vmem>>, vector<1x128xf32>
    %23 = vector.broadcast %22 : vector<1x128xf32> to vector<4x128xf32>
    %24 = arith.addf %21, %23 : vector<4x128xf32>
    %25 = math.tanh %24 : vector<4x128xf32>
    %26 = arith.mulf %18, %11 : vector<4x128xf32>
    %cst_21 = arith.constant dense<0.000000e+00> : vector<4xf32>
    %27 = vector.multi_reduction <add>, %26, %cst_21 [1] : vector<4x128xf32> to vector<4xf32>
    %28 = vector.shape_cast %27 : vector<4xf32> to vector<4x1xf32>
    %29 = arith.mulf %25, %11 : vector<4x128xf32>
    %cst_22 = arith.constant dense<0.000000e+00> : vector<4xf32>
    %30 = vector.multi_reduction <add>, %29, %cst_22 [1] : vector<4x128xf32> to vector<4xf32>
    %31 = vector.shape_cast %30 : vector<4xf32> to vector<4x1xf32>
    %32 = arith.maximumf %28, %31 : vector<4x1xf32>
    %33 = arith.subf %28, %32 : vector<4x1xf32>
    %34 = math.exp %33 : vector<4x1xf32>
    %35 = arith.subf %31, %32 : vector<4x1xf32>
    %36 = math.exp %35 : vector<4x1xf32>
    %37 = arith.addf %34, %36 : vector<4x1xf32>
    %c0_23 = arith.constant 0 : index
    %c0_24 = arith.constant 0 : index
    %38 = vector.load %arg3[%c0_23, %c0_24] : memref<4x32xf32, #tpu.memory_space<vmem>>, vector<4x32xf32>
    %39 = arith.divf %34, %37 : vector<4x1xf32>
    %40 = vector.broadcast %39 : vector<4x1xf32> to vector<4x32xf32>
    %41 = arith.mulf %38, %40 : vector<4x32xf32>
    %c0_25 = arith.constant 0 : index
    %c0_26 = arith.constant 0 : index
    %42 = vector.load %arg9[%c0_25, %c0_26] : memref<4x32xf32, #tpu.memory_space<vmem>>, vector<4x32xf32>
    tpu.vector_store %arg9[%c0_25, %c0_26], %41 {strides = array<i32>} : memref<4x32xf32, #tpu.memory_space<vmem>>, vector<4x32xf32>,
    %c0_27 = arith.constant 0 : index
    %c0_28 = arith.constant 0 : index
    %43 = vector.load %arg6[%c0_27, %c0_28] : memref<4x48xf32, #tpu.memory_space<vmem>>, vector<4x48xf32>
    %44 = arith.divf %36, %37 : vector<4x1xf32>
    %45 = vector.broadcast %44 : vector<4x1xf32> to vector<4x48xf32>
    %46 = arith.mulf %43, %45 : vector<4x48xf32>
    %c0_29 = arith.constant 0 : index
    %c0_30 = arith.constant 0 : index
    %47 = vector.load %arg10[%c0_29, %c0_30] : memref<4x48xf32, #tpu.memory_space<vmem>>, vector<4x48xf32>
    tpu.vector_store %arg10[%c0_29, %c0_30], %46 {strides = array<i32>} : memref<4x48xf32, #tpu.memory_space<vmem>>, vector<4x48xf32>,
    return
  }
}

</mosaic_0001>

<bundles_post_ra>
// kernel: attention_forward.3
= control target key start
LH: loop header
LB: loop body
LE: loop exit
PB: predicated region body
PF: predicated region fallthrough
CT: control target
= control target key end

     0   :  { %vm276_vm0 = vcmask 1041408   ;;  %vm89_vm1 = vcmask 539648   ;;  %vm669_vm4 = vcmask 261120   ;;  %s1437_s1 = inlined_call_operand.vmem [shape: f32[66,32], index: 1, kind: input, shape index: {}]   ;;  %s1438_s2 = inlined_call_operand.vmem [shape: f32[1,32], index: 2, kind: input, shape index: {}]   ;;  %s1439_s0 = inlined_call_operand.vmem [shape: f32[496,66], index: 0, kind: input, shape index: {}]   ;;  %s1440_s3 = inlined_call_operand.vmem [shape: f32[496,32], index: 3, kind: output, shape index: {}]  }
   0x1   :  { %v84_v0 = vld [vmem:[%s1437_s1 + $0x40] sm:$0x3]  ;;  %v83_v1 = vld [vmem:[%s1437_s1 + $0x38] sm:$0xff]  ;;  %v82_v2 = vld [vmem:[%s1437_s1 + $0x30] sm:$0xff] }
   0x2   :  { %800 = vmatpush.msk.msra.mxu2 %vm276_vm0, %v84_v0  ;;  %801 = vmatpush.msk.msra.mxu3 %vm276_vm0, %v84_v0  ;;  %v81_v3 = vld [vmem:[%s1437_s1 + $0x28] sm:$0xff]  ;;  %v80_v4 = vld [vmem:[%s1437_s1 + $0x20] sm:$0xff]  ;;  %v79_v5 = vld [vmem:[%s1437_s1 + $0x18] sm:$0xff] }
   0x3   :  { %736 = vmatpush.msk.msra.mxu0 %vm276_vm0, %v84_v0  ;;  %799 = vmatpush.msk.msra.mxu1 %vm276_vm0, %v84_v0  ;;  %v78_v6 = vld [vmem:[%s1437_s1 + $0x10] sm:$0xff]  ;;  %v77_v7 = vld [vmem:[%s1437_s1 + $0x8] sm:$0xff]  ;;  %v76_v8 = vld [vmem:[%s1437_s1] sm:$0xff] }
   0x4   :  { %803 = vmatpush.msra.mxu2 %v83_v1  ;;  %804 = vmatpush.msra.mxu3 %v83_v1  ;;  %v44_v9 = vld [vmem:[%s1439_s0 + $0xf0] sm:$0xff]  ;;  %v14_v11 = vld [vmem:[%s1439_s0] sm:$0xff]  ;;  %v29_v12 = vld [vmem:[%s1439_s0 + $0x78] sm:$0xff] }
   0x5   :  { %288 = vmatpush.msra.mxu0 %v83_v1  ;;  %802 = vmatpush.msra.mxu1 %v83_v1  ;;  %v60_v10 = vld [vmem:[%s1439_s0 + $0x170] sm:$0xff]  ;;  %v45_v13 = vld [vmem:[%s1439_s0 + $0xf8] sm:$0xff]  ;;  %v15_v15 = vld [vmem:[%s1439_s0 + $0x8] sm:$0xff] }
   0x6   :  { %806 = vmatpush.msra.mxu2 %v82_v2  ;;  %807 = vmatpush.msra.mxu3 %v82_v2  ;;  %v61_v14 = vld [vmem:[%s1439_s0 + $0x178] sm:$0xff]  ;;  %v30_v16 = vld [vmem:[%s1439_s0 + $0x80] sm:$0xff]  ;;  %v16_v19 = vld [vmem:[%s1439_s0 + $0x10] sm:$0xff] }
   0x7   :  { %289 = vmatpush.msra.mxu0 %v82_v2  ;;  %805 = vmatpush.msra.mxu1 %v82_v2  ;;  %v46_v17 = vld [vmem:[%s1439_s0 + $0x100] sm:$0xff]  ;;  %v31_v20 = vld [vmem:[%s1439_s0 + $0x88] sm:$0xff]  ;;  %v17_v23 = vld [vmem:[%s1439_s0 + $0x18] sm:$0xff] }
   0x8   :  { %809 = vmatpush.msra.mxu2 %v81_v3  ;;  %810 = vmatpush.msra.mxu3 %v81_v3  ;;  %v62_v18 = vld [vmem:[%s1439_s0 + $0x180] sm:$0xff]  ;;  %v47_v21 = vld [vmem:[%s1439_s0 + $0x108] sm:$0xff]  ;;  %v32_v24 = vld [vmem:[%s1439_s0 + $0x90] sm:$0xff] }
   0x9   :  { %290 = vmatpush.msra.mxu0 %v81_v3  ;;  %808 = vmatpush.msra.mxu1 %v81_v3  ;;  %v63_v22 = vld [vmem:[%s1439_s0 + $0x188] sm:$0xff]  ;;  %v48_v25 = vld [vmem:[%s1439_s0 + $0x110] sm:$0xff]  ;;  %v18_v27 = vld [vmem:[%s1439_s0 + $0x20] sm:$0xff] }
   0xa   :  { %812 = vmatpush.msra.mxu2 %v80_v4  ;;  %813 = vmatpush.msra.mxu3 %v80_v4  ;;  %v64_v26 = vld [vmem:[%s1439_s0 + $0x190] sm:$0xff]  ;;  %v33_v28 = vld [vmem:[%s1439_s0 + $0x98] sm:$0xff]  ;;  %v19_v31 = vld [vmem:[%s1439_s0 + $0x28] sm:$0xff] }
   0xb   :  { %291 = vmatpush.msra.mxu0 %v80_v4  ;;  %811 = vmatpush.msra.mxu1 %v80_v4  ;;  %v49_v29 = vld [vmem:[%s1439_s0 + $0x118] sm:$0xff]  ;;  %v34_v32 = vld [vmem:[%s1439_s0 + $0xa0] sm:$0xff]  ;;  %v20_v35 = vld [vmem:[%s1439_s0 + $0x30] sm:$0xff] }
   0xc   :  { %815 = vmatpush.msra.mxu2 %v79_v5  ;;  %816 = vmatpush.msra.mxu3 %v79_v5  ;;  %v65_v30 = vld [vmem:[%s1439_s0 + $0x198] sm:$0xff]  ;;  %v50_v33 = vld [vmem:[%s1439_s0 + $0x120] sm:$0xff]  ;;  %v35_v36 = vld [vmem:[%s1439_s0 + $0xa8] sm:$0xff] }
   0xd   :  { %292 = vmatpush.msra.mxu0 %v79_v5  ;;  %814 = vmatpush.msra.mxu1 %v79_v5  ;;  %v66_v34 = vld [vmem:[%s1439_s0 + $0x1a0] sm:$0xff]  ;;  %v51_v37 = vld [vmem:[%s1439_s0 + $0x128] sm:$0xff]  ;;  %v21_v39 = vld [vmem:[%s1439_s0 + $0x38] sm:$0xff] }
   0xe   :  { %818 = vmatpush.msra.mxu2 %v78_v6  ;;  %819 = vmatpush.msra.mxu3 %v78_v6  ;;  %v67_v38 = vld [vmem:[%s1439_s0 + $0x1a8] sm:$0xff]  ;;  %v36_v40 = vld [vmem:[%s1439_s0 + $0xb0] sm:$0xff]  ;;  %v22_v43 = vld [vmem:[%s1439_s0 + $0x40] sm:$0xff] }
   0xf   :  { %293 = vmatpush.msra.mxu0 %v78_v6  ;;  %817 = vmatpush.msra.mxu1 %v78_v6  ;;  %v52_v41 = vld [vmem:[%s1439_s0 + $0x130] sm:$0xff]  ;;  %v37_v44 = vld [vmem:[%s1439_s0 + $0xb8] sm:$0xff]  ;;  %v23_v47 = vld [vmem:[%s1439_s0 + $0x48] sm:$0xff] }
  0x10   :  { %821 = vmatpush.msra.mxu2 %v77_v7  ;;  %822 = vmatpush.msra.mxu3 %v77_v7  ;;  %v68_v42 = vld [vmem:[%s1439_s0 + $0x1b0] sm:$0xff]  ;;  %v53_v45 = vld [vmem:[%s1439_s0 + $0x138] sm:$0xff]  ;;  %v38_v48 = vld [vmem:[%s1439_s0 + $0xc0] sm:$0xff] }
  0x11   :  { %294 = vmatpush.msra.mxu0 %v77_v7  ;;  %820 = vmatpush.msra.mxu1 %v77_v7  ;;  %v69_v46 = vld [vmem:[%s1439_s0 + $0x1b8] sm:$0xff]  ;;  %v54_v49 = vld [vmem:[%s1439_s0 + $0x140] sm:$0xff]  ;;  %v24_v51 = vld [vmem:[%s1439_s0 + $0x50] sm:$0xff] }
  0x12   :  { %824 = vmatpush.msra.mxu2 %v76_v8  ;;  %825 = vmatpush.msra.mxu3 %v76_v8  ;;  %v70_v50 = vld [vmem:[%s1439_s0 + $0x1c0] sm:$0xff]  ;;  %v39_v52 = vld [vmem:[%s1439_s0 + $0xc8] sm:$0xff]  ;;  %v25_v55 = vld [vmem:[%s1439_s0 + $0x58] sm:$0xff] }
  0x13   :  { %767 = vmatmul.msk.f32.vlgmr.msra.gmra.mxu2 %vm89_vm1, %v44_v9  ;;  %783 = vmatmul.msk.f32.vlgmr.msra.gmra.mxu3 %vm89_vm1, %v60_v10  ;;  %v55_v53 = vld [vmem:[%s1439_s0 + $0x148] sm:$0xff]  ;;  %v40_v56 = vld [vmem:[%s1439_s0 + $0xd0] sm:$0xff]  ;;  %v26_v59 = vld [vmem:[%s1439_s0 + $0x60] sm:$0xff] }
  0x14   :  { %295 = vmatpush.msra.mxu0 %v76_v8  ;;  %823 = vmatpush.msra.mxu1 %v76_v8  ;;  %v71_v54 = vld [vmem:[%s1439_s0 + $0x1c8] sm:$0xff]  ;;  %v56_v57 = vld [vmem:[%s1439_s0 + $0x150] sm:$0xff]  ;;  %v41_v60 = vld [vmem:[%s1439_s0 + $0xd8] sm:$0xff] }
  0x15   :  { %737 = vmatmul.msk.f32.vlgmr.msra.gmra.mxu0 %vm89_vm1, %v14_v11  ;;  %752 = vmatmul.msk.f32.vlgmr.msra.gmra.mxu1 %vm89_vm1, %v29_v12  ;;  %v72_v58 = vld [vmem:[%s1439_s0 + $0x1d0] sm:$0xff]  ;;  %v57_v61 = vld [vmem:[%s1439_s0 + $0x158] sm:$0xff]  ;;  %v27_v63 = vld [vmem:[%s1439_s0 + $0x68] sm:$0xff] }
  0x16   :  { %v73_v62 = vld [vmem:[%s1439_s0 + $0x1d8] sm:$0xff]  ;;  %v42_v0 = vld [vmem:[%s1439_s0 + $0xe0] sm:$0xff]  ;;  %v28_v3 = vld [vmem:[%s1439_s0 + $0x70] sm:$0xff] }
  0x17   :  { %v58_v1 = vld [vmem:[%s1439_s0 + $0x160] sm:$0xff]  ;;  %v43_v4 = vld [vmem:[%s1439_s0 + $0xe8] sm:$0xff] }
  0x18   :  { %v74_v2 = vld [vmem:[%s1439_s0 + $0x1e0] sm:$0xff]  ;;  %v59_v5 = vld [vmem:[%s1439_s0 + $0x168] sm:$0xff] }
  0x19   :  { %v75_v6 = vld [vmem:[%s1439_s0 + $0x1e8] sm:$0xff]  ;;  %v1125_v7 = vld [vmem:[%s1438_s2] ss:$0 sm:$0xff] }
  0x1b   :  { %768 = vmatmul.msk.f32.gmra.mxu2 %vm89_vm1, %v45_v13  ;;  %784 = vmatmul.msk.f32.gmra.mxu3 %vm89_vm1, %v61_v14 }
  0x1d   :  { %738 = vmatmul.msk.f32.gmra.mxu0 %vm89_vm1, %v15_v15  ;;  %753 = vmatmul.msk.f32.gmra.mxu1 %vm89_vm1, %v30_v16 }
  0x23   :  { %769 = vmatmul.msk.f32.gmra.mxu2 %vm89_vm1, %v46_v17  ;;  %785 = vmatmul.msk.f32.gmra.mxu3 %vm89_vm1, %v62_v18 }
  0x25   :  { %739 = vmatmul.msk.f32.gmra.mxu0 %vm89_vm1, %v16_v19  ;;  %754 = vmatmul.msk.f32.gmra.mxu1 %vm89_vm1, %v31_v20 }
  0x2b   :  { %770 = vmatmul.msk.f32.gmra.mxu2 %vm89_vm1, %v47_v21  ;;  %786 = vmatmul.msk.f32.gmra.mxu3 %vm89_vm1, %v63_v22 }
  0x2d   :  { %740 = vmatmul.msk.f32.gmra.mxu0 %vm89_vm1, %v17_v23  ;;  %755 = vmatmul.msk.f32.gmra.mxu1 %vm89_vm1, %v32_v24 }
  0x33   :  { %771 = vmatmul.msk.f32.gmra.mxu2 %vm89_vm1, %v48_v25  ;;  %787 = vmatmul.msk.f32.gmra.mxu3 %vm89_vm1, %v64_v26 }
  0x35   :  { %741 = vmatmul.msk.f32.gmra.mxu0 %vm89_vm1, %v18_v27  ;;  %756 = vmatmul.msk.f32.gmra.mxu1 %vm89_vm1, %v33_v28 }
  0x3b   :  { %772 = vmatmul.msk.f32.gmra.mxu2 %vm89_vm1, %v49_v29  ;;  %788 = vmatmul.msk.f32.gmra.mxu3 %vm89_vm1, %v65_v30 }
  0x3d   :  { %742 = vmatmul.msk.f32.gmra.mxu0 %vm89_vm1, %v19_v31  ;;  %757 = vmatmul.msk.f32.gmra.mxu1 %vm89_vm1, %v34_v32 }
  0x43   :  { %773 = vmatmul.msk.f32.gmra.mxu2 %vm89_vm1, %v50_v33  ;;  %789 = vmatmul.msk.f32.gmra.mxu3 %vm89_vm1, %v66_v34 }
  0x45   :  { %743 = vmatmul.msk.f32.gmra.mxu0 %vm89_vm1, %v20_v35  ;;  %758 = vmatmul.msk.f32.gmra.mxu1 %vm89_vm1, %v35_v36 }
  0x4b   :  { %774 = vmatmul.msk.f32.gmra.mxu2 %vm89_vm1, %v51_v37  ;;  %790 = vmatmul.msk.f32.gmra.mxu3 %vm89_vm1, %v67_v38 }
  0x4d   :  { %744 = vmatmul.msk.f32.gmra.mxu0 %vm89_vm1, %v21_v39  ;;  %759 = vmatmul.msk.f32.gmra.mxu1 %vm89_vm1, %v36_v40 }
  0x53   :  { %775 = vmatmul.msk.f32.gmra.mxu2 %vm89_vm1, %v52_v41  ;;  %791 = vmatmul.msk.f32.gmra.mxu3 %vm89_vm1, %v68_v42 }
  0x55   :  { %745 = vmatmul.msk.f32.gmra.mxu0 %vm89_vm1, %v22_v43  ;;  %760 = vmatmul.msk.f32.gmra.mxu1 %vm89_vm1, %v37_v44 }
  0x5b   :  { %776 = vmatmul.msk.f32.gmra.mxu2 %vm89_vm1, %v53_v45  ;;  %792 = vmatmul.msk.f32.gmra.mxu3 %vm89_vm1, %v69_v46 }
  0x5d   :  { %746 = vmatmul.msk.f32.gmra.mxu0 %vm89_vm1, %v23_v47  ;;  %761 = vmatmul.msk.f32.gmra.mxu1 %vm89_vm1, %v38_v48 }
  0x63   :  { %777 = vmatmul.msk.f32.gmra.mxu2 %vm89_vm1, %v54_v49  ;;  %793 = vmatmul.msk.f32.gmra.mxu3 %vm89_vm1, %v70_v50 }
  0x65   :  { %747 = vmatmul.msk.f32.gmra.mxu0 %vm89_vm1, %v24_v51  ;;  %762 = vmatmul.msk.f32.gmra.mxu1 %vm89_vm1, %v39_v52 }
  0x6b   :  { %778 = vmatmul.msk.f32.gmra.mxu2 %vm89_vm1, %v55_v53  ;;  %794 = vmatmul.msk.f32.gmra.mxu3 %vm89_vm1, %v71_v54 }
  0x6d   :  { %748 = vmatmul.msk.f32.gmra.mxu0 %vm89_vm1, %v25_v55  ;;  %763 = vmatmul.msk.f32.gmra.mxu1 %vm89_vm1, %v40_v56 }
  0x73   :  { %779 = vmatmul.msk.f32.gmra.mxu2 %vm89_vm1, %v56_v57  ;;  %795 = vmatmul.msk.f32.gmra.mxu3 %vm89_vm1, %v72_v58 }
  0x75   :  { %749 = vmatmul.msk.f32.gmra.mxu0 %vm89_vm1, %v26_v59  ;;  %764 = vmatmul.msk.f32.gmra.mxu1 %vm89_vm1, %v41_v60 }
  0x7b   :  { %780 = vmatmul.msk.f32.gmra.mxu2 %vm89_vm1, %v57_v61  ;;  %796 = vmatmul.msk.f32.gmra.mxu3 %vm89_vm1, %v73_v62 }
  0x7d   :  { %750 = vmatmul.msk.f32.gmra.mxu0 %vm89_vm1, %v27_v63  ;;  %765 = vmatmul.msk.f32.gmra.mxu1 %vm89_vm1, %v42_v0 }
  0x83   :  { %781 = vmatmul.msk.f32.gmra.mxu2 %vm89_vm1, %v58_v1  ;;  %797 = vmatmul.msk.f32.gmra.mxu3 %vm89_vm1, %v74_v2 }
  0x85   :  { %751 = vmatmul.msk.f32.gmra.mxu0 %vm89_vm1, %v28_v3  ;;  %766 = vmatmul.msk.f32.gmra.mxu1 %vm89_vm1, %v43_v4 }
  0x8b   :  { %782 = vmatmul.msk.f32.gmra.mxu2 %vm89_vm1, %v59_v5  ;;  %798 = vmatmul.msk.f32.gmra.mxu3 %vm89_vm1, %v75_v6 }
  0x92   :  { %v297_v8 = vpop.f32.mrf.mxu0  ;;  %v342_v9 = vpop.f32.mrf.mxu1 }
  0x93   :  { %v298_v10 = vadd.f32 %v1125_v7, %v297_v8  ;;  %v343_v11 = vadd.f32 %v1125_v7, %v342_v9 }
  0x95   :  { %vm483_vm2 = vcmp.ge.f32.partialorder %v298_v10, 0.0  ;;  %v545_v12 = vmul.f32 0.01, %v298_v10  ;;  %vm498_vm3 = vcmp.ge.f32.partialorder %v343_v11, 0.0  ;;  %v560_v13 = vmul.f32 0.01, %v343_v11 }
  0x96   :  { %v387_v14 = vpop.f32.mrf.mxu2  ;;  %v435_v15 = vpop.f32.mrf.mxu3 }
  0x97   :  { %v388_v16 = vadd.f32 %v1125_v7, %v387_v14  ;;  %v436_v17 = vadd.f32 %v1125_v7, %v435_v15  ;;  %v607_v18 = vsel %vm483_vm2, %v298_v10, %v545_v12  ;;  %v622_v19 = vsel %vm498_vm3, %v343_v11, %v560_v13 }
  0x98   :  { %670 = vst.msk [vmem:[%s1440_s3] sm:$0xff] %vm669_vm4, %v607_v18 }
  0x99   :  { %vm513_vm5 = vcmp.ge.f32.partialorder %v388_v16, 0.0  ;;  %v575_v20 = vmul.f32 0.01, %v388_v16  ;;  %vm529_vm6 = vcmp.ge.f32.partialorder %v436_v17, 0.0  ;;  %v591_v21 = vmul.f32 0.01, %v436_v17 }
  0x9a   :  { %685 = vst.msk [vmem:[%s1440_s3 + $0x78] sm:$0xff] %vm669_vm4, %v622_v19  ;;  %v300_v22 = vpop.f32.mrf.mxu0  ;;  %v345_v23 = vpop.f32.mrf.mxu1 }
  0x9b   :  { %v637_v24 = vsel %vm513_vm5, %v388_v16, %v575_v20  ;;  %v653_v25 = vsel %vm529_vm6, %v436_v17, %v591_v21  ;;  %v301_v26 = vadd.f32 %v1125_v7, %v300_v22  ;;  %v346_v27 = vadd.f32 %v1125_v7, %v345_v23 }
  0x9c   :  { %700 = vst.msk [vmem:[%s1440_s3 + $0xf0] sm:$0xff] %vm669_vm4, %v637_v24 }
  0x9d   :  { %716 = vst.msk [vmem:[%s1440_s3 + $0x170] sm:$0xff] %vm669_vm4, %v653_v25  ;;  %vm484_vm7 = vcmp.ge.f32.partialorder %v301_v26, 0.0  ;;  %v546_v28 = vmul.f32 0.01, %v301_v26  ;;  %vm499_vm8 = vcmp.ge.f32.partialorder %v346_v27, 0.0 }
  0x9e   :  { %v390_v29 = vpop.f32.mrf.mxu2  ;;  %v438_v30 = vpop.f32.mrf.mxu3  ;;  %v561_v31 = vmul.f32 0.01, %v346_v27 }
  0x9f   :  { %v391_v32 = vadd.f32 %v1125_v7, %v390_v29  ;;  %v439_v33 = vadd.f32 %v1125_v7, %v438_v30  ;;  %v608_v34 = vsel %vm484_vm7, %v301_v26, %v546_v28 }
  0xa0   :  { %671 = vst.msk [vmem:[%s1440_s3 + $0x8] sm:$0xff] %vm669_vm4, %v608_v34  ;;  %v623_v35 = vsel %vm499_vm8, %v346_v27, %v561_v31 }
  0xa1   :  { %vm514_vm9 = vcmp.ge.f32.partialorder %v391_v32, 0.0  ;;  %v576_v36 = vmul.f32 0.01, %v391_v32  ;;  %vm530_vm10 = vcmp.ge.f32.partialorder %v439_v33, 0.0  ;;  %v592_v37 = vmul.f32 0.01, %v439_v33 }
  0xa2   :  { %686 = vst.msk [vmem:[%s1440_s3 + $0x80] sm:$0xff] %vm669_vm4, %v623_v35  ;;  %v303_v38 = vpop.f32.mrf.mxu0  ;;  %v348_v39 = vpop.f32.mrf.mxu1 }
  0xa3   :  { %v638_v40 = vsel %vm514_vm9, %v391_v32, %v576_v36  ;;  %v654_v41 = vsel %vm530_vm10, %v439_v33, %v592_v37  ;;  %v304_v42 = vadd.f32 %v1125_v7, %v303_v38  ;;  %v349_v43 = vadd.f32 %v1125_v7, %v348_v39 }
  0xa4   :  { %701 = vst.msk [vmem:[%s1440_s3 + $0xf8] sm:$0xff] %vm669_vm4, %v638_v40 }
  0xa5   :  { %717 = vst.msk [vmem:[%s1440_s3 + $0x178] sm:$0xff] %vm669_vm4, %v654_v41  ;;  %vm485_vm11 = vcmp.ge.f32.partialorder %v304_v42, 0.0  ;;  %v547_v44 = vmul.f32 0.01, %v304_v42  ;;  %vm500_vm12 = vcmp.ge.f32.partialorder %v349_v43, 0.0 }
  0xa6   :  { %v393_v45 = vpop.f32.mrf.mxu2  ;;  %v441_v46 = vpop.f32.mrf.mxu3  ;;  %v562_v47 = vmul.f32 0.01, %v349_v43 }
  0xa7   :  { %v394_v48 = vadd.f32 %v1125_v7, %v393_v45  ;;  %v442_v49 = vadd.f32 %v1125_v7, %v441_v46  ;;  %v609_v50 = vsel %vm485_vm11, %v304_v42, %v547_v44 }
  0xa8   :  { %672 = vst.msk [vmem:[%s1440_s3 + $0x10] sm:$0xff] %vm669_vm4, %v609_v50  ;;  %v624_v51 = vsel %vm500_vm12, %v349_v43, %v562_v47 }
  0xa9   :  { %vm515_vm13 = vcmp.ge.f32.partialorder %v394_v48, 0.0  ;;  %v577_v52 = vmul.f32 0.01, %v394_v48  ;;  %vm531_vm14 = vcmp.ge.f32.partialorder %v442_v49, 0.0  ;;  %v593_v53 = vmul.f32 0.01, %v442_v49 }
  0xaa   :  { %687 = vst.msk [vmem:[%s1440_s3 + $0x88] sm:$0xff] %vm669_vm4, %v624_v51  ;;  %v306_v54 = vpop.f32.mrf.mxu0  ;;  %v351_v55 = vpop.f32.mrf.mxu1 }
  0xab   :  { %v639_v56 = vsel %vm515_vm13, %v394_v48, %v577_v52  ;;  %v655_v57 = vsel %vm531_vm14, %v442_v49, %v593_v53  ;;  %v307_v58 = vadd.f32 %v1125_v7, %v306_v54  ;;  %v352_v59 = vadd.f32 %v1125_v7, %v351_v55 }
  0xac   :  { %702 = vst.msk [vmem:[%s1440_s3 + $0x100] sm:$0xff] %vm669_vm4, %v639_v56 }
  0xad   :  { %718 = vst.msk [vmem:[%s1440_s3 + $0x180] sm:$0xff] %vm669_vm4, %v655_v57  ;;  %vm486_vm15 = vcmp.ge.f32.partialorder %v307_v58, 0.0  ;;  %v548_v60 = vmul.f32 0.01, %v307_v58  ;;  %vm501_vm0 = vcmp.ge.f32.partialorder %v352_v59, 0.0 }
  0xae   :  { %v396_v61 = vpop.f32.mrf.mxu2  ;;  %v444_v62 = vpop.f32.mrf.mxu3  ;;  %v563_v63 = vmul.f32 0.01, %v352_v59 }
  0xaf   :  { %v397_v0 = vadd.f32 %v1125_v7, %v396_v61  ;;  %v445_v1 = vadd.f32 %v1125_v7, %v444_v62  ;;  %v610_v2 = vsel %vm486_vm15, %v307_v58, %v548_v60 }
  0xb0   :  { %673 = vst.msk [vmem:[%s1440_s3 + $0x18] sm:$0xff] %vm669_vm4, %v610_v2  ;;  %v625_v3 = vsel %vm501_vm0, %v352_v59, %v563_v63 }
  0xb1   :  { %vm516_vm1 = vcmp.ge.f32.partialorder %v397_v0, 0.0  ;;  %v578_v4 = vmul.f32 0.01, %v397_v0  ;;  %vm532_vm2 = vcmp.ge.f32.partialorder %v445_v1, 0.0  ;;  %v594_v5 = vmul.f32 0.01, %v445_v1 }
  0xb2   :  { %688 = vst.msk [vmem:[%s1440_s3 + $0x90] sm:$0xff] %vm669_vm4, %v625_v3  ;;  %v309_v6 = vpop.f32.mrf.mxu0  ;;  %v354_v8 = vpop.f32.mrf.mxu1 }
  0xb3   :  { %v640_v9 = vsel %vm516_vm1, %v397_v0, %v578_v4  ;;  %v656_v10 = vsel %vm532_vm2, %v445_v1, %v594_v5  ;;  %v310_v11 = vadd.f32 %v1125_v7, %v309_v6  ;;  %v355_v12 = vadd.f32 %v1125_v7, %v354_v8 }
  0xb4   :  { %703 = vst.msk [vmem:[%s1440_s3 + $0x108] sm:$0xff] %vm669_vm4, %v640_v9 }
  0xb5   :  { %719 = vst.msk [vmem:[%s1440_s3 + $0x188] sm:$0xff] %vm669_vm4, %v656_v10  ;;  %vm487_vm3 = vcmp.ge.f32.partialorder %v310_v11, 0.0  ;;  %v549_v13 = vmul.f32 0.01, %v310_v11  ;;  %vm502_vm5 = vcmp.ge.f32.partialorder %v355_v12, 0.0 }
  0xb6   :  { %v399_v14 = vpop.f32.mrf.mxu2  ;;  %v447_v15 = vpop.f32.mrf.mxu3  ;;  %v564_v16 = vmul.f32 0.01, %v355_v12 }
  0xb7   :  { %v400_v17 = vadd.f32 %v1125_v7, %v399_v14  ;;  %v448_v18 = vadd.f32 %v1125_v7, %v447_v15  ;;  %v611_v19 = vsel %vm487_vm3, %v310_v11, %v549_v13 }
  0xb8   :  { %674 = vst.msk [vmem:[%s1440_s3 + $0x20] sm:$0xff] %vm669_vm4, %v611_v19  ;;  %v626_v20 = vsel %vm502_vm5, %v355_v12, %v564_v16 }
  0xb9   :  { %vm517_vm6 = vcmp.ge.f32.partialorder %v400_v17, 0.0  ;;  %v579_v21 = vmul.f32 0.01, %v400_v17  ;;  %vm533_vm7 = vcmp.ge.f32.partialorder %v448_v18, 0.0  ;;  %v595_v22 = vmul.f32 0.01, %v448_v18 }
  0xba   :  { %689 = vst.msk [vmem:[%s1440_s3 + $0x98] sm:$0xff] %vm669_vm4, %v626_v20  ;;  %v312_v23 = vpop.f32.mrf.mxu0  ;;  %v357_v24 = vpop.f32.mrf.mxu1 }
  0xbb   :  { %v641_v25 = vsel %vm517_vm6, %v400_v17, %v579_v21  ;;  %v657_v26 = vsel %vm533_vm7, %v448_v18, %v595_v22  ;;  %v313_v27 = vadd.f32 %v1125_v7, %v312_v23  ;;  %v358_v28 = vadd.f32 %v1125_v7, %v357_v24 }
  0xbc   :  { %704 = vst.msk [vmem:[%s1440_s3 + $0x110] sm:$0xff] %vm669_vm4, %v641_v25 }
  0xbd   :  { %720 = vst.msk [vmem:[%s1440_s3 + $0x190] sm:$0xff] %vm669_vm4, %v657_v26  ;;  %vm488_vm8 = vcmp.ge.f32.partialorder %v313_v27, 0.0  ;;  %v550_v29 = vmul.f32 0.01, %v313_v27  ;;  %vm503_vm9 = vcmp.ge.f32.partialorder %v358_v28, 0.0 }
  0xbe   :  { %v402_v30 = vpop.f32.mrf.mxu2  ;;  %v450_v31 = vpop.f32.mrf.mxu3  ;;  %v565_v32 = vmul.f32 0.01, %v358_v28 }
  0xbf   :  { %v403_v33 = vadd.f32 %v1125_v7, %v402_v30  ;;  %v451_v34 = vadd.f32 %v1125_v7, %v450_v31  ;;  %v612_v35 = vsel %vm488_vm8, %v313_v27, %v550_v29 }
  0xc0   :  { %675 = vst.msk [vmem:[%s1440_s3 + $0x28] sm:$0xff] %vm669_vm4, %v612_v35  ;;  %v627_v36 = vsel %vm503_vm9, %v358_v28, %v565_v32 }
  0xc1   :  { %vm518_vm10 = vcmp.ge.f32.partialorder %v403_v33, 0.0  ;;  %v580_v37 = vmul.f32 0.01, %v403_v33  ;;  %vm534_vm11 = vcmp.ge.f32.partialorder %v451_v34, 0.0  ;;  %v596_v38 = vmul.f32 0.01, %v451_v34 }
  0xc2   :  { %690 = vst.msk [vmem:[%s1440_s3 + $0xa0] sm:$0xff] %vm669_vm4, %v627_v36  ;;  %v315_v39 = vpop.f32.mrf.mxu0  ;;  %v360_v40 = vpop.f32.mrf.mxu1 }
  0xc3   :  { %v642_v41 = vsel %vm518_vm10, %v403_v33, %v580_v37  ;;  %v658_v42 = vsel %vm534_vm11, %v451_v34, %v596_v38  ;;  %v316_v43 = vadd.f32 %v1125_v7, %v315_v39  ;;  %v361_v44 = vadd.f32 %v1125_v7, %v360_v40 }
  0xc4   :  { %705 = vst.msk [vmem:[%s1440_s3 + $0x118] sm:$0xff] %vm669_vm4, %v642_v41 }
  0xc5   :  { %721 = vst.msk [vmem:[%s1440_s3 + $0x198] sm:$0xff] %vm669_vm4, %v658_v42  ;;  %vm489_vm12 = vcmp.ge.f32.partialorder %v316_v43, 0.0  ;;  %v551_v45 = vmul.f32 0.01, %v316_v43  ;;  %vm504_vm13 = vcmp.ge.f32.partialorder %v361_v44, 0.0 }
  0xc6   :  { %v405_v46 = vpop.f32.mrf.mxu2  ;;  %v453_v47 = vpop.f32.mrf.mxu3  ;;  %v566_v48 = vmul.f32 0.01, %v361_v44 }
  0xc7   :  { %v406_v49 = vadd.f32 %v1125_v7, %v405_v46  ;;  %v454_v50 = vadd.f32 %v1125_v7, %v453_v47  ;;  %v613_v51 = vsel %vm489_vm12, %v316_v43, %v551_v45 }
  0xc8   :  { %676 = vst.msk [vmem:[%s1440_s3 + $0x30] sm:$0xff] %vm669_vm4, %v613_v51  ;;  %v628_v52 = vsel %vm504_vm13, %v361_v44, %v566_v48 }
  0xc9   :  { %vm519_vm14 = vcmp.ge.f32.partialorder %v406_v49, 0.0  ;;  %v581_v53 = vmul.f32 0.01, %v406_v49  ;;  %vm535_vm15 = vcmp.ge.f32.partialorder %v454_v50, 0.0  ;;  %v597_v54 = vmul.f32 0.01, %v454_v50 }
  0xca   :  { %691 = vst.msk [vmem:[%s1440_s3 + $0xa8] sm:$0xff] %vm669_vm4, %v628_v52  ;;  %v318_v55 = vpop.f32.mrf.mxu0  ;;  %v363_v56 = vpop.f32.mrf.mxu1 }
  0xcb   :  { %v643_v57 = vsel %vm519_vm14, %v406_v49, %v581_v53  ;;  %v659_v58 = vsel %vm535_vm15, %v454_v50, %v597_v54  ;;  %v319_v59 = vadd.f32 %v1125_v7, %v318_v55  ;;  %v364_v60 = vadd.f32 %v1125_v7, %v363_v56 }
  0xcc   :  { %706 = vst.msk [vmem:[%s1440_s3 + $0x120] sm:$0xff] %vm669_vm4, %v643_v57 }
  0xcd   :  { %722 = vst.msk [vmem:[%s1440_s3 + $0x1a0] sm:$0xff] %vm669_vm4, %v659_v58  ;;  %vm490_vm0 = vcmp.ge.f32.partialorder %v319_v59, 0.0  ;;  %v552_v61 = vmul.f32 0.01, %v319_v59  ;;  %vm505_vm1 = vcmp.ge.f32.partialorder %v364_v60, 0.0 }
  0xce   :  { %v408_v62 = vpop.f32.mrf.mxu2  ;;  %v456_v63 = vpop.f32.mrf.mxu3  ;;  %v567_v0 = vmul.f32 0.01, %v364_v60 }
  0xcf   :  { %v409_v1 = vadd.f32 %v1125_v7, %v408_v62  ;;  %v457_v2 = vadd.f32 %v1125_v7, %v456_v63  ;;  %v614_v3 = vsel %vm490_vm0, %v319_v59, %v552_v61 }
  0xd0   :  { %677 = vst.msk [vmem:[%s1440_s3 + $0x38] sm:$0xff] %vm669_vm4, %v614_v3  ;;  %v629_v4 = vsel %vm505_vm1, %v364_v60, %v567_v0 }
  0xd1   :  { %vm520_vm2 = vcmp.ge.f32.partialorder %v409_v1, 0.0  ;;  %v582_v5 = vmul.f32 0.01, %v409_v1  ;;  %vm536_vm3 = vcmp.ge.f32.partialorder %v457_v2, 0.0  ;;  %v598_v6 = vmul.f32 0.01, %v457_v2 }
  0xd2   :  { %692 = vst.msk [vmem:[%s1440_s3 + $0xb0] sm:$0xff] %vm669_vm4, %v629_v4  ;;  %v321_v8 = vpop.f32.mrf.mxu0  ;;  %v366_v9 = vpop.f32.mrf.mxu1 }
  0xd3   :  { %v644_v10 = vsel %vm520_vm2, %v409_v1, %v582_v5  ;;  %v660_v11 = vsel %vm536_vm3, %v457_v2, %v598_v6  ;;  %v322_v12 = vadd.f32 %v1125_v7, %v321_v8  ;;  %v367_v13 = vadd.f32 %v1125_v7, %v366_v9 }
  0xd4   :  { %707 = vst.msk [vmem:[%s1440_s3 + $0x128] sm:$0xff] %vm669_vm4, %v644_v10 }
  0xd5   :  { %723 = vst.msk [vmem:[%s1440_s3 + $0x1a8] sm:$0xff] %vm669_vm4, %v660_v11  ;;  %vm491_vm5 = vcmp.ge.f32.partialorder %v322_v12, 0.0  ;;  %v553_v14 = vmul.f32 0.01, %v322_v12  ;;  %vm506_vm6 = vcmp.ge.f32.partialorder %v367_v13, 0.0 }
  0xd6   :  { %v411_v15 = vpop.f32.mrf.mxu2  ;;  %v459_v16 = vpop.f32.mrf.mxu3  ;;  %v568_v17 = vmul.f32 0.01, %v367_v13 }
  0xd7   :  { %v412_v18 = vadd.f32 %v1125_v7, %v411_v15  ;;  %v460_v19 = vadd.f32 %v1125_v7, %v459_v16  ;;  %v615_v20 = vsel %vm491_vm5, %v322_v12, %v553_v14 }
  0xd8   :  { %678 = vst.msk [vmem:[%s1440_s3 + $0x40] sm:$0xff] %vm669_vm4, %v615_v20  ;;  %v630_v21 = vsel %vm506_vm6, %v367_v13, %v568_v17 }
  0xd9   :  { %vm521_vm7 = vcmp.ge.f32.partialorder %v412_v18, 0.0  ;;  %v583_v22 = vmul.f32 0.01, %v412_v18  ;;  %vm537_vm8 = vcmp.ge.f32.partialorder %v460_v19, 0.0  ;;  %v599_v23 = vmul.f32 0.01, %v460_v19 }
  0xda   :  { %693 = vst.msk [vmem:[%s1440_s3 + $0xb8] sm:$0xff] %vm669_vm4, %v630_v21  ;;  %v324_v24 = vpop.f32.mrf.mxu0  ;;  %v369_v25 = vpop.f32.mrf.mxu1 }
  0xdb   :  { %v645_v26 = vsel %vm521_vm7, %v412_v18, %v583_v22  ;;  %v661_v27 = vsel %vm537_vm8, %v460_v19, %v599_v23  ;;  %v325_v28 = vadd.f32 %v1125_v7, %v324_v24  ;;  %v370_v29 = vadd.f32 %v1125_v7, %v369_v25 }
  0xdc   :  { %708 = vst.msk [vmem:[%s1440_s3 + $0x130] sm:$0xff] %vm669_vm4, %v645_v26 }
  0xdd   :  { %724 = vst.msk [vmem:[%s1440_s3 + $0x1b0] sm:$0xff] %vm669_vm4, %v661_v27  ;;  %vm492_vm9 = vcmp.ge.f32.partialorder %v325_v28, 0.0  ;;  %v554_v30 = vmul.f32 0.01, %v325_v28  ;;  %vm507_vm10 = vcmp.ge.f32.partialorder %v370_v29, 0.0 }
  0xde   :  { %v414_v31 = vpop.f32.mrf.mxu2  ;;  %v462_v32 = vpop.f32.mrf.mxu3  ;;  %v569_v33 = vmul.f32 0.01, %v370_v29 }
  0xdf   :  { %v415_v34 = vadd.f32 %v1125_v7, %v414_v31  ;;  %v463_v35 = vadd.f32 %v1125_v7, %v462_v32  ;;  %v616_v36 = vsel %vm492_vm9, %v325_v28, %v554_v30 }
  0xe0   :  { %679 = vst.msk [vmem:[%s1440_s3 + $0x48] sm:$0xff] %vm669_vm4, %v616_v36  ;;  %v631_v37 = vsel %vm507_vm10, %v370_v29, %v569_v33 }
  0xe1   :  { %vm522_vm11 = vcmp.ge.f32.partialorder %v415_v34, 0.0  ;;  %v584_v38 = vmul.f32 0.01, %v415_v34  ;;  %vm538_vm12 = vcmp.ge.f32.partialorder %v463_v35, 0.0  ;;  %v600_v39 = vmul.f32 0.01, %v463_v35 }
  0xe2   :  { %694 = vst.msk [vmem:[%s1440_s3 + $0xc0] sm:$0xff] %vm669_vm4, %v631_v37  ;;  %v327_v40 = vpop.f32.mrf.mxu0  ;;  %v372_v41 = vpop.f32.mrf.mxu1 }
  0xe3   :  { %v646_v42 = vsel %vm522_vm11, %v415_v34, %v584_v38  ;;  %v662_v43 = vsel %vm538_vm12, %v463_v35, %v600_v39  ;;  %v328_v44 = vadd.f32 %v1125_v7, %v327_v40  ;;  %v373_v45 = vadd.f32 %v1125_v7, %v372_v41 }
  0xe4   :  { %709 = vst.msk [vmem:[%s1440_s3 + $0x138] sm:$0xff] %vm669_vm4, %v646_v42 }
  0xe5   :  { %725 = vst.msk [vmem:[%s1440_s3 + $0x1b8] sm:$0xff] %vm669_vm4, %v662_v43  ;;  %vm493_vm13 = vcmp.ge.f32.partialorder %v328_v44, 0.0  ;;  %v555_v46 = vmul.f32 0.01, %v328_v44  ;;  %vm508_vm14 = vcmp.ge.f32.partialorder %v373_v45, 0.0 }
  0xe6   :  { %v417_v47 = vpop.f32.mrf.mxu2  ;;  %v465_v48 = vpop.f32.mrf.mxu3  ;;  %v570_v49 = vmul.f32 0.01, %v373_v45 }
  0xe7   :  { %v418_v50 = vadd.f32 %v1125_v7, %v417_v47  ;;  %v466_v51 = vadd.f32 %v1125_v7, %v465_v48  ;;  %v617_v52 = vsel %vm493_vm13, %v328_v44, %v555_v46 }
  0xe8   :  { %680 = vst.msk [vmem:[%s1440_s3 + $0x50] sm:$0xff] %vm669_vm4, %v617_v52  ;;  %v632_v53 = vsel %vm508_vm14, %v373_v45, %v570_v49 }
  0xe9   :  { %vm523_vm15 = vcmp.ge.f32.partialorder %v418_v50, 0.0  ;;  %v585_v54 = vmul.f32 0.01, %v418_v50  ;;  %vm539_vm0 = vcmp.ge.f32.partialorder %v466_v51, 0.0  ;;  %v601_v55 = vmul.f32 0.01, %v466_v51 }
  0xea   :  { %695 = vst.msk [vmem:[%s1440_s3 + $0xc8] sm:$0xff] %vm669_vm4, %v632_v53  ;;  %v330_v56 = vpop.f32.mrf.mxu0  ;;  %v375_v57 = vpop.f32.mrf.mxu1 }
  0xeb   :  { %v647_v58 = vsel %vm523_vm15, %v418_v50, %v585_v54  ;;  %v663_v59 = vsel %vm539_vm0, %v466_v51, %v601_v55  ;;  %v331_v60 = vadd.f32 %v1125_v7, %v330_v56  ;;  %v376_v61 = vadd.f32 %v1125_v7, %v375_v57 }
  0xec   :  { %710 = vst.msk [vmem:[%s1440_s3 + $0x140] sm:$0xff] %vm669_vm4, %v647_v58 }
  0xed   :  { %726 = vst.msk [vmem:[%s1440_s3 + $0x1c0] sm:$0xff] %vm669_vm4, %v663_v59  ;;  %vm494_vm1 = vcmp.ge.f32.partialorder %v331_v60, 0.0  ;;  %v556_v62 = vmul.f32 0.01, %v331_v60  ;;  %vm509_vm2 = vcmp.ge.f32.partialorder %v376_v61, 0.0 }
  0xee   :  { %v420_v63 = vpop.f32.mrf.mxu2  ;;  %v468_v0 = vpop.f32.mrf.mxu3  ;;  %v571_v1 = vmul.f32 0.01, %v376_v61 }
  0xef   :  { %v421_v2 = vadd.f32 %v1125_v7, %v420_v63  ;;  %v469_v3 = vadd.f32 %v1125_v7, %v468_v0  ;;  %v618_v4 = vsel %vm494_vm1, %v331_v60, %v556_v62 }
  0xf0   :  { %681 = vst.msk [vmem:[%s1440_s3 + $0x58] sm:$0xff] %vm669_vm4, %v618_v4  ;;  %v633_v5 = vsel %vm509_vm2, %v376_v61, %v571_v1 }
  0xf1   :  { %vm524_vm3 = vcmp.ge.f32.partialorder %v421_v2, 0.0  ;;  %v586_v6 = vmul.f32 0.01, %v421_v2  ;;  %vm540_vm5 = vcmp.ge.f32.partialorder %v469_v3, 0.0  ;;  %v602_v8 = vmul.f32 0.01, %v469_v3 }
  0xf2   :  { %696 = vst.msk [vmem:[%s1440_s3 + $0xd0] sm:$0xff] %vm669_vm4, %v633_v5  ;;  %v333_v9 = vpop.f32.mrf.mxu0  ;;  %v378_v10 = vpop.f32.mrf.mxu1 }
  0xf3   :  { %v648_v11 = vsel %vm524_vm3, %v421_v2, %v586_v6  ;;  %v664_v12 = vsel %vm540_vm5, %v469_v3, %v602_v8  ;;  %v334_v13 = vadd.f32 %v1125_v7, %v333_v9  ;;  %v379_v14 = vadd.f32 %v1125_v7, %v378_v10 }
  0xf4   :  { %711 = vst.msk [vmem:[%s1440_s3 + $0x148] sm:$0xff] %vm669_vm4, %v648_v11 }
  0xf5   :  { %727 = vst.msk [vmem:[%s1440_s3 + $0x1c8] sm:$0xff] %vm669_vm4, %v664_v12  ;;  %vm495_vm6 = vcmp.ge.f32.partialorder %v334_v13, 0.0  ;;  %v557_v15 = vmul.f32 0.01, %v334_v13  ;;  %vm510_vm7 = vcmp.ge.f32.partialorder %v379_v14, 0.0 }
  0xf6   :  { %v423_v16 = vpop.f32.mrf.mxu2  ;;  %v471_v17 = vpop.f32.mrf.mxu3  ;;  %v572_v18 = vmul.f32 0.01, %v379_v14 }
  0xf7   :  { %v424_v19 = vadd.f32 %v1125_v7, %v423_v16  ;;  %v472_v20 = vadd.f32 %v1125_v7, %v471_v17  ;;  %v619_v21 = vsel %vm495_vm6, %v334_v13, %v557_v15 }
  0xf8   :  { %682 = vst.msk [vmem:[%s1440_s3 + $0x60] sm:$0xff] %vm669_vm4, %v619_v21  ;;  %v634_v22 = vsel %vm510_vm7, %v379_v14, %v572_v18 }
  0xf9   :  { %vm525_vm8 = vcmp.ge.f32.partialorder %v424_v19, 0.0  ;;  %v587_v23 = vmul.f32 0.01, %v424_v19  ;;  %vm541_vm9 = vcmp.ge.f32.partialorder %v472_v20, 0.0  ;;  %v603_v24 = vmul.f32 0.01, %v472_v20 }
  0xfa   :  { %697 = vst.msk [vmem:[%s1440_s3 + $0xd8] sm:$0xff] %vm669_vm4, %v634_v22  ;;  %v336_v25 = vpop.f32.mrf.mxu0  ;;  %v381_v26 = vpop.f32.mrf.mxu1 }
  0xfb   :  { %v649_v27 = vsel %vm525_vm8, %v424_v19, %v587_v23  ;;  %v665_v28 = vsel %vm541_vm9, %v472_v20, %v603_v24  ;;  %v337_v29 = vadd.f32 %v1125_v7, %v336_v25  ;;  %v382_v30 = vadd.f32 %v1125_v7, %v381_v26 }
  0xfc   :  { %712 = vst.msk [vmem:[%s1440_s3 + $0x150] sm:$0xff] %vm669_vm4, %v649_v27 }
  0xfd   :  { %728 = vst.msk [vmem:[%s1440_s3 + $0x1d0] sm:$0xff] %vm669_vm4, %v665_v28  ;;  %vm496_vm10 = vcmp.ge.f32.partialorder %v337_v29, 0.0  ;;  %v558_v31 = vmul.f32 0.01, %v337_v29  ;;  %vm511_vm11 = vcmp.ge.f32.partialorder %v382_v30, 0.0 }
  0xfe   :  { %v426_v32 = vpop.f32.mrf.mxu2  ;;  %v474_v33 = vpop.f32.mrf.mxu3  ;;  %v573_v34 = vmul.f32 0.01, %v382_v30 }
  0xff   :  { %v427_v35 = vadd.f32 %v1125_v7, %v426_v32  ;;  %v475_v36 = vadd.f32 %v1125_v7, %v474_v33  ;;  %v620_v37 = vsel %vm496_vm10, %v337_v29, %v558_v31 }
 0x100   :  { %683 = vst.msk [vmem:[%s1440_s3 + $0x68] sm:$0xff] %vm669_vm4, %v620_v37  ;;  %v635_v38 = vsel %vm511_vm11, %v382_v30, %v573_v34 }
 0x101   :  { %vm526_vm12 = vcmp.ge.f32.partialorder %v427_v35, 0.0  ;;  %v588_v39 = vmul.f32 0.01, %v427_v35  ;;  %vm542_vm13 = vcmp.ge.f32.partialorder %v475_v36, 0.0  ;;  %v604_v40 = vmul.f32 0.01, %v475_v36 }
 0x102   :  { %698 = vst.msk [vmem:[%s1440_s3 + $0xe0] sm:$0xff] %vm669_vm4, %v635_v38  ;;  %v339_v41 = vpop.f32.mrf.mxu0  ;;  %v384_v42 = vpop.f32.mrf.mxu1 }
 0x103   :  { %v650_v43 = vsel %vm526_vm12, %v427_v35, %v588_v39  ;;  %v666_v44 = vsel %vm542_vm13, %v475_v36, %v604_v40  ;;  %v340_v45 = vadd.f32 %v1125_v7, %v339_v41  ;;  %v385_v46 = vadd.f32 %v1125_v7, %v384_v42 }
 0x104   :  { %713 = vst.msk [vmem:[%s1440_s3 + $0x158] sm:$0xff] %vm669_vm4, %v650_v43 }
 0x105   :  { %729 = vst.msk [vmem:[%s1440_s3 + $0x1d8] sm:$0xff] %vm669_vm4, %v666_v44  ;;  %vm497_vm14 = vcmp.ge.f32.partialorder %v340_v45, 0.0  ;;  %v559_v47 = vmul.f32 0.01, %v340_v45  ;;  %vm512_vm15 = vcmp.ge.f32.partialorder %v385_v46, 0.0 }
 0x106   :  { %v429_v48 = vpop.f32.mrf.mxu2  ;;  %v477_v49 = vpop.f32.mrf.mxu3  ;;  %v574_v50 = vmul.f32 0.01, %v385_v46 }
 0x107   :  { %v430_v51 = vadd.f32 %v1125_v7, %v429_v48  ;;  %v478_v52 = vadd.f32 %v1125_v7, %v477_v49  ;;  %v621_v53 = vsel %vm497_vm14, %v340_v45, %v559_v47 }
 0x108   :  { %684 = vst.msk [vmem:[%s1440_s3 + $0x70] sm:$0xff] %vm669_vm4, %v621_v53  ;;  %v636_v54 = vsel %vm512_vm15, %v385_v46, %v574_v50 }
 0x109   :  { %vm527_vm0 = vcmp.ge.f32.partialorder %v430_v51, 0.0  ;;  %v589_v55 = vmul.f32 0.01, %v430_v51  ;;  %vm543_vm1 = vcmp.ge.f32.partialorder %v478_v52, 0.0  ;;  %v605_v56 = vmul.f32 0.01, %v478_v52 }
 0x10a   :  { %699 = vst.msk [vmem:[%s1440_s3 + $0xe8] sm:$0xff] %vm669_vm4, %v636_v54 }
 0x10b   :  { %v651_v57 = vsel %vm527_vm0, %v430_v51, %v589_v55  ;;  %v667_v58 = vsel %vm543_vm1, %v478_v52, %v605_v56 }
 0x10c   :  { %714 = vst.msk [vmem:[%s1440_s3 + $0x160] sm:$0xff] %vm669_vm4, %v651_v57 }
 0x10d   :  { %730 = vst.msk [vmem:[%s1440_s3 + $0x1e0] sm:$0xff] %vm669_vm4, %v667_v58 }
 0x10e   :  { %v432_v59 = vpop.f32.mrf.mxu2  ;;  %v480_v60 = vpop.f32.mrf.mxu3 }
 0x10f   :  { %v433_v61 = vadd.f32 %v1125_v7, %v432_v59  ;;  %v481_v62 = vadd.f32 %v1125_v7, %v480_v60 }
 0x111   :  { %vm528_vm2 = vcmp.ge.f32.partialorder %v433_v61, 0.0  ;;  %v590_v63 = vmul.f32 0.01, %v433_v61  ;;  %vm544_vm3 = vcmp.ge.f32.partialorder %v481_v62, 0.0  ;;  %v606_v0 = vmul.f32 0.01, %v481_v62 }
 0x113   :  { %v652_v1 = vsel %vm528_vm2, %v433_v61, %v590_v63  ;;  %v668_v2 = vsel %vm544_vm3, %v481_v62, %v606_v0 }
 0x114   :  { %715 = vst.msk [vmem:[%s1440_s3 + $0x168] sm:$0xff] %vm669_vm4, %v652_v1 }
 0x115   :  { %731 = vst.msk [vmem:[%s1440_s3 + $0x1e8] sm:$0xff] %vm669_vm4, %v668_v2 }

// kernel: attention_forward.5
= control target key start
LH: loop header
LB: loop body
LE: loop exit
PB: predicated region body
PF: predicated region fallthrough
CT: control target
= control target key end

     0   :  { %16 = vsyncpa [#allocation3], 0  ;;  %s1548_s0 = inlined_call_operand.vmem [shape: f32[4,1024], index: 0, kind: input, shape index: {}]   ;;  %s1549_s1 = inlined_call_operand.vmem [shape: bf16[1024,128], index: 1, kind: input, shape index: {}]   ;;  %s1550_s2 = inlined_call_operand.vmem [shape: f32[1,128], index: 2, kind: input, shape index: {}]   ;;  %s1551_s3 = inlined_call_operand.vmem [shape: f32[4,32], index: 3, kind: input, shape index: {}]   ;;  %s1552_s4 = inlined_call_operand.vmem [shape: f32[32,128], index: 4, kind: input, shape index: {}]   ;;  %s1553_s5 = inlined_call_operand.vmem [shape: f32[1,128], index: 5, kind: input, shape index: {}]   ;;  %s1554_s6 = inlined_call_operand.vmem [shape: f32[4,48], index: 6, kind: input, shape index: {}]   ;;  %s1555_s7 = inlined_call_operand.vmem [shape: f32[48,128], index: 7, kind: input, shape index: {}]   ;;  %s1556_s8 = inlined_call_operand.vmem [shape: f32[1,128], index: 8, kind: input, shape index: {}]   ;;  %s1557_s9 = inlined_call_operand.hbm [shape: f32[4,32], index: 9, kind: output, shape index: {0}]   ;;  %s1558_s10 = inlined_call_operand.hbm [shape: f32[4,48], index: 10, kind: output, shape index: {1}]  }
   0x1   :  { %v1105_v0 = vld [vmem:[%s1549_s1 + $0x38] sm:$0xff]  ;;  %v1104_v4 = vld [vmem:[%s1549_s1 + $0x30] sm:$0xff]  ;;  %v1103_v8 = vld [vmem:[%s1549_s1 + $0x28] sm:$0xff] }
   0x2   :  { %v1113_v1 = vld [vmem:[%s1549_s1 + $0x78] sm:$0xff]  ;;  %591 = vmatpush.bf16.msra.mxu0 %v1105_v0  ;;  %v1112_v5 = vld [vmem:[%s1549_s1 + $0x70] sm:$0xff]  ;;  %v1111_v9 = vld [vmem:[%s1549_s1 + $0x68] sm:$0xff] }
   0x3   :  { %v1121_v2 = vld [vmem:[%s1549_s1 + $0xb8] sm:$0xff]  ;;  %604 = vmatpush.bf16.msra.mxu1 %v1113_v1  ;;  %v1120_v6 = vld [vmem:[%s1549_s1 + $0xb0] sm:$0xff]  ;;  %v1119_v10 = vld [vmem:[%s1549_s1 + $0xa8] sm:$0xff] }
   0x4   :  { %v1129_v3 = vld [vmem:[%s1549_s1 + $0xf8] sm:$0xff]  ;;  %617 = vmatpush.bf16.msra.mxu2 %v1121_v2  ;;  %v1128_v7 = vld [vmem:[%s1549_s1 + $0xf0] sm:$0xff]  ;;  %v1127_v11 = vld [vmem:[%s1549_s1 + $0xe8] sm:$0xff] }
   0x5   :  { %630 = vmatpush.bf16.msra.mxu3 %v1129_v3  ;;  %v1102_v12 = vld [vmem:[%s1549_s1 + $0x20] sm:$0xff]  ;;  %v1101_v17 = vld [vmem:[%s1549_s1 + $0x18] sm:$0xff]  ;;  %v37_v21 = vld [vmem:[%s1548_s0 + $0x8] sm:$0xff] }
   0x6   :  { %592 = vmatpush.bf16.msra.mxu0 %v1104_v4  ;;  %v1110_v13 = vld [vmem:[%s1549_s1 + $0x60] sm:$0xff]  ;;  %v1109_v18 = vld [vmem:[%s1549_s1 + $0x58] sm:$0xff]  ;;  %v1100_v22 = vld [vmem:[%s1549_s1 + $0x10] sm:$0xff]  ;;  %46 = vst [vmem:[#allocation1 + $0x10] ss:$2 sm:$0xff] %v37_v21 }
   0x7   :  { %605 = vmatpush.bf16.msra.mxu1 %v1112_v5  ;;  %v1118_v14 = vld [vmem:[%s1549_s1 + $0xa0] sm:$0xff]  ;;  %v1117_v19 = vld [vmem:[%s1549_s1 + $0x98] sm:$0xff]  ;;  %v1108_v23 = vld [vmem:[%s1549_s1 + $0x50] sm:$0xff] }
   0x8   :  { %618 = vmatpush.bf16.msra.mxu2 %v1120_v6  ;;  %v1126_v15 = vld [vmem:[%s1549_s1 + $0xe0] sm:$0xff]  ;;  %v1125_v20 = vld [vmem:[%s1549_s1 + $0xd8] sm:$0xff]  ;;  %v1116_v24 = vld [vmem:[%s1549_s1 + $0x90] sm:$0xff] }
   0x9   :  { %631 = vmatpush.bf16.msra.mxu3 %v1128_v7  ;;  %v36_v16 = vld [vmem:[%s1548_s0] sm:$0xff]  ;;  %v1124_v25 = vld [vmem:[%s1549_s1 + $0xd0] sm:$0xff]  ;;  %v39_v27 = vld [vmem:[%s1548_s0 + $0x18] sm:$0xff] }
   0xa   :  { %593 = vmatpush.bf16.msra.mxu0 %v1103_v8  ;;  %44 = vst [vmem:[#allocation1] ss:$2 sm:$0xff] %v36_v16  ;;  %v38_v26 = vld [vmem:[%s1548_s0 + $0x10] sm:$0xff]  ;;  %v1099_v28 = vld [vmem:[%s1549_s1 + $0x8] sm:$0xff] }
   0xb   :  { %606 = vmatpush.bf16.msra.mxu1 %v1111_v9  ;;  %v1107_v29 = vld [vmem:[%s1549_s1 + $0x48] sm:$0xff]  ;;  %48 = vst [vmem:[#allocation1 + $0x20] ss:$2 sm:$0xff] %v38_v26 }
   0xc   :  { %619 = vmatpush.bf16.msra.mxu2 %v1119_v10  ;;  %v1115_v30 = vld [vmem:[%s1549_s1 + $0x88] sm:$0xff]  ;;  %50 = vst [vmem:[#allocation1 + $0x30] ss:$2 sm:$0xff] %v39_v27 }
   0xd   :  { %632 = vmatpush.bf16.msra.mxu3 %v1127_v11  ;;  %v1123_v31 = vld [vmem:[%s1549_s1 + $0xc8] sm:$0xff] }
   0xe   :  { %594 = vmatpush.bf16.msra.mxu0 %v1102_v12 }
   0xf   :  { %607 = vmatpush.bf16.msra.mxu1 %v1110_v13 }
  0x10   :  { %620 = vmatpush.bf16.msra.mxu2 %v1118_v14 }
  0x11   :  { %633 = vmatpush.bf16.msra.mxu3 %v1126_v15 }
  0x12   :  { %595 = vmatpush.bf16.msra.mxu0 %v1101_v17 }
  0x13   :  { %608 = vmatpush.bf16.msra.mxu1 %v1109_v18 }
  0x14   :  { %621 = vmatpush.bf16.msra.mxu2 %v1117_v19 }
  0x15   :  { %634 = vmatpush.bf16.msra.mxu3 %v1125_v20 }
  0x16   :  { %596 = vmatpush.bf16.msra.mxu0 %v1100_v22 }
  0x17   :  { %609 = vmatpush.bf16.msra.mxu1 %v1108_v23 }
  0x18   :  { %622 = vmatpush.bf16.msra.mxu2 %v1116_v24 }
  0x19   :  { %635 = vmatpush.bf16.msra.mxu3 %v1124_v25 }
  0x1a   :  { %17 = vsyncpa [#allocation5], 0  ;;  %597 = vmatpush.bf16.msra.mxu0 %v1099_v28  ;;  %v1098_v32 = vld [vmem:[%s1549_s1] sm:$0xff]  ;;  %v1137_v36 = vld [vmem:[%s1549_s1 + $0x138] sm:$0xff]  ;;  %vm707_vm0 = vcmask 261120   ;;  %vm743_vm1 = vcmask 392192  }
  0x1b   :  { %610 = vmatpush.bf16.msra.mxu1 %v1107_v29  ;;  %v1106_v33 = vld [vmem:[%s1549_s1 + $0x40] sm:$0xff]  ;;  %v53_v37 = vld.sshfl [vmem:[#allocation1 + $0x10] sm:$0xff pattern:$0x75316420]  ;;  %v1145_v38 = vld [vmem:[%s1549_s1 + $0x178] sm:$0xff]  ;;  %vm769_vm3 = vcmask 1043456  }
  0x1c   :  { %v51_v34 = vld.sshfl [vmem:[#allocation1] sm:$0xff pattern:$0x75316420]  ;;  %623 = vmatpush.bf16.msra.mxu2 %v1115_v30  ;;  %v1153_v39 = vld [vmem:[%s1549_s1 + $0x1b8] sm:$0xff]  ;;  %v69_v44 = vpack.c.bf16 %v53_v37, %v53_v37  ;;  %v1136_v46 = vld [vmem:[%s1549_s1 + $0x130] sm:$0xff]  ;;  %s815_s30 = sshll.u32 %s1557_s9, 4  ;;  %s816_s30 = int_to_ptr.hbm [resolvable:$true] %s815_s30 }
  0x1d   :  { %636 = vmatpush.bf16.msra.mxu3 %v1123_v31  ;;  %v1114_v35 = vld [vmem:[%s1549_s1 + $0x80] sm:$0xff]  ;;  %v52_v40 = vld.sshfl [vmem:[#allocation1 + $0x8] sm:$0xff pattern:$0x75316420]  ;;  %v67_v42 = vpack.c.bf16 %v51_v34, %v51_v34  ;;  %v1161_v43 = vld [vmem:[%s1549_s1 + $0x1f8] sm:$0xff]  ;;  %s1230_s13 = smov [#allocation4]  }
  0x1e   :  { %v1122_v41 = vld [vmem:[%s1549_s1 + $0xc0] sm:$0xff]  ;;  %598 = vmatpush.bf16.msra.mxu0 %v1098_v32  ;;  %v54_v45 = vld.sshfl [vmem:[#allocation1 + $0x18] sm:$0xff pattern:$0x75316420]  ;;  %v68_v47 = vpack.c.bf16 %v52_v40, %v52_v40  ;;  %v1144_v48 = vld [vmem:[%s1549_s1 + $0x170] sm:$0xff]  ;;  %s824_s14 = sshll.u32 %s1230_s13, 4  ;;  %s825_s14 = int_to_ptr.vmem [resolvable:$true] %s824_s14 }
  0x1f   :  { %611 = vmatpush.bf16.msra.mxu1 %v1106_v33  ;;  %v1152_v49 = vld [vmem:[%s1549_s1 + $0x1b0] sm:$0xff]  ;;  %v70_v50 = vpack.c.bf16 %v54_v45, %v54_v45  ;;  %v1135_v52 = vld [vmem:[%s1549_s1 + $0x128] sm:$0xff]  ;;  %v1134_v56 = vld [vmem:[%s1549_s1 + $0x120] sm:$0xff]  ;;  %s826_s0 = sshll.u32 %s1558_s10, 4  ;;  %vm801_vm8 = vcmask 257024   ;;  %vm806_vm9 = vcmask 388096   ;;  %s827_s0 = int_to_ptr.hbm [resolvable:$true] %s826_s0 }
  0x20   :  { %624 = vmatpush.bf16.msra.mxu2 %v1114_v35  ;;  %v1160_v51 = vld [vmem:[%s1549_s1 + $0x1f0] sm:$0xff]  ;;  %v1143_v53 = vld [vmem:[%s1549_s1 + $0x168] sm:$0xff]  ;;  %v1142_v57 = vld [vmem:[%s1549_s1 + $0x160] sm:$0xff] }
  0x21   :  { %637 = vmatpush.bf16.msra.mxu3 %v1122_v41  ;;  %599 = vmatmul.bf16.vlgmr.msra.gmra.mxu0 %v67_v42  ;;  %v1151_v54 = vld [vmem:[%s1549_s1 + $0x1a8] sm:$0xff]  ;;  %v1150_v58 = vld [vmem:[%s1549_s1 + $0x1a0] sm:$0xff]  ;;  %v1133_v60 = vld [vmem:[%s1549_s1 + $0x118] sm:$0xff] }
  0x22   :  { %643 = vmatpush.bf16.msrb.mxu0 %v1137_v36  ;;  %612 = vmatmul.bf16.vlgmr.msra.gmra.mxu1 %v68_v47  ;;  %v1159_v55 = vld [vmem:[%s1549_s1 + $0x1e8] sm:$0xff]  ;;  %v1158_v59 = vld [vmem:[%s1549_s1 + $0x1e0] sm:$0xff]  ;;  %v1141_v61 = vld [vmem:[%s1549_s1 + $0x158] sm:$0xff] }
  0x23   :  { %656 = vmatpush.bf16.msrb.mxu1 %v1145_v38  ;;  %625 = vmatmul.bf16.vlgmr.msra.gmra.mxu2 %v69_v44  ;;  %v1149_v62 = vld [vmem:[%s1549_s1 + $0x198] sm:$0xff]  ;;  %v1132_v0 = vld [vmem:[%s1549_s1 + $0x110] sm:$0xff]  ;;  %v1131_v4 = vld [vmem:[%s1549_s1 + $0x108] sm:$0xff] }
  0x24   :  { %669 = vmatpush.bf16.msrb.mxu2 %v1153_v39  ;;  %638 = vmatmul.bf16.vlgmr.msra.gmra.mxu3 %v70_v50  ;;  %v1157_v63 = vld [vmem:[%s1549_s1 + $0x1d8] sm:$0xff]  ;;  %v1140_v1 = vld [vmem:[%s1549_s1 + $0x150] sm:$0xff]  ;;  %v1139_v5 = vld [vmem:[%s1549_s1 + $0x148] sm:$0xff] }
  0x25   :  { %682 = vmatpush.bf16.msrb.mxu3 %v1161_v43  ;;  %v1148_v2 = vld [vmem:[%s1549_s1 + $0x190] sm:$0xff]  ;;  %v1147_v6 = vld [vmem:[%s1549_s1 + $0x188] sm:$0xff]  ;;  %v1130_v8 = vld [vmem:[%s1549_s1 + $0x100] sm:$0xff] }
  0x26   :  { %644 = vmatpush.bf16.msrb.mxu0 %v1136_v46  ;;  %v1156_v3 = vld [vmem:[%s1549_s1 + $0x1d0] sm:$0xff]  ;;  %v1155_v7 = vld [vmem:[%s1549_s1 + $0x1c8] sm:$0xff]  ;;  %v1138_v9 = vld [vmem:[%s1549_s1 + $0x140] sm:$0xff] }
  0x27   :  { %657 = vmatpush.bf16.msrb.mxu1 %v1144_v48  ;;  %v1146_v10 = vld [vmem:[%s1549_s1 + $0x180] sm:$0xff]  ;;  %v56_v12 = vld.sshfl [vmem:[#allocation1 + $0x28] sm:$0xff pattern:$0x75316420]  ;;  %v702_v16 = vld [vmem:[%s1552_s4 + $0x18] sm:$0xff] }
  0x28   :  { %670 = vmatpush.bf16.msrb.mxu2 %v1152_v49  ;;  %v55_v11 = vld.sshfl [vmem:[#allocation1 + $0x20] sm:$0xff pattern:$0x75316420]  ;;  %v57_v13 = vld.sshfl [vmem:[#allocation1 + $0x30] sm:$0xff pattern:$0x75316420]  ;;  %v72_v19 = vpack.c.bf16 %v56_v12, %v56_v12 }
  0x29   :  { %683 = vmatpush.bf16.msrb.mxu3 %v1160_v51  ;;  %v1154_v14 = vld [vmem:[%s1549_s1 + $0x1c0] sm:$0xff]  ;;  %v71_v15 = vpack.c.bf16 %v55_v11, %v55_v11  ;;  %v58_v17 = vld.sshfl [vmem:[#allocation1 + $0x38] sm:$0xff pattern:$0x75316420]  ;;  %v738_v18 = vld [vmem:[%s1555_s7 + $0x28] sm:$0xff]  ;;  %v73_v20 = vpack.c.bf16 %v57_v13, %v57_v13 }
  0x2a   :  { %645 = vmatpush.bf16.msrb.mxu0 %v1135_v52  ;;  %v74_v21 = vpack.c.bf16 %v58_v17, %v58_v17  ;;  %v701_v22 = vld [vmem:[%s1552_s4 + $0x10] sm:$0xff]  ;;  %v737_v23 = vld [vmem:[%s1555_s7 + $0x20] sm:$0xff]  ;;  %v700_v24 = vld [vmem:[%s1552_s4 + $0x8] sm:$0xff] }
  0x2b   :  { %658 = vmatpush.bf16.msrb.mxu1 %v1143_v53  ;;  %v736_v25 = vld [vmem:[%s1555_s7 + $0x18] sm:$0xff]  ;;  %v735_v26 = vld [vmem:[%s1555_s7 + $0x10] sm:$0xff]  ;;  %v699_v27 = vld [vmem:[%s1552_s4] sm:$0xff] }
  0x2c   :  { %671 = vmatpush.bf16.msrb.mxu2 %v1151_v54  ;;  %v734_v28 = vld [vmem:[%s1555_s7 + $0x8] sm:$0xff]  ;;  %v733_v29 = vld [vmem:[%s1555_s7] sm:$0xff] }
  0x2d   :  { %684 = vmatpush.bf16.msrb.mxu3 %v1159_v55  ;;  %v1523_v30 = vld [vmem:[%s1551_s3] sm:$0xf] }
  0x2e   :  { %646 = vmatpush.bf16.msrb.mxu0 %v1134_v56  ;;  %v732_v31 = vld [vmem:[%s1554_s6] sm:$0xf] }
  0x2f   :  { %659 = vmatpush.bf16.msrb.mxu1 %v1142_v57  ;;  %v1164_v39 = vld [vmem:[%s1550_s2] ss:$0 sm:$0xff] }
  0x30   :  { %672 = vmatpush.bf16.msrb.mxu2 %v1150_v58  ;;  %v1165_v54 = vld [vmem:[%s1553_s5] ss:$0 sm:$0xff]  ;;  %s1229_s5 = smov [#allocation2]  }
  0x31   :  { %685 = vmatpush.bf16.msrb.mxu3 %v1158_v59  ;;  %v1166_v55 = vld [vmem:[%s1556_s8] ss:$0 sm:$0xff]  ;;  %s813_s8 = sshll.u32 %s1229_s5, 4  ;;  %s814_s8 = int_to_ptr.vmem [resolvable:$true] %s813_s8 }
  0x32   :  { %647 = vmatpush.bf16.msrb.mxu0 %v1133_v60 }
  0x33   :  { %660 = vmatpush.bf16.msrb.mxu1 %v1141_v61 }
  0x34   :  { %673 = vmatpush.bf16.msrb.mxu2 %v1149_v62 }
  0x35   :  { %686 = vmatpush.bf16.msrb.mxu3 %v1157_v63 }
  0x36   :  { %648 = vmatpush.bf16.msrb.mxu0 %v1132_v0 }
  0x37   :  { %661 = vmatpush.bf16.msrb.mxu1 %v1140_v1 }
  0x38   :  { %674 = vmatpush.bf16.msrb.mxu2 %v1148_v2 }
  0x39   :  { %687 = vmatpush.bf16.msrb.mxu3 %v1156_v3 }
  0x3a   :  { %649 = vmatpush.bf16.msrb.mxu0 %v1131_v4 }
  0x3b   :  { %662 = vmatpush.bf16.msrb.mxu1 %v1139_v5 }
  0x3c   :  { %675 = vmatpush.bf16.msrb.mxu2 %v1147_v6 }
  0x3d   :  { %688 = vmatpush.bf16.msrb.mxu3 %v1155_v7 }
  0x3e   :  { %650 = vmatpush.bf16.msrb.mxu0 %v1130_v8 }
  0x3f   :  { %663 = vmatpush.bf16.msrb.mxu1 %v1138_v9 }
  0x40   :  { %676 = vmatpush.bf16.msrb.mxu2 %v1146_v10 }
  0x41   :  { %689 = vmatpush.bf16.msrb.mxu3 %v1154_v14  ;;  %651 = vmatmul.bf16.vlgmr.msrb.gmra.mxu0 %v71_v15 }
  0x42   :  { %723 = vmatpush.msra.mxu0 %v702_v16  ;;  %664 = vmatmul.bf16.vlgmr.msrb.gmra.mxu1 %v72_v19 }
  0x43   :  { %757 = vmatpush.msra.mxu1 %v738_v18  ;;  %677 = vmatmul.bf16.vlgmr.msrb.gmra.mxu2 %v73_v20 }
  0x44   :  { %724 = vmatpush.msra.mxu0 %v701_v22  ;;  %690 = vmatmul.bf16.vlgmr.msrb.gmra.mxu3 %v74_v21 }
  0x45   :  { %758 = vmatpush.msra.mxu1 %v737_v23 }
  0x46   :  { %725 = vmatpush.msra.mxu0 %v700_v24 }
  0x47   :  { %759 = vmatpush.msra.mxu1 %v736_v25 }
  0x48   :  { %726 = vmatpush.msra.mxu0 %v699_v27  ;;  %v803_v27 = vld [vmem:[%s1554_s6] sm:$0xf] }
  0x49   :  { %760 = vmatpush.msra.mxu1 %v735_v26 }
  0x4b   :  { %761 = vmatpush.msra.mxu1 %v734_v28 }
  0x4d   :  { %762 = vmatpush.msra.mxu1 %v733_v29 }
  0x51   :  { %1096 = vmatmul.msk.f32.vlgmr.msra.gmra.mxu0 %vm707_vm0, %v1523_v30 }
  0x52   :  { %1097 = vmatmul.msk.f32.vlgmr.msra.gmra.mxu1 %vm743_vm1, %v732_v31 }
  0x9e   :  { %v600_v32 = vpop.f32.mrf.mxu0 }
  0x9f   :  { %v613_v33 = vpop.f32.mrf.mxu1  ;;  %v601_v41 = vadd.f32 %v1164_v39, %v600_v32 }
  0xa1   :  { %v614_v42 = vadd.f32 %v613_v33, %v601_v41 }
  0xa6   :  { %v626_v34 = vpop.f32.mrf.mxu2  ;;  %v602_v35 = vpop.f32.mrf.mxu0 }
  0xa7   :  { %v639_v36 = vpop.f32.mrf.mxu3  ;;  %v615_v37 = vpop.f32.mrf.mxu1  ;;  %v627_v44 = vadd.f32 %v626_v34, %v614_v42 }
  0xa9   :  { %v640_v46 = vadd.f32 %v639_v36, %v627_v44 }
  0xae   :  { %v628_v38 = vpop.f32.mrf.mxu2 }
  0xaf   :  { %v641_v40 = vpop.f32.mrf.mxu3 }
  0xbe   :  { %v652_v43 = vpop.f32.mrf.mxu0 }
  0xbf   :  { %v665_v45 = vpop.f32.mrf.mxu1  ;;  %v653_v47 = vadd.f32 %v652_v43, %v640_v46 }
  0xc1   :  { %v666_v52 = vadd.f32 %v665_v45, %v653_v47 }
  0xc6   :  { %v678_v48 = vpop.f32.mrf.mxu2  ;;  %v654_v49 = vpop.f32.mrf.mxu0 }
  0xc7   :  { %v667_v50 = vpop.f32.mrf.mxu1  ;;  %v691_v51 = vpop.f32.mrf.mxu3  ;;  %v679_v53 = vadd.f32 %v678_v48, %v666_v52 }
  0xc9   :  { %v692_v58 = vadd.f32 %v691_v51, %v679_v53 }
  0xcb   :  { %v696_v63 = vmul.f32 0.01, %v692_v58  ;;  %vm695_vm2 = vcmp.ge.f32.partialorder %v692_v58, 0.0 }
  0xcd   :  { %v697_v1 = vsel %vm695_vm2, %v692_v58, %v696_v63 }
  0xce   :  { %v680_v56 = vpop.f32.mrf.mxu2  ;;  %v728_v57 = vpop.f32.mrf.mxu0 }
  0xcf   :  { %v729_v59 = vadd.f32 %v1165_v54, %v728_v57  ;;  %v764_v60 = vpop.f32.mrf.mxu1  ;;  %v693_v61 = vpop.f32.mrf.mxu3 }
  0xd0   :  { %v765_v62 = vadd.f32 %v1166_v55, %v764_v60 }
  0xd1   :  { %1167 = vtanh.f32 %v729_v59 }
  0xd2   :  { %1169 = vtanh.f32 %v765_v62 }
  0xd7   :  { %v1168_v0 = vpop.eup %1167 }
  0xd8   :  { %v768_v2 = vmul.f32 %v1168_v0, %v697_v1  ;;  %v1170_v4 = vpop.eup %1169 }
  0xd9   :  { %v773_v5 = vmul.f32 %v1170_v4, %v697_v1 }
  0xda   :  { %v770_v3 = vsel %vm769_vm3, %v768_v2, 0.0 }
  0xdb   :  { %771 = vadd.xlane.f32.xlu0 %v770_v3  ;;  %v774_v6 = vsel %vm769_vm3, %v773_v5, 0.0 }
  0xe3   :  { %775 = vadd.xlane.f32.xlu0 %v774_v6 }
 0x14e   :  { %v772_v7 = vpop.xlane.xlu0 %771 }
 0x156   :  { %v776_v8 = vpop.xlane.xlu0 %775 }
 0x157   :  { %v777_v9 = vmax.f32 %v772_v7, %v776_v8 }
 0x159   :  { %v778_v10 = vsub.f32 %v772_v7, %v777_v9  ;;  %v781_v11 = vsub.f32 %v776_v8, %v777_v9 }
 0x15b   :  { %v779_v12 = vmul.f32 1.442695, %v778_v10  ;;  %v782_v13 = vmul.f32 1.442695, %v781_v11 }
 0x15d   :  { %1171 = vpow2.f32 %v779_v12 }
 0x15e   :  { %1173 = vpow2.f32 %v782_v13 }
 0x163   :  { %v1172_v14 = vpop.eup %1171 }
 0x164   :  { %v1174_v15 = vpop.eup %1173 }
 0x165   :  { %v784_v16 = vadd.f32 %v1174_v15, %v1172_v14 }
 0x167   :  { %1175 = vrcp.f32 %v784_v16  ;;  %v796_v20 = vand.u32 2147483648, %v784_v16  ;;  %v794_v22 = vand.u32 2147483647, %v784_v16  ;;  %vm790_vm5 = vweird.f32 %v784_v16 }
 0x169   :  { %v797_v24 = vor.u32 1.1754944e-38, %v796_v20  ;;  %vm795_vm7 = vcmp.eq.f32.partialorder %v794_v22, 8.507059e+37 }
 0x16d   :  { %v1176_v17 = vpop.eup %1175 }
 0x16e   :  { %v786_v18 = vmul.f32 %v1176_v17, %v784_v16  ;;  %vm791_vm4 = vweird.f32 %v1176_v17 }
 0x16f   :  { %vm792_vm6 = vmor %vm790_vm5, %vm791_vm4 }
 0x170   :  { %v787_v19 = vsub.f32 1.0, %v786_v18 }
 0x172   :  { %v788_v21 = vmul.f32 %v1176_v17, %v787_v19 }
 0x174   :  { %v789_v23 = vadd.f32 %v1176_v17, %v788_v21 }
 0x176   :  { %v793_v25 = vsel %vm792_vm6, %v1176_v17, %v789_v23 }
 0x177   :  { %v798_v26 = vsel %vm795_vm7, %v797_v24, %v793_v25 }
 0x178   :  { %v799_v28 = vmul.f32 %v1172_v14, %v798_v26  ;;  %v804_v29 = vmul.f32 %v1174_v15, %v798_v26 }
 0x17a   :  { %v800_v31 = vmul.f32 %v799_v28, %v1523_v30  ;;  %v805_v32 = vmul.f32 %v804_v29, %v803_v27 }
 0x17c   :  { %802 = vst.msk [vmem:[#allocation2] sm:$0xf] %vm801_vm8, %v800_v31 }
 0x17d   :  { %818 = dma.vmem_to_hbm [thread:$0]  %s814_s8, 64, %s816_s30, [#allocation3]   ;;  %807 = vst.msk [vmem:[#allocation4] sm:$0xf] %vm806_vm9, %v805_v32 }
 0x17e   :  { %829 = dma.vmem_to_hbm [thread:$0]  %s825_s14, 64, %s827_s0, [#allocation5]  }
 0x17f   :  { %1225 = dma.done.wait [#allocation3], 64  }
 0x180   :  { %1226 = vsyncadd [#allocation3], 4294967232 }
 0x181   :  { %1227 = dma.done.wait [#allocation5], 64  }
 0x182   :  { %1228 = vsyncadd [#allocation5], 4294967232 }
 0x183   :  { %838 = vsyncpa [#allocation3], 1 }
 0x184   :  { %839 = vsyncpa [#allocation5], 1 }

// kernel: attention_forward.4
= control target key start
LH: loop header
LB: loop body
LE: loop exit
PB: predicated region body
PF: predicated region fallthrough
CT: control target
= control target key end

     0   :  { %s16166_s12 = smov 0   ;;  %s16168_s13 = smov 0   ;;  %s19672_s0 = inlined_call_operand.vmem [shape: f32[4,3968], index: 0, kind: input, shape index: {}]   ;;  %s19673_s1 = inlined_call_operand.vmem [shape: bf16[3968,1024], index: 1, kind: input, shape index: {}]   ;;  %s19674_s2 = inlined_call_operand.vmem [shape: f32[1,1024], index: 2, kind: input, shape index: {}]   ;;  %s19675_s3 = inlined_call_operand.vmem [shape: f32[4,1024], index: 3, kind: output, shape index: {}]  }
   0x1   :  { %s16170_s14 = smov 0  }
   0x2 LB: > { %s11054_s15 = sadd.s32 4294967295, %s16128_s14   ;;  %s16183_s16 = sadd.s32 1, %s16128_s14   ;;  %s16128_s14 = sphi %s16170_s14, %s19683_s14   ;;  %s16124_s13 = sphi %s16168_s13, %s19682_s13   ;;  %s16120_s12 = sphi %s16166_s12, %s19681_s12  }
   0x3   : > { %s38_s17 = ssub.s32 %s16128_s14, %s16183_s16  ;;  %s41_s18 = sadd.s32 1, %s16124_s13 }
   0x4   : > { %p39_p0 = scmp.eq.s32.totalorder %s38_s17, 0  ;;  %p48_p1 = scmp.ne.s32.totalorder %s16124_s13, %s16120_s12 }
   0x5   : > { %p49_p2 = scmp.eq.s32.totalorder %s16128_s14, 0  ;;  %p11057_p4 = scmp.ge.s32.totalorder %s16128_s14, 2 }
   0x6   : > { %s16192_s19 = scalar_select %p39_p0, %s16124_s13, %s41_s18  }
   0x7   : > { %p50_p3 = por %p49_p2, %p48_p1  ;;  %129 = sbr.rel (%p11057_p4) target bundleno = 514 (0x202), region = 20 }
   0xc   : > { %132 = sbr.rel (!%p50_p3) target bundleno = 514 (0x202), region = 24  ;;  %s134_s20 = sand.u32 (%p50_p3), 1, %s16124_s13  }
   0xd   : > { %s15036_s21 = sshll.u32 (%p50_p3), %s16128_s14, 4  ;;  %s16197_s22 = smul.u32 (%p50_p3), 7936, %s134_s20 }
   0xe   : > { %s16202_s25 = scalar_lea.vmem (%p50_p3), %s19673_s1, %s15036_s21   ;;  %s16212_s29 = smov (%p50_p3), 0  }
   0xf   : > { %s136_s26 = scalar_lea.vmem (%p50_p3), [#allocation2], %s16197_s22   ;;  %s19677_s28 = smov (%p50_p3), %s16202_s25 }
  0x10   : > { %s19676_s27 = smov (%p50_p3), %s136_s26  ;;  %s16214_s30 = smov (%p50_p3), 0  }
  0x11 LB: >> { %v153_v0 = vld [vmem:[%s16136_s28] sm:$0xff]  ;;  %s1145_s4 = sadd.s32 1, %s16140_s29  ;;  %s149_s30 = sadd.s32 1, %s16144_s30   ;;  %s16144_s30 = sphi %s16214_s30, %s149_s30   ;;  %s16140_s29 = sphi %s16212_s29, %s19680_s29   ;;  %s16136_s28 = sphi %s19677_s28, %s19679_s28   ;;  %s16132_s27 = sphi %s19676_s27, %s19678_s27  }
  0x12   : >> { %v155_v1 = vld [vmem:[%s16136_s28 + $0x20] sm:$0xff]  ;;  %154 = vst [vmem:[%s16132_s27] sm:$0xff] %v153_v0  ;;  %p1146_p5 = scmp.ge.s32.totalorder %s1145_s4, 2  ;;  %p146_p6 = scmp.ge.s32.totalorder %s149_s30, 2  }
  0x13   : >> { %v157_v2 = vld [vmem:[%s16136_s28 + $0x40] sm:$0xff]  ;;  %156 = vst [vmem:[%s16132_s27 + $0x10] sm:$0xff] %v155_v1 }
  0x14   : >> { %v159_v3 = vld [vmem:[%s16136_s28 + $0x60] sm:$0xff]  ;;  %158 = vst [vmem:[%s16132_s27 + $0x20] sm:$0xff] %v157_v2  ;;  %s19685_s4 = smov (%p1146_p5, %s1145_s4), 0 }
  0x15   : >> { %v161_v4 = vld [vmem:[%s16136_s28 + $0x80] sm:$0xff]  ;;  %160 = vst [vmem:[%s16132_s27 + $0x30] sm:$0xff] %v159_v3  ;;  %s11060_s5 = sshll.u32 %s19685_s4, 3  ;;  %s19680_s29 = smov %s19685_s4 }
  0x16   : >> { %v163_v5 = vld [vmem:[%s16136_s28 + $0xa0] sm:$0xff]  ;;  %162 = vst [vmem:[%s16132_s27 + $0x40] sm:$0xff] %v161_v4  ;;  %s16972_s6 = scalar_lea.vmem %s16202_s25, %s11060_s5   ;;  %s16976_s7 = scalar_lea.vmem %s136_s26, %s11060_s5 [#allocation2]  }
  0x17   : >> { %v165_v6 = vld [vmem:[%s16136_s28 + $0xc0] sm:$0xff]  ;;  %164 = vst [vmem:[%s16132_s27 + $0x50] sm:$0xff] %v163_v5 }
  0x18   : >> { %v167_v7 = vld [vmem:[%s16136_s28 + $0xe0] sm:$0xff]  ;;  %166 = vst [vmem:[%s16132_s27 + $0x60] sm:$0xff] %v165_v6 }
  0x19   : >> { %v169_v8 = vld [vmem:[%s16136_s28 + $0x100] sm:$0xff]  ;;  %168 = vst [vmem:[%s16132_s27 + $0x70] sm:$0xff] %v167_v7 }
  0x1a   : >> { %v171_v9 = vld [vmem:[%s16136_s28 + $0x120] sm:$0xff]  ;;  %170 = vst [vmem:[%s16132_s27 + $0x80] sm:$0xff] %v169_v8 }
  0x1b   : >> { %v173_v10 = vld [vmem:[%s16136_s28 + $0x140] sm:$0xff]  ;;  %172 = vst [vmem:[%s16132_s27 + $0x90] sm:$0xff] %v171_v9 }
  0x1c   : >> { %v175_v11 = vld [vmem:[%s16136_s28 + $0x160] sm:$0xff]  ;;  %174 = vst [vmem:[%s16132_s27 + $0xa0] sm:$0xff] %v173_v10 }
  0x1d   : >> { %v177_v12 = vld [vmem:[%s16136_s28 + $0x180] sm:$0xff]  ;;  %176 = vst [vmem:[%s16132_s27 + $0xb0] sm:$0xff] %v175_v11 }
  0x1e   : >> { %v179_v13 = vld [vmem:[%s16136_s28 + $0x1a0] sm:$0xff]  ;;  %178 = vst [vmem:[%s16132_s27 + $0xc0] sm:$0xff] %v177_v12 }
  0x1f   : >> { %v181_v14 = vld [vmem:[%s16136_s28 + $0x1c0] sm:$0xff]  ;;  %180 = vst [vmem:[%s16132_s27 + $0xd0] sm:$0xff] %v179_v13 }
  0x20   : >> { %v183_v15 = vld [vmem:[%s16136_s28 + $0x1e0] sm:$0xff]  ;;  %182 = vst [vmem:[%s16132_s27 + $0xe0] sm:$0xff] %v181_v14 }
  0x21   : >> { %v185_v16 = vld [vmem:[%s16136_s28 + $0x200] sm:$0xff]  ;;  %184 = vst [vmem:[%s16132_s27 + $0xf0] sm:$0xff] %v183_v15 }
  0x22   : >> { %v187_v17 = vld [vmem:[%s16136_s28 + $0x220] sm:$0xff]  ;;  %186 = vst [vmem:[%s16132_s27 + $0x100] sm:$0xff] %v185_v16 }
  0x23   : >> { %v189_v18 = vld [vmem:[%s16136_s28 + $0x240] sm:$0xff]  ;;  %188 = vst [vmem:[%s16132_s27 + $0x110] sm:$0xff] %v187_v17 }
  0x24   : >> { %v191_v19 = vld [vmem:[%s16136_s28 + $0x260] sm:$0xff]  ;;  %190 = vst [vmem:[%s16132_s27 + $0x120] sm:$0xff] %v189_v18 }
  0x25   : >> { %v193_v20 = vld [vmem:[%s16136_s28 + $0x280] sm:$0xff]  ;;  %192 = vst [vmem:[%s16132_s27 + $0x130] sm:$0xff] %v191_v19 }
  0x26   : >> { %v195_v21 = vld [vmem:[%s16136_s28 + $0x2a0] sm:$0xff]  ;;  %194 = vst [vmem:[%s16132_s27 + $0x140] sm:$0xff] %v193_v20 }
  0x27   : >> { %v197_v22 = vld [vmem:[%s16136_s28 + $0x2c0] sm:$0xff]  ;;  %196 = vst [vmem:[%s16132_s27 + $0x150] sm:$0xff] %v195_v21 }
  0x28   : >> { %v199_v23 = vld [vmem:[%s16136_s28 + $0x2e0] sm:$0xff]  ;;  %198 = vst [vmem:[%s16132_s27 + $0x160] sm:$0xff] %v197_v22 }
  0x29   : >> { %v201_v24 = vld [vmem:[%s16136_s28 + $0x300] sm:$0xff]  ;;  %200 = vst [vmem:[%s16132_s27 + $0x170] sm:$0xff] %v199_v23 }
  0x2a   : >> { %v203_v25 = vld [vmem:[%s16136_s28 + $0x320] sm:$0xff]  ;;  %202 = vst [vmem:[%s16132_s27 + $0x180] sm:$0xff] %v201_v24 }
  0x2b   : >> { %v205_v26 = vld [vmem:[%s16136_s28 + $0x340] sm:$0xff]  ;;  %204 = vst [vmem:[%s16132_s27 + $0x190] sm:$0xff] %v203_v25 }
  0x2c   : >> { %v207_v27 = vld [vmem:[%s16136_s28 + $0x360] sm:$0xff]  ;;  %206 = vst [vmem:[%s16132_s27 + $0x1a0] sm:$0xff] %v205_v26 }
  0x2d   : >> { %v209_v28 = vld [vmem:[%s16136_s28 + $0x380] sm:$0xff]  ;;  %208 = vst [vmem:[%s16132_s27 + $0x1b0] sm:$0xff] %v207_v27 }
  0x2e   : >> { %v211_v29 = vld [vmem:[%s16136_s28 + $0x3a0] sm:$0xff]  ;;  %210 = vst [vmem:[%s16132_s27 + $0x1c0] sm:$0xff] %v209_v28 }
  0x2f   : >> { %v213_v30 = vld [vmem:[%s16136_s28 + $0x3c0] sm:$0xff]  ;;  %212 = vst [vmem:[%s16132_s27 + $0x1d0] sm:$0xff] %v211_v29 }
  0x30   : >> { %v215_v31 = vld [vmem:[%s16136_s28 + $0x3e0] sm:$0xff]  ;;  %214 = vst [vmem:[%s16132_s27 + $0x1e0] sm:$0xff] %v213_v30 }
  0x31   : >> { %v217_v32 = vld [vmem:[%s16136_s28 + $0x400] sm:$0xff]  ;;  %216 = vst [vmem:[%s16132_s27 + $0x1f0] sm:$0xff] %v215_v31 }
  0x32   : >> { %v219_v33 = vld [vmem:[%s16136_s28 + $0x420] sm:$0xff]  ;;  %218 = vst [vmem:[%s16132_s27 + $0x200] sm:$0xff] %v217_v32 }
  0x33   : >> { %v221_v34 = vld [vmem:[%s16136_s28 + $0x440] sm:$0xff]  ;;  %220 = vst [vmem:[%s16132_s27 + $0x210] sm:$0xff] %v219_v33 }
  0x34   : >> { %v223_v35 = vld [vmem:[%s16136_s28 + $0x460] sm:$0xff]  ;;  %222 = vst [vmem:[%s16132_s27 + $0x220] sm:$0xff] %v221_v34 }
  0x35   : >> { %v225_v36 = vld [vmem:[%s16136_s28 + $0x480] sm:$0xff]  ;;  %224 = vst [vmem:[%s16132_s27 + $0x230] sm:$0xff] %v223_v35 }
  0x36   : >> { %v227_v37 = vld [vmem:[%s16136_s28 + $0x4a0] sm:$0xff]  ;;  %226 = vst [vmem:[%s16132_s27 + $0x240] sm:$0xff] %v225_v36 }
  0x37   : >> { %v229_v38 = vld [vmem:[%s16136_s28 + $0x4c0] sm:$0xff]  ;;  %228 = vst [vmem:[%s16132_s27 + $0x250] sm:$0xff] %v227_v37 }
  0x38   : >> { %v231_v39 = vld [vmem:[%s16136_s28 + $0x4e0] sm:$0xff]  ;;  %230 = vst [vmem:[%s16132_s27 + $0x260] sm:$0xff] %v229_v38 }
  0x39   : >> { %v233_v40 = vld [vmem:[%s16136_s28 + $0x500] sm:$0xff]  ;;  %232 = vst [vmem:[%s16132_s27 + $0x270] sm:$0xff] %v231_v39 }
  0x3a   : >> { %v235_v41 = vld [vmem:[%s16136_s28 + $0x520] sm:$0xff]  ;;  %234 = vst [vmem:[%s16132_s27 + $0x280] sm:$0xff] %v233_v40 }
  0x3b   : >> { %v237_v42 = vld [vmem:[%s16136_s28 + $0x540] sm:$0xff]  ;;  %236 = vst [vmem:[%s16132_s27 + $0x290] sm:$0xff] %v235_v41 }
  0x3c   : >> { %v239_v43 = vld [vmem:[%s16136_s28 + $0x560] sm:$0xff]  ;;  %238 = vst [vmem:[%s16132_s27 + $0x2a0] sm:$0xff] %v237_v42 }
  0x3d   : >> { %v241_v44 = vld [vmem:[%s16136_s28 + $0x580] sm:$0xff]  ;;  %240 = vst [vmem:[%s16132_s27 + $0x2b0] sm:$0xff] %v239_v43 }
  0x3e   : >> { %v243_v45 = vld [vmem:[%s16136_s28 + $0x5a0] sm:$0xff]  ;;  %242 = vst [vmem:[%s16132_s27 + $0x2c0] sm:$0xff] %v241_v44 }
  0x3f   : >> { %v245_v46 = vld [vmem:[%s16136_s28 + $0x5c0] sm:$0xff]  ;;  %244 = vst [vmem:[%s16132_s27 + $0x2d0] sm:$0xff] %v243_v45 }
  0x40   : >> { %v247_v47 = vld [vmem:[%s16136_s28 + $0x5e0] sm:$0xff]  ;;  %246 = vst [vmem:[%s16132_s27 + $0x2e0] sm:$0xff] %v245_v46 }
  0x41   : >> { %v249_v48 = vld [vmem:[%s16136_s28 + $0x600] sm:$0xff]  ;;  %248 = vst [vmem:[%s16132_s27 + $0x2f0] sm:$0xff] %v247_v47 }
  0x42   : >> { %v251_v49 = vld [vmem:[%s16136_s28 + $0x620] sm:$0xff]  ;;  %250 = vst [vmem:[%s16132_s27 + $0x300] sm:$0xff] %v249_v48 }
  0x43   : >> { %v253_v50 = vld [vmem:[%s16136_s28 + $0x640] sm:$0xff]  ;;  %252 = vst [vmem:[%s16132_s27 + $0x310] sm:$0xff] %v251_v49 }
  0x44   : >> { %v255_v51 = vld [vmem:[%s16136_s28 + $0x660] sm:$0xff]  ;;  %254 = vst [vmem:[%s16132_s27 + $0x320] sm:$0xff] %v253_v50 }
  0x45   : >> { %v257_v52 = vld [vmem:[%s16136_s28 + $0x680] sm:$0xff]  ;;  %256 = vst [vmem:[%s16132_s27 + $0x330] sm:$0xff] %v255_v51 }
  0x46   : >> { %v259_v53 = vld [vmem:[%s16136_s28 + $0x6a0] sm:$0xff]  ;;  %258 = vst [vmem:[%s16132_s27 + $0x340] sm:$0xff] %v257_v52 }
  0x47   : >> { %v261_v54 = vld [vmem:[%s16136_s28 + $0x6c0] sm:$0xff]  ;;  %260 = vst [vmem:[%s16132_s27 + $0x350] sm:$0xff] %v259_v53 }
  0x48   : >> { %v263_v55 = vld [vmem:[%s16136_s28 + $0x6e0] sm:$0xff]  ;;  %262 = vst [vmem:[%s16132_s27 + $0x360] sm:$0xff] %v261_v54 }
  0x49   : >> { %v265_v56 = vld [vmem:[%s16136_s28 + $0x700] sm:$0xff]  ;;  %264 = vst [vmem:[%s16132_s27 + $0x370] sm:$0xff] %v263_v55 }
  0x4a   : >> { %v267_v57 = vld [vmem:[%s16136_s28 + $0x720] sm:$0xff]  ;;  %266 = vst [vmem:[%s16132_s27 + $0x380] sm:$0xff] %v265_v56 }
  0x4b   : >> { %v269_v58 = vld [vmem:[%s16136_s28 + $0x740] sm:$0xff]  ;;  %268 = vst [vmem:[%s16132_s27 + $0x390] sm:$0xff] %v267_v57 }
  0x4c   : >> { %v271_v59 = vld [vmem:[%s16136_s28 + $0x760] sm:$0xff]  ;;  %270 = vst [vmem:[%s16132_s27 + $0x3a0] sm:$0xff] %v269_v58 }
  0x4d   : >> { %v273_v60 = vld [vmem:[%s16136_s28 + $0x780] sm:$0xff]  ;;  %272 = vst [vmem:[%s16132_s27 + $0x3b0] sm:$0xff] %v271_v59 }
  0x4e   : >> { %v275_v61 = vld [vmem:[%s16136_s28 + $0x7a0] sm:$0xff]  ;;  %274 = vst [vmem:[%s16132_s27 + $0x3c0] sm:$0xff] %v273_v60 }
  0x4f   : >> { %v277_v62 = vld [vmem:[%s16136_s28 + $0x7c0] sm:$0xff]  ;;  %276 = vst [vmem:[%s16132_s27 + $0x3d0] sm:$0xff] %v275_v61 }
  0x50   : >> { %v279_v63 = vld [vmem:[%s16136_s28 + $0x7e0] sm:$0xff]  ;;  %278 = vst [vmem:[%s16132_s27 + $0x3e0] sm:$0xff] %v277_v62 }
  0x51   : >> { %v281_v0 = vld [vmem:[%s16136_s28 + $0x800] sm:$0xff]  ;;  %280 = vst [vmem:[%s16132_s27 + $0x3f0] sm:$0xff] %v279_v63 }
  0x52   : >> { %v283_v1 = vld [vmem:[%s16136_s28 + $0x820] sm:$0xff]  ;;  %282 = vst [vmem:[%s16132_s27 + $0x400] sm:$0xff] %v281_v0 }
  0x53   : >> { %v285_v2 = vld [vmem:[%s16136_s28 + $0x840] sm:$0xff]  ;;  %284 = vst [vmem:[%s16132_s27 + $0x410] sm:$0xff] %v283_v1 }
  0x54   : >> { %v287_v3 = vld [vmem:[%s16136_s28 + $0x860] sm:$0xff]  ;;  %286 = vst [vmem:[%s16132_s27 + $0x420] sm:$0xff] %v285_v2 }
  0x55   : >> { %v289_v4 = vld [vmem:[%s16136_s28 + $0x880] sm:$0xff]  ;;  %288 = vst [vmem:[%s16132_s27 + $0x430] sm:$0xff] %v287_v3 }
  0x56   : >> { %v291_v5 = vld [vmem:[%s16136_s28 + $0x8a0] sm:$0xff]  ;;  %290 = vst [vmem:[%s16132_s27 + $0x440] sm:$0xff] %v289_v4 }
  0x57   : >> { %v293_v6 = vld [vmem:[%s16136_s28 + $0x8c0] sm:$0xff]  ;;  %292 = vst [vmem:[%s16132_s27 + $0x450] sm:$0xff] %v291_v5 }
  0x58   : >> { %v295_v7 = vld [vmem:[%s16136_s28 + $0x8e0] sm:$0xff]  ;;  %294 = vst [vmem:[%s16132_s27 + $0x460] sm:$0xff] %v293_v6 }
  0x59   : >> { %v297_v8 = vld [vmem:[%s16136_s28 + $0x900] sm:$0xff]  ;;  %296 = vst [vmem:[%s16132_s27 + $0x470] sm:$0xff] %v295_v7 }
  0x5a   : >> { %v299_v9 = vld [vmem:[%s16136_s28 + $0x920] sm:$0xff]  ;;  %298 = vst [vmem:[%s16132_s27 + $0x480] sm:$0xff] %v297_v8 }
  0x5b   : >> { %v301_v10 = vld [vmem:[%s16136_s28 + $0x940] sm:$0xff]  ;;  %300 = vst [vmem:[%s16132_s27 + $0x490] sm:$0xff] %v299_v9 }
  0x5c   : >> { %v303_v11 = vld [vmem:[%s16136_s28 + $0x960] sm:$0xff]  ;;  %302 = vst [vmem:[%s16132_s27 + $0x4a0] sm:$0xff] %v301_v10 }
  0x5d   : >> { %v305_v12 = vld [vmem:[%s16136_s28 + $0x980] sm:$0xff]  ;;  %304 = vst [vmem:[%s16132_s27 + $0x4b0] sm:$0xff] %v303_v11 }
  0x5e   : >> { %v307_v13 = vld [vmem:[%s16136_s28 + $0x9a0] sm:$0xff]  ;;  %306 = vst [vmem:[%s16132_s27 + $0x4c0] sm:$0xff] %v305_v12 }
  0x5f   : >> { %v309_v14 = vld [vmem:[%s16136_s28 + $0x9c0] sm:$0xff]  ;;  %308 = vst [vmem:[%s16132_s27 + $0x4d0] sm:$0xff] %v307_v13 }
  0x60   : >> { %v311_v15 = vld [vmem:[%s16136_s28 + $0x9e0] sm:$0xff]  ;;  %310 = vst [vmem:[%s16132_s27 + $0x4e0] sm:$0xff] %v309_v14 }
  0x61   : >> { %v313_v16 = vld [vmem:[%s16136_s28 + $0xa00] sm:$0xff]  ;;  %312 = vst [vmem:[%s16132_s27 + $0x4f0] sm:$0xff] %v311_v15 }
  0x62   : >> { %v315_v17 = vld [vmem:[%s16136_s28 + $0xa20] sm:$0xff]  ;;  %314 = vst [vmem:[%s16132_s27 + $0x500] sm:$0xff] %v313_v16 }
  0x63   : >> { %v317_v18 = vld [vmem:[%s16136_s28 + $0xa40] sm:$0xff]  ;;  %316 = vst [vmem:[%s16132_s27 + $0x510] sm:$0xff] %v315_v17 }
  0x64   : >> { %v319_v19 = vld [vmem:[%s16136_s28 + $0xa60] sm:$0xff]  ;;  %318 = vst [vmem:[%s16132_s27 + $0x520] sm:$0xff] %v317_v18 }
  0x65   : >> { %v321_v20 = vld [vmem:[%s16136_s28 + $0xa80] sm:$0xff]  ;;  %320 = vst [vmem:[%s16132_s27 + $0x530] sm:$0xff] %v319_v19 }
  0x66   : >> { %v323_v21 = vld [vmem:[%s16136_s28 + $0xaa0] sm:$0xff]  ;;  %322 = vst [vmem:[%s16132_s27 + $0x540] sm:$0xff] %v321_v20 }
  0x67   : >> { %v325_v22 = vld [vmem:[%s16136_s28 + $0xac0] sm:$0xff]  ;;  %324 = vst [vmem:[%s16132_s27 + $0x550] sm:$0xff] %v323_v21 }
  0x68   : >> { %v327_v23 = vld [vmem:[%s16136_s28 + $0xae0] sm:$0xff]  ;;  %326 = vst [vmem:[%s16132_s27 + $0x560] sm:$0xff] %v325_v22 }
  0x69   : >> { %v329_v24 = vld [vmem:[%s16136_s28 + $0xb00] sm:$0xff]  ;;  %328 = vst [vmem:[%s16132_s27 + $0x570] sm:$0xff] %v327_v23 }
  0x6a   : >> { %v331_v25 = vld [vmem:[%s16136_s28 + $0xb20] sm:$0xff]  ;;  %330 = vst [vmem:[%s16132_s27 + $0x580] sm:$0xff] %v329_v24 }
  0x6b   : >> { %v333_v26 = vld [vmem:[%s16136_s28 + $0xb40] sm:$0xff]  ;;  %332 = vst [vmem:[%s16132_s27 + $0x590] sm:$0xff] %v331_v25 }
  0x6c   : >> { %v335_v27 = vld [vmem:[%s16136_s28 + $0xb60] sm:$0xff]  ;;  %334 = vst [vmem:[%s16132_s27 + $0x5a0] sm:$0xff] %v333_v26 }
  0x6d   : >> { %v337_v28 = vld [vmem:[%s16136_s28 + $0xb80] sm:$0xff]  ;;  %336 = vst [vmem:[%s16132_s27 + $0x5b0] sm:$0xff] %v335_v27 }
  0x6e   : >> { %v339_v29 = vld [vmem:[%s16136_s28 + $0xba0] sm:$0xff]  ;;  %338 = vst [vmem:[%s16132_s27 + $0x5c0] sm:$0xff] %v337_v28 }
  0x6f   : >> { %v341_v30 = vld [vmem:[%s16136_s28 + $0xbc0] sm:$0xff]  ;;  %340 = vst [vmem:[%s16132_s27 + $0x5d0] sm:$0xff] %v339_v29 }
  0x70   : >> { %v343_v31 = vld [vmem:[%s16136_s28 + $0xbe0] sm:$0xff]  ;;  %342 = vst [vmem:[%s16132_s27 + $0x5e0] sm:$0xff] %v341_v30 }
  0x71   : >> { %v345_v32 = vld [vmem:[%s16136_s28 + $0xc00] sm:$0xff]  ;;  %344 = vst [vmem:[%s16132_s27 + $0x5f0] sm:$0xff] %v343_v31 }
  0x72   : >> { %v347_v33 = vld [vmem:[%s16136_s28 + $0xc20] sm:$0xff]  ;;  %346 = vst [vmem:[%s16132_s27 + $0x600] sm:$0xff] %v345_v32 }
  0x73   : >> { %v349_v34 = vld [vmem:[%s16136_s28 + $0xc40] sm:$0xff]  ;;  %348 = vst [vmem:[%s16132_s27 + $0x610] sm:$0xff] %v347_v33 }
  0x74   : >> { %v351_v35 = vld [vmem:[%s16136_s28 + $0xc60] sm:$0xff]  ;;  %350 = vst [vmem:[%s16132_s27 + $0x620] sm:$0xff] %v349_v34 }
  0x75   : >> { %v353_v36 = vld [vmem:[%s16136_s28 + $0xc80] sm:$0xff]  ;;  %352 = vst [vmem:[%s16132_s27 + $0x630] sm:$0xff] %v351_v35 }
  0x76   : >> { %v355_v37 = vld [vmem:[%s16136_s28 + $0xca0] sm:$0xff]  ;;  %354 = vst [vmem:[%s16132_s27 + $0x640] sm:$0xff] %v353_v36 }
  0x77   : >> { %v357_v38 = vld [vmem:[%s16136_s28 + $0xcc0] sm:$0xff]  ;;  %356 = vst [vmem:[%s16132_s27 + $0x650] sm:$0xff] %v355_v37 }
  0x78   : >> { %v359_v39 = vld [vmem:[%s16136_s28 + $0xce0] sm:$0xff]  ;;  %358 = vst [vmem:[%s16132_s27 + $0x660] sm:$0xff] %v357_v38 }
  0x79   : >> { %v361_v40 = vld [vmem:[%s16136_s28 + $0xd00] sm:$0xff]  ;;  %360 = vst [vmem:[%s16132_s27 + $0x670] sm:$0xff] %v359_v39 }
  0x7a   : >> { %v363_v41 = vld [vmem:[%s16136_s28 + $0xd20] sm:$0xff]  ;;  %362 = vst [vmem:[%s16132_s27 + $0x680] sm:$0xff] %v361_v40 }
  0x7b   : >> { %v365_v42 = vld [vmem:[%s16136_s28 + $0xd40] sm:$0xff]  ;;  %364 = vst [vmem:[%s16132_s27 + $0x690] sm:$0xff] %v363_v41 }
  0x7c   : >> { %v367_v43 = vld [vmem:[%s16136_s28 + $0xd60] sm:$0xff]  ;;  %366 = vst [vmem:[%s16132_s27 + $0x6a0] sm:$0xff] %v365_v42 }
  0x7d   : >> { %v369_v44 = vld [vmem:[%s16136_s28 + $0xd80] sm:$0xff]  ;;  %368 = vst [vmem:[%s16132_s27 + $0x6b0] sm:$0xff] %v367_v43 }
  0x7e   : >> { %v371_v45 = vld [vmem:[%s16136_s28 + $0xda0] sm:$0xff]  ;;  %370 = vst [vmem:[%s16132_s27 + $0x6c0] sm:$0xff] %v369_v44 }
  0x7f   : >> { %v373_v46 = vld [vmem:[%s16136_s28 + $0xdc0] sm:$0xff]  ;;  %372 = vst [vmem:[%s16132_s27 + $0x6d0] sm:$0xff] %v371_v45 }
  0x80   : >> { %v375_v47 = vld [vmem:[%s16136_s28 + $0xde0] sm:$0xff]  ;;  %374 = vst [vmem:[%s16132_s27 + $0x6e0] sm:$0xff] %v373_v46 }
  0x81   : >> { %v377_v48 = vld [vmem:[%s16136_s28 + $0xe00] sm:$0xff]  ;;  %376 = vst [vmem:[%s16132_s27 + $0x6f0] sm:$0xff] %v375_v47 }
  0x82   : >> { %v379_v49 = vld [vmem:[%s16136_s28 + $0xe20] sm:$0xff]  ;;  %378 = vst [vmem:[%s16132_s27 + $0x700] sm:$0xff] %v377_v48 }
  0x83   : >> { %v381_v50 = vld [vmem:[%s16136_s28 + $0xe40] sm:$0xff]  ;;  %380 = vst [vmem:[%s16132_s27 + $0x710] sm:$0xff] %v379_v49 }
  0x84   : >> { %v383_v51 = vld [vmem:[%s16136_s28 + $0xe60] sm:$0xff]  ;;  %382 = vst [vmem:[%s16132_s27 + $0x720] sm:$0xff] %v381_v50 }
  0x85   : >> { %v385_v52 = vld [vmem:[%s16136_s28 + $0xe80] sm:$0xff]  ;;  %384 = vst [vmem:[%s16132_s27 + $0x730] sm:$0xff] %v383_v51 }
  0x86   : >> { %v387_v53 = vld [vmem:[%s16136_s28 + $0xea0] sm:$0xff]  ;;  %386 = vst [vmem:[%s16132_s27 + $0x740] sm:$0xff] %v385_v52 }
  0x87   : >> { %v389_v54 = vld [vmem:[%s16136_s28 + $0xec0] sm:$0xff]  ;;  %388 = vst [vmem:[%s16132_s27 + $0x750] sm:$0xff] %v387_v53 }
  0x88   : >> { %v391_v55 = vld [vmem:[%s16136_s28 + $0xee0] sm:$0xff]  ;;  %390 = vst [vmem:[%s16132_s27 + $0x760] sm:$0xff] %v389_v54 }
  0x89   : >> { %v393_v56 = vld [vmem:[%s16136_s28 + $0xf00] sm:$0xff]  ;;  %392 = vst [vmem:[%s16132_s27 + $0x770] sm:$0xff] %v391_v55 }
  0x8a   : >> { %v395_v57 = vld [vmem:[%s16136_s28 + $0xf20] sm:$0xff]  ;;  %394 = vst [vmem:[%s16132_s27 + $0x780] sm:$0xff] %v393_v56 }
  0x8b   : >> { %v397_v58 = vld [vmem:[%s16136_s28 + $0xf40] sm:$0xff]  ;;  %396 = vst [vmem:[%s16132_s27 + $0x790] sm:$0xff] %v395_v57 }
  0x8c   : >> { %v399_v59 = vld [vmem:[%s16136_s28 + $0xf60] sm:$0xff]  ;;  %398 = vst [vmem:[%s16132_s27 + $0x7a0] sm:$0xff] %v397_v58 }
  0x8d   : >> { %v401_v60 = vld [vmem:[%s16136_s28 + $0xf80] sm:$0xff]  ;;  %400 = vst [vmem:[%s16132_s27 + $0x7b0] sm:$0xff] %v399_v59 }
  0x8e   : >> { %v403_v61 = vld [vmem:[%s16136_s28 + $0xfa0] sm:$0xff]  ;;  %402 = vst [vmem:[%s16132_s27 + $0x7c0] sm:$0xff] %v401_v60 }
  0x8f   : >> { %v405_v62 = vld [vmem:[%s16136_s28 + $0xfc0] sm:$0xff]  ;;  %404 = vst [vmem:[%s16132_s27 + $0x7d0] sm:$0xff] %v403_v61 }
  0x90   : >> { %v407_v63 = vld [vmem:[%s16136_s28 + $0xfe0] sm:$0xff]  ;;  %406 = vst [vmem:[%s16132_s27 + $0x7e0] sm:$0xff] %v405_v62 }
  0x91   : >> { %v409_v0 = vld [vmem:[%s16136_s28 + $0x1000] sm:$0xff]  ;;  %408 = vst [vmem:[%s16132_s27 + $0x7f0] sm:$0xff] %v407_v63 }
  0x92   : >> { %v411_v1 = vld [vmem:[%s16136_s28 + $0x1020] sm:$0xff]  ;;  %410 = vst [vmem:[%s16132_s27 + $0x800] sm:$0xff] %v409_v0 }
  0x93   : >> { %v413_v2 = vld [vmem:[%s16136_s28 + $0x1040] sm:$0xff]  ;;  %412 = vst [vmem:[%s16132_s27 + $0x810] sm:$0xff] %v411_v1 }
  0x94   : >> { %v415_v3 = vld [vmem:[%s16136_s28 + $0x1060] sm:$0xff]  ;;  %414 = vst [vmem:[%s16132_s27 + $0x820] sm:$0xff] %v413_v2 }
  0x95   : >> { %v417_v4 = vld [vmem:[%s16136_s28 + $0x1080] sm:$0xff]  ;;  %416 = vst [vmem:[%s16132_s27 + $0x830] sm:$0xff] %v415_v3 }
  0x96   : >> { %v419_v5 = vld [vmem:[%s16136_s28 + $0x10a0] sm:$0xff]  ;;  %418 = vst [vmem:[%s16132_s27 + $0x840] sm:$0xff] %v417_v4 }
  0x97   : >> { %v421_v6 = vld [vmem:[%s16136_s28 + $0x10c0] sm:$0xff]  ;;  %420 = vst [vmem:[%s16132_s27 + $0x850] sm:$0xff] %v419_v5 }
  0x98   : >> { %v423_v7 = vld [vmem:[%s16136_s28 + $0x10e0] sm:$0xff]  ;;  %422 = vst [vmem:[%s16132_s27 + $0x860] sm:$0xff] %v421_v6 }
  0x99   : >> { %v425_v8 = vld [vmem:[%s16136_s28 + $0x1100] sm:$0xff]  ;;  %424 = vst [vmem:[%s16132_s27 + $0x870] sm:$0xff] %v423_v7 }
  0x9a   : >> { %v427_v9 = vld [vmem:[%s16136_s28 + $0x1120] sm:$0xff]  ;;  %426 = vst [vmem:[%s16132_s27 + $0x880] sm:$0xff] %v425_v8 }
  0x9b   : >> { %v429_v10 = vld [vmem:[%s16136_s28 + $0x1140] sm:$0xff]  ;;  %428 = vst [vmem:[%s16132_s27 + $0x890] sm:$0xff] %v427_v9 }
  0x9c   : >> { %v431_v11 = vld [vmem:[%s16136_s28 + $0x1160] sm:$0xff]  ;;  %430 = vst [vmem:[%s16132_s27 + $0x8a0] sm:$0xff] %v429_v10 }
  0x9d   : >> { %v433_v12 = vld [vmem:[%s16136_s28 + $0x1180] sm:$0xff]  ;;  %432 = vst [vmem:[%s16132_s27 + $0x8b0] sm:$0xff] %v431_v11 }
  0x9e   : >> { %v435_v13 = vld [vmem:[%s16136_s28 + $0x11a0] sm:$0xff]  ;;  %434 = vst [vmem:[%s16132_s27 + $0x8c0] sm:$0xff] %v433_v12 }
  0x9f   : >> { %v437_v14 = vld [vmem:[%s16136_s28 + $0x11c0] sm:$0xff]  ;;  %436 = vst [vmem:[%s16132_s27 + $0x8d0] sm:$0xff] %v435_v13 }
  0xa0   : >> { %v439_v15 = vld [vmem:[%s16136_s28 + $0x11e0] sm:$0xff]  ;;  %438 = vst [vmem:[%s16132_s27 + $0x8e0] sm:$0xff] %v437_v14 }
  0xa1   : >> { %v441_v16 = vld [vmem:[%s16136_s28 + $0x1200] sm:$0xff]  ;;  %440 = vst [vmem:[%s16132_s27 + $0x8f0] sm:$0xff] %v439_v15 }
  0xa2   : >> { %v443_v17 = vld [vmem:[%s16136_s28 + $0x1220] sm:$0xff]  ;;  %442 = vst [vmem:[%s16132_s27 + $0x900] sm:$0xff] %v441_v16 }
  0xa3   : >> { %v445_v18 = vld [vmem:[%s16136_s28 + $0x1240] sm:$0xff]  ;;  %444 = vst [vmem:[%s16132_s27 + $0x910] sm:$0xff] %v443_v17 }
  0xa4   : >> { %v447_v19 = vld [vmem:[%s16136_s28 + $0x1260] sm:$0xff]  ;;  %446 = vst [vmem:[%s16132_s27 + $0x920] sm:$0xff] %v445_v18 }
  0xa5   : >> { %v449_v20 = vld [vmem:[%s16136_s28 + $0x1280] sm:$0xff]  ;;  %448 = vst [vmem:[%s16132_s27 + $0x930] sm:$0xff] %v447_v19 }
  0xa6   : >> { %v451_v21 = vld [vmem:[%s16136_s28 + $0x12a0] sm:$0xff]  ;;  %450 = vst [vmem:[%s16132_s27 + $0x940] sm:$0xff] %v449_v20 }
  0xa7   : >> { %v453_v22 = vld [vmem:[%s16136_s28 + $0x12c0] sm:$0xff]  ;;  %452 = vst [vmem:[%s16132_s27 + $0x950] sm:$0xff] %v451_v21 }
  0xa8   : >> { %v455_v23 = vld [vmem:[%s16136_s28 + $0x12e0] sm:$0xff]  ;;  %454 = vst [vmem:[%s16132_s27 + $0x960] sm:$0xff] %v453_v22 }
  0xa9   : >> { %v457_v24 = vld [vmem:[%s16136_s28 + $0x1300] sm:$0xff]  ;;  %456 = vst [vmem:[%s16132_s27 + $0x970] sm:$0xff] %v455_v23 }
  0xaa   : >> { %v459_v25 = vld [vmem:[%s16136_s28 + $0x1320] sm:$0xff]  ;;  %458 = vst [vmem:[%s16132_s27 + $0x980] sm:$0xff] %v457_v24 }
  0xab   : >> { %v461_v26 = vld [vmem:[%s16136_s28 + $0x1340] sm:$0xff]  ;;  %460 = vst [vmem:[%s16132_s27 + $0x990] sm:$0xff] %v459_v25 }
  0xac   : >> { %v463_v27 = vld [vmem:[%s16136_s28 + $0x1360] sm:$0xff]  ;;  %462 = vst [vmem:[%s16132_s27 + $0x9a0] sm:$0xff] %v461_v26 }
  0xad   : >> { %v465_v28 = vld [vmem:[%s16136_s28 + $0x1380] sm:$0xff]  ;;  %464 = vst [vmem:[%s16132_s27 + $0x9b0] sm:$0xff] %v463_v27 }
  0xae   : >> { %v467_v29 = vld [vmem:[%s16136_s28 + $0x13a0] sm:$0xff]  ;;  %466 = vst [vmem:[%s16132_s27 + $0x9c0] sm:$0xff] %v465_v28 }
  0xaf   : >> { %v469_v30 = vld [vmem:[%s16136_s28 + $0x13c0] sm:$0xff]  ;;  %468 = vst [vmem:[%s16132_s27 + $0x9d0] sm:$0xff] %v467_v29 }
  0xb0   : >> { %v471_v31 = vld [vmem:[%s16136_s28 + $0x13e0] sm:$0xff]  ;;  %470 = vst [vmem:[%s16132_s27 + $0x9e0] sm:$0xff] %v469_v30 }
  0xb1   : >> { %v473_v32 = vld [vmem:[%s16136_s28 + $0x1400] sm:$0xff]  ;;  %472 = vst [vmem:[%s16132_s27 + $0x9f0] sm:$0xff] %v471_v31 }
  0xb2   : >> { %v475_v33 = vld [vmem:[%s16136_s28 + $0x1420] sm:$0xff]  ;;  %474 = vst [vmem:[%s16132_s27 + $0xa00] sm:$0xff] %v473_v32 }
  0xb3   : >> { %v477_v34 = vld [vmem:[%s16136_s28 + $0x1440] sm:$0xff]  ;;  %476 = vst [vmem:[%s16132_s27 + $0xa10] sm:$0xff] %v475_v33 }
  0xb4   : >> { %v479_v35 = vld [vmem:[%s16136_s28 + $0x1460] sm:$0xff]  ;;  %478 = vst [vmem:[%s16132_s27 + $0xa20] sm:$0xff] %v477_v34 }
  0xb5   : >> { %v481_v36 = vld [vmem:[%s16136_s28 + $0x1480] sm:$0xff]  ;;  %480 = vst [vmem:[%s16132_s27 + $0xa30] sm:$0xff] %v479_v35 }
  0xb6   : >> { %v483_v37 = vld [vmem:[%s16136_s28 + $0x14a0] sm:$0xff]  ;;  %482 = vst [vmem:[%s16132_s27 + $0xa40] sm:$0xff] %v481_v36 }
  0xb7   : >> { %v485_v38 = vld [vmem:[%s16136_s28 + $0x14c0] sm:$0xff]  ;;  %484 = vst [vmem:[%s16132_s27 + $0xa50] sm:$0xff] %v483_v37 }
  0xb8   : >> { %v487_v39 = vld [vmem:[%s16136_s28 + $0x14e0] sm:$0xff]  ;;  %486 = vst [vmem:[%s16132_s27 + $0xa60] sm:$0xff] %v485_v38 }
  0xb9   : >> { %v489_v40 = vld [vmem:[%s16136_s28 + $0x1500] sm:$0xff]  ;;  %488 = vst [vmem:[%s16132_s27 + $0xa70] sm:$0xff] %v487_v39 }
  0xba   : >> { %v491_v41 = vld [vmem:[%s16136_s28 + $0x1520] sm:$0xff]  ;;  %490 = vst [vmem:[%s16132_s27 + $0xa80] sm:$0xff] %v489_v40 }
  0xbb   : >> { %v493_v42 = vld [vmem:[%s16136_s28 + $0x1540] sm:$0xff]  ;;  %492 = vst [vmem:[%s16132_s27 + $0xa90] sm:$0xff] %v491_v41 }
  0xbc   : >> { %v495_v43 = vld [vmem:[%s16136_s28 + $0x1560] sm:$0xff]  ;;  %494 = vst [vmem:[%s16132_s27 + $0xaa0] sm:$0xff] %v493_v42 }
  0xbd   : >> { %v497_v44 = vld [vmem:[%s16136_s28 + $0x1580] sm:$0xff]  ;;  %496 = vst [vmem:[%s16132_s27 + $0xab0] sm:$0xff] %v495_v43 }
  0xbe   : >> { %v499_v45 = vld [vmem:[%s16136_s28 + $0x15a0] sm:$0xff]  ;;  %498 = vst [vmem:[%s16132_s27 + $0xac0] sm:$0xff] %v497_v44 }
  0xbf   : >> { %v501_v46 = vld [vmem:[%s16136_s28 + $0x15c0] sm:$0xff]  ;;  %500 = vst [vmem:[%s16132_s27 + $0xad0] sm:$0xff] %v499_v45 }
  0xc0   : >> { %v503_v47 = vld [vmem:[%s16136_s28 + $0x15e0] sm:$0xff]  ;;  %502 = vst [vmem:[%s16132_s27 + $0xae0] sm:$0xff] %v501_v46 }
  0xc1   : >> { %v505_v48 = vld [vmem:[%s16136_s28 + $0x1600] sm:$0xff]  ;;  %504 = vst [vmem:[%s16132_s27 + $0xaf0] sm:$0xff] %v503_v47 }
  0xc2   : >> { %v507_v49 = vld [vmem:[%s16136_s28 + $0x1620] sm:$0xff]  ;;  %506 = vst [vmem:[%s16132_s27 + $0xb00] sm:$0xff] %v505_v48 }
  0xc3   : >> { %v509_v50 = vld [vmem:[%s16136_s28 + $0x1640] sm:$0xff]  ;;  %508 = vst [vmem:[%s16132_s27 + $0xb10] sm:$0xff] %v507_v49 }
  0xc4   : >> { %v511_v51 = vld [vmem:[%s16136_s28 + $0x1660] sm:$0xff]  ;;  %510 = vst [vmem:[%s16132_s27 + $0xb20] sm:$0xff] %v509_v50 }
  0xc5   : >> { %v513_v52 = vld [vmem:[%s16136_s28 + $0x1680] sm:$0xff]  ;;  %512 = vst [vmem:[%s16132_s27 + $0xb30] sm:$0xff] %v511_v51 }
  0xc6   : >> { %v515_v53 = vld [vmem:[%s16136_s28 + $0x16a0] sm:$0xff]  ;;  %514 = vst [vmem:[%s16132_s27 + $0xb40] sm:$0xff] %v513_v52 }
  0xc7   : >> { %v517_v54 = vld [vmem:[%s16136_s28 + $0x16c0] sm:$0xff]  ;;  %516 = vst [vmem:[%s16132_s27 + $0xb50] sm:$0xff] %v515_v53 }
  0xc8   : >> { %v519_v55 = vld [vmem:[%s16136_s28 + $0x16e0] sm:$0xff]  ;;  %518 = vst [vmem:[%s16132_s27 + $0xb60] sm:$0xff] %v517_v54 }
  0xc9   : >> { %v521_v56 = vld [vmem:[%s16136_s28 + $0x1700] sm:$0xff]  ;;  %520 = vst [vmem:[%s16132_s27 + $0xb70] sm:$0xff] %v519_v55 }
  0xca   : >> { %v523_v57 = vld [vmem:[%s16136_s28 + $0x1720] sm:$0xff]  ;;  %522 = vst [vmem:[%s16132_s27 + $0xb80] sm:$0xff] %v521_v56 }
  0xcb   : >> { %v525_v58 = vld [vmem:[%s16136_s28 + $0x1740] sm:$0xff]  ;;  %524 = vst [vmem:[%s16132_s27 + $0xb90] sm:$0xff] %v523_v57 }
  0xcc   : >> { %v527_v59 = vld [vmem:[%s16136_s28 + $0x1760] sm:$0xff]  ;;  %526 = vst [vmem:[%s16132_s27 + $0xba0] sm:$0xff] %v525_v58 }
  0xcd   : >> { %v529_v60 = vld [vmem:[%s16136_s28 + $0x1780] sm:$0xff]  ;;  %528 = vst [vmem:[%s16132_s27 + $0xbb0] sm:$0xff] %v527_v59 }
  0xce   : >> { %v531_v61 = vld [vmem:[%s16136_s28 + $0x17a0] sm:$0xff]  ;;  %530 = vst [vmem:[%s16132_s27 + $0xbc0] sm:$0xff] %v529_v60 }
  0xcf   : >> { %v533_v62 = vld [vmem:[%s16136_s28 + $0x17c0] sm:$0xff]  ;;  %532 = vst [vmem:[%s16132_s27 + $0xbd0] sm:$0xff] %v531_v61 }
  0xd0   : >> { %v535_v63 = vld [vmem:[%s16136_s28 + $0x17e0] sm:$0xff]  ;;  %534 = vst [vmem:[%s16132_s27 + $0xbe0] sm:$0xff] %v533_v62 }
  0xd1   : >> { %v537_v0 = vld [vmem:[%s16136_s28 + $0x1800] sm:$0xff]  ;;  %536 = vst [vmem:[%s16132_s27 + $0xbf0] sm:$0xff] %v535_v63 }
  0xd2   : >> { %v539_v1 = vld [vmem:[%s16136_s28 + $0x1820] sm:$0xff]  ;;  %538 = vst [vmem:[%s16132_s27 + $0xc00] sm:$0xff] %v537_v0 }
  0xd3   : >> { %v541_v2 = vld [vmem:[%s16136_s28 + $0x1840] sm:$0xff]  ;;  %540 = vst [vmem:[%s16132_s27 + $0xc10] sm:$0xff] %v539_v1 }
  0xd4   : >> { %v543_v3 = vld [vmem:[%s16136_s28 + $0x1860] sm:$0xff]  ;;  %542 = vst [vmem:[%s16132_s27 + $0xc20] sm:$0xff] %v541_v2 }
  0xd5   : >> { %v545_v4 = vld [vmem:[%s16136_s28 + $0x1880] sm:$0xff]  ;;  %544 = vst [vmem:[%s16132_s27 + $0xc30] sm:$0xff] %v543_v3 }
  0xd6   : >> { %v547_v5 = vld [vmem:[%s16136_s28 + $0x18a0] sm:$0xff]  ;;  %546 = vst [vmem:[%s16132_s27 + $0xc40] sm:$0xff] %v545_v4 }
  0xd7   : >> { %v549_v6 = vld [vmem:[%s16136_s28 + $0x18c0] sm:$0xff]  ;;  %548 = vst [vmem:[%s16132_s27 + $0xc50] sm:$0xff] %v547_v5 }
  0xd8   : >> { %v551_v7 = vld [vmem:[%s16136_s28 + $0x18e0] sm:$0xff]  ;;  %550 = vst [vmem:[%s16132_s27 + $0xc60] sm:$0xff] %v549_v6 }
  0xd9   : >> { %v553_v8 = vld [vmem:[%s16136_s28 + $0x1900] sm:$0xff]  ;;  %552 = vst [vmem:[%s16132_s27 + $0xc70] sm:$0xff] %v551_v7 }
  0xda   : >> { %v555_v9 = vld [vmem:[%s16136_s28 + $0x1920] sm:$0xff]  ;;  %554 = vst [vmem:[%s16132_s27 + $0xc80] sm:$0xff] %v553_v8 }
  0xdb   : >> { %v557_v10 = vld [vmem:[%s16136_s28 + $0x1940] sm:$0xff]  ;;  %556 = vst [vmem:[%s16132_s27 + $0xc90] sm:$0xff] %v555_v9 }
  0xdc   : >> { %v559_v11 = vld [vmem:[%s16136_s28 + $0x1960] sm:$0xff]  ;;  %558 = vst [vmem:[%s16132_s27 + $0xca0] sm:$0xff] %v557_v10 }
  0xdd   : >> { %v561_v12 = vld [vmem:[%s16136_s28 + $0x1980] sm:$0xff]  ;;  %560 = vst [vmem:[%s16132_s27 + $0xcb0] sm:$0xff] %v559_v11 }
  0xde   : >> { %v563_v13 = vld [vmem:[%s16136_s28 + $0x19a0] sm:$0xff]  ;;  %562 = vst [vmem:[%s16132_s27 + $0xcc0] sm:$0xff] %v561_v12 }
  0xdf   : >> { %v565_v14 = vld [vmem:[%s16136_s28 + $0x19c0] sm:$0xff]  ;;  %564 = vst [vmem:[%s16132_s27 + $0xcd0] sm:$0xff] %v563_v13 }
  0xe0   : >> { %v567_v15 = vld [vmem:[%s16136_s28 + $0x19e0] sm:$0xff]  ;;  %566 = vst [vmem:[%s16132_s27 + $0xce0] sm:$0xff] %v565_v14 }
  0xe1   : >> { %v569_v16 = vld [vmem:[%s16136_s28 + $0x1a00] sm:$0xff]  ;;  %568 = vst [vmem:[%s16132_s27 + $0xcf0] sm:$0xff] %v567_v15 }
  0xe2   : >> { %v571_v17 = vld [vmem:[%s16136_s28 + $0x1a20] sm:$0xff]  ;;  %570 = vst [vmem:[%s16132_s27 + $0xd00] sm:$0xff] %v569_v16 }
  0xe3   : >> { %v573_v18 = vld [vmem:[%s16136_s28 + $0x1a40] sm:$0xff]  ;;  %572 = vst [vmem:[%s16132_s27 + $0xd10] sm:$0xff] %v571_v17 }
  0xe4   : >> { %v575_v19 = vld [vmem:[%s16136_s28 + $0x1a60] sm:$0xff]  ;;  %574 = vst [vmem:[%s16132_s27 + $0xd20] sm:$0xff] %v573_v18 }
  0xe5   : >> { %v577_v20 = vld [vmem:[%s16136_s28 + $0x1a80] sm:$0xff]  ;;  %576 = vst [vmem:[%s16132_s27 + $0xd30] sm:$0xff] %v575_v19 }
  0xe6   : >> { %v579_v21 = vld [vmem:[%s16136_s28 + $0x1aa0] sm:$0xff]  ;;  %578 = vst [vmem:[%s16132_s27 + $0xd40] sm:$0xff] %v577_v20 }
  0xe7   : >> { %v581_v22 = vld [vmem:[%s16136_s28 + $0x1ac0] sm:$0xff]  ;;  %580 = vst [vmem:[%s16132_s27 + $0xd50] sm:$0xff] %v579_v21 }
  0xe8   : >> { %v583_v23 = vld [vmem:[%s16136_s28 + $0x1ae0] sm:$0xff]  ;;  %582 = vst [vmem:[%s16132_s27 + $0xd60] sm:$0xff] %v581_v22 }
  0xe9   : >> { %v585_v24 = vld [vmem:[%s16136_s28 + $0x1b00] sm:$0xff]  ;;  %584 = vst [vmem:[%s16132_s27 + $0xd70] sm:$0xff] %v583_v23 }
  0xea   : >> { %v587_v25 = vld [vmem:[%s16136_s28 + $0x1b20] sm:$0xff]  ;;  %586 = vst [vmem:[%s16132_s27 + $0xd80] sm:$0xff] %v585_v24 }
  0xeb   : >> { %v589_v26 = vld [vmem:[%s16136_s28 + $0x1b40] sm:$0xff]  ;;  %588 = vst [vmem:[%s16132_s27 + $0xd90] sm:$0xff] %v587_v25 }
  0xec   : >> { %v591_v27 = vld [vmem:[%s16136_s28 + $0x1b60] sm:$0xff]  ;;  %590 = vst [vmem:[%s16132_s27 + $0xda0] sm:$0xff] %v589_v26 }
  0xed   : >> { %v593_v28 = vld [vmem:[%s16136_s28 + $0x1b80] sm:$0xff]  ;;  %592 = vst [vmem:[%s16132_s27 + $0xdb0] sm:$0xff] %v591_v27 }
  0xee   : >> { %v595_v29 = vld [vmem:[%s16136_s28 + $0x1ba0] sm:$0xff]  ;;  %594 = vst [vmem:[%s16132_s27 + $0xdc0] sm:$0xff] %v593_v28 }
  0xef   : >> { %v597_v30 = vld [vmem:[%s16136_s28 + $0x1bc0] sm:$0xff]  ;;  %596 = vst [vmem:[%s16132_s27 + $0xdd0] sm:$0xff] %v595_v29 }
  0xf0   : >> { %v599_v31 = vld [vmem:[%s16136_s28 + $0x1be0] sm:$0xff]  ;;  %598 = vst [vmem:[%s16132_s27 + $0xde0] sm:$0xff] %v597_v30 }
  0xf1   : >> { %v601_v32 = vld [vmem:[%s16136_s28 + $0x1c00] sm:$0xff]  ;;  %600 = vst [vmem:[%s16132_s27 + $0xdf0] sm:$0xff] %v599_v31 }
  0xf2   : >> { %v603_v33 = vld [vmem:[%s16136_s28 + $0x1c20] sm:$0xff]  ;;  %602 = vst [vmem:[%s16132_s27 + $0xe00] sm:$0xff] %v601_v32 }
  0xf3   : >> { %v605_v34 = vld [vmem:[%s16136_s28 + $0x1c40] sm:$0xff]  ;;  %604 = vst [vmem:[%s16132_s27 + $0xe10] sm:$0xff] %v603_v33 }
  0xf4   : >> { %v607_v35 = vld [vmem:[%s16136_s28 + $0x1c60] sm:$0xff]  ;;  %606 = vst [vmem:[%s16132_s27 + $0xe20] sm:$0xff] %v605_v34 }
  0xf5   : >> { %v609_v36 = vld [vmem:[%s16136_s28 + $0x1c80] sm:$0xff]  ;;  %608 = vst [vmem:[%s16132_s27 + $0xe30] sm:$0xff] %v607_v35 }
  0xf6   : >> { %v611_v37 = vld [vmem:[%s16136_s28 + $0x1ca0] sm:$0xff]  ;;  %610 = vst [vmem:[%s16132_s27 + $0xe40] sm:$0xff] %v609_v36 }
  0xf7   : >> { %v613_v38 = vld [vmem:[%s16136_s28 + $0x1cc0] sm:$0xff]  ;;  %612 = vst [vmem:[%s16132_s27 + $0xe50] sm:$0xff] %v611_v37 }
  0xf8   : >> { %v615_v39 = vld [vmem:[%s16136_s28 + $0x1ce0] sm:$0xff]  ;;  %614 = vst [vmem:[%s16132_s27 + $0xe60] sm:$0xff] %v613_v38 }
  0xf9   : >> { %v617_v40 = vld [vmem:[%s16136_s28 + $0x1d00] sm:$0xff]  ;;  %616 = vst [vmem:[%s16132_s27 + $0xe70] sm:$0xff] %v615_v39 }
  0xfa   : >> { %v619_v41 = vld [vmem:[%s16136_s28 + $0x1d20] sm:$0xff]  ;;  %618 = vst [vmem:[%s16132_s27 + $0xe80] sm:$0xff] %v617_v40 }
  0xfb   : >> { %v621_v42 = vld [vmem:[%s16136_s28 + $0x1d40] sm:$0xff]  ;;  %620 = vst [vmem:[%s16132_s27 + $0xe90] sm:$0xff] %v619_v41 }
  0xfc   : >> { %v623_v43 = vld [vmem:[%s16136_s28 + $0x1d60] sm:$0xff]  ;;  %622 = vst [vmem:[%s16132_s27 + $0xea0] sm:$0xff] %v621_v42 }
  0xfd   : >> { %v625_v44 = vld [vmem:[%s16136_s28 + $0x1d80] sm:$0xff]  ;;  %624 = vst [vmem:[%s16132_s27 + $0xeb0] sm:$0xff] %v623_v43 }
  0xfe   : >> { %v627_v45 = vld [vmem:[%s16136_s28 + $0x1da0] sm:$0xff]  ;;  %626 = vst [vmem:[%s16132_s27 + $0xec0] sm:$0xff] %v625_v44 }
  0xff   : >> { %v629_v46 = vld [vmem:[%s16136_s28 + $0x1dc0] sm:$0xff]  ;;  %628 = vst [vmem:[%s16132_s27 + $0xed0] sm:$0xff] %v627_v45 }
 0x100   : >> { %v631_v47 = vld [vmem:[%s16136_s28 + $0x1de0] sm:$0xff]  ;;  %630 = vst [vmem:[%s16132_s27 + $0xee0] sm:$0xff] %v629_v46 }
 0x101   : >> { %v633_v48 = vld [vmem:[%s16136_s28 + $0x1e00] sm:$0xff]  ;;  %632 = vst [vmem:[%s16132_s27 + $0xef0] sm:$0xff] %v631_v47 }
 0x102   : >> { %v635_v49 = vld [vmem:[%s16136_s28 + $0x1e20] sm:$0xff]  ;;  %634 = vst [vmem:[%s16132_s27 + $0xf00] sm:$0xff] %v633_v48 }
 0x103   : >> { %v637_v50 = vld [vmem:[%s16136_s28 + $0x1e40] sm:$0xff]  ;;  %636 = vst [vmem:[%s16132_s27 + $0xf10] sm:$0xff] %v635_v49 }
 0x104   : >> { %v639_v51 = vld [vmem:[%s16136_s28 + $0x1e60] sm:$0xff]  ;;  %638 = vst [vmem:[%s16132_s27 + $0xf20] sm:$0xff] %v637_v50 }
 0x105   : >> { %v641_v52 = vld [vmem:[%s16136_s28 + $0x1e80] sm:$0xff]  ;;  %640 = vst [vmem:[%s16132_s27 + $0xf30] sm:$0xff] %v639_v51 }
 0x106   : >> { %v643_v53 = vld [vmem:[%s16136_s28 + $0x1ea0] sm:$0xff]  ;;  %642 = vst [vmem:[%s16132_s27 + $0xf40] sm:$0xff] %v641_v52 }
 0x107   : >> { %v645_v54 = vld [vmem:[%s16136_s28 + $0x1ec0] sm:$0xff]  ;;  %644 = vst [vmem:[%s16132_s27 + $0xf50] sm:$0xff] %v643_v53 }
 0x108   : >> { %v647_v55 = vld [vmem:[%s16136_s28 + $0x1ee0] sm:$0xff]  ;;  %646 = vst [vmem:[%s16132_s27 + $0xf60] sm:$0xff] %v645_v54 }
 0x109   : >> { %v649_v56 = vld [vmem:[%s16136_s28 + $0x1f00] sm:$0xff]  ;;  %648 = vst [vmem:[%s16132_s27 + $0xf70] sm:$0xff] %v647_v55 }
 0x10a   : >> { %v651_v57 = vld [vmem:[%s16136_s28 + $0x1f20] sm:$0xff]  ;;  %650 = vst [vmem:[%s16132_s27 + $0xf80] sm:$0xff] %v649_v56 }
 0x10b   : >> { %v653_v58 = vld [vmem:[%s16136_s28 + $0x1f40] sm:$0xff]  ;;  %652 = vst [vmem:[%s16132_s27 + $0xf90] sm:$0xff] %v651_v57 }
 0x10c   : >> { %v655_v59 = vld [vmem:[%s16136_s28 + $0x1f60] sm:$0xff]  ;;  %654 = vst [vmem:[%s16132_s27 + $0xfa0] sm:$0xff] %v653_v58 }
 0x10d   : >> { %v657_v60 = vld [vmem:[%s16136_s28 + $0x1f80] sm:$0xff]  ;;  %656 = vst [vmem:[%s16132_s27 + $0xfb0] sm:$0xff] %v655_v59 }
 0x10e   : >> { %v659_v61 = vld [vmem:[%s16136_s28 + $0x1fa0] sm:$0xff]  ;;  %658 = vst [vmem:[%s16132_s27 + $0xfc0] sm:$0xff] %v657_v60 }
 0x10f   : >> { %v661_v62 = vld [vmem:[%s16136_s28 + $0x1fc0] sm:$0xff]  ;;  %660 = vst [vmem:[%s16132_s27 + $0xfd0] sm:$0xff] %v659_v61 }
 0x110   : >> { %v663_v63 = vld [vmem:[%s16136_s28 + $0x1fe0] sm:$0xff]  ;;  %662 = vst [vmem:[%s16132_s27 + $0xfe0] sm:$0xff] %v661_v62 }
 0x111   : >> { %v665_v0 = vld [vmem:[%s16136_s28 + $0x2000] sm:$0xff]  ;;  %664 = vst [vmem:[%s16132_s27 + $0xff0] sm:$0xff] %v663_v63 }
 0x112   : >> { %v667_v1 = vld [vmem:[%s16136_s28 + $0x2020] sm:$0xff]  ;;  %666 = vst [vmem:[%s16132_s27 + $0x1000] sm:$0xff] %v665_v0 }
 0x113   : >> { %v669_v2 = vld [vmem:[%s16136_s28 + $0x2040] sm:$0xff]  ;;  %668 = vst [vmem:[%s16132_s27 + $0x1010] sm:$0xff] %v667_v1 }
 0x114   : >> { %v671_v3 = vld [vmem:[%s16136_s28 + $0x2060] sm:$0xff]  ;;  %670 = vst [vmem:[%s16132_s27 + $0x1020] sm:$0xff] %v669_v2 }
 0x115   : >> { %v673_v4 = vld [vmem:[%s16136_s28 + $0x2080] sm:$0xff]  ;;  %672 = vst [vmem:[%s16132_s27 + $0x1030] sm:$0xff] %v671_v3 }
 0x116   : >> { %v675_v5 = vld [vmem:[%s16136_s28 + $0x20a0] sm:$0xff]  ;;  %674 = vst [vmem:[%s16132_s27 + $0x1040] sm:$0xff] %v673_v4 }
 0x117   : >> { %v677_v6 = vld [vmem:[%s16136_s28 + $0x20c0] sm:$0xff]  ;;  %676 = vst [vmem:[%s16132_s27 + $0x1050] sm:$0xff] %v675_v5 }
 0x118   : >> { %v679_v7 = vld [vmem:[%s16136_s28 + $0x20e0] sm:$0xff]  ;;  %678 = vst [vmem:[%s16132_s27 + $0x1060] sm:$0xff] %v677_v6 }
 0x119   : >> { %v681_v8 = vld [vmem:[%s16136_s28 + $0x2100] sm:$0xff]  ;;  %680 = vst [vmem:[%s16132_s27 + $0x1070] sm:$0xff] %v679_v7 }
 0x11a   : >> { %v683_v9 = vld [vmem:[%s16136_s28 + $0x2120] sm:$0xff]  ;;  %682 = vst [vmem:[%s16132_s27 + $0x1080] sm:$0xff] %v681_v8 }
 0x11b   : >> { %v685_v10 = vld [vmem:[%s16136_s28 + $0x2140] sm:$0xff]  ;;  %684 = vst [vmem:[%s16132_s27 + $0x1090] sm:$0xff] %v683_v9 }
 0x11c   : >> { %v687_v11 = vld [vmem:[%s16136_s28 + $0x2160] sm:$0xff]  ;;  %686 = vst [vmem:[%s16132_s27 + $0x10a0] sm:$0xff] %v685_v10 }
 0x11d   : >> { %v689_v12 = vld [vmem:[%s16136_s28 + $0x2180] sm:$0xff]  ;;  %688 = vst [vmem:[%s16132_s27 + $0x10b0] sm:$0xff] %v687_v11 }
 0x11e   : >> { %v691_v13 = vld [vmem:[%s16136_s28 + $0x21a0] sm:$0xff]  ;;  %690 = vst [vmem:[%s16132_s27 + $0x10c0] sm:$0xff] %v689_v12 }
 0x11f   : >> { %v693_v14 = vld [vmem:[%s16136_s28 + $0x21c0] sm:$0xff]  ;;  %692 = vst [vmem:[%s16132_s27 + $0x10d0] sm:$0xff] %v691_v13 }
 0x120   : >> { %v695_v15 = vld [vmem:[%s16136_s28 + $0x21e0] sm:$0xff]  ;;  %694 = vst [vmem:[%s16132_s27 + $0x10e0] sm:$0xff] %v693_v14 }
 0x121   : >> { %v697_v16 = vld [vmem:[%s16136_s28 + $0x2200] sm:$0xff]  ;;  %696 = vst [vmem:[%s16132_s27 + $0x10f0] sm:$0xff] %v695_v15 }
 0x122   : >> { %v699_v17 = vld [vmem:[%s16136_s28 + $0x2220] sm:$0xff]  ;;  %698 = vst [vmem:[%s16132_s27 + $0x1100] sm:$0xff] %v697_v16 }
 0x123   : >> { %v701_v18 = vld [vmem:[%s16136_s28 + $0x2240] sm:$0xff]  ;;  %700 = vst [vmem:[%s16132_s27 + $0x1110] sm:$0xff] %v699_v17 }
 0x124   : >> { %v703_v19 = vld [vmem:[%s16136_s28 + $0x2260] sm:$0xff]  ;;  %702 = vst [vmem:[%s16132_s27 + $0x1120] sm:$0xff] %v701_v18 }
 0x125   : >> { %v705_v20 = vld [vmem:[%s16136_s28 + $0x2280] sm:$0xff]  ;;  %704 = vst [vmem:[%s16132_s27 + $0x1130] sm:$0xff] %v703_v19 }
 0x126   : >> { %v707_v21 = vld [vmem:[%s16136_s28 + $0x22a0] sm:$0xff]  ;;  %706 = vst [vmem:[%s16132_s27 + $0x1140] sm:$0xff] %v705_v20 }
 0x127   : >> { %v709_v22 = vld [vmem:[%s16136_s28 + $0x22c0] sm:$0xff]  ;;  %708 = vst [vmem:[%s16132_s27 + $0x1150] sm:$0xff] %v707_v21 }
 0x128   : >> { %v711_v23 = vld [vmem:[%s16136_s28 + $0x22e0] sm:$0xff]  ;;  %710 = vst [vmem:[%s16132_s27 + $0x1160] sm:$0xff] %v709_v22 }
 0x129   : >> { %v713_v24 = vld [vmem:[%s16136_s28 + $0x2300] sm:$0xff]  ;;  %712 = vst [vmem:[%s16132_s27 + $0x1170] sm:$0xff] %v711_v23 }
 0x12a   : >> { %v715_v25 = vld [vmem:[%s16136_s28 + $0x2320] sm:$0xff]  ;;  %714 = vst [vmem:[%s16132_s27 + $0x1180] sm:$0xff] %v713_v24 }
 0x12b   : >> { %v717_v26 = vld [vmem:[%s16136_s28 + $0x2340] sm:$0xff]  ;;  %716 = vst [vmem:[%s16132_s27 + $0x1190] sm:$0xff] %v715_v25 }
 0x12c   : >> { %v719_v27 = vld [vmem:[%s16136_s28 + $0x2360] sm:$0xff]  ;;  %718 = vst [vmem:[%s16132_s27 + $0x11a0] sm:$0xff] %v717_v26 }
 0x12d   : >> { %v721_v28 = vld [vmem:[%s16136_s28 + $0x2380] sm:$0xff]  ;;  %720 = vst [vmem:[%s16132_s27 + $0x11b0] sm:$0xff] %v719_v27 }
 0x12e   : >> { %v723_v29 = vld [vmem:[%s16136_s28 + $0x23a0] sm:$0xff]  ;;  %722 = vst [vmem:[%s16132_s27 + $0x11c0] sm:$0xff] %v721_v28 }
 0x12f   : >> { %v725_v30 = vld [vmem:[%s16136_s28 + $0x23c0] sm:$0xff]  ;;  %724 = vst [vmem:[%s16132_s27 + $0x11d0] sm:$0xff] %v723_v29 }
 0x130   : >> { %v727_v31 = vld [vmem:[%s16136_s28 + $0x23e0] sm:$0xff]  ;;  %726 = vst [vmem:[%s16132_s27 + $0x11e0] sm:$0xff] %v725_v30 }
 0x131   : >> { %v729_v32 = vld [vmem:[%s16136_s28 + $0x2400] sm:$0xff]  ;;  %728 = vst [vmem:[%s16132_s27 + $0x11f0] sm:$0xff] %v727_v31 }
 0x132   : >> { %v731_v33 = vld [vmem:[%s16136_s28 + $0x2420] sm:$0xff]  ;;  %730 = vst [vmem:[%s16132_s27 + $0x1200] sm:$0xff] %v729_v32 }
 0x133   : >> { %v733_v34 = vld [vmem:[%s16136_s28 + $0x2440] sm:$0xff]  ;;  %732 = vst [vmem:[%s16132_s27 + $0x1210] sm:$0xff] %v731_v33 }
 0x134   : >> { %v735_v35 = vld [vmem:[%s16136_s28 + $0x2460] sm:$0xff]  ;;  %734 = vst [vmem:[%s16132_s27 + $0x1220] sm:$0xff] %v733_v34 }
 0x135   : >> { %v737_v36 = vld [vmem:[%s16136_s28 + $0x2480] sm:$0xff]  ;;  %736 = vst [vmem:[%s16132_s27 + $0x1230] sm:$0xff] %v735_v35 }
 0x136   : >> { %v739_v37 = vld [vmem:[%s16136_s28 + $0x24a0] sm:$0xff]  ;;  %738 = vst [vmem:[%s16132_s27 + $0x1240] sm:$0xff] %v737_v36 }
 0x137   : >> { %v741_v38 = vld [vmem:[%s16136_s28 + $0x24c0] sm:$0xff]  ;;  %740 = vst [vmem:[%s16132_s27 + $0x1250] sm:$0xff] %v739_v37 }
 0x138   : >> { %v743_v39 = vld [vmem:[%s16136_s28 + $0x24e0] sm:$0xff]  ;;  %742 = vst [vmem:[%s16132_s27 + $0x1260] sm:$0xff] %v741_v38 }
 0x139   : >> { %v745_v40 = vld [vmem:[%s16136_s28 + $0x2500] sm:$0xff]  ;;  %744 = vst [vmem:[%s16132_s27 + $0x1270] sm:$0xff] %v743_v39 }
 0x13a   : >> { %v747_v41 = vld [vmem:[%s16136_s28 + $0x2520] sm:$0xff]  ;;  %746 = vst [vmem:[%s16132_s27 + $0x1280] sm:$0xff] %v745_v40 }
 0x13b   : >> { %v749_v42 = vld [vmem:[%s16136_s28 + $0x2540] sm:$0xff]  ;;  %748 = vst [vmem:[%s16132_s27 + $0x1290] sm:$0xff] %v747_v41 }
 0x13c   : >> { %v751_v43 = vld [vmem:[%s16136_s28 + $0x2560] sm:$0xff]  ;;  %750 = vst [vmem:[%s16132_s27 + $0x12a0] sm:$0xff] %v749_v42 }
 0x13d   : >> { %v753_v44 = vld [vmem:[%s16136_s28 + $0x2580] sm:$0xff]  ;;  %752 = vst [vmem:[%s16132_s27 + $0x12b0] sm:$0xff] %v751_v43 }
 0x13e   : >> { %v755_v45 = vld [vmem:[%s16136_s28 + $0x25a0] sm:$0xff]  ;;  %754 = vst [vmem:[%s16132_s27 + $0x12c0] sm:$0xff] %v753_v44 }
 0x13f   : >> { %v757_v46 = vld [vmem:[%s16136_s28 + $0x25c0] sm:$0xff]  ;;  %756 = vst [vmem:[%s16132_s27 + $0x12d0] sm:$0xff] %v755_v45 }
 0x140   : >> { %v759_v47 = vld [vmem:[%s16136_s28 + $0x25e0] sm:$0xff]  ;;  %758 = vst [vmem:[%s16132_s27 + $0x12e0] sm:$0xff] %v757_v46 }
 0x141   : >> { %v761_v48 = vld [vmem:[%s16136_s28 + $0x2600] sm:$0xff]  ;;  %760 = vst [vmem:[%s16132_s27 + $0x12f0] sm:$0xff] %v759_v47 }
 0x142   : >> { %v763_v49 = vld [vmem:[%s16136_s28 + $0x2620] sm:$0xff]  ;;  %762 = vst [vmem:[%s16132_s27 + $0x1300] sm:$0xff] %v761_v48 }
 0x143   : >> { %v765_v50 = vld [vmem:[%s16136_s28 + $0x2640] sm:$0xff]  ;;  %764 = vst [vmem:[%s16132_s27 + $0x1310] sm:$0xff] %v763_v49 }
 0x144   : >> { %v767_v51 = vld [vmem:[%s16136_s28 + $0x2660] sm:$0xff]  ;;  %766 = vst [vmem:[%s16132_s27 + $0x1320] sm:$0xff] %v765_v50 }
 0x145   : >> { %v769_v52 = vld [vmem:[%s16136_s28 + $0x2680] sm:$0xff]  ;;  %768 = vst [vmem:[%s16132_s27 + $0x1330] sm:$0xff] %v767_v51 }
 0x146   : >> { %v771_v53 = vld [vmem:[%s16136_s28 + $0x26a0] sm:$0xff]  ;;  %770 = vst [vmem:[%s16132_s27 + $0x1340] sm:$0xff] %v769_v52 }
 0x147   : >> { %v773_v54 = vld [vmem:[%s16136_s28 + $0x26c0] sm:$0xff]  ;;  %772 = vst [vmem:[%s16132_s27 + $0x1350] sm:$0xff] %v771_v53 }
 0x148   : >> { %v775_v55 = vld [vmem:[%s16136_s28 + $0x26e0] sm:$0xff]  ;;  %774 = vst [vmem:[%s16132_s27 + $0x1360] sm:$0xff] %v773_v54 }
 0x149   : >> { %v777_v56 = vld [vmem:[%s16136_s28 + $0x2700] sm:$0xff]  ;;  %776 = vst [vmem:[%s16132_s27 + $0x1370] sm:$0xff] %v775_v55 }
 0x14a   : >> { %v779_v57 = vld [vmem:[%s16136_s28 + $0x2720] sm:$0xff]  ;;  %778 = vst [vmem:[%s16132_s27 + $0x1380] sm:$0xff] %v777_v56 }
 0x14b   : >> { %v781_v58 = vld [vmem:[%s16136_s28 + $0x2740] sm:$0xff]  ;;  %780 = vst [vmem:[%s16132_s27 + $0x1390] sm:$0xff] %v779_v57 }
 0x14c   : >> { %v783_v59 = vld [vmem:[%s16136_s28 + $0x2760] sm:$0xff]  ;;  %782 = vst [vmem:[%s16132_s27 + $0x13a0] sm:$0xff] %v781_v58 }
 0x14d   : >> { %v785_v60 = vld [vmem:[%s16136_s28 + $0x2780] sm:$0xff]  ;;  %784 = vst [vmem:[%s16132_s27 + $0x13b0] sm:$0xff] %v783_v59 }
 0x14e   : >> { %v787_v61 = vld [vmem:[%s16136_s28 + $0x27a0] sm:$0xff]  ;;  %786 = vst [vmem:[%s16132_s27 + $0x13c0] sm:$0xff] %v785_v60 }
 0x14f   : >> { %v789_v62 = vld [vmem:[%s16136_s28 + $0x27c0] sm:$0xff]  ;;  %788 = vst [vmem:[%s16132_s27 + $0x13d0] sm:$0xff] %v787_v61 }
 0x150   : >> { %v791_v63 = vld [vmem:[%s16136_s28 + $0x27e0] sm:$0xff]  ;;  %790 = vst [vmem:[%s16132_s27 + $0x13e0] sm:$0xff] %v789_v62 }
 0x151   : >> { %v793_v0 = vld [vmem:[%s16136_s28 + $0x2800] sm:$0xff]  ;;  %792 = vst [vmem:[%s16132_s27 + $0x13f0] sm:$0xff] %v791_v63 }
 0x152   : >> { %v795_v1 = vld [vmem:[%s16136_s28 + $0x2820] sm:$0xff]  ;;  %794 = vst [vmem:[%s16132_s27 + $0x1400] sm:$0xff] %v793_v0 }
 0x153   : >> { %v797_v2 = vld [vmem:[%s16136_s28 + $0x2840] sm:$0xff]  ;;  %796 = vst [vmem:[%s16132_s27 + $0x1410] sm:$0xff] %v795_v1 }
 0x154   : >> { %v799_v3 = vld [vmem:[%s16136_s28 + $0x2860] sm:$0xff]  ;;  %798 = vst [vmem:[%s16132_s27 + $0x1420] sm:$0xff] %v797_v2 }
 0x155   : >> { %v801_v4 = vld [vmem:[%s16136_s28 + $0x2880] sm:$0xff]  ;;  %800 = vst [vmem:[%s16132_s27 + $0x1430] sm:$0xff] %v799_v3 }
 0x156   : >> { %v803_v5 = vld [vmem:[%s16136_s28 + $0x28a0] sm:$0xff]  ;;  %802 = vst [vmem:[%s16132_s27 + $0x1440] sm:$0xff] %v801_v4 }
 0x157   : >> { %v805_v6 = vld [vmem:[%s16136_s28 + $0x28c0] sm:$0xff]  ;;  %804 = vst [vmem:[%s16132_s27 + $0x1450] sm:$0xff] %v803_v5 }
 0x158   : >> { %v807_v7 = vld [vmem:[%s16136_s28 + $0x28e0] sm:$0xff]  ;;  %806 = vst [vmem:[%s16132_s27 + $0x1460] sm:$0xff] %v805_v6 }
 0x159   : >> { %v809_v8 = vld [vmem:[%s16136_s28 + $0x2900] sm:$0xff]  ;;  %808 = vst [vmem:[%s16132_s27 + $0x1470] sm:$0xff] %v807_v7 }
 0x15a   : >> { %v811_v9 = vld [vmem:[%s16136_s28 + $0x2920] sm:$0xff]  ;;  %810 = vst [vmem:[%s16132_s27 + $0x1480] sm:$0xff] %v809_v8 }
 0x15b   : >> { %v813_v10 = vld [vmem:[%s16136_s28 + $0x2940] sm:$0xff]  ;;  %812 = vst [vmem:[%s16132_s27 + $0x1490] sm:$0xff] %v811_v9 }
 0x15c   : >> { %v815_v11 = vld [vmem:[%s16136_s28 + $0x2960] sm:$0xff]  ;;  %814 = vst [vmem:[%s16132_s27 + $0x14a0] sm:$0xff] %v813_v10 }
 0x15d   : >> { %v817_v12 = vld [vmem:[%s16136_s28 + $0x2980] sm:$0xff]  ;;  %816 = vst [vmem:[%s16132_s27 + $0x14b0] sm:$0xff] %v815_v11 }
 0x15e   : >> { %v819_v13 = vld [vmem:[%s16136_s28 + $0x29a0] sm:$0xff]  ;;  %818 = vst [vmem:[%s16132_s27 + $0x14c0] sm:$0xff] %v817_v12 }
 0x15f   : >> { %v821_v14 = vld [vmem:[%s16136_s28 + $0x29c0] sm:$0xff]  ;;  %820 = vst [vmem:[%s16132_s27 + $0x14d0] sm:$0xff] %v819_v13 }
 0x160   : >> { %v823_v15 = vld [vmem:[%s16136_s28 + $0x29e0] sm:$0xff]  ;;  %822 = vst [vmem:[%s16132_s27 + $0x14e0] sm:$0xff] %v821_v14 }
 0x161   : >> { %v825_v16 = vld [vmem:[%s16136_s28 + $0x2a00] sm:$0xff]  ;;  %824 = vst [vmem:[%s16132_s27 + $0x14f0] sm:$0xff] %v823_v15 }
 0x162   : >> { %v827_v17 = vld [vmem:[%s16136_s28 + $0x2a20] sm:$0xff]  ;;  %826 = vst [vmem:[%s16132_s27 + $0x1500] sm:$0xff] %v825_v16 }
 0x163   : >> { %v829_v18 = vld [vmem:[%s16136_s28 + $0x2a40] sm:$0xff]  ;;  %828 = vst [vmem:[%s16132_s27 + $0x1510] sm:$0xff] %v827_v17 }
 0x164   : >> { %v831_v19 = vld [vmem:[%s16136_s28 + $0x2a60] sm:$0xff]  ;;  %830 = vst [vmem:[%s16132_s27 + $0x1520] sm:$0xff] %v829_v18 }
 0x165   : >> { %v833_v20 = vld [vmem:[%s16136_s28 + $0x2a80] sm:$0xff]  ;;  %832 = vst [vmem:[%s16132_s27 + $0x1530] sm:$0xff] %v831_v19 }
 0x166   : >> { %v835_v21 = vld [vmem:[%s16136_s28 + $0x2aa0] sm:$0xff]  ;;  %834 = vst [vmem:[%s16132_s27 + $0x1540] sm:$0xff] %v833_v20 }
 0x167   : >> { %v837_v22 = vld [vmem:[%s16136_s28 + $0x2ac0] sm:$0xff]  ;;  %836 = vst [vmem:[%s16132_s27 + $0x1550] sm:$0xff] %v835_v21 }
 0x168   : >> { %v839_v23 = vld [vmem:[%s16136_s28 + $0x2ae0] sm:$0xff]  ;;  %838 = vst [vmem:[%s16132_s27 + $0x1560] sm:$0xff] %v837_v22 }
 0x169   : >> { %v841_v24 = vld [vmem:[%s16136_s28 + $0x2b00] sm:$0xff]  ;;  %840 = vst [vmem:[%s16132_s27 + $0x1570] sm:$0xff] %v839_v23 }
 0x16a   : >> { %v843_v25 = vld [vmem:[%s16136_s28 + $0x2b20] sm:$0xff]  ;;  %842 = vst [vmem:[%s16132_s27 + $0x1580] sm:$0xff] %v841_v24 }
 0x16b   : >> { %v845_v26 = vld [vmem:[%s16136_s28 + $0x2b40] sm:$0xff]  ;;  %844 = vst [vmem:[%s16132_s27 + $0x1590] sm:$0xff] %v843_v25 }
 0x16c   : >> { %v847_v27 = vld [vmem:[%s16136_s28 + $0x2b60] sm:$0xff]  ;;  %846 = vst [vmem:[%s16132_s27 + $0x15a0] sm:$0xff] %v845_v26 }
 0x16d   : >> { %v849_v28 = vld [vmem:[%s16136_s28 + $0x2b80] sm:$0xff]  ;;  %848 = vst [vmem:[%s16132_s27 + $0x15b0] sm:$0xff] %v847_v27 }
 0x16e   : >> { %v851_v29 = vld [vmem:[%s16136_s28 + $0x2ba0] sm:$0xff]  ;;  %850 = vst [vmem:[%s16132_s27 + $0x15c0] sm:$0xff] %v849_v28 }
 0x16f   : >> { %v853_v30 = vld [vmem:[%s16136_s28 + $0x2bc0] sm:$0xff]  ;;  %852 = vst [vmem:[%s16132_s27 + $0x15d0] sm:$0xff] %v851_v29 }
 0x170   : >> { %v855_v31 = vld [vmem:[%s16136_s28 + $0x2be0] sm:$0xff]  ;;  %854 = vst [vmem:[%s16132_s27 + $0x15e0] sm:$0xff] %v853_v30 }
 0x171   : >> { %v857_v32 = vld [vmem:[%s16136_s28 + $0x2c00] sm:$0xff]  ;;  %856 = vst [vmem:[%s16132_s27 + $0x15f0] sm:$0xff] %v855_v31 }
 0x172   : >> { %v859_v33 = vld [vmem:[%s16136_s28 + $0x2c20] sm:$0xff]  ;;  %858 = vst [vmem:[%s16132_s27 + $0x1600] sm:$0xff] %v857_v32 }
 0x173   : >> { %v861_v34 = vld [vmem:[%s16136_s28 + $0x2c40] sm:$0xff]  ;;  %860 = vst [vmem:[%s16132_s27 + $0x1610] sm:$0xff] %v859_v33 }
 0x174   : >> { %v863_v35 = vld [vmem:[%s16136_s28 + $0x2c60] sm:$0xff]  ;;  %862 = vst [vmem:[%s16132_s27 + $0x1620] sm:$0xff] %v861_v34 }
 0x175   : >> { %v865_v36 = vld [vmem:[%s16136_s28 + $0x2c80] sm:$0xff]  ;;  %864 = vst [vmem:[%s16132_s27 + $0x1630] sm:$0xff] %v863_v35 }
 0x176   : >> { %v867_v37 = vld [vmem:[%s16136_s28 + $0x2ca0] sm:$0xff]  ;;  %866 = vst [vmem:[%s16132_s27 + $0x1640] sm:$0xff] %v865_v36 }
 0x177   : >> { %v869_v38 = vld [vmem:[%s16136_s28 + $0x2cc0] sm:$0xff]  ;;  %868 = vst [vmem:[%s16132_s27 + $0x1650] sm:$0xff] %v867_v37 }
 0x178   : >> { %v871_v39 = vld [vmem:[%s16136_s28 + $0x2ce0] sm:$0xff]  ;;  %870 = vst [vmem:[%s16132_s27 + $0x1660] sm:$0xff] %v869_v38 }
 0x179   : >> { %v873_v40 = vld [vmem:[%s16136_s28 + $0x2d00] sm:$0xff]  ;;  %872 = vst [vmem:[%s16132_s27 + $0x1670] sm:$0xff] %v871_v39 }
 0x17a   : >> { %v875_v41 = vld [vmem:[%s16136_s28 + $0x2d20] sm:$0xff]  ;;  %874 = vst [vmem:[%s16132_s27 + $0x1680] sm:$0xff] %v873_v40 }
 0x17b   : >> { %v877_v42 = vld [vmem:[%s16136_s28 + $0x2d40] sm:$0xff]  ;;  %876 = vst [vmem:[%s16132_s27 + $0x1690] sm:$0xff] %v875_v41 }
 0x17c   : >> { %v879_v43 = vld [vmem:[%s16136_s28 + $0x2d60] sm:$0xff]  ;;  %878 = vst [vmem:[%s16132_s27 + $0x16a0] sm:$0xff] %v877_v42 }
 0x17d   : >> { %v881_v44 = vld [vmem:[%s16136_s28 + $0x2d80] sm:$0xff]  ;;  %880 = vst [vmem:[%s16132_s27 + $0x16b0] sm:$0xff] %v879_v43 }
 0x17e   : >> { %v883_v45 = vld [vmem:[%s16136_s28 + $0x2da0] sm:$0xff]  ;;  %882 = vst [vmem:[%s16132_s27 + $0x16c0] sm:$0xff] %v881_v44 }
 0x17f   : >> { %v885_v46 = vld [vmem:[%s16136_s28 + $0x2dc0] sm:$0xff]  ;;  %884 = vst [vmem:[%s16132_s27 + $0x16d0] sm:$0xff] %v883_v45 }
 0x180   : >> { %v887_v47 = vld [vmem:[%s16136_s28 + $0x2de0] sm:$0xff]  ;;  %886 = vst [vmem:[%s16132_s27 + $0x16e0] sm:$0xff] %v885_v46 }
 0x181   : >> { %v889_v48 = vld [vmem:[%s16136_s28 + $0x2e00] sm:$0xff]  ;;  %888 = vst [vmem:[%s16132_s27 + $0x16f0] sm:$0xff] %v887_v47 }
 0x182   : >> { %v891_v49 = vld [vmem:[%s16136_s28 + $0x2e20] sm:$0xff]  ;;  %890 = vst [vmem:[%s16132_s27 + $0x1700] sm:$0xff] %v889_v48 }
 0x183   : >> { %v893_v50 = vld [vmem:[%s16136_s28 + $0x2e40] sm:$0xff]  ;;  %892 = vst [vmem:[%s16132_s27 + $0x1710] sm:$0xff] %v891_v49 }
 0x184   : >> { %v895_v51 = vld [vmem:[%s16136_s28 + $0x2e60] sm:$0xff]  ;;  %894 = vst [vmem:[%s16132_s27 + $0x1720] sm:$0xff] %v893_v50 }
 0x185   : >> { %v897_v52 = vld [vmem:[%s16136_s28 + $0x2e80] sm:$0xff]  ;;  %896 = vst [vmem:[%s16132_s27 + $0x1730] sm:$0xff] %v895_v51 }
 0x186   : >> { %v899_v53 = vld [vmem:[%s16136_s28 + $0x2ea0] sm:$0xff]  ;;  %898 = vst [vmem:[%s16132_s27 + $0x1740] sm:$0xff] %v897_v52 }
 0x187   : >> { %v901_v54 = vld [vmem:[%s16136_s28 + $0x2ec0] sm:$0xff]  ;;  %900 = vst [vmem:[%s16132_s27 + $0x1750] sm:$0xff] %v899_v53 }
 0x188   : >> { %v903_v55 = vld [vmem:[%s16136_s28 + $0x2ee0] sm:$0xff]  ;;  %902 = vst [vmem:[%s16132_s27 + $0x1760] sm:$0xff] %v901_v54 }
 0x189   : >> { %v905_v56 = vld [vmem:[%s16136_s28 + $0x2f00] sm:$0xff]  ;;  %904 = vst [vmem:[%s16132_s27 + $0x1770] sm:$0xff] %v903_v55 }
 0x18a   : >> { %v907_v57 = vld [vmem:[%s16136_s28 + $0x2f20] sm:$0xff]  ;;  %906 = vst [vmem:[%s16132_s27 + $0x1780] sm:$0xff] %v905_v56 }
 0x18b   : >> { %v909_v58 = vld [vmem:[%s16136_s28 + $0x2f40] sm:$0xff]  ;;  %908 = vst [vmem:[%s16132_s27 + $0x1790] sm:$0xff] %v907_v57 }
 0x18c   : >> { %v911_v59 = vld [vmem:[%s16136_s28 + $0x2f60] sm:$0xff]  ;;  %910 = vst [vmem:[%s16132_s27 + $0x17a0] sm:$0xff] %v909_v58 }
 0x18d   : >> { %v913_v60 = vld [vmem:[%s16136_s28 + $0x2f80] sm:$0xff]  ;;  %912 = vst [vmem:[%s16132_s27 + $0x17b0] sm:$0xff] %v911_v59 }
 0x18e   : >> { %v915_v61 = vld [vmem:[%s16136_s28 + $0x2fa0] sm:$0xff]  ;;  %914 = vst [vmem:[%s16132_s27 + $0x17c0] sm:$0xff] %v913_v60 }
 0x18f   : >> { %v917_v62 = vld [vmem:[%s16136_s28 + $0x2fc0] sm:$0xff]  ;;  %916 = vst [vmem:[%s16132_s27 + $0x17d0] sm:$0xff] %v915_v61 }
 0x190   : >> { %v919_v63 = vld [vmem:[%s16136_s28 + $0x2fe0] sm:$0xff]  ;;  %918 = vst [vmem:[%s16132_s27 + $0x17e0] sm:$0xff] %v917_v62 }
 0x191   : >> { %v921_v0 = vld [vmem:[%s16136_s28 + $0x3000] sm:$0xff]  ;;  %920 = vst [vmem:[%s16132_s27 + $0x17f0] sm:$0xff] %v919_v63 }
 0x192   : >> { %v923_v1 = vld [vmem:[%s16136_s28 + $0x3020] sm:$0xff]  ;;  %922 = vst [vmem:[%s16132_s27 + $0x1800] sm:$0xff] %v921_v0 }
 0x193   : >> { %v925_v2 = vld [vmem:[%s16136_s28 + $0x3040] sm:$0xff]  ;;  %924 = vst [vmem:[%s16132_s27 + $0x1810] sm:$0xff] %v923_v1 }
 0x194   : >> { %v927_v3 = vld [vmem:[%s16136_s28 + $0x3060] sm:$0xff]  ;;  %926 = vst [vmem:[%s16132_s27 + $0x1820] sm:$0xff] %v925_v2 }
 0x195   : >> { %v929_v4 = vld [vmem:[%s16136_s28 + $0x3080] sm:$0xff]  ;;  %928 = vst [vmem:[%s16132_s27 + $0x1830] sm:$0xff] %v927_v3 }
 0x196   : >> { %v931_v5 = vld [vmem:[%s16136_s28 + $0x30a0] sm:$0xff]  ;;  %930 = vst [vmem:[%s16132_s27 + $0x1840] sm:$0xff] %v929_v4 }
 0x197   : >> { %v933_v6 = vld [vmem:[%s16136_s28 + $0x30c0] sm:$0xff]  ;;  %932 = vst [vmem:[%s16132_s27 + $0x1850] sm:$0xff] %v931_v5 }
 0x198   : >> { %v935_v7 = vld [vmem:[%s16136_s28 + $0x30e0] sm:$0xff]  ;;  %934 = vst [vmem:[%s16132_s27 + $0x1860] sm:$0xff] %v933_v6 }
 0x199   : >> { %v937_v8 = vld [vmem:[%s16136_s28 + $0x3100] sm:$0xff]  ;;  %936 = vst [vmem:[%s16132_s27 + $0x1870] sm:$0xff] %v935_v7 }
 0x19a   : >> { %v939_v9 = vld [vmem:[%s16136_s28 + $0x3120] sm:$0xff]  ;;  %938 = vst [vmem:[%s16132_s27 + $0x1880] sm:$0xff] %v937_v8 }
 0x19b   : >> { %v941_v10 = vld [vmem:[%s16136_s28 + $0x3140] sm:$0xff]  ;;  %940 = vst [vmem:[%s16132_s27 + $0x1890] sm:$0xff] %v939_v9 }
 0x19c   : >> { %v943_v11 = vld [vmem:[%s16136_s28 + $0x3160] sm:$0xff]  ;;  %942 = vst [vmem:[%s16132_s27 + $0x18a0] sm:$0xff] %v941_v10 }
 0x19d   : >> { %v945_v12 = vld [vmem:[%s16136_s28 + $0x3180] sm:$0xff]  ;;  %944 = vst [vmem:[%s16132_s27 + $0x18b0] sm:$0xff] %v943_v11 }
 0x19e   : >> { %v947_v13 = vld [vmem:[%s16136_s28 + $0x31a0] sm:$0xff]  ;;  %946 = vst [vmem:[%s16132_s27 + $0x18c0] sm:$0xff] %v945_v12 }
 0x19f   : >> { %v949_v14 = vld [vmem:[%s16136_s28 + $0x31c0] sm:$0xff]  ;;  %948 = vst [vmem:[%s16132_s27 + $0x18d0] sm:$0xff] %v947_v13 }
 0x1a0   : >> { %v951_v15 = vld [vmem:[%s16136_s28 + $0x31e0] sm:$0xff]  ;;  %950 = vst [vmem:[%s16132_s27 + $0x18e0] sm:$0xff] %v949_v14 }
 0x1a1   : >> { %v953_v16 = vld [vmem:[%s16136_s28 + $0x3200] sm:$0xff]  ;;  %952 = vst [vmem:[%s16132_s27 + $0x18f0] sm:$0xff] %v951_v15 }
 0x1a2   : >> { %v955_v17 = vld [vmem:[%s16136_s28 + $0x3220] sm:$0xff]  ;;  %954 = vst [vmem:[%s16132_s27 + $0x1900] sm:$0xff] %v953_v16 }
 0x1a3   : >> { %v957_v18 = vld [vmem:[%s16136_s28 + $0x3240] sm:$0xff]  ;;  %956 = vst [vmem:[%s16132_s27 + $0x1910] sm:$0xff] %v955_v17 }
 0x1a4   : >> { %v959_v19 = vld [vmem:[%s16136_s28 + $0x3260] sm:$0xff]  ;;  %958 = vst [vmem:[%s16132_s27 + $0x1920] sm:$0xff] %v957_v18 }
 0x1a5   : >> { %v961_v20 = vld [vmem:[%s16136_s28 + $0x3280] sm:$0xff]  ;;  %960 = vst [vmem:[%s16132_s27 + $0x1930] sm:$0xff] %v959_v19 }
 0x1a6   : >> { %v963_v21 = vld [vmem:[%s16136_s28 + $0x32a0] sm:$0xff]  ;;  %962 = vst [vmem:[%s16132_s27 + $0x1940] sm:$0xff] %v961_v20 }
 0x1a7   : >> { %v965_v22 = vld [vmem:[%s16136_s28 + $0x32c0] sm:$0xff]  ;;  %964 = vst [vmem:[%s16132_s27 + $0x1950] sm:$0xff] %v963_v21 }
 0x1a8   : >> { %v967_v23 = vld [vmem:[%s16136_s28 + $0x32e0] sm:$0xff]  ;;  %966 = vst [vmem:[%s16132_s27 + $0x1960] sm:$0xff] %v965_v22 }
 0x1a9   : >> { %v969_v24 = vld [vmem:[%s16136_s28 + $0x3300] sm:$0xff]  ;;  %968 = vst [vmem:[%s16132_s27 + $0x1970] sm:$0xff] %v967_v23 }
 0x1aa   : >> { %v971_v25 = vld [vmem:[%s16136_s28 + $0x3320] sm:$0xff]  ;;  %970 = vst [vmem:[%s16132_s27 + $0x1980] sm:$0xff] %v969_v24 }
 0x1ab   : >> { %v973_v26 = vld [vmem:[%s16136_s28 + $0x3340] sm:$0xff]  ;;  %972 = vst [vmem:[%s16132_s27 + $0x1990] sm:$0xff] %v971_v25 }
 0x1ac   : >> { %v975_v27 = vld [vmem:[%s16136_s28 + $0x3360] sm:$0xff]  ;;  %974 = vst [vmem:[%s16132_s27 + $0x19a0] sm:$0xff] %v973_v26 }
 0x1ad   : >> { %v977_v28 = vld [vmem:[%s16136_s28 + $0x3380] sm:$0xff]  ;;  %976 = vst [vmem:[%s16132_s27 + $0x19b0] sm:$0xff] %v975_v27 }
 0x1ae   : >> { %v979_v29 = vld [vmem:[%s16136_s28 + $0x33a0] sm:$0xff]  ;;  %978 = vst [vmem:[%s16132_s27 + $0x19c0] sm:$0xff] %v977_v28 }
 0x1af   : >> { %v981_v30 = vld [vmem:[%s16136_s28 + $0x33c0] sm:$0xff]  ;;  %980 = vst [vmem:[%s16132_s27 + $0x19d0] sm:$0xff] %v979_v29 }
 0x1b0   : >> { %v983_v31 = vld [vmem:[%s16136_s28 + $0x33e0] sm:$0xff]  ;;  %982 = vst [vmem:[%s16132_s27 + $0x19e0] sm:$0xff] %v981_v30 }
 0x1b1   : >> { %v985_v32 = vld [vmem:[%s16136_s28 + $0x3400] sm:$0xff]  ;;  %984 = vst [vmem:[%s16132_s27 + $0x19f0] sm:$0xff] %v983_v31 }
 0x1b2   : >> { %v987_v33 = vld [vmem:[%s16136_s28 + $0x3420] sm:$0xff]  ;;  %986 = vst [vmem:[%s16132_s27 + $0x1a00] sm:$0xff] %v985_v32 }
 0x1b3   : >> { %v989_v34 = vld [vmem:[%s16136_s28 + $0x3440] sm:$0xff]  ;;  %988 = vst [vmem:[%s16132_s27 + $0x1a10] sm:$0xff] %v987_v33 }
 0x1b4   : >> { %v991_v35 = vld [vmem:[%s16136_s28 + $0x3460] sm:$0xff]  ;;  %990 = vst [vmem:[%s16132_s27 + $0x1a20] sm:$0xff] %v989_v34 }
 0x1b5   : >> { %v993_v36 = vld [vmem:[%s16136_s28 + $0x3480] sm:$0xff]  ;;  %992 = vst [vmem:[%s16132_s27 + $0x1a30] sm:$0xff] %v991_v35 }
 0x1b6   : >> { %v995_v37 = vld [vmem:[%s16136_s28 + $0x34a0] sm:$0xff]  ;;  %994 = vst [vmem:[%s16132_s27 + $0x1a40] sm:$0xff] %v993_v36 }
 0x1b7   : >> { %v997_v38 = vld [vmem:[%s16136_s28 + $0x34c0] sm:$0xff]  ;;  %996 = vst [vmem:[%s16132_s27 + $0x1a50] sm:$0xff] %v995_v37 }
 0x1b8   : >> { %v999_v39 = vld [vmem:[%s16136_s28 + $0x34e0] sm:$0xff]  ;;  %998 = vst [vmem:[%s16132_s27 + $0x1a60] sm:$0xff] %v997_v38 }
 0x1b9   : >> { %v1001_v40 = vld [vmem:[%s16136_s28 + $0x3500] sm:$0xff]  ;;  %1000 = vst [vmem:[%s16132_s27 + $0x1a70] sm:$0xff] %v999_v39 }
 0x1ba   : >> { %v1003_v41 = vld [vmem:[%s16136_s28 + $0x3520] sm:$0xff]  ;;  %1002 = vst [vmem:[%s16132_s27 + $0x1a80] sm:$0xff] %v1001_v40 }
 0x1bb   : >> { %v1005_v42 = vld [vmem:[%s16136_s28 + $0x3540] sm:$0xff]  ;;  %1004 = vst [vmem:[%s16132_s27 + $0x1a90] sm:$0xff] %v1003_v41 }
 0x1bc   : >> { %v1007_v43 = vld [vmem:[%s16136_s28 + $0x3560] sm:$0xff]  ;;  %1006 = vst [vmem:[%s16132_s27 + $0x1aa0] sm:$0xff] %v1005_v42 }
 0x1bd   : >> { %v1009_v44 = vld [vmem:[%s16136_s28 + $0x3580] sm:$0xff]  ;;  %1008 = vst [vmem:[%s16132_s27 + $0x1ab0] sm:$0xff] %v1007_v43 }
 0x1be   : >> { %v1011_v45 = vld [vmem:[%s16136_s28 + $0x35a0] sm:$0xff]  ;;  %1010 = vst [vmem:[%s16132_s27 + $0x1ac0] sm:$0xff] %v1009_v44 }
 0x1bf   : >> { %v1013_v46 = vld [vmem:[%s16136_s28 + $0x35c0] sm:$0xff]  ;;  %1012 = vst [vmem:[%s16132_s27 + $0x1ad0] sm:$0xff] %v1011_v45 }
 0x1c0   : >> { %v1015_v47 = vld [vmem:[%s16136_s28 + $0x35e0] sm:$0xff]  ;;  %1014 = vst [vmem:[%s16132_s27 + $0x1ae0] sm:$0xff] %v1013_v46 }
 0x1c1   : >> { %v1017_v48 = vld [vmem:[%s16136_s28 + $0x3600] sm:$0xff]  ;;  %1016 = vst [vmem:[%s16132_s27 + $0x1af0] sm:$0xff] %v1015_v47 }
 0x1c2   : >> { %v1019_v49 = vld [vmem:[%s16136_s28 + $0x3620] sm:$0xff]  ;;  %1018 = vst [vmem:[%s16132_s27 + $0x1b00] sm:$0xff] %v1017_v48 }
 0x1c3   : >> { %v1021_v50 = vld [vmem:[%s16136_s28 + $0x3640] sm:$0xff]  ;;  %1020 = vst [vmem:[%s16132_s27 + $0x1b10] sm:$0xff] %v1019_v49 }
 0x1c4   : >> { %v1023_v51 = vld [vmem:[%s16136_s28 + $0x3660] sm:$0xff]  ;;  %1022 = vst [vmem:[%s16132_s27 + $0x1b20] sm:$0xff] %v1021_v50 }
 0x1c5   : >> { %v1025_v52 = vld [vmem:[%s16136_s28 + $0x3680] sm:$0xff]  ;;  %1024 = vst [vmem:[%s16132_s27 + $0x1b30] sm:$0xff] %v1023_v51 }
 0x1c6   : >> { %v1027_v53 = vld [vmem:[%s16136_s28 + $0x36a0] sm:$0xff]  ;;  %1026 = vst [vmem:[%s16132_s27 + $0x1b40] sm:$0xff] %v1025_v52 }
 0x1c7   : >> { %v1029_v54 = vld [vmem:[%s16136_s28 + $0x36c0] sm:$0xff]  ;;  %1028 = vst [vmem:[%s16132_s27 + $0x1b50] sm:$0xff] %v1027_v53 }
 0x1c8   : >> { %v1031_v55 = vld [vmem:[%s16136_s28 + $0x36e0] sm:$0xff]  ;;  %1030 = vst [vmem:[%s16132_s27 + $0x1b60] sm:$0xff] %v1029_v54 }
 0x1c9   : >> { %v1033_v56 = vld [vmem:[%s16136_s28 + $0x3700] sm:$0xff]  ;;  %1032 = vst [vmem:[%s16132_s27 + $0x1b70] sm:$0xff] %v1031_v55 }
 0x1ca   : >> { %v1035_v57 = vld [vmem:[%s16136_s28 + $0x3720] sm:$0xff]  ;;  %1034 = vst [vmem:[%s16132_s27 + $0x1b80] sm:$0xff] %v1033_v56 }
 0x1cb   : >> { %v1037_v58 = vld [vmem:[%s16136_s28 + $0x3740] sm:$0xff]  ;;  %1036 = vst [vmem:[%s16132_s27 + $0x1b90] sm:$0xff] %v1035_v57 }
 0x1cc   : >> { %v1039_v59 = vld [vmem:[%s16136_s28 + $0x3760] sm:$0xff]  ;;  %1038 = vst [vmem:[%s16132_s27 + $0x1ba0] sm:$0xff] %v1037_v58 }
 0x1cd   : >> { %v1041_v60 = vld [vmem:[%s16136_s28 + $0x3780] sm:$0xff]  ;;  %1040 = vst [vmem:[%s16132_s27 + $0x1bb0] sm:$0xff] %v1039_v59 }
 0x1ce   : >> { %v1043_v61 = vld [vmem:[%s16136_s28 + $0x37a0] sm:$0xff]  ;;  %1042 = vst [vmem:[%s16132_s27 + $0x1bc0] sm:$0xff] %v1041_v60 }
 0x1cf   : >> { %v1045_v62 = vld [vmem:[%s16136_s28 + $0x37c0] sm:$0xff]  ;;  %1044 = vst [vmem:[%s16132_s27 + $0x1bd0] sm:$0xff] %v1043_v61 }
 0x1d0   : >> { %v1047_v63 = vld [vmem:[%s16136_s28 + $0x37e0] sm:$0xff]  ;;  %1046 = vst [vmem:[%s16132_s27 + $0x1be0] sm:$0xff] %v1045_v62 }
 0x1d1   : >> { %v1049_v0 = vld [vmem:[%s16136_s28 + $0x3800] sm:$0xff]  ;;  %1048 = vst [vmem:[%s16132_s27 + $0x1bf0] sm:$0xff] %v1047_v63 }
 0x1d2   : >> { %v1051_v1 = vld [vmem:[%s16136_s28 + $0x3820] sm:$0xff]  ;;  %1050 = vst [vmem:[%s16132_s27 + $0x1c00] sm:$0xff] %v1049_v0 }
 0x1d3   : >> { %v1053_v2 = vld [vmem:[%s16136_s28 + $0x3840] sm:$0xff]  ;;  %1052 = vst [vmem:[%s16132_s27 + $0x1c10] sm:$0xff] %v1051_v1 }
 0x1d4   : >> { %v1055_v3 = vld [vmem:[%s16136_s28 + $0x3860] sm:$0xff]  ;;  %1054 = vst [vmem:[%s16132_s27 + $0x1c20] sm:$0xff] %v1053_v2 }
 0x1d5   : >> { %v1057_v4 = vld [vmem:[%s16136_s28 + $0x3880] sm:$0xff]  ;;  %1056 = vst [vmem:[%s16132_s27 + $0x1c30] sm:$0xff] %v1055_v3 }
 0x1d6   : >> { %v1059_v5 = vld [vmem:[%s16136_s28 + $0x38a0] sm:$0xff]  ;;  %1058 = vst [vmem:[%s16132_s27 + $0x1c40] sm:$0xff] %v1057_v4 }
 0x1d7   : >> { %v1061_v6 = vld [vmem:[%s16136_s28 + $0x38c0] sm:$0xff]  ;;  %1060 = vst [vmem:[%s16132_s27 + $0x1c50] sm:$0xff] %v1059_v5 }
 0x1d8   : >> { %v1063_v7 = vld [vmem:[%s16136_s28 + $0x38e0] sm:$0xff]  ;;  %1062 = vst [vmem:[%s16132_s27 + $0x1c60] sm:$0xff] %v1061_v6 }
 0x1d9   : >> { %v1065_v8 = vld [vmem:[%s16136_s28 + $0x3900] sm:$0xff]  ;;  %1064 = vst [vmem:[%s16132_s27 + $0x1c70] sm:$0xff] %v1063_v7 }
 0x1da   : >> { %v1067_v9 = vld [vmem:[%s16136_s28 + $0x3920] sm:$0xff]  ;;  %1066 = vst [vmem:[%s16132_s27 + $0x1c80] sm:$0xff] %v1065_v8 }
 0x1db   : >> { %v1069_v10 = vld [vmem:[%s16136_s28 + $0x3940] sm:$0xff]  ;;  %1068 = vst [vmem:[%s16132_s27 + $0x1c90] sm:$0xff] %v1067_v9 }
 0x1dc   : >> { %v1071_v11 = vld [vmem:[%s16136_s28 + $0x3960] sm:$0xff]  ;;  %1070 = vst [vmem:[%s16132_s27 + $0x1ca0] sm:$0xff] %v1069_v10 }
 0x1dd   : >> { %v1073_v12 = vld [vmem:[%s16136_s28 + $0x3980] sm:$0xff]  ;;  %1072 = vst [vmem:[%s16132_s27 + $0x1cb0] sm:$0xff] %v1071_v11 }
 0x1de   : >> { %v1075_v13 = vld [vmem:[%s16136_s28 + $0x39a0] sm:$0xff]  ;;  %1074 = vst [vmem:[%s16132_s27 + $0x1cc0] sm:$0xff] %v1073_v12 }
 0x1df   : >> { %v1077_v14 = vld [vmem:[%s16136_s28 + $0x39c0] sm:$0xff]  ;;  %1076 = vst [vmem:[%s16132_s27 + $0x1cd0] sm:$0xff] %v1075_v13 }
 0x1e0   : >> { %v1079_v15 = vld [vmem:[%s16136_s28 + $0x39e0] sm:$0xff]  ;;  %1078 = vst [vmem:[%s16132_s27 + $0x1ce0] sm:$0xff] %v1077_v14 }
 0x1e1   : >> { %v1081_v16 = vld [vmem:[%s16136_s28 + $0x3a00] sm:$0xff]  ;;  %1080 = vst [vmem:[%s16132_s27 + $0x1cf0] sm:$0xff] %v1079_v15 }
 0x1e2   : >> { %v1083_v17 = vld [vmem:[%s16136_s28 + $0x3a20] sm:$0xff]  ;;  %1082 = vst [vmem:[%s16132_s27 + $0x1d00] sm:$0xff] %v1081_v16 }
 0x1e3   : >> { %v1085_v18 = vld [vmem:[%s16136_s28 + $0x3a40] sm:$0xff]  ;;  %1084 = vst [vmem:[%s16132_s27 + $0x1d10] sm:$0xff] %v1083_v17 }
 0x1e4   : >> { %v1087_v19 = vld [vmem:[%s16136_s28 + $0x3a60] sm:$0xff]  ;;  %1086 = vst [vmem:[%s16132_s27 + $0x1d20] sm:$0xff] %v1085_v18 }
 0x1e5   : >> { %v1089_v20 = vld [vmem:[%s16136_s28 + $0x3a80] sm:$0xff]  ;;  %1088 = vst [vmem:[%s16132_s27 + $0x1d30] sm:$0xff] %v1087_v19 }
 0x1e6   : >> { %v1091_v21 = vld [vmem:[%s16136_s28 + $0x3aa0] sm:$0xff]  ;;  %1090 = vst [vmem:[%s16132_s27 + $0x1d40] sm:$0xff] %v1089_v20 }
 0x1e7   : >> { %v1093_v22 = vld [vmem:[%s16136_s28 + $0x3ac0] sm:$0xff]  ;;  %1092 = vst [vmem:[%s16132_s27 + $0x1d50] sm:$0xff] %v1091_v21 }
 0x1e8   : >> { %v1095_v23 = vld [vmem:[%s16136_s28 + $0x3ae0] sm:$0xff]  ;;  %1094 = vst [vmem:[%s16132_s27 + $0x1d60] sm:$0xff] %v1093_v22 }
 0x1e9   : >> { %v1097_v24 = vld [vmem:[%s16136_s28 + $0x3b00] sm:$0xff]  ;;  %1096 = vst [vmem:[%s16132_s27 + $0x1d70] sm:$0xff] %v1095_v23 }
 0x1ea   : >> { %v1099_v25 = vld [vmem:[%s16136_s28 + $0x3b20] sm:$0xff]  ;;  %1098 = vst [vmem:[%s16132_s27 + $0x1d80] sm:$0xff] %v1097_v24 }
 0x1eb   : >> { %v1101_v26 = vld [vmem:[%s16136_s28 + $0x3b40] sm:$0xff]  ;;  %1100 = vst [vmem:[%s16132_s27 + $0x1d90] sm:$0xff] %v1099_v25 }
 0x1ec   : >> { %v1103_v27 = vld [vmem:[%s16136_s28 + $0x3b60] sm:$0xff]  ;;  %1102 = vst [vmem:[%s16132_s27 + $0x1da0] sm:$0xff] %v1101_v26 }
 0x1ed   : >> { %v1105_v28 = vld [vmem:[%s16136_s28 + $0x3b80] sm:$0xff]  ;;  %1104 = vst [vmem:[%s16132_s27 + $0x1db0] sm:$0xff] %v1103_v27 }
 0x1ee   : >> { %v1107_v29 = vld [vmem:[%s16136_s28 + $0x3ba0] sm:$0xff]  ;;  %1106 = vst [vmem:[%s16132_s27 + $0x1dc0] sm:$0xff] %v1105_v28 }
 0x1ef   : >> { %v1109_v30 = vld [vmem:[%s16136_s28 + $0x3bc0] sm:$0xff]  ;;  %1108 = vst [vmem:[%s16132_s27 + $0x1dd0] sm:$0xff] %v1107_v29 }
 0x1f0   : >> { %v1111_v31 = vld [vmem:[%s16136_s28 + $0x3be0] sm:$0xff]  ;;  %1110 = vst [vmem:[%s16132_s27 + $0x1de0] sm:$0xff] %v1109_v30 }
 0x1f1   : >> { %v1113_v32 = vld [vmem:[%s16136_s28 + $0x3c00] sm:$0xff]  ;;  %1112 = vst [vmem:[%s16132_s27 + $0x1df0] sm:$0xff] %v1111_v31 }
 0x1f2   : >> { %v1115_v33 = vld [vmem:[%s16136_s28 + $0x3c20] sm:$0xff]  ;;  %1114 = vst [vmem:[%s16132_s27 + $0x1e00] sm:$0xff] %v1113_v32 }
 0x1f3   : >> { %v1117_v34 = vld [vmem:[%s16136_s28 + $0x3c40] sm:$0xff]  ;;  %1116 = vst [vmem:[%s16132_s27 + $0x1e10] sm:$0xff] %v1115_v33 }
 0x1f4   : >> { %v1119_v35 = vld [vmem:[%s16136_s28 + $0x3c60] sm:$0xff]  ;;  %1118 = vst [vmem:[%s16132_s27 + $0x1e20] sm:$0xff] %v1117_v34 }
 0x1f5   : >> { %v1121_v36 = vld [vmem:[%s16136_s28 + $0x3c80] sm:$0xff]  ;;  %1120 = vst [vmem:[%s16132_s27 + $0x1e30] sm:$0xff] %v1119_v35 }
 0x1f6   : >> { %v1123_v37 = vld [vmem:[%s16136_s28 + $0x3ca0] sm:$0xff]  ;;  %1122 = vst [vmem:[%s16132_s27 + $0x1e40] sm:$0xff] %v1121_v36 }
 0x1f7   : >> { %v1125_v38 = vld [vmem:[%s16136_s28 + $0x3cc0] sm:$0xff]  ;;  %1124 = vst [vmem:[%s16132_s27 + $0x1e50] sm:$0xff] %v1123_v37 }
 0x1f8   : >> { %v1127_v39 = vld [vmem:[%s16136_s28 + $0x3ce0] sm:$0xff]  ;;  %1126 = vst [vmem:[%s16132_s27 + $0x1e60] sm:$0xff] %v1125_v38 }
 0x1f9   : >> { %v1129_v40 = vld [vmem:[%s16136_s28 + $0x3d00] sm:$0xff]  ;;  %1128 = vst [vmem:[%s16132_s27 + $0x1e70] sm:$0xff] %v1127_v39 }
 0x1fa   : >> { %v1131_v41 = vld [vmem:[%s16136_s28 + $0x3d20] sm:$0xff]  ;;  %1130 = vst [vmem:[%s16132_s27 + $0x1e80] sm:$0xff] %v1129_v40 }
 0x1fb   : >> { %v1133_v42 = vld [vmem:[%s16136_s28 + $0x3d40] sm:$0xff]  ;;  %1132 = vst [vmem:[%s16132_s27 + $0x1e90] sm:$0xff] %v1131_v41 }
 0x1fc   : >> { %v1135_v43 = vld [vmem:[%s16136_s28 + $0x3d60] sm:$0xff]  ;;  %1134 = vst [vmem:[%s16132_s27 + $0x1ea0] sm:$0xff] %v1133_v42 }
 0x1fd   : >> { %v1137_v44 = vld [vmem:[%s16136_s28 + $0x3d80] sm:$0xff]  ;;  %1136 = vst [vmem:[%s16132_s27 + $0x1eb0] sm:$0xff] %v1135_v43  ;;  %148 = sbr.rel (!%p146_p6) target bundleno = 17 (0x11), region = 112 }
 0x1fe   : >> { %v1139_v45 = vld [vmem:[%s16136_s28 + $0x3da0] sm:$0xff]  ;;  %1138 = vst [vmem:[%s16132_s27 + $0x1ec0] sm:$0xff] %v1137_v44 }
 0x1ff   : >> { %v1141_v46 = vld [vmem:[%s16136_s28 + $0x3dc0] sm:$0xff]  ;;  %1140 = vst [vmem:[%s16132_s27 + $0x1ed0] sm:$0xff] %v1139_v45 }
 0x200   : >> { %v1143_v47 = vld [vmem:[%s16136_s28 + $0x3de0] sm:$0xff]  ;;  %1142 = vst [vmem:[%s16132_s27 + $0x1ee0] sm:$0xff] %v1141_v46  ;;  %s19679_s28 = smov %s16972_s6 }
 0x201   : >> { %1144 = vst [vmem:[%s16132_s27 + $0x1ef0] sm:$0xff] %v1143_v47  ;;  %s19678_s27 = smov %s16976_s7 }
 0x202 PF: > { %p11062_p7 = scmp.ge.s32.totalorder %s16128_s14, 1  ;;  %p3176_p8 = scmp.lt.s32.totalorder %s16128_s14, 3 }
 0x204   : > { %p3177_p9 = pnand %p11062_p7, %p3176_p8 }
 0x205   : > { %s3183_s8 = sand.u32 (!%p3177_p9), 1, %s16120_s12   ;;  %s17740_s23 = sshll.u32 (!%p3177_p9), %s11054_s15, 2 }
 0x206   : > { %3180 = sbr.rel (%p3177_p9) target bundleno = 1679 (0x68f), region = 65  ;;  %p3212_p10 = scmp.lt.s32.totalorder (!%p3177_p9), %s17740_s23, 7 }
 0x207   : > { %s16030_s9 = smul.u32 (!%p3177_p9), 7936, %s3183_s8 }
 0x209   : > { %s17246_s10 = scalar_lea.vmem (!%p3177_p9), [#allocation2], %s16030_s9 }
 0x20b   : > { %v11180_v48 = vld [vmem:[%s17246_s10 + $0xe0] sm:$0xf]  ;;  %v15067_v49 = vld [vmem:[%s17246_s10 + $0xec] sm:$0xf0]  ;;  %s19687_s23 = smov (!%p3212_p10, %s17740_s23), 7  ;;  %vm10958_vm2 = vcmask 1043456  }
 0x20c   : > { %v11308_v50 = vld [vmem:[%s17246_s10 + $0x1e0] sm:$0xf]  ;;  %v11181_v51 = vor.u32 %v15067_v49, %v11180_v48  ;;  %v15099_v52 = vld [vmem:[%s17246_s10 + $0x1ec] sm:$0xf0]  ;;  %s17792_s28 = scalar_lea.vmem %s19674_s2, %s19687_s23  ;;  %s11065_s29 = sshll.u32 %s19687_s23, 2 }
 0x20d   : > { %v11436_v53 = vld [vmem:[%s17246_s10 + $0x2e0] sm:$0xf]  ;;  %v15131_v54 = vld [vmem:[%s17246_s10 + $0x2ec] sm:$0xf0]  ;;  %v11309_v55 = vor.u32 %v15099_v52, %v11308_v50  ;;  %s18915_s5 = scalar_lea.vmem %s19675_s3, %s11065_s29 }
 0x20e   : > { %v11437_v56 = vor.u32 %v15131_v54, %v11436_v53  ;;  %v11564_v57 = vld [vmem:[%s17246_s10 + $0x3e0] sm:$0xf]  ;;  %v15163_v58 = vld [vmem:[%s17246_s10 + $0x3ec] sm:$0xf0]  ;;  %9328 = vmatpush.bf16.msra.mxu0 %v11181_v51 }
 0x20f   : > { %v11164_v59 = vld [vmem:[%s17246_s10 + $0xc0] sm:$0xf]  ;;  %v11565_v60 = vor.u32 %v15163_v58, %v11564_v57  ;;  %v15063_v61 = vld [vmem:[%s17246_s10 + $0xcc] sm:$0xf0]  ;;  %9341 = vmatpush.bf16.msra.mxu1 %v11309_v55 }
 0x210   : > { %v11292_v62 = vld [vmem:[%s17246_s10 + $0x1c0] sm:$0xf]  ;;  %v15095_v63 = vld [vmem:[%s17246_s10 + $0x1cc] sm:$0xf0]  ;;  %9354 = vmatpush.bf16.msra.mxu2 %v11437_v56  ;;  %v11165_v0 = vor.u32 %v15063_v61, %v11164_v59 }
 0x211   : > { %v11293_v1 = vor.u32 %v15095_v63, %v11292_v62  ;;  %v11420_v2 = vld [vmem:[%s17246_s10 + $0x2c0] sm:$0xf]  ;;  %v15127_v3 = vld [vmem:[%s17246_s10 + $0x2cc] sm:$0xf0]  ;;  %9367 = vmatpush.bf16.msra.mxu3 %v11565_v60 }
 0x212   : > { %v11548_v4 = vld [vmem:[%s17246_s10 + $0x3c0] sm:$0xf]  ;;  %v11421_v5 = vor.u32 %v15127_v3, %v11420_v2  ;;  %v15159_v6 = vld [vmem:[%s17246_s10 + $0x3cc] sm:$0xf0]  ;;  %9329 = vmatpush.bf16.msra.mxu0 %v11165_v0 }
 0x213   : > { %v11148_v7 = vld [vmem:[%s17246_s10 + $0xa0] sm:$0xf]  ;;  %v15059_v8 = vld [vmem:[%s17246_s10 + $0xac] sm:$0xf0]  ;;  %v11549_v9 = vor.u32 %v15159_v6, %v11548_v4  ;;  %9342 = vmatpush.bf16.msra.mxu1 %v11293_v1 }
 0x214   : > { %v11276_v10 = vld [vmem:[%s17246_s10 + $0x1a0] sm:$0xf]  ;;  %v15091_v11 = vld [vmem:[%s17246_s10 + $0x1ac] sm:$0xf0]  ;;  %v11149_v13 = vor.u32 %v15059_v8, %v11148_v7  ;;  %9355 = vmatpush.bf16.msra.mxu2 %v11421_v5 }
 0x215   : > { %v11404_v12 = vld [vmem:[%s17246_s10 + $0x2a0] sm:$0xf]  ;;  %v15123_v14 = vld [vmem:[%s17246_s10 + $0x2ac] sm:$0xf0]  ;;  %v11277_v17 = vor.u32 %v15091_v11, %v11276_v10  ;;  %9368 = vmatpush.bf16.msra.mxu3 %v11549_v9 }
 0x216   : > { %v11532_v15 = vld [vmem:[%s17246_s10 + $0x3a0] sm:$0xf]  ;;  %v15155_v16 = vld [vmem:[%s17246_s10 + $0x3ac] sm:$0xf0]  ;;  %v11405_v18 = vor.u32 %v15123_v14, %v11404_v12  ;;  %9330 = vmatpush.bf16.msra.mxu0 %v11149_v13 }
 0x217   : > { %v11132_v19 = vld [vmem:[%s17246_s10 + $0x80] sm:$0xf]  ;;  %v15055_v20 = vld [vmem:[%s17246_s10 + $0x8c] sm:$0xf0]  ;;  %v11533_v22 = vor.u32 %v15155_v16, %v11532_v15  ;;  %9343 = vmatpush.bf16.msra.mxu1 %v11277_v17 }
 0x218   : > { %v11260_v21 = vld [vmem:[%s17246_s10 + $0x180] sm:$0xf]  ;;  %v15087_v23 = vld [vmem:[%s17246_s10 + $0x18c] sm:$0xf0]  ;;  %v11133_v28 = vor.u32 %v15055_v20, %v11132_v19  ;;  %9356 = vmatpush.bf16.msra.mxu2 %v11405_v18 }
 0x219   : > { %v11388_v24 = vld [vmem:[%s17246_s10 + $0x280] sm:$0xf]  ;;  %v15119_v25 = vld [vmem:[%s17246_s10 + $0x28c] sm:$0xf0]  ;;  %v11261_v29 = vor.u32 %v15087_v23, %v11260_v21  ;;  %9369 = vmatpush.bf16.msra.mxu3 %v11533_v22 }
 0x21a   : > { %v11516_v26 = vld [vmem:[%s17246_s10 + $0x380] sm:$0xf]  ;;  %v15151_v27 = vld [vmem:[%s17246_s10 + $0x38c] sm:$0xf0]  ;;  %v11389_v30 = vor.u32 %v15119_v25, %v11388_v24  ;;  %9331 = vmatpush.bf16.msra.mxu0 %v11133_v28 }
 0x21b   : > { %v11116_v31 = vld [vmem:[%s17246_s10 + $0x60] sm:$0xf]  ;;  %v15051_v32 = vld [vmem:[%s17246_s10 + $0x6c] sm:$0xf0]  ;;  %v11517_v34 = vor.u32 %v15151_v27, %v11516_v26  ;;  %9344 = vmatpush.bf16.msra.mxu1 %v11261_v29 }
 0x21c   : > { %v11244_v33 = vld [vmem:[%s17246_s10 + $0x160] sm:$0xf]  ;;  %v15083_v35 = vld [vmem:[%s17246_s10 + $0x16c] sm:$0xf0]  ;;  %v11117_v40 = vor.u32 %v15051_v32, %v11116_v31  ;;  %9357 = vmatpush.bf16.msra.mxu2 %v11389_v30 }
 0x21d   : > { %v11372_v36 = vld [vmem:[%s17246_s10 + $0x260] sm:$0xf]  ;;  %v15115_v37 = vld [vmem:[%s17246_s10 + $0x26c] sm:$0xf0]  ;;  %v11245_v41 = vor.u32 %v15083_v35, %v11244_v33  ;;  %9370 = vmatpush.bf16.msra.mxu3 %v11517_v34 }
 0x21e   : > { %v11500_v38 = vld [vmem:[%s17246_s10 + $0x360] sm:$0xf]  ;;  %v15147_v39 = vld [vmem:[%s17246_s10 + $0x36c] sm:$0xf0]  ;;  %v11373_v42 = vor.u32 %v15115_v37, %v11372_v36  ;;  %9332 = vmatpush.bf16.msra.mxu0 %v11117_v40 }
 0x21f   : > { %v11100_v43 = vld [vmem:[%s17246_s10 + $0x40] sm:$0xf]  ;;  %v15047_v44 = vld [vmem:[%s17246_s10 + $0x4c] sm:$0xf0]  ;;  %v11501_v46 = vor.u32 %v15147_v39, %v11500_v38  ;;  %9345 = vmatpush.bf16.msra.mxu1 %v11245_v41 }
 0x220   : > { %v11228_v45 = vld [vmem:[%s17246_s10 + $0x140] sm:$0xf]  ;;  %v15079_v47 = vld [vmem:[%s17246_s10 + $0x14c] sm:$0xf0]  ;;  %v11101_v52 = vor.u32 %v15047_v44, %v11100_v43  ;;  %9358 = vmatpush.bf16.msra.mxu2 %v11373_v42 }
 0x221   : > { %v11356_v48 = vld [vmem:[%s17246_s10 + $0x240] sm:$0xf]  ;;  %v15111_v49 = vld [vmem:[%s17246_s10 + $0x24c] sm:$0xf0]  ;;  %v11229_v53 = vor.u32 %v15079_v47, %v11228_v45  ;;  %9371 = vmatpush.bf16.msra.mxu3 %v11501_v46 }
 0x222   : > { %v11484_v50 = vld [vmem:[%s17246_s10 + $0x340] sm:$0xf]  ;;  %v15143_v51 = vld [vmem:[%s17246_s10 + $0x34c] sm:$0xf0]  ;;  %v11357_v54 = vor.u32 %v15111_v49, %v11356_v48  ;;  %9333 = vmatpush.bf16.msra.mxu0 %v11101_v52  ;;  %v3222_v52 = vld [vmem:[%s19672_s0] sm:$0xff] }
 0x223   : > { %v11084_v55 = vld [vmem:[%s17246_s10 + $0x20] sm:$0xf]  ;;  %v15043_v56 = vld [vmem:[%s17246_s10 + $0x2c] sm:$0xf0]  ;;  %v11485_v58 = vor.u32 %v15143_v51, %v11484_v50  ;;  %9346 = vmatpush.bf16.msra.mxu1 %v11229_v53  ;;  %3254 = vst [vmem:[#allocation1] ss:$2 sm:$0xff] %v3222_v52 }
 0x224   : > { %v11212_v57 = vld [vmem:[%s17246_s10 + $0x120] sm:$0xf]  ;;  %v15075_v59 = vld [vmem:[%s17246_s10 + $0x12c] sm:$0xf0]  ;;  %v11085_v0 = vor.u32 %v15043_v56, %v11084_v55  ;;  %9359 = vmatpush.bf16.msra.mxu2 %v11357_v54 }
 0x225   : > { %v11340_v60 = vld [vmem:[%s17246_s10 + $0x220] sm:$0xf]  ;;  %v15107_v61 = vld [vmem:[%s17246_s10 + $0x22c] sm:$0xf0]  ;;  %v11213_v3 = vor.u32 %v15075_v59, %v11212_v57  ;;  %9372 = vmatpush.bf16.msra.mxu3 %v11485_v58 }
 0x226   : > { %v11468_v62 = vld [vmem:[%s17246_s10 + $0x320] sm:$0xf]  ;;  %v15139_v63 = vld [vmem:[%s17246_s10 + $0x32c] sm:$0xf0]  ;;  %v11341_v4 = vor.u32 %v15107_v61, %v11340_v60  ;;  %9334 = vmatpush.bf16.msra.mxu0 %v11085_v0 }
 0x227   : > { %v11068_v1 = vld [vmem:[%s17246_s10] sm:$0xf]  ;;  %v15039_v2 = vld [vmem:[%s17246_s10 + $0xc] sm:$0xf0]  ;;  %v11469_v8 = vor.u32 %v15139_v63, %v11468_v62  ;;  %9347 = vmatpush.bf16.msra.mxu1 %v11213_v3 }
 0x228   : > { %v11196_v5 = vld [vmem:[%s17246_s10 + $0x100] sm:$0xf]  ;;  %v15071_v6 = vld [vmem:[%s17246_s10 + $0x10c] sm:$0xf0]  ;;  %v11069_v15 = vor.u32 %v15039_v2, %v11068_v1  ;;  %9360 = vmatpush.bf16.msra.mxu2 %v11341_v4 }
 0x229   : > { %v11324_v7 = vld [vmem:[%s17246_s10 + $0x200] sm:$0xf]  ;;  %v15103_v9 = vld [vmem:[%s17246_s10 + $0x20c] sm:$0xf0]  ;;  %v11197_v19 = vor.u32 %v15071_v6, %v11196_v5  ;;  %9373 = vmatpush.bf16.msra.mxu3 %v11469_v8 }
 0x22a   : > { %v11452_v10 = vld [vmem:[%s17246_s10 + $0x300] sm:$0xf]  ;;  %v15135_v11 = vld [vmem:[%s17246_s10 + $0x30c] sm:$0xf0]  ;;  %v11325_v20 = vor.u32 %v15103_v9, %v11324_v7  ;;  %9335 = vmatpush.bf16.msra.mxu0 %v11069_v15 }
 0x22b   : > { %v11692_v12 = vld [vmem:[%s17246_s10 + $0x4e0] sm:$0xf]  ;;  %v15195_v13 = vld [vmem:[%s17246_s10 + $0x4ec] sm:$0xf0]  ;;  %v11453_v23 = vor.u32 %v15135_v11, %v11452_v10  ;;  %9348 = vmatpush.bf16.msra.mxu1 %v11197_v19 }
 0x22c   : > { %v11820_v14 = vld [vmem:[%s17246_s10 + $0x5e0] sm:$0xf]  ;;  %v15227_v16 = vld [vmem:[%s17246_s10 + $0x5ec] sm:$0xf0]  ;;  %v11693_v24 = vor.u32 %v15195_v13, %v11692_v12  ;;  %9361 = vmatpush.bf16.msra.mxu2 %v11325_v20  ;;  %v3226_v13 = vld [vmem:[%s19672_s0 + $0x20] sm:$0xff] }
 0x22d   : > { %v11948_v17 = vld [vmem:[%s17246_s10 + $0x6e0] sm:$0xf]  ;;  %v15259_v18 = vld [vmem:[%s17246_s10 + $0x6ec] sm:$0xf0]  ;;  %v11821_v25 = vor.u32 %v15227_v16, %v11820_v14  ;;  %9374 = vmatpush.bf16.msra.mxu3 %v11453_v23 }
 0x22e   : > { %v12076_v21 = vld [vmem:[%s17246_s10 + $0x7e0] sm:$0xf]  ;;  %v15291_v22 = vld [vmem:[%s17246_s10 + $0x7ec] sm:$0xf0]  ;;  %v11949_v26 = vor.u32 %v15259_v18, %v11948_v17  ;;  %9380 = vmatpush.bf16.msrb.mxu0 %v11693_v24 }
 0x22f   : > { %v11676_v27 = vld [vmem:[%s17246_s10 + $0x4c0] sm:$0xf]  ;;  %v15191_v28 = vld [vmem:[%s17246_s10 + $0x4cc] sm:$0xf0]  ;;  %v12077_v30 = vor.u32 %v15291_v22, %v12076_v21  ;;  %9393 = vmatpush.bf16.msrb.mxu1 %v11821_v25 }
 0x230   : > { %v11804_v29 = vld [vmem:[%s17246_s10 + $0x5c0] sm:$0xf]  ;;  %v15223_v31 = vld [vmem:[%s17246_s10 + $0x5cc] sm:$0xf0]  ;;  %v11677_v36 = vor.u32 %v15191_v28, %v11676_v27  ;;  %9406 = vmatpush.bf16.msrb.mxu2 %v11949_v26 }
 0x231   : > { %v11932_v32 = vld [vmem:[%s17246_s10 + $0x6c0] sm:$0xf]  ;;  %v15255_v33 = vld [vmem:[%s17246_s10 + $0x6cc] sm:$0xf0]  ;;  %v11805_v37 = vor.u32 %v15223_v31, %v11804_v29  ;;  %9419 = vmatpush.bf16.msrb.mxu3 %v12077_v30 }
 0x232   : > { %v12060_v34 = vld [vmem:[%s17246_s10 + $0x7c0] sm:$0xf]  ;;  %v15287_v35 = vld [vmem:[%s17246_s10 + $0x7cc] sm:$0xf0]  ;;  %v11933_v38 = vor.u32 %v15255_v33, %v11932_v32  ;;  %9381 = vmatpush.bf16.msrb.mxu0 %v11677_v36 }
 0x233   : > { %v11660_v39 = vld [vmem:[%s17246_s10 + $0x4a0] sm:$0xf]  ;;  %v15187_v40 = vld [vmem:[%s17246_s10 + $0x4ac] sm:$0xf0]  ;;  %v12061_v42 = vor.u32 %v15287_v35, %v12060_v34  ;;  %9394 = vmatpush.bf16.msrb.mxu1 %v11805_v37 }
 0x234   : > { %v11788_v41 = vld [vmem:[%s17246_s10 + $0x5a0] sm:$0xf]  ;;  %v15219_v43 = vld [vmem:[%s17246_s10 + $0x5ac] sm:$0xf0]  ;;  %v11661_v49 = vor.u32 %v15187_v40, %v11660_v39  ;;  %9407 = vmatpush.bf16.msrb.mxu2 %v11933_v38 }
 0x235   : > { %v11916_v44 = vld [vmem:[%s17246_s10 + $0x6a0] sm:$0xf]  ;;  %v15251_v45 = vld [vmem:[%s17246_s10 + $0x6ac] sm:$0xf0]  ;;  %v11789_v53 = vor.u32 %v15219_v43, %v11788_v41  ;;  %9420 = vmatpush.bf16.msrb.mxu3 %v12061_v42 }
 0x236   : > { %v12044_v46 = vld [vmem:[%s17246_s10 + $0x7a0] sm:$0xf]  ;;  %v15283_v47 = vld [vmem:[%s17246_s10 + $0x7ac] sm:$0xf0]  ;;  %v11917_v54 = vor.u32 %v15251_v45, %v11916_v44  ;;  %9382 = vmatpush.bf16.msrb.mxu0 %v11661_v49 }
 0x237   : > { %v11644_v48 = vld [vmem:[%s17246_s10 + $0x480] sm:$0xf]  ;;  %v15183_v50 = vld [vmem:[%s17246_s10 + $0x48c] sm:$0xf0]  ;;  %v12045_v57 = vor.u32 %v15283_v47, %v12044_v46  ;;  %9395 = vmatpush.bf16.msrb.mxu1 %v11789_v53  ;;  %v3224_v47 = vld [vmem:[%s19672_s0 + $0x10] sm:$0xff] }
 0x238   : > { %v3223_v51 = vld [vmem:[%s19672_s0 + $0x8] sm:$0xff]  ;;  %v15215_v56 = vld [vmem:[%s17246_s10 + $0x58c] sm:$0xf0]  ;;  %v11645_v62 = vor.u32 %v15183_v50, %v11644_v48  ;;  %9408 = vmatpush.bf16.msrb.mxu2 %v11917_v54  ;;  %v3261_v23 = vld.sshfl [vmem:[#allocation1] sm:$0xff pattern:$0x75316420] }
 0x239   : > { %v11772_v55 = vld [vmem:[%s17246_s10 + $0x580] sm:$0xf]  ;;  %3256 = vst [vmem:[#allocation1 + $0x10] ss:$2 sm:$0xff] %v3223_v51  ;;  %v15247_v59 = vld [vmem:[%s17246_s10 + $0x68c] sm:$0xf0]  ;;  %9421 = vmatpush.bf16.msrb.mxu3 %v12045_v57  ;;  %v17374_v27 = vpack.c.bf16 %v3261_v23, %v3261_v23 }
 0x23a   : > { %v11900_v58 = vld [vmem:[%s17246_s10 + $0x680] sm:$0xf]  ;;  %v15279_v61 = vld [vmem:[%s17246_s10 + $0x78c] sm:$0xf0]  ;;  %v11773_v2 = vor.u32 %v15215_v56, %v11772_v55  ;;  %9383 = vmatpush.bf16.msrb.mxu0 %v11645_v62  ;;  %3258 = vst [vmem:[#allocation1 + $0x20] ss:$2 sm:$0xff] %v3224_v47 }
 0x23b   : > { %v12028_v60 = vld [vmem:[%s17246_s10 + $0x780] sm:$0xf]  ;;  %v15179_v0 = vld [vmem:[%s17246_s10 + $0x46c] sm:$0xf0]  ;;  %v11901_v3 = vor.u32 %v15247_v59, %v11900_v58  ;;  %9336 = vmatmul.bf16.vlgmr.msra.gmra.mxu0 %v17374_v27 }
 0x23c   : > { %v11628_v63 = vld [vmem:[%s17246_s10 + $0x460] sm:$0xf]  ;;  %v15211_v4 = vld [vmem:[%s17246_s10 + $0x56c] sm:$0xf0]  ;;  %v12029_v7 = vor.u32 %v15279_v61, %v12028_v60  ;;  %9396 = vmatpush.bf16.msrb.mxu1 %v11773_v2 }
 0x23d   : > { %v11756_v1 = vld [vmem:[%s17246_s10 + $0x560] sm:$0xf]  ;;  %v15243_v6 = vld [vmem:[%s17246_s10 + $0x66c] sm:$0xf0]  ;;  %v11629_v14 = vor.u32 %v15179_v0, %v11628_v63  ;;  %9409 = vmatpush.bf16.msrb.mxu2 %v11901_v3 }
 0x23e   : > { %v11884_v5 = vld [vmem:[%s17246_s10 + $0x660] sm:$0xf]  ;;  %v15275_v9 = vld [vmem:[%s17246_s10 + $0x76c] sm:$0xf0]  ;;  %v11757_v15 = vor.u32 %v15211_v4, %v11756_v1  ;;  %9422 = vmatpush.bf16.msrb.mxu3 %v12029_v7 }
 0x23f   : > { %v12012_v8 = vld [vmem:[%s17246_s10 + $0x760] sm:$0xf]  ;;  %v15175_v12 = vld [vmem:[%s17246_s10 + $0x44c] sm:$0xf0]  ;;  %v11885_v21 = vor.u32 %v15243_v6, %v11884_v5  ;;  %9384 = vmatpush.bf16.msrb.mxu0 %v11629_v14 }
 0x240   : > { %v3227_v10 = vld [vmem:[%s19672_s0 + $0x28] sm:$0xff]  ;;  %v15207_v17 = vld [vmem:[%s17246_s10 + $0x54c] sm:$0xf0]  ;;  %v3263_v19 = vld.sshfl [vmem:[#allocation1 + $0x10] sm:$0xff pattern:$0x75316420]  ;;  %v12013_v25 = vor.u32 %v15275_v9, %v12012_v8  ;;  %9397 = vmatpush.bf16.msrb.mxu1 %v11757_v15 }
 0x241   : > { %v11612_v11 = vld [vmem:[%s17246_s10 + $0x440] sm:$0xf]  ;;  %v3264_v20 = vld.sshfl [vmem:[#allocation1 + $0x18] sm:$0xff pattern:$0x75316420]  ;;  %v17369_v22 = vpack.c.bf16 %v3263_v19, %v3263_v19  ;;  %9410 = vmatpush.bf16.msrb.mxu2 %v11885_v21 }
 0x242   : > { %v11740_v16 = vld [vmem:[%s17246_s10 + $0x540] sm:$0xf]  ;;  %3270 = vst [vmem:[#allocation1 + $0x10] ss:$2 sm:$0xff] %v3227_v10  ;;  %v17371_v24 = vpack.c.bf16 %v3264_v20, %v3264_v20  ;;  %v15239_v26 = vld [vmem:[%s17246_s10 + $0x64c] sm:$0xf0]  ;;  %v11613_v32 = vor.u32 %v15175_v12, %v11612_v11  ;;  %9423 = vmatpush.bf16.msrb.mxu3 %v12013_v25 }
 0x243   : > { %v11868_v18 = vld [vmem:[%s17246_s10 + $0x640] sm:$0xf]  ;;  %v15271_v30 = vld [vmem:[%s17246_s10 + $0x74c] sm:$0xf0]  ;;  %9362 = vmatmul.bf16.vlgmr.msra.gmra.mxu2 %v17369_v22  ;;  %v11741_v36 = vor.u32 %v15207_v17, %v11740_v16  ;;  %v3228_v17 = vld [vmem:[%s19672_s0 + $0x30] sm:$0xff] }
 0x244   : > { %v3262_v28 = vld.sshfl [vmem:[#allocation1 + $0x8] sm:$0xff pattern:$0x75316420]  ;;  %9375 = vmatmul.bf16.vlgmr.msra.gmra.mxu3 %v17371_v24  ;;  %v15171_v34 = vld [vmem:[%s17246_s10 + $0x42c] sm:$0xf0]  ;;  %v11869_v37 = vor.u32 %v15239_v26, %v11868_v18  ;;  %9385 = vmatpush.bf16.msrb.mxu0 %v11613_v32 }
 0x245   : > { %v11996_v29 = vld [vmem:[%s17246_s10 + $0x740] sm:$0xf]  ;;  %3269 = vst [vmem:[#allocation1] ss:$2 sm:$0xff] %v3226_v13  ;;  %v17380_v31 = vpack.c.bf16 %v3262_v28, %v3262_v28  ;;  %v3225_v35 = vld [vmem:[%s19672_s0 + $0x18] sm:$0xff]  ;;  %9398 = vmatpush.bf16.msrb.mxu1 %v11741_v36 }
 0x246   : > { %v11596_v33 = vld [vmem:[%s17246_s10 + $0x420] sm:$0xf]  ;;  %v15203_v39 = vld [vmem:[%s17246_s10 + $0x52c] sm:$0xf0]  ;;  %v11997_v41 = vor.u32 %v15271_v30, %v11996_v29  ;;  %3260 = vst [vmem:[#allocation1 + $0x30] ss:$2 sm:$0xff] %v3225_v35  ;;  %9411 = vmatpush.bf16.msrb.mxu2 %v11869_v37 }
 0x247   : > { %v11724_v38 = vld [vmem:[%s17246_s10 + $0x520] sm:$0xf]  ;;  %v15235_v42 = vld [vmem:[%s17246_s10 + $0x62c] sm:$0xf0]  ;;  %9349 = vmatmul.bf16.vlgmr.msra.gmra.mxu1 %v17380_v31  ;;  %v11597_v48 = vor.u32 %v15171_v34, %v11596_v33 }
 0x248   : > { %v11852_v40 = vld [vmem:[%s17246_s10 + $0x620] sm:$0xf]  ;;  %v15267_v44 = vld [vmem:[%s17246_s10 + $0x72c] sm:$0xf0]  ;;  %v11725_v52 = vor.u32 %v15203_v39, %v11724_v38  ;;  %9424 = vmatpush.bf16.msrb.mxu3 %v11997_v41 }
 0x249   : > { %v11980_v43 = vld [vmem:[%s17246_s10 + $0x720] sm:$0xf]  ;;  %v15167_v46 = vld [vmem:[%s17246_s10 + $0x40c] sm:$0xf0]  ;;  %v11853_v53 = vor.u32 %v15235_v42, %v11852_v40  ;;  %9386 = vmatpush.bf16.msrb.mxu0 %v11597_v48 }
 0x24a   : > { %v11580_v45 = vld [vmem:[%s17246_s10 + $0x400] sm:$0xf]  ;;  %v15199_v50 = vld [vmem:[%s17246_s10 + $0x50c] sm:$0xf0]  ;;  %v11981_v57 = vor.u32 %v15267_v44, %v11980_v43  ;;  %9399 = vmatpush.bf16.msrb.mxu1 %v11725_v52 }
 0x24b   : > { %v11708_v49 = vld [vmem:[%s17246_s10 + $0x500] sm:$0xf]  ;;  %v15231_v54 = vld [vmem:[%s17246_s10 + $0x60c] sm:$0xf0]  ;;  %v11581_v63 = vor.u32 %v15167_v46, %v11580_v45  ;;  %9412 = vmatpush.bf16.msrb.mxu2 %v11853_v53 }
 0x24c   : > { %v11836_v51 = vld [vmem:[%s17246_s10 + $0x600] sm:$0xf]  ;;  %v15263_v56 = vld [vmem:[%s17246_s10 + $0x70c] sm:$0xf0]  ;;  %v11709_v3 = vor.u32 %v15199_v50, %v11708_v49  ;;  %9425 = vmatpush.bf16.msrb.mxu3 %v11981_v57 }
 0x24d   : > { %v11964_v55 = vld [vmem:[%s17246_s10 + $0x700] sm:$0xf]  ;;  %v15323_v59 = vld [vmem:[%s17246_s10 + $0x8ec] sm:$0xf0]  ;;  %v11837_v4 = vor.u32 %v15231_v54, %v11836_v51  ;;  %9387 = vmatpush.bf16.msrb.mxu0 %v11581_v63 }
 0x24e   : > { %v12204_v58 = vld [vmem:[%s17246_s10 + $0x8e0] sm:$0xf]  ;;  %v15355_v61 = vld [vmem:[%s17246_s10 + $0x9ec] sm:$0xf0]  ;;  %v11965_v8 = vor.u32 %v15263_v56, %v11964_v55  ;;  %9400 = vmatpush.bf16.msrb.mxu1 %v11709_v3 }
 0x24f   : > { %v12332_v60 = vld [vmem:[%s17246_s10 + $0x9e0] sm:$0xf]  ;;  %v15387_v0 = vld [vmem:[%s17246_s10 + $0xaec] sm:$0xf0]  ;;  %v12205_v9 = vor.u32 %v15323_v59, %v12204_v58  ;;  %9413 = vmatpush.bf16.msrb.mxu2 %v11837_v4 }
 0x250   : > { %v12460_v62 = vld [vmem:[%s17246_s10 + $0xae0] sm:$0xf]  ;;  %v3229_v2 = vld [vmem:[%s19672_s0 + $0x38] sm:$0xff]  ;;  %v3267_v12 = vld.sshfl [vmem:[#allocation1 + $0x30] sm:$0xff pattern:$0x75316420]  ;;  %v12333_v14 = vor.u32 %v15355_v61, %v12332_v60  ;;  %9426 = vmatpush.bf16.msrb.mxu3 %v11965_v8 }
 0x251   : > { %v12588_v1 = vld [vmem:[%s17246_s10 + $0xbe0] sm:$0xf]  ;;  %v15419_v5 = vld [vmem:[%s17246_s10 + $0xbec] sm:$0xf0]  ;;  %v12461_v15 = vor.u32 %v15387_v0, %v12460_v62  ;;  %v17428_v23 = vpack.c.bf16 %v3267_v12, %v3267_v12  ;;  %9432 = vmatpush.bf16.msra.mxu0 %v12205_v9  ;;  %v3230_v12 = vld [vmem:[%s19672_s0 + $0x40] sm:$0xff] }
 0x252   : > { %v12188_v6 = vld [vmem:[%s17246_s10 + $0x8c0] sm:$0xf]  ;;  %v15319_v7 = vld [vmem:[%s17246_s10 + $0x8cc] sm:$0xf0]  ;;  %v12589_v18 = vor.u32 %v15419_v5, %v12588_v1  ;;  %9445 = vmatpush.bf16.msra.mxu1 %v12333_v14 }
 0x253   : > { %v12316_v10 = vld [vmem:[%s17246_s10 + $0x9c0] sm:$0xf]  ;;  %v15351_v11 = vld [vmem:[%s17246_s10 + $0x9cc] sm:$0xf0]  ;;  %v12189_v29 = vor.u32 %v15319_v7, %v12188_v6  ;;  %9458 = vmatpush.bf16.msra.mxu2 %v12461_v15 }
 0x254   : > { %v3268_v13 = vld.sshfl [vmem:[#allocation1 + $0x38] sm:$0xff pattern:$0x75316420]  ;;  %v12444_v16 = vld [vmem:[%s17246_s10 + $0xac0] sm:$0xf]  ;;  %v12317_v30 = vor.u32 %v15351_v11, %v12316_v10  ;;  %9471 = vmatpush.bf16.msra.mxu3 %v12589_v18  ;;  %9414 = vmatmul.bf16.vlgmr.msrb.gmra.mxu2 %v17428_v23 }
 0x255   : > { %3272 = vst [vmem:[#allocation1 + $0x30] ss:$2 sm:$0xff] %v3229_v2  ;;  %v15383_v19 = vld [vmem:[%s17246_s10 + $0xacc] sm:$0xf0]  ;;  %v12572_v20 = vld [vmem:[%s17246_s10 + $0xbc0] sm:$0xf]  ;;  %v17430_v26 = vpack.c.bf16 %v3268_v13, %v3268_v13  ;;  %9433 = vmatpush.bf16.msra.mxu0 %v12189_v29 }
 0x256   : > { %v15415_v21 = vld [vmem:[%s17246_s10 + $0xbcc] sm:$0xf0]  ;;  %v3265_v25 = vld.sshfl [vmem:[#allocation1 + $0x20] sm:$0xff pattern:$0x75316420]  ;;  %v12445_v32 = vor.u32 %v15383_v19, %v12444_v16  ;;  %9446 = vmatpush.bf16.msra.mxu1 %v12317_v30  ;;  %v3231_v18 = vld [vmem:[%s19672_s0 + $0x48] sm:$0xff] }
 0x257   : > { %v3266_v28 = vld.sshfl [vmem:[#allocation1 + $0x28] sm:$0xff pattern:$0x75316420]  ;;  %v15315_v34 = vld [vmem:[%s17246_s10 + $0x8ac] sm:$0xf0]  ;;  %v12573_v36 = vor.u32 %v15415_v21, %v12572_v20  ;;  %v17439_v40 = vpack.c.bf16 %v3265_v25, %v3265_v25  ;;  %9427 = vmatmul.bf16.vlgmr.msrb.gmra.mxu3 %v17430_v26 }
 0x258   : > { %3271 = vst [vmem:[#allocation1 + $0x20] ss:$2 sm:$0xff] %v3228_v17  ;;  %v12172_v33 = vld [vmem:[%s17246_s10 + $0x8a0] sm:$0xf]  ;;  %v15347_v37 = vld [vmem:[%s17246_s10 + $0x9ac] sm:$0xf0]  ;;  %v17444_v43 = vpack.c.bf16 %v3266_v28, %v3266_v28  ;;  %9459 = vmatpush.bf16.msra.mxu2 %v12445_v32 }
 0x259   : > { %v12300_v35 = vld [vmem:[%s17246_s10 + $0x9a0] sm:$0xf]  ;;  %v15379_v39 = vld [vmem:[%s17246_s10 + $0xaac] sm:$0xf0]  ;;  %v12173_v44 = vor.u32 %v15315_v34, %v12172_v33  ;;  %9472 = vmatpush.bf16.msra.mxu3 %v12573_v36  ;;  %9388 = vmatmul.bf16.vlgmr.msrb.gmra.mxu0 %v17439_v40 }
 0x25a   : > { %v12428_v38 = vld [vmem:[%s17246_s10 + $0xaa0] sm:$0xf]  ;;  %v15411_v42 = vld [vmem:[%s17246_s10 + $0xbac] sm:$0xf0]  ;;  %v12301_v45 = vor.u32 %v15347_v37, %v12300_v35  ;;  %9401 = vmatmul.bf16.vlgmr.msrb.gmra.mxu1 %v17444_v43 }
 0x25b   : > { %v12556_v41 = vld [vmem:[%s17246_s10 + $0xba0] sm:$0xf]  ;;  %v12429_v46 = vor.u32 %v15379_v39, %v12428_v38  ;;  %v15311_v48 = vld [vmem:[%s17246_s10 + $0x88c] sm:$0xf0]  ;;  %9434 = vmatpush.bf16.msra.mxu0 %v12173_v44 }
 0x25c   : > { %v12156_v47 = vld [vmem:[%s17246_s10 + $0x880] sm:$0xf]  ;;  %v12557_v50 = vor.u32 %v15411_v42, %v12556_v41  ;;  %v15343_v51 = vld [vmem:[%s17246_s10 + $0x98c] sm:$0xf0]  ;;  %9447 = vmatpush.bf16.msra.mxu1 %v12301_v45 }
 0x25d   : > { %v12284_v49 = vld [vmem:[%s17246_s10 + $0x980] sm:$0xf]  ;;  %v15375_v53 = vld [vmem:[%s17246_s10 + $0xa8c] sm:$0xf0]  ;;  %v12157_v56 = vor.u32 %v15311_v48, %v12156_v47  ;;  %9460 = vmatpush.bf16.msra.mxu2 %v12429_v46 }
 0x25e   : > { %v12412_v52 = vld [vmem:[%s17246_s10 + $0xa80] sm:$0xf]  ;;  %v15407_v55 = vld [vmem:[%s17246_s10 + $0xb8c] sm:$0xf0]  ;;  %v12285_v58 = vor.u32 %v15343_v51, %v12284_v49  ;;  %9473 = vmatpush.bf16.msra.mxu3 %v12557_v50 }
 0x25f   : > { %v12540_v54 = vld [vmem:[%s17246_s10 + $0xb80] sm:$0xf]  ;;  %v12413_v59 = vor.u32 %v15375_v53, %v12412_v52  ;;  %v15307_v60 = vld [vmem:[%s17246_s10 + $0x86c] sm:$0xf0]  ;;  %9435 = vmatpush.bf16.msra.mxu0 %v12157_v56 }
 0x260   : > { %v12140_v57 = vld [vmem:[%s17246_s10 + $0x860] sm:$0xf]  ;;  %v15339_v62 = vld [vmem:[%s17246_s10 + $0x96c] sm:$0xf0]  ;;  %v12541_v63 = vor.u32 %v15407_v55, %v12540_v54  ;;  %9448 = vmatpush.bf16.msra.mxu1 %v12285_v58 }
 0x261   : > { %v12268_v61 = vld [vmem:[%s17246_s10 + $0x960] sm:$0xf]  ;;  %v15371_v1 = vld [vmem:[%s17246_s10 + $0xa6c] sm:$0xf0]  ;;  %v12141_v6 = vor.u32 %v15307_v60, %v12140_v57  ;;  %9461 = vmatpush.bf16.msra.mxu2 %v12413_v59 }
 0x262   : > { %v12396_v0 = vld [vmem:[%s17246_s10 + $0xa60] sm:$0xf]  ;;  %v15403_v3 = vld [vmem:[%s17246_s10 + $0xb6c] sm:$0xf0]  ;;  %v12269_v13 = vor.u32 %v15339_v62, %v12268_v61  ;;  %9474 = vmatpush.bf16.msra.mxu3 %v12541_v63 }
 0x263   : > { %v12524_v2 = vld [vmem:[%s17246_s10 + $0xb60] sm:$0xf]  ;;  %v15303_v5 = vld [vmem:[%s17246_s10 + $0x84c] sm:$0xf0]  ;;  %v12397_v14 = vor.u32 %v15371_v1, %v12396_v0  ;;  %9436 = vmatpush.bf16.msra.mxu0 %v12141_v6 }
 0x264   : > { %v12124_v4 = vld [vmem:[%s17246_s10 + $0x840] sm:$0xf]  ;;  %v15335_v8 = vld [vmem:[%s17246_s10 + $0x94c] sm:$0xf0]  ;;  %v12525_v17 = vor.u32 %v15403_v3, %v12524_v2  ;;  %9449 = vmatpush.bf16.msra.mxu1 %v12269_v13 }
 0x265   : > { %v12252_v7 = vld [vmem:[%s17246_s10 + $0x940] sm:$0xf]  ;;  %v15367_v10 = vld [vmem:[%s17246_s10 + $0xa4c] sm:$0xf0]  ;;  %v12125_v25 = vor.u32 %v15303_v5, %v12124_v4  ;;  %9462 = vmatpush.bf16.msra.mxu2 %v12397_v14 }
 0x266   : > { %v12380_v9 = vld [vmem:[%s17246_s10 + $0xa40] sm:$0xf]  ;;  %v17470_v11 = vld.sshfl [vmem:[#allocation1] sm:$0xff pattern:$0x75316420]  ;;  %v12253_v28 = vor.u32 %v15335_v8, %v12252_v7  ;;  %9475 = vmatpush.bf16.msra.mxu3 %v12525_v17 }
 0x267   : > { %v17475_v15 = vld.sshfl [vmem:[#allocation1 + $0x10] sm:$0xff pattern:$0x75316420]  ;;  %v17477_v16 = vld.sshfl [vmem:[#allocation1 + $0x8] sm:$0xff pattern:$0x75316420]  ;;  %v12381_v29 = vor.u32 %v15367_v10, %v12380_v9  ;;  %9437 = vmatpush.bf16.msra.mxu0 %v12125_v25  ;;  %v17515_v9 = vpack.c.bf16 %v17470_v11, %v17470_v11 }
 0x268   : > { %3281 = vst [vmem:[#allocation1] ss:$2 sm:$0xff] %v3230_v12  ;;  %v17482_v19 = vld.sshfl [vmem:[#allocation1 + $0x18] sm:$0xff pattern:$0x75316420]  ;;  %9450 = vmatpush.bf16.msra.mxu1 %v12253_v28  ;;  %v17522_v14 = vpack.c.bf16 %v17475_v15, %v17475_v15  ;;  %v17526_v17 = vpack.c.bf16 %v17477_v16, %v17477_v16 }
 0x269   : > { %v12508_v20 = vld [vmem:[%s17246_s10 + $0xb40] sm:$0xf]  ;;  %v15399_v21 = vld [vmem:[%s17246_s10 + $0xb4c] sm:$0xf0]  ;;  %3282 = vst [vmem:[#allocation1 + $0x10] ss:$2 sm:$0xff] %v3231_v18  ;;  %9463 = vmatpush.bf16.msra.mxu2 %v12381_v29 }
 0x26a   : > { %v12108_v30 = vld [vmem:[%s17246_s10 + $0x820] sm:$0xf]  ;;  %v15299_v32 = vld [vmem:[%s17246_s10 + $0x82c] sm:$0xf0]  ;;  %v12509_v34 = vor.u32 %v15399_v21, %v12508_v20  ;;  %v17532_v20 = vpack.c.bf16 %v17482_v19, %v17482_v19 }
 0x26b   : > { %v12236_v33 = vld [vmem:[%s17246_s10 + $0x920] sm:$0xf]  ;;  %v15331_v35 = vld [vmem:[%s17246_s10 + $0x92c] sm:$0xf0]  ;;  %v12109_v41 = vor.u32 %v15299_v32, %v12108_v30 }
 0x26c   : > { %v12364_v36 = vld [vmem:[%s17246_s10 + $0xa20] sm:$0xf]  ;;  %v15363_v37 = vld [vmem:[%s17246_s10 + $0xa2c] sm:$0xf0]  ;;  %v12237_v45 = vor.u32 %v15331_v35, %v12236_v33  ;;  %9476 = vmatpush.bf16.msra.mxu3 %v12509_v34 }
 0x26d   : > { %v12492_v38 = vld [vmem:[%s17246_s10 + $0xb20] sm:$0xf]  ;;  %v15395_v39 = vld [vmem:[%s17246_s10 + $0xb2c] sm:$0xf0]  ;;  %v12365_v46 = vor.u32 %v15363_v37, %v12364_v36  ;;  %9438 = vmatpush.bf16.msra.mxu0 %v12109_v41 }
 0x26e   : > { %v12092_v42 = vld [vmem:[%s17246_s10 + $0x800] sm:$0xf]  ;;  %v15295_v44 = vld [vmem:[%s17246_s10 + $0x80c] sm:$0xf0]  ;;  %v12493_v50 = vor.u32 %v15395_v39, %v12492_v38  ;;  %9451 = vmatpush.bf16.msra.mxu1 %v12237_v45 }
 0x26f   : > { %v12220_v47 = vld [vmem:[%s17246_s10 + $0x900] sm:$0xf]  ;;  %v15327_v48 = vld [vmem:[%s17246_s10 + $0x90c] sm:$0xf0]  ;;  %v12093_v57 = vor.u32 %v15295_v44, %v12092_v42  ;;  %9464 = vmatpush.bf16.msra.mxu2 %v12365_v46 }
 0x270   : > { %v12348_v49 = vld [vmem:[%s17246_s10 + $0xa00] sm:$0xf]  ;;  %v15359_v51 = vld [vmem:[%s17246_s10 + $0xa0c] sm:$0xf0]  ;;  %v12221_v61 = vor.u32 %v15327_v48, %v12220_v47  ;;  %9477 = vmatpush.bf16.msra.mxu3 %v12493_v50  ;;  %v3232_v50 = vld [vmem:[%s19672_s0 + $0x50] sm:$0xff] }
 0x271   : > { %v12476_v52 = vld [vmem:[%s17246_s10 + $0xb00] sm:$0xf]  ;;  %v15391_v53 = vld [vmem:[%s17246_s10 + $0xb0c] sm:$0xf0]  ;;  %v12349_v62 = vor.u32 %v15359_v51, %v12348_v49  ;;  %9439 = vmatpush.bf16.msra.mxu0 %v12093_v57 }
 0x272   : > { %v12716_v54 = vld [vmem:[%s17246_s10 + $0xce0] sm:$0xf]  ;;  %v15451_v55 = vld [vmem:[%s17246_s10 + $0xcec] sm:$0xf0]  ;;  %v12477_v1 = vor.u32 %v15391_v53, %v12476_v52  ;;  %9452 = vmatpush.bf16.msra.mxu1 %v12221_v61 }
 0x273   : > { %v12844_v56 = vld [vmem:[%s17246_s10 + $0xde0] sm:$0xf]  ;;  %v15483_v58 = vld [vmem:[%s17246_s10 + $0xdec] sm:$0xf0]  ;;  %v12717_v2 = vor.u32 %v15451_v55, %v12716_v54  ;;  %9465 = vmatpush.bf16.msra.mxu2 %v12349_v62 }
 0x274   : > { %v12972_v59 = vld [vmem:[%s17246_s10 + $0xee0] sm:$0xf]  ;;  %v15515_v60 = vld [vmem:[%s17246_s10 + $0xeec] sm:$0xf0]  ;;  %v12845_v3 = vor.u32 %v15483_v58, %v12844_v56  ;;  %9478 = vmatpush.bf16.msra.mxu3 %v12477_v1  ;;  %9440 = vmatmul.bf16.vlgmr.msra.gmra.mxu0 %v17515_v9 }
 0x275   : > { %v13100_v63 = vld [vmem:[%s17246_s10 + $0xfe0] sm:$0xf]  ;;  %v15547_v0 = vld [vmem:[%s17246_s10 + $0xfec] sm:$0xf0]  ;;  %v12973_v4 = vor.u32 %v15515_v60, %v12972_v59  ;;  %9484 = vmatpush.bf16.msrb.mxu0 %v12717_v2  ;;  %9453 = vmatmul.bf16.vlgmr.msra.gmra.mxu1 %v17526_v17 }
 0x276   : > { %v12700_v5 = vld [vmem:[%s17246_s10 + $0xcc0] sm:$0xf]  ;;  %v15447_v6 = vld [vmem:[%s17246_s10 + $0xccc] sm:$0xf0]  ;;  %v13101_v8 = vor.u32 %v15547_v0, %v13100_v63  ;;  %9497 = vmatpush.bf16.msrb.mxu1 %v12845_v3  ;;  %9466 = vmatmul.bf16.vlgmr.msra.gmra.mxu2 %v17522_v14 }
 0x277   : > { %v12828_v7 = vld [vmem:[%s17246_s10 + $0xdc0] sm:$0xf]  ;;  %v15479_v10 = vld [vmem:[%s17246_s10 + $0xdcc] sm:$0xf0]  ;;  %v12701_v21 = vor.u32 %v15447_v6, %v12700_v5  ;;  %9510 = vmatpush.bf16.msrb.mxu2 %v12973_v4  ;;  %9479 = vmatmul.bf16.vlgmr.msra.gmra.mxu3 %v17532_v20 }
 0x278   : > { %v12956_v12 = vld [vmem:[%s17246_s10 + $0xec0] sm:$0xf]  ;;  %v15511_v13 = vld [vmem:[%s17246_s10 + $0xecc] sm:$0xf0]  ;;  %v12829_v15 = vor.u32 %v15479_v10, %v12828_v7  ;;  %9523 = vmatpush.bf16.msrb.mxu3 %v13101_v8 }
 0x279   : > { %v13084_v18 = vld [vmem:[%s17246_s10 + $0xfc0] sm:$0xf]  ;;  %v15543_v11 = vld [vmem:[%s17246_s10 + $0xfcc] sm:$0xf0]  ;;  %v12957_v25 = vor.u32 %v15511_v13, %v12956_v12  ;;  %9485 = vmatpush.bf16.msrb.mxu0 %v12701_v21 }
 0x27a   : > { %v12684_v16 = vld [vmem:[%s17246_s10 + $0xca0] sm:$0xf]  ;;  %v15443_v28 = vld [vmem:[%s17246_s10 + $0xcac] sm:$0xf0]  ;;  %v13085_v30 = vor.u32 %v15543_v11, %v13084_v18  ;;  %9498 = vmatpush.bf16.msrb.mxu1 %v12829_v15 }
 0x27b   : > { %v12812_v29 = vld [vmem:[%s17246_s10 + $0xda0] sm:$0xf]  ;;  %v15475_v32 = vld [vmem:[%s17246_s10 + $0xdac] sm:$0xf0]  ;;  %v12685_v36 = vor.u32 %v15443_v28, %v12684_v16  ;;  %9511 = vmatpush.bf16.msrb.mxu2 %v12957_v25 }
 0x27c   : > { %v12940_v19 = vld [vmem:[%s17246_s10 + $0xea0] sm:$0xf]  ;;  %v15507_v33 = vld [vmem:[%s17246_s10 + $0xeac] sm:$0xf0]  ;;  %v12813_v41 = vor.u32 %v15475_v32, %v12812_v29  ;;  %9524 = vmatpush.bf16.msrb.mxu3 %v13085_v30 }
 0x27d   : > { %v13068_v34 = vld [vmem:[%s17246_s10 + $0xfa0] sm:$0xf]  ;;  %v15539_v35 = vld [vmem:[%s17246_s10 + $0xfac] sm:$0xf0]  ;;  %v12941_v42 = vor.u32 %v15507_v33, %v12940_v19  ;;  %9486 = vmatpush.bf16.msrb.mxu0 %v12685_v36 }
 0x27e   : > { %v12668_v37 = vld [vmem:[%s17246_s10 + $0xc80] sm:$0xf]  ;;  %v15439_v38 = vld [vmem:[%s17246_s10 + $0xc8c] sm:$0xf0]  ;;  %v13069_v47 = vor.u32 %v15539_v35, %v13068_v34  ;;  %9499 = vmatpush.bf16.msrb.mxu1 %v12813_v41 }
 0x27f   : > { %v12796_v39 = vld [vmem:[%s17246_s10 + $0xd80] sm:$0xf]  ;;  %v15471_v44 = vld [vmem:[%s17246_s10 + $0xd8c] sm:$0xf0]  ;;  %v12669_v55 = vor.u32 %v15439_v38, %v12668_v37  ;;  %9512 = vmatpush.bf16.msrb.mxu2 %v12941_v42 }
 0x280   : > { %v12924_v45 = vld [vmem:[%s17246_s10 + $0xe80] sm:$0xf]  ;;  %v15503_v46 = vld [vmem:[%s17246_s10 + $0xe8c] sm:$0xf0]  ;;  %v12797_v60 = vor.u32 %v15471_v44, %v12796_v39  ;;  %9525 = vmatpush.bf16.msrb.mxu3 %v13069_v47 }
 0x281   : > { %v13052_v48 = vld [vmem:[%s17246_s10 + $0xf80] sm:$0xf]  ;;  %v15535_v49 = vld [vmem:[%s17246_s10 + $0xf8c] sm:$0xf0]  ;;  %v12925_v61 = vor.u32 %v15503_v46, %v12924_v45  ;;  %9487 = vmatpush.bf16.msrb.mxu0 %v12669_v55 }
 0x282   : > { %v12652_v51 = vld [vmem:[%s17246_s10 + $0xc60] sm:$0xf]  ;;  %v15435_v52 = vld [vmem:[%s17246_s10 + $0xc6c] sm:$0xf0]  ;;  %v13053_v63 = vor.u32 %v15535_v49, %v13052_v48  ;;  %9500 = vmatpush.bf16.msrb.mxu1 %v12797_v60 }
 0x283   : > { %v17559_v53 = vld.sshfl [vmem:[#allocation1 + $0x20] sm:$0xff pattern:$0x75316420]  ;;  %v17561_v54 = vld.sshfl [vmem:[#allocation1 + $0x30] sm:$0xff pattern:$0x75316420]  ;;  %v12653_v4 = vor.u32 %v15435_v52, %v12652_v51  ;;  %9513 = vmatpush.bf16.msrb.mxu2 %v12925_v61 }
 0x284   : > { %v12780_v56 = vld [vmem:[%s17246_s10 + $0xd60] sm:$0xf]  ;;  %v15467_v57 = vld [vmem:[%s17246_s10 + $0xd6c] sm:$0xf0]  ;;  %9526 = vmatpush.bf16.msrb.mxu3 %v13053_v63 }
 0x285   : > { %v17565_v58 = vld.sshfl [vmem:[#allocation1 + $0x28] sm:$0xff pattern:$0x75316420]  ;;  %v3233_v59 = vld [vmem:[%s19672_s0 + $0x58] sm:$0xff]  ;;  %v12781_v5 = vor.u32 %v15467_v57, %v12780_v56  ;;  %9488 = vmatpush.bf16.msrb.mxu0 %v12653_v4 }
 0x286   : > { %3283 = vst [vmem:[#allocation1 + $0x20] ss:$2 sm:$0xff] %v3232_v50  ;;  %v17570_v62 = vld.sshfl [vmem:[#allocation1 + $0x38] sm:$0xff pattern:$0x75316420] }
 0x287   : > { %v12908_v0 = vld [vmem:[%s17246_s10 + $0xe60] sm:$0xf]  ;;  %v15499_v1 = vld [vmem:[%s17246_s10 + $0xe6c] sm:$0xf0]  ;;  %3284 = vst [vmem:[#allocation1 + $0x30] ss:$2 sm:$0xff] %v3233_v59  ;;  %9501 = vmatpush.bf16.msrb.mxu1 %v12781_v5 }
 0x288   : > { %v13036_v2 = vld [vmem:[%s17246_s10 + $0xf60] sm:$0xf]  ;;  %v15531_v3 = vld [vmem:[%s17246_s10 + $0xf6c] sm:$0xf0]  ;;  %v12909_v6 = vor.u32 %v15499_v1, %v12908_v0 }
 0x289   : > { %v12636_v7 = vld [vmem:[%s17246_s10 + $0xc40] sm:$0xf]  ;;  %v15431_v8 = vld [vmem:[%s17246_s10 + $0xc4c] sm:$0xf0]  ;;  %v13037_v12 = vor.u32 %v15531_v3, %v13036_v2 }
 0x28a   : > { %v12764_v10 = vld [vmem:[%s17246_s10 + $0xd40] sm:$0xf]  ;;  %v15463_v13 = vld [vmem:[%s17246_s10 + $0xd4c] sm:$0xf0]  ;;  %v12637_v25 = vor.u32 %v15431_v8, %v12636_v7  ;;  %9514 = vmatpush.bf16.msrb.mxu2 %v12909_v6 }
 0x28b   : > { %v12892_v18 = vld [vmem:[%s17246_s10 + $0xe40] sm:$0xf]  ;;  %v15495_v11 = vld [vmem:[%s17246_s10 + $0xe4c] sm:$0xf0]  ;;  %v12765_v16 = vor.u32 %v15463_v13, %v12764_v10  ;;  %9527 = vmatpush.bf16.msrb.mxu3 %v13037_v12 }
 0x28c   : > { %v13020_v21 = vld [vmem:[%s17246_s10 + $0xf40] sm:$0xf]  ;;  %v15527_v15 = vld [vmem:[%s17246_s10 + $0xf4c] sm:$0xf0]  ;;  %v12893_v28 = vor.u32 %v15495_v11, %v12892_v18  ;;  %9489 = vmatpush.bf16.msrb.mxu0 %v12637_v25  ;;  %v17614_v18 = vpack.c.bf16 %v17559_v53, %v17559_v53  ;;  %v17621_v25 = vpack.c.bf16 %v17561_v54, %v17561_v54 }
 0x28d   : > { %v12620_v29 = vld [vmem:[%s17246_s10 + $0xc20] sm:$0xf]  ;;  %v15427_v30 = vld [vmem:[%s17246_s10 + $0xc2c] sm:$0xf0]  ;;  %v13021_v19 = vor.u32 %v15527_v15, %v13020_v21  ;;  %9502 = vmatpush.bf16.msrb.mxu1 %v12765_v16  ;;  %v17625_v16 = vpack.c.bf16 %v17565_v58, %v17565_v58 }
 0x28e   : > { %v12748_v32 = vld [vmem:[%s17246_s10 + $0xd20] sm:$0xf]  ;;  %v15459_v33 = vld [vmem:[%s17246_s10 + $0xd2c] sm:$0xf0]  ;;  %v12621_v38 = vor.u32 %v15427_v30, %v12620_v29  ;;  %9515 = vmatpush.bf16.msrb.mxu2 %v12893_v28  ;;  %v17632_v30 = vpack.c.bf16 %v17570_v62, %v17570_v62 }
 0x28f   : > { %v12876_v34 = vld [vmem:[%s17246_s10 + $0xe20] sm:$0xf]  ;;  %v15491_v35 = vld [vmem:[%s17246_s10 + $0xe2c] sm:$0xf0]  ;;  %v12749_v42 = vor.u32 %v15459_v33, %v12748_v32  ;;  %9528 = vmatpush.bf16.msrb.mxu3 %v13021_v19 }
 0x290   : > { %v13004_v36 = vld [vmem:[%s17246_s10 + $0xf20] sm:$0xf]  ;;  %v15523_v37 = vld [vmem:[%s17246_s10 + $0xf2c] sm:$0xf0]  ;;  %v12877_v44 = vor.u32 %v15491_v35, %v12876_v34  ;;  %9490 = vmatpush.bf16.msrb.mxu0 %v12621_v38 }
 0x291   : > { %v12604_v39 = vld [vmem:[%s17246_s10 + $0xc00] sm:$0xf]  ;;  %v15423_v41 = vld [vmem:[%s17246_s10 + $0xc0c] sm:$0xf0]  ;;  %v13005_v48 = vor.u32 %v15523_v37, %v13004_v36  ;;  %9503 = vmatpush.bf16.msrb.mxu1 %v12749_v42 }
 0x292   : > { %v12732_v45 = vld [vmem:[%s17246_s10 + $0xd00] sm:$0xf]  ;;  %v15455_v46 = vld [vmem:[%s17246_s10 + $0xd0c] sm:$0xf0]  ;;  %v12605_v57 = vor.u32 %v15423_v41, %v12604_v39  ;;  %9516 = vmatpush.bf16.msrb.mxu2 %v12877_v44  ;;  %v3234_v39 = vld [vmem:[%s19672_s0 + $0x60] sm:$0xff] }
 0x293   : > { %v12860_v47 = vld [vmem:[%s17246_s10 + $0xe00] sm:$0xf]  ;;  %v15487_v49 = vld [vmem:[%s17246_s10 + $0xe0c] sm:$0xf0]  ;;  %v12733_v63 = vor.u32 %v15455_v46, %v12732_v45  ;;  %9529 = vmatpush.bf16.msrb.mxu3 %v13005_v48 }
 0x294   : > { %v12988_v50 = vld [vmem:[%s17246_s10 + $0xf00] sm:$0xf]  ;;  %v15519_v51 = vld [vmem:[%s17246_s10 + $0xf0c] sm:$0xf0]  ;;  %v12861_v0 = vor.u32 %v15487_v49, %v12860_v47  ;;  %9491 = vmatpush.bf16.msrb.mxu0 %v12605_v57 }
 0x295   : > { %v13228_v52 = vld [vmem:[%s17246_s10 + $0x10e0] sm:$0xf]  ;;  %v15579_v55 = vld [vmem:[%s17246_s10 + $0x10ec] sm:$0xf0]  ;;  %v12989_v3 = vor.u32 %v15519_v51, %v12988_v50  ;;  %9504 = vmatpush.bf16.msrb.mxu1 %v12733_v63 }
 0x296   : > { %v13356_v56 = vld [vmem:[%s17246_s10 + $0x11e0] sm:$0xf]  ;;  %v15611_v59 = vld [vmem:[%s17246_s10 + $0x11ec] sm:$0xf0]  ;;  %v13229_v4 = vor.u32 %v15579_v55, %v13228_v52  ;;  %9517 = vmatpush.bf16.msrb.mxu2 %v12861_v0 }
 0x297   : > { %v13484_v60 = vld [vmem:[%s17246_s10 + $0x12e0] sm:$0xf]  ;;  %v15643_v61 = vld [vmem:[%s17246_s10 + $0x12ec] sm:$0xf0]  ;;  %v13357_v6 = vor.u32 %v15611_v59, %v13356_v56  ;;  %9530 = vmatpush.bf16.msrb.mxu3 %v12989_v3  ;;  %9492 = vmatmul.bf16.vlgmr.msrb.gmra.mxu0 %v17614_v18 }
 0x298   : > { %v13612_v1 = vld [vmem:[%s17246_s10 + $0x13e0] sm:$0xf]  ;;  %v15675_v2 = vld [vmem:[%s17246_s10 + $0x13ec] sm:$0xf0]  ;;  %v13485_v7 = vor.u32 %v15643_v61, %v13484_v60  ;;  %9536 = vmatpush.bf16.msra.mxu0 %v13229_v4  ;;  %9505 = vmatmul.bf16.vlgmr.msrb.gmra.mxu1 %v17625_v16 }
 0x299   : > { %v13212_v5 = vld [vmem:[%s17246_s10 + $0x10c0] sm:$0xf]  ;;  %v15575_v8 = vld [vmem:[%s17246_s10 + $0x10cc] sm:$0xf0]  ;;  %v13613_v13 = vor.u32 %v15675_v2, %v13612_v1  ;;  %9549 = vmatpush.bf16.msra.mxu1 %v13357_v6  ;;  %9518 = vmatmul.bf16.vlgmr.msrb.gmra.mxu2 %v17621_v25 }
 0x29a   : > { %v13340_v10 = vld [vmem:[%s17246_s10 + $0x11c0] sm:$0xf]  ;;  %v15607_v12 = vld [vmem:[%s17246_s10 + $0x11cc] sm:$0xf0]  ;;  %v13213_v32 = vor.u32 %v15575_v8, %v13212_v5  ;;  %9562 = vmatpush.bf16.msra.mxu2 %v13485_v7  ;;  %9531 = vmatmul.bf16.vlgmr.msrb.gmra.mxu3 %v17632_v30 }
 0x29b   : > { %v13468_v11 = vld [vmem:[%s17246_s10 + $0x12c0] sm:$0xf]  ;;  %v15639_v21 = vld [vmem:[%s17246_s10 + $0x12cc] sm:$0xf0]  ;;  %v13341_v58 = vor.u32 %v15607_v12, %v13340_v10  ;;  %9575 = vmatpush.bf16.msra.mxu3 %v13613_v13 }
 0x29c   : > { %v13596_v15 = vld [vmem:[%s17246_s10 + $0x13c0] sm:$0xf]  ;;  %v15671_v28 = vld [vmem:[%s17246_s10 + $0x13cc] sm:$0xf0]  ;;  %v13469_v35 = vor.u32 %v15639_v21, %v13468_v11  ;;  %9537 = vmatpush.bf16.msra.mxu0 %v13213_v32 }
 0x29d   : > { %v13196_v53 = vld [vmem:[%s17246_s10 + $0x10a0] sm:$0xf]  ;;  %v15571_v29 = vld [vmem:[%s17246_s10 + $0x10ac] sm:$0xf0]  ;;  %v13597_v62 = vor.u32 %v15671_v28, %v13596_v15  ;;  %9550 = vmatpush.bf16.msra.mxu1 %v13341_v58 }
 0x29e   : > { %v13324_v19 = vld [vmem:[%s17246_s10 + $0x11a0] sm:$0xf]  ;;  %v15603_v33 = vld [vmem:[%s17246_s10 + $0x11ac] sm:$0xf0]  ;;  %v13197_v46 = vor.u32 %v15571_v29, %v13196_v53  ;;  %9563 = vmatpush.bf16.msra.mxu2 %v13469_v35 }
 0x29f   : > { %v13452_v54 = vld [vmem:[%s17246_s10 + $0x12a0] sm:$0xf]  ;;  %v15635_v34 = vld [vmem:[%s17246_s10 + $0x12ac] sm:$0xf0]  ;;  %v13325_v47 = vor.u32 %v15603_v33, %v13324_v19  ;;  %9576 = vmatpush.bf16.msra.mxu3 %v13597_v62 }
 0x2a0   : > { %v13580_v36 = vld [vmem:[%s17246_s10 + $0x13a0] sm:$0xf]  ;;  %v15667_v37 = vld [vmem:[%s17246_s10 + $0x13ac] sm:$0xf0]  ;;  %v13453_v48 = vor.u32 %v15635_v34, %v13452_v54  ;;  %9538 = vmatpush.bf16.msra.mxu0 %v13197_v46 }
 0x2a1   : > { %v17640_v38 = vld.sshfl [vmem:[#allocation1] sm:$0xff pattern:$0x75316420]  ;;  %v17646_v41 = vld.sshfl [vmem:[#allocation1 + $0x10] sm:$0xff pattern:$0x75316420]  ;;  %v13581_v52 = vor.u32 %v15667_v37, %v13580_v36  ;;  %9551 = vmatpush.bf16.msra.mxu1 %v13325_v47 }
 0x2a2   : > { %v17648_v42 = vld.sshfl [vmem:[#allocation1 + $0x8] sm:$0xff pattern:$0x75316420]  ;;  %v17655_v45 = vld.sshfl [vmem:[#allocation1 + $0x18] sm:$0xff pattern:$0x75316420]  ;;  %9564 = vmatpush.bf16.msra.mxu2 %v13453_v48 }
 0x2a3   : > { %3293 = vst [vmem:[#allocation1] ss:$2 sm:$0xff] %v3234_v39  ;;  %v3235_v44 = vld [vmem:[%s19672_s0 + $0x68] sm:$0xff]  ;;  %v15567_v50 = vld [vmem:[%s17246_s10 + $0x108c] sm:$0xf0]  ;;  %9577 = vmatpush.bf16.msra.mxu3 %v13581_v52 }
 0x2a4   : > { %3294 = vst [vmem:[#allocation1 + $0x10] ss:$2 sm:$0xff] %v3235_v44  ;;  %v13180_v49 = vld [vmem:[%s17246_s10 + $0x1080] sm:$0xf]  ;;  %v15599_v55 = vld [vmem:[%s17246_s10 + $0x118c] sm:$0xf0] }
 0x2a5   : > { %v13308_v51 = vld [vmem:[%s17246_s10 + $0x1180] sm:$0xf]  ;;  %v15631_v57 = vld [vmem:[%s17246_s10 + $0x128c] sm:$0xf0]  ;;  %v13181_v61 = vor.u32 %v15567_v50, %v13180_v49 }
 0x2a6   : > { %v13436_v56 = vld [vmem:[%s17246_s10 + $0x1280] sm:$0xf]  ;;  %v15663_v60 = vld [vmem:[%s17246_s10 + $0x138c] sm:$0xf0]  ;;  %v13309_v63 = vor.u32 %v15599_v55, %v13308_v51 }
 0x2a7   : > { %v13564_v59 = vld [vmem:[%s17246_s10 + $0x1380] sm:$0xf]  ;;  %v13437_v0 = vor.u32 %v15631_v57, %v13436_v56  ;;  %v15563_v2 = vld [vmem:[%s17246_s10 + $0x106c] sm:$0xf0]  ;;  %9539 = vmatpush.bf16.msra.mxu0 %v13181_v61 }
 0x2a8   : > { %v13164_v1 = vld [vmem:[%s17246_s10 + $0x1060] sm:$0xf]  ;;  %v13565_v4 = vor.u32 %v15663_v60, %v13564_v59  ;;  %v15595_v5 = vld [vmem:[%s17246_s10 + $0x116c] sm:$0xf0]  ;;  %9552 = vmatpush.bf16.msra.mxu1 %v13309_v63 }
 0x2a9   : > { %v13292_v3 = vld [vmem:[%s17246_s10 + $0x1160] sm:$0xf]  ;;  %v15627_v7 = vld [vmem:[%s17246_s10 + $0x126c] sm:$0xf0]  ;;  %v13165_v12 = vor.u32 %v15563_v2, %v13164_v1  ;;  %9565 = vmatpush.bf16.msra.mxu2 %v13437_v0 }
 0x2aa   : > { %v13420_v6 = vld [vmem:[%s17246_s10 + $0x1260] sm:$0xf]  ;;  %v15659_v10 = vld [vmem:[%s17246_s10 + $0x136c] sm:$0xf0]  ;;  %v13293_v13 = vor.u32 %v15595_v5, %v13292_v3  ;;  %9578 = vmatpush.bf16.msra.mxu3 %v13565_v4 }
 0x2ab   : > { %v13548_v8 = vld [vmem:[%s17246_s10 + $0x1360] sm:$0xf]  ;;  %v13421_v11 = vor.u32 %v15627_v7, %v13420_v6  ;;  %v15559_v15 = vld [vmem:[%s17246_s10 + $0x104c] sm:$0xf0]  ;;  %9540 = vmatpush.bf16.msra.mxu0 %v13165_v12 }
 0x2ac   : > { %v13148_v21 = vld [vmem:[%s17246_s10 + $0x1040] sm:$0xf]  ;;  %v13549_v53 = vor.u32 %v15659_v10, %v13548_v8  ;;  %v15591_v29 = vld [vmem:[%s17246_s10 + $0x114c] sm:$0xf0]  ;;  %9553 = vmatpush.bf16.msra.mxu1 %v13293_v13 }
 0x2ad   : > { %v13276_v28 = vld [vmem:[%s17246_s10 + $0x1140] sm:$0xf]  ;;  %v15623_v19 = vld [vmem:[%s17246_s10 + $0x124c] sm:$0xf0]  ;;  %v13149_v34 = vor.u32 %v15559_v15, %v13148_v21  ;;  %9566 = vmatpush.bf16.msra.mxu2 %v13421_v11 }
 0x2ae   : > { %v13404_v32 = vld [vmem:[%s17246_s10 + $0x1240] sm:$0xf]  ;;  %v15655_v54 = vld [vmem:[%s17246_s10 + $0x134c] sm:$0xf0]  ;;  %v13277_v58 = vor.u32 %v15591_v29, %v13276_v28  ;;  %9579 = vmatpush.bf16.msra.mxu3 %v13549_v53 }
 0x2af   : > { %v13532_v33 = vld [vmem:[%s17246_s10 + $0x1340] sm:$0xf]  ;;  %v13405_v35 = vor.u32 %v15623_v19, %v13404_v32  ;;  %v15555_v37 = vld [vmem:[%s17246_s10 + $0x102c] sm:$0xf0]  ;;  %9541 = vmatpush.bf16.msra.mxu0 %v13149_v34  ;;  %v17712_v34 = vpack.c.bf16 %v17640_v38, %v17640_v38 }
 0x2b0   : > { %v13132_v36 = vld [vmem:[%s17246_s10 + $0x1020] sm:$0xf]  ;;  %v13533_v62 = vor.u32 %v15655_v54, %v13532_v33  ;;  %v15587_v44 = vld [vmem:[%s17246_s10 + $0x112c] sm:$0xf0]  ;;  %9554 = vmatpush.bf16.msra.mxu1 %v13277_v58 }
 0x2b1   : > { %v13260_v39 = vld [vmem:[%s17246_s10 + $0x1120] sm:$0xf]  ;;  %v15619_v47 = vld [vmem:[%s17246_s10 + $0x122c] sm:$0xf0]  ;;  %v13133_v50 = vor.u32 %v15555_v37, %v13132_v36  ;;  %9567 = vmatpush.bf16.msra.mxu2 %v13405_v35  ;;  %v17719_v37 = vpack.c.bf16 %v17646_v41, %v17646_v41 }
 0x2b2   : > { %v13388_v46 = vld [vmem:[%s17246_s10 + $0x1220] sm:$0xf]  ;;  %v15651_v49 = vld [vmem:[%s17246_s10 + $0x132c] sm:$0xf0]  ;;  %v13261_v55 = vor.u32 %v15587_v44, %v13260_v39  ;;  %9580 = vmatpush.bf16.msra.mxu3 %v13533_v62  ;;  %v17723_v39 = vpack.c.bf16 %v17648_v42, %v17648_v42 }
 0x2b3   : > { %v13516_v48 = vld [vmem:[%s17246_s10 + $0x1320] sm:$0xf]  ;;  %v15551_v52 = vld [vmem:[%s17246_s10 + $0x100c] sm:$0xf0]  ;;  %v13389_v56 = vor.u32 %v15619_v47, %v13388_v46  ;;  %9542 = vmatpush.bf16.msra.mxu0 %v13133_v50  ;;  %v17730_v46 = vpack.c.bf16 %v17655_v45, %v17655_v45  ;;  %v3236_v45 = vld [vmem:[%s19672_s0 + $0x70] sm:$0xff] }
 0x2b4   : > { %v13116_v51 = vld [vmem:[%s17246_s10 + $0x1000] sm:$0xf]  ;;  %v15583_v59 = vld [vmem:[%s17246_s10 + $0x110c] sm:$0xf0]  ;;  %v13517_v61 = vor.u32 %v15651_v49, %v13516_v48  ;;  %9555 = vmatpush.bf16.msra.mxu1 %v13261_v55 }
 0x2b5   : > { %v13244_v57 = vld [vmem:[%s17246_s10 + $0x1100] sm:$0xf]  ;;  %v15615_v63 = vld [vmem:[%s17246_s10 + $0x120c] sm:$0xf0]  ;;  %v13117_v5 = vor.u32 %v15551_v52, %v13116_v51  ;;  %9568 = vmatpush.bf16.msra.mxu2 %v13389_v56 }
 0x2b6   : > { %v13372_v60 = vld [vmem:[%s17246_s10 + $0x1200] sm:$0xf]  ;;  %v15647_v1 = vld [vmem:[%s17246_s10 + $0x130c] sm:$0xf0]  ;;  %v13245_v10 = vor.u32 %v15583_v59, %v13244_v57  ;;  %9581 = vmatpush.bf16.msra.mxu3 %v13517_v61 }
 0x2b7   : > { %v13500_v0 = vld [vmem:[%s17246_s10 + $0x1300] sm:$0xf]  ;;  %v15707_v3 = vld [vmem:[%s17246_s10 + $0x14ec] sm:$0xf0]  ;;  %v13373_v12 = vor.u32 %v15615_v63, %v13372_v60  ;;  %9543 = vmatpush.bf16.msra.mxu0 %v13117_v5 }
 0x2b8   : > { %v13740_v2 = vld [vmem:[%s17246_s10 + $0x14e0] sm:$0xf]  ;;  %v15739_v6 = vld [vmem:[%s17246_s10 + $0x15ec] sm:$0xf0]  ;;  %v13501_v21 = vor.u32 %v15647_v1, %v13500_v0  ;;  %9556 = vmatpush.bf16.msra.mxu1 %v13245_v10 }
 0x2b9   : > { %v13868_v4 = vld [vmem:[%s17246_s10 + $0x15e0] sm:$0xf]  ;;  %v15771_v8 = vld [vmem:[%s17246_s10 + $0x16ec] sm:$0xf0]  ;;  %v13741_v15 = vor.u32 %v15707_v3, %v13740_v2  ;;  %9569 = vmatpush.bf16.msra.mxu2 %v13373_v12 }
 0x2ba   : > { %v13996_v7 = vld [vmem:[%s17246_s10 + $0x16e0] sm:$0xf]  ;;  %v15803_v11 = vld [vmem:[%s17246_s10 + $0x17ec] sm:$0xf0]  ;;  %v13869_v53 = vor.u32 %v15739_v6, %v13868_v4  ;;  %9582 = vmatpush.bf16.msra.mxu3 %v13501_v21  ;;  %9544 = vmatmul.bf16.vlgmr.msra.gmra.mxu0 %v17712_v34 }
 0x2bb   : > { %v14124_v13 = vld [vmem:[%s17246_s10 + $0x17e0] sm:$0xf]  ;;  %v13997_v29 = vor.u32 %v15771_v8, %v13996_v7  ;;  %v15703_v32 = vld [vmem:[%s17246_s10 + $0x14cc] sm:$0xf0]  ;;  %9588 = vmatpush.bf16.msrb.mxu0 %v13741_v15  ;;  %9557 = vmatmul.bf16.vlgmr.msra.gmra.mxu1 %v17723_v39 }
 0x2bc   : > { %v13724_v28 = vld [vmem:[%s17246_s10 + $0x14c0] sm:$0xf]  ;;  %v15735_v33 = vld [vmem:[%s17246_s10 + $0x15cc] sm:$0xf0]  ;;  %v14125_v54 = vor.u32 %v15803_v11, %v14124_v13  ;;  %9601 = vmatpush.bf16.msrb.mxu1 %v13869_v53  ;;  %9570 = vmatmul.bf16.vlgmr.msra.gmra.mxu2 %v17719_v37 }
 0x2bd   : > { %v13852_v19 = vld [vmem:[%s17246_s10 + $0x15c0] sm:$0xf]  ;;  %v15767_v35 = vld [vmem:[%s17246_s10 + $0x16cc] sm:$0xf0]  ;;  %v13725_v47 = vor.u32 %v15703_v32, %v13724_v28  ;;  %9614 = vmatpush.bf16.msrb.mxu2 %v13997_v29  ;;  %9583 = vmatmul.bf16.vlgmr.msra.gmra.mxu3 %v17730_v46 }
 0x2be   : > { %v13980_v58 = vld [vmem:[%s17246_s10 + $0x16c0] sm:$0xf]  ;;  %v15799_v62 = vld [vmem:[%s17246_s10 + $0x17cc] sm:$0xf0]  ;;  %v13853_v42 = vor.u32 %v15735_v33, %v13852_v19  ;;  %9627 = vmatpush.bf16.msrb.mxu3 %v14125_v54 }
 0x2bf   : > { %v14108_v36 = vld [vmem:[%s17246_s10 + $0x17c0] sm:$0xf]  ;;  %v15699_v44 = vld [vmem:[%s17246_s10 + $0x14ac] sm:$0xf0]  ;;  %v13981_v52 = vor.u32 %v15767_v35, %v13980_v58  ;;  %9589 = vmatpush.bf16.msrb.mxu0 %v13725_v47 }
 0x2c0   : > { %v13708_v38 = vld [vmem:[%s17246_s10 + $0x14a0] sm:$0xf]  ;;  %v15731_v49 = vld [vmem:[%s17246_s10 + $0x15ac] sm:$0xf0]  ;;  %v14109_v57 = vor.u32 %v15799_v62, %v14108_v36  ;;  %9602 = vmatpush.bf16.msrb.mxu1 %v13853_v42 }
 0x2c1   : > { %v13836_v48 = vld [vmem:[%s17246_s10 + $0x15a0] sm:$0xf]  ;;  %v15763_v50 = vld [vmem:[%s17246_s10 + $0x16ac] sm:$0xf0]  ;;  %v13709_v0 = vor.u32 %v15699_v44, %v13708_v38  ;;  %9615 = vmatpush.bf16.msrb.mxu2 %v13981_v52 }
 0x2c2   : > { %v13964_v41 = vld [vmem:[%s17246_s10 + $0x16a0] sm:$0xf]  ;;  %v17736_v51 = vld.sshfl [vmem:[#allocation1 + $0x20] sm:$0xff pattern:$0x75316420]  ;;  %v13837_v1 = vor.u32 %v15731_v49, %v13836_v48  ;;  %9628 = vmatpush.bf16.msrb.mxu3 %v14109_v57 }
 0x2c3   : > { %v14092_v55 = vld [vmem:[%s17246_s10 + $0x17a0] sm:$0xf]  ;;  %v15795_v59 = vld [vmem:[%s17246_s10 + $0x17ac] sm:$0xf0]  ;;  %v13965_v2 = vor.u32 %v15763_v50, %v13964_v41  ;;  %9590 = vmatpush.bf16.msrb.mxu0 %v13709_v0 }
 0x2c4   : > { %v17746_v56 = vld.sshfl [vmem:[#allocation1 + $0x28] sm:$0xff pattern:$0x75316420]  ;;  %v3237_v60 = vld [vmem:[%s19672_s0 + $0x78] sm:$0xf]  ;;  %v14093_v6 = vor.u32 %v15795_v59, %v14092_v55  ;;  %9603 = vmatpush.bf16.msrb.mxu1 %v13837_v1 }
 0x2c5   : > { %3295 = vst [vmem:[#allocation1 + $0x20] ss:$2 sm:$0xff] %v3236_v45  ;;  %v17755_v61 = vld.sshfl [vmem:[#allocation1 + $0x30] sm:$0xff pattern:$0x75316420]  ;;  %9616 = vmatpush.bf16.msrb.mxu2 %v13965_v2 }
 0x2c6   : > { %v17757_v63 = vld.sshfl [vmem:[#allocation1 + $0x38] sm:$0xff pattern:$0x75316420]  ;;  %v13692_v3 = vld [vmem:[%s17246_s10 + $0x1480] sm:$0xf]  ;;  %9629 = vmatpush.bf16.msrb.mxu3 %v14093_v6 }
 0x2c7   : > { %3296 = vst [vmem:[#allocation1 + $0x30] ss:$2 sm:$0xff] %v3237_v60  ;;  %v15695_v4 = vld [vmem:[%s17246_s10 + $0x148c] sm:$0xf0]  ;;  %v13820_v5 = vld [vmem:[%s17246_s10 + $0x1580] sm:$0xf] }
 0x2c8   : > { %v15727_v7 = vld [vmem:[%s17246_s10 + $0x158c] sm:$0xf0]  ;;  %v13948_v8 = vld [vmem:[%s17246_s10 + $0x1680] sm:$0xf]  ;;  %v13693_v11 = vor.u32 %v15695_v4, %v13692_v3  ;;  %v4358_v2 = vld [vmem:[%s17792_s28] sm:$0xf] }
 0x2c9   : > { %v15759_v10 = vld [vmem:[%s17246_s10 + $0x168c] sm:$0xf0]  ;;  %v14076_v12 = vld [vmem:[%s17246_s10 + $0x1780] sm:$0xf]  ;;  %v13821_v15 = vor.u32 %v15727_v7, %v13820_v5 }
 0x2ca   : > { %v15791_v13 = vld [vmem:[%s17246_s10 + $0x178c] sm:$0xf0]  ;;  %v13676_v21 = vld [vmem:[%s17246_s10 + $0x1460] sm:$0xf]  ;;  %v13949_v28 = vor.u32 %v15759_v10, %v13948_v8  ;;  %9591 = vmatpush.bf16.msrb.mxu0 %v13693_v11  ;;  %v4360_v11 = vperm.slane %v4358_v2, 0 }
 0x2cb   : > { %v15691_v53 = vld [vmem:[%s17246_s10 + $0x146c] sm:$0xf0]  ;;  %v13804_v29 = vld [vmem:[%s17246_s10 + $0x1560] sm:$0xf]  ;;  %v14077_v19 = vor.u32 %v15791_v13, %v14076_v12  ;;  %9604 = vmatpush.bf16.msrb.mxu1 %v13821_v15 }
 0x2cc   : > { %v15723_v32 = vld [vmem:[%s17246_s10 + $0x156c] sm:$0xf0]  ;;  %v13932_v33 = vld [vmem:[%s17246_s10 + $0x1660] sm:$0xf]  ;;  %v13677_v36 = vor.u32 %v15691_v53, %v13676_v21  ;;  %9617 = vmatpush.bf16.msrb.mxu2 %v13949_v28 }
 0x2cd   : > { %v15755_v54 = vld [vmem:[%s17246_s10 + $0x166c] sm:$0xf0]  ;;  %v14060_v58 = vld [vmem:[%s17246_s10 + $0x1760] sm:$0xf]  ;;  %v13805_v62 = vor.u32 %v15723_v32, %v13804_v29  ;;  %9630 = vmatpush.bf16.msrb.mxu3 %v14077_v19 }
 0x2ce   : > { %v15787_v35 = vld [vmem:[%s17246_s10 + $0x176c] sm:$0xf0]  ;;  %v13933_v38 = vor.u32 %v15755_v54, %v13932_v33  ;;  %v13660_v44 = vld [vmem:[%s17246_s10 + $0x1440] sm:$0xf]  ;;  %9592 = vmatpush.bf16.msrb.mxu0 %v13677_v36 }
 0x2cf   : > { %v15687_v47 = vld [vmem:[%s17246_s10 + $0x144c] sm:$0xf0]  ;;  %v13788_v48 = vld [vmem:[%s17246_s10 + $0x1540] sm:$0xf]  ;;  %v14061_v49 = vor.u32 %v15787_v35, %v14060_v58  ;;  %9605 = vmatpush.bf16.msrb.mxu1 %v13805_v62  ;;  %v9337_v62 = vpop.f32.mrf.mxu0 }
 0x2d0   : > { %v15719_v41 = vld [vmem:[%s17246_s10 + $0x154c] sm:$0xf0]  ;;  %v13916_v50 = vld [vmem:[%s17246_s10 + $0x1640] sm:$0xf]  ;;  %v13661_v45 = vor.u32 %v15687_v47, %v13660_v44  ;;  %9618 = vmatpush.bf16.msrb.mxu2 %v13933_v38 }
 0x2d1   : > { %v15751_v42 = vld [vmem:[%s17246_s10 + $0x164c] sm:$0xf0]  ;;  %v14044_v52 = vld [vmem:[%s17246_s10 + $0x1740] sm:$0xf]  ;;  %v13789_v59 = vor.u32 %v15719_v41, %v13788_v48  ;;  %9631 = vmatpush.bf16.msrb.mxu3 %v14061_v49  ;;  %v9338_v49 = vadd.f32 %v9337_v62, %v4360_v11  ;;  %v9350_v41 = vpop.f32.mrf.mxu1  ;;  %v17833_v11 = vpack.c.bf16 %v17755_v61, %v17755_v61 }
 0x2d2   : > { %v15783_v55 = vld [vmem:[%s17246_s10 + $0x174c] sm:$0xf0]  ;;  %v13644_v57 = vld [vmem:[%s17246_s10 + $0x1420] sm:$0xf]  ;;  %v13917_v60 = vor.u32 %v15751_v42, %v13916_v50  ;;  %9593 = vmatpush.bf16.msrb.mxu0 %v13661_v45 }
 0x2d3   : > { %v15683_v0 = vld [vmem:[%s17246_s10 + $0x142c] sm:$0xf0]  ;;  %v13772_v1 = vld [vmem:[%s17246_s10 + $0x1520] sm:$0xf]  ;;  %v14045_v3 = vor.u32 %v15783_v55, %v14044_v52  ;;  %9606 = vmatpush.bf16.msrb.mxu1 %v13789_v59  ;;  %v9351_v59 = vadd.f32 %v9350_v41, %v9338_v49 }
 0x2d4   : > { %v15715_v4 = vld [vmem:[%s17246_s10 + $0x152c] sm:$0xf0]  ;;  %v13900_v5 = vld [vmem:[%s17246_s10 + $0x1620] sm:$0xf]  ;;  %v13645_v10 = vor.u32 %v15683_v0, %v13644_v57  ;;  %9619 = vmatpush.bf16.msrb.mxu2 %v13917_v60  ;;  %v9363_v60 = vpop.f32.mrf.mxu2  ;;  %v9376_v0 = vpop.f32.mrf.mxu3 }
 0x2d5   : > { %v15747_v6 = vld [vmem:[%s17246_s10 + $0x162c] sm:$0xf0]  ;;  %v14028_v7 = vld [vmem:[%s17246_s10 + $0x1720] sm:$0xf]  ;;  %v13773_v21 = vor.u32 %v15715_v4, %v13772_v1  ;;  %9632 = vmatpush.bf16.msrb.mxu3 %v14045_v3 }
 0x2d6   : > { %v15779_v8 = vld [vmem:[%s17246_s10 + $0x172c] sm:$0xf0]  ;;  %v13628_v12 = vld [vmem:[%s17246_s10 + $0x1400] sm:$0xf]  ;;  %v13901_v15 = vor.u32 %v15747_v6, %v13900_v5  ;;  %9594 = vmatpush.bf16.msrb.mxu0 %v13645_v10 }
 0x2d7   : > { %v15679_v13 = vld [vmem:[%s17246_s10 + $0x140c] sm:$0xf0]  ;;  %v13756_v28 = vld [vmem:[%s17246_s10 + $0x1500] sm:$0xf]  ;;  %v14029_v32 = vor.u32 %v15779_v8, %v14028_v7  ;;  %9607 = vmatpush.bf16.msrb.mxu1 %v13773_v21  ;;  %v17826_v7 = vpack.c.bf16 %v17736_v51, %v17736_v51  ;;  %v17837_v21 = vpack.c.bf16 %v17746_v56, %v17746_v56 }
 0x2d8   : > { %v15711_v53 = vld [vmem:[%s17246_s10 + $0x150c] sm:$0xf0]  ;;  %v13884_v29 = vld [vmem:[%s17246_s10 + $0x1600] sm:$0xf]  ;;  %v13629_v38 = vor.u32 %v15679_v13, %v13628_v12  ;;  %9620 = vmatpush.bf16.msrb.mxu2 %v13901_v15  ;;  %v9364_v13 = vadd.f32 %v9363_v60, %v9351_v59 }
 0x2d9   : > { %v15743_v19 = vld [vmem:[%s17246_s10 + $0x160c] sm:$0xf0]  ;;  %v14012_v33 = vld [vmem:[%s17246_s10 + $0x1700] sm:$0xf]  ;;  %v13757_v50 = vor.u32 %v15711_v53, %v13756_v28  ;;  %9633 = vmatpush.bf16.msrb.mxu3 %v14029_v32  ;;  %v17843_v28 = vpack.c.bf16 %v17757_v63, %v17757_v63  ;;  %v9352_v62 = vpop.f32.mrf.mxu1 }
 0x2da   : > { %v15775_v54 = vld [vmem:[%s17246_s10 + $0x170c] sm:$0xf0]  ;;  %v14252_v58 = vld [vmem:[%s17246_s10 + $0x18e0] sm:$0xf]  ;;  %v13885_v42 = vor.u32 %v15743_v19, %v13884_v29  ;;  %9595 = vmatpush.bf16.msrb.mxu0 %v13629_v38  ;;  %v9377_v29 = vadd.f32 %v9376_v0, %v9364_v13 }
 0x2db   : > { %v15835_v35 = vld [vmem:[%s17246_s10 + $0x18ec] sm:$0xf0]  ;;  %v14380_v36 = vld [vmem:[%s17246_s10 + $0x19e0] sm:$0xf]  ;;  %v14013_v45 = vor.u32 %v15775_v54, %v14012_v33  ;;  %9608 = vmatpush.bf16.msrb.mxu1 %v13757_v50  ;;  %v9339_v54 = vpop.f32.mrf.mxu0 }
 0x2dc   : > { %v15867_v44 = vld [vmem:[%s17246_s10 + $0x19ec] sm:$0xf0]  ;;  %v14508_v47 = vld [vmem:[%s17246_s10 + $0x1ae0] sm:$0xf]  ;;  %v14253_v57 = vor.u32 %v15835_v35, %v14252_v58  ;;  %9621 = vmatpush.bf16.msrb.mxu2 %v13885_v42  ;;  %v9378_v49 = vpop.f32.mrf.mxu3 }
 0x2dd   : > { %v15899_v48 = vld [vmem:[%s17246_s10 + $0x1aec] sm:$0xf0]  ;;  %v14636_v52 = vld [vmem:[%s17246_s10 + $0x1be0] sm:$0xf]  ;;  %v14381_v1 = vor.u32 %v15867_v44, %v14380_v36  ;;  %9634 = vmatpush.bf16.msrb.mxu3 %v14013_v45  ;;  %9596 = vmatmul.bf16.vlgmr.msrb.gmra.mxu0 %v17826_v7 }
 0x2de   : > { %v15931_v55 = vld [vmem:[%s17246_s10 + $0x1bec] sm:$0xf0]  ;;  %v14509_v2 = vor.u32 %v15899_v48, %v14508_v47  ;;  %v14236_v3 = vld [vmem:[%s17246_s10 + $0x18c0] sm:$0xf]  ;;  %9640 = vmatpush.bf16.msra.mxu0 %v14253_v57  ;;  %9609 = vmatmul.bf16.vlgmr.msrb.gmra.mxu1 %v17837_v21  ;;  %v9365_v48 = vpop.f32.mrf.mxu2 }
 0x2df   : > { %v15831_v4 = vld [vmem:[%s17246_s10 + $0x18cc] sm:$0xf0]  ;;  %v14364_v5 = vld [vmem:[%s17246_s10 + $0x19c0] sm:$0xf]  ;;  %v14637_v6 = vor.u32 %v15931_v55, %v14636_v52  ;;  %9653 = vmatpush.bf16.msra.mxu1 %v14381_v1  ;;  %9622 = vmatmul.bf16.vlgmr.msrb.gmra.mxu2 %v17833_v11 }
 0x2e0   : > { %v15863_v8 = vld [vmem:[%s17246_s10 + $0x19cc] sm:$0xf0]  ;;  %v14492_v10 = vld [vmem:[%s17246_s10 + $0x1ac0] sm:$0xf]  ;;  %v14237_v53 = vor.u32 %v15831_v4, %v14236_v3  ;;  %9666 = vmatpush.bf16.msra.mxu2 %v14509_v2  ;;  %9635 = vmatmul.bf16.vlgmr.msrb.gmra.mxu3 %v17843_v28 }
 0x2e1   : > { %v15895_v12 = vld [vmem:[%s17246_s10 + $0x1acc] sm:$0xf0]  ;;  %v14620_v15 = vld [vmem:[%s17246_s10 + $0x1bc0] sm:$0xf]  ;;  %v14365_v61 = vor.u32 %v15863_v8, %v14364_v5  ;;  %9679 = vmatpush.bf16.msra.mxu3 %v14637_v6 }
 0x2e2   : > { %v15927_v51 = vld [vmem:[%s17246_s10 + $0x1bcc] sm:$0xf0]  ;;  %v14493_v56 = vor.u32 %v15895_v12, %v14492_v10  ;;  %v14220_v32 = vld [vmem:[%s17246_s10 + $0x18a0] sm:$0xf]  ;;  %9641 = vmatpush.bf16.msra.mxu0 %v14237_v53 }
 0x2e3   : > { %v15827_v19 = vld [vmem:[%s17246_s10 + $0x18ac] sm:$0xf0]  ;;  %v14348_v33 = vld [vmem:[%s17246_s10 + $0x19a0] sm:$0xf]  ;;  %v14621_v58 = vor.u32 %v15927_v51, %v14620_v15  ;;  %9654 = vmatpush.bf16.msra.mxu1 %v14365_v61  ;;  %v9389_v61 = vpop.f32.mrf.mxu0 }
 0x2e4   : > { %v15859_v35 = vld [vmem:[%s17246_s10 + $0x19ac] sm:$0xf0]  ;;  %v14476_v63 = vld [vmem:[%s17246_s10 + $0x1aa0] sm:$0xf]  ;;  %v14221_v47 = vor.u32 %v15827_v19, %v14220_v32  ;;  %9667 = vmatpush.bf16.msra.mxu2 %v14493_v56  ;;  %v9390_v32 = vadd.f32 %v9389_v61, %v9377_v29  ;;  %v9402_v19 = vpop.f32.mrf.mxu1  ;;  %v9428_v48 = vpop.f32.mrf.mxu3 }
 0x2e5   : > { %v15891_v36 = vld [vmem:[%s17246_s10 + $0x1aac] sm:$0xf0]  ;;  %v14604_v38 = vld [vmem:[%s17246_s10 + $0x1ba0] sm:$0xf]  ;;  %v14349_v41 = vor.u32 %v15859_v35, %v14348_v33  ;;  %9680 = vmatpush.bf16.msra.mxu3 %v14621_v58 }
 0x2e6   : > { %v15923_v44 = vld [vmem:[%s17246_s10 + $0x1bac] sm:$0xf0]  ;;  %v14477_v50 = vor.u32 %v15891_v36, %v14476_v63  ;;  %v14204_v42 = vld [vmem:[%s17246_s10 + $0x1880] sm:$0xf]  ;;  %9642 = vmatpush.bf16.msra.mxu0 %v14221_v47  ;;  %v9415_v36 = vpop.f32.mrf.mxu2  ;;  %v9403_v29 = vadd.f32 %v9402_v19, %v9390_v32 }
 0x2e7   : > { %v15823_v52 = vld [vmem:[%s17246_s10 + $0x188c] sm:$0xf0]  ;;  %v14332_v55 = vld [vmem:[%s17246_s10 + $0x1980] sm:$0xf]  ;;  %v14605_v45 = vor.u32 %v15923_v44, %v14604_v38  ;;  %9655 = vmatpush.bf16.msra.mxu1 %v14349_v41 }
 0x2e8   : > { %v15855_v57 = vld [vmem:[%s17246_s10 + $0x198c] sm:$0xf0]  ;;  %v14460_v59 = vld [vmem:[%s17246_s10 + $0x1a80] sm:$0xf]  ;;  %v14205_v2 = vor.u32 %v15823_v52, %v14204_v42  ;;  %9668 = vmatpush.bf16.msra.mxu2 %v14477_v50  ;;  %v9416_v42 = vadd.f32 %v9415_v36, %v9403_v29 }
 0x2e9   : > { %v15887_v60 = vld [vmem:[%s17246_s10 + $0x1a8c] sm:$0xf0]  ;;  %v14588_v0 = vld [vmem:[%s17246_s10 + $0x1b80] sm:$0xf]  ;;  %v14333_v3 = vor.u32 %v15855_v57, %v14332_v55  ;;  %9681 = vmatpush.bf16.msra.mxu3 %v14605_v45 }
 0x2ea   : > { %v15919_v1 = vld [vmem:[%s17246_s10 + $0x1b8c] sm:$0xf0]  ;;  %v14461_v4 = vor.u32 %v15887_v60, %v14460_v59  ;;  %v14188_v5 = vld [vmem:[%s17246_s10 + $0x1860] sm:$0xf]  ;;  %9643 = vmatpush.bf16.msra.mxu0 %v14205_v2 }
 0x2eb   : > { %v15819_v6 = vld [vmem:[%s17246_s10 + $0x186c] sm:$0xf0]  ;;  %v14316_v8 = vld [vmem:[%s17246_s10 + $0x1960] sm:$0xf]  ;;  %v14589_v10 = vor.u32 %v15919_v1, %v14588_v0  ;;  %9656 = vmatpush.bf16.msra.mxu1 %v14333_v3  ;;  %v17887_v3 = vadd.f32 %v9428_v48, %v9416_v42  ;;  %v15065_v48 = vld [vmem:[%s17246_s10 + $0xe4] sm:$0xf] }
 0x2ec   : > { %v15851_v12 = vld [vmem:[%s17246_s10 + $0x196c] sm:$0xf0]  ;;  %v14444_v13 = vld [vmem:[%s17246_s10 + $0x1a60] sm:$0xf]  ;;  %v14189_v56 = vor.u32 %v15819_v6, %v14188_v5  ;;  %9669 = vmatpush.bf16.msra.mxu2 %v14461_v4  ;;  %v9430_v36 = vpop.f32.mrf.mxu3 }
 0x2ed   : > { %v15883_v15 = vld [vmem:[%s17246_s10 + $0x1a6c] sm:$0xf0]  ;;  %v14572_v51 = vld [vmem:[%s17246_s10 + $0x1b60] sm:$0xf]  ;;  %v14317_v33 = vor.u32 %v15851_v12, %v14316_v8  ;;  %9682 = vmatpush.bf16.msra.mxu3 %v14589_v10  ;;  %v9391_v8 = vpop.f32.mrf.mxu0 }
 0x2ee   : > { %v15915_v53 = vld [vmem:[%s17246_s10 + $0x1b6c] sm:$0xf0]  ;;  %v14445_v54 = vor.u32 %v15883_v15, %v14444_v13  ;;  %v14172_v58 = vld [vmem:[%s17246_s10 + $0x1840] sm:$0xf]  ;;  %9644 = vmatpush.bf16.msra.mxu0 %v14189_v56 }
 0x2ef   : > { %v15815_v35 = vld [vmem:[%s17246_s10 + $0x184c] sm:$0xf0]  ;;  %v14300_v63 = vld [vmem:[%s17246_s10 + $0x1940] sm:$0xf]  ;;  %v14573_v62 = vor.u32 %v15915_v53, %v14572_v51  ;;  %9657 = vmatpush.bf16.msra.mxu1 %v14317_v33  ;;  %v9404_v51 = vpop.f32.mrf.mxu1  ;;  %v9417_v33 = vpop.f32.mrf.mxu2 }
 0x2f0   : > { %v15847_v38 = vld [vmem:[%s17246_s10 + $0x194c] sm:$0xf0]  ;;  %v14428_v44 = vld [vmem:[%s17246_s10 + $0x1a40] sm:$0xf]  ;;  %v14173_v50 = vor.u32 %v15815_v35, %v14172_v58  ;;  %9670 = vmatpush.bf16.msra.mxu2 %v14445_v54  ;;  %v15061_v51 = vld [vmem:[%s17246_s10 + $0xc4] sm:$0xf] }
 0x2f1   : > { %v15879_v47 = vld [vmem:[%s17246_s10 + $0x1a4c] sm:$0xf0]  ;;  %v14556_v49 = vld [vmem:[%s17246_s10 + $0x1b40] sm:$0xf]  ;;  %v14301_v52 = vor.u32 %v15847_v38, %v14300_v63  ;;  %9683 = vmatpush.bf16.msra.mxu3 %v14573_v62 }
 0x2f2   : > { %v15911_v41 = vld [vmem:[%s17246_s10 + $0x1b4c] sm:$0xf0]  ;;  %v14429_v55 = vor.u32 %v15879_v47, %v14428_v44  ;;  %v14156_v45 = vld [vmem:[%s17246_s10 + $0x1820] sm:$0xf]  ;;  %9645 = vmatpush.bf16.msra.mxu0 %v14173_v50 }
 0x2f3   : > { %v15811_v57 = vld [vmem:[%s17246_s10 + $0x182c] sm:$0xf0]  ;;  %v14284_v59 = vld [vmem:[%s17246_s10 + $0x1920] sm:$0xf]  ;;  %v14557_v60 = vor.u32 %v15911_v41, %v14556_v49  ;;  %9658 = vmatpush.bf16.msra.mxu1 %v14301_v52  ;;  %v11182_v49 = vld [vmem:[%s17246_s10 + $0xf0] sm:$0xf0] }
 0x2f4   : > { %v15843_v0 = vld [vmem:[%s17246_s10 + $0x192c] sm:$0xf0]  ;;  %v14412_v1 = vld [vmem:[%s17246_s10 + $0x1a20] sm:$0xf]  ;;  %v14157_v10 = vor.u32 %v15811_v57, %v14156_v45  ;;  %9671 = vmatpush.bf16.msra.mxu2 %v14429_v55 }
 0x2f5   : > { %v15875_v2 = vld [vmem:[%s17246_s10 + $0x1a2c] sm:$0xf0]  ;;  %v14540_v4 = vld [vmem:[%s17246_s10 + $0x1b20] sm:$0xf]  ;;  %v14285_v53 = vor.u32 %v15843_v0, %v14284_v59  ;;  %9684 = vmatpush.bf16.msra.mxu3 %v14557_v60 }
 0x2f6   : > { %v15907_v5 = vld [vmem:[%s17246_s10 + $0x1b2c] sm:$0xf0]  ;;  %v14140_v6 = vld [vmem:[%s17246_s10 + $0x1800] sm:$0xf]  ;;  %v14413_v61 = vor.u32 %v15875_v2, %v14412_v1  ;;  %9646 = vmatpush.bf16.msra.mxu0 %v14157_v10 }
 0x2f7   : > { %v15807_v12 = vld [vmem:[%s17246_s10 + $0x180c] sm:$0xf0]  ;;  %v14268_v13 = vld [vmem:[%s17246_s10 + $0x1900] sm:$0xf]  ;;  %v14541_v54 = vor.u32 %v15907_v5, %v14540_v4  ;;  %9659 = vmatpush.bf16.msra.mxu1 %v14285_v53  ;;  %v11185_v5 = vor.u32 %v15065_v48, %v11182_v49  ;;  %v11166_v53 = vld [vmem:[%s17246_s10 + $0xd0] sm:$0xf0] }
 0x2f8   : > { %v15839_v15 = vld [vmem:[%s17246_s10 + $0x190c] sm:$0xf0]  ;;  %v14396_v56 = vld [vmem:[%s17246_s10 + $0x1a00] sm:$0xf]  ;;  %v14141_v47 = vor.u32 %v15807_v12, %v14140_v6  ;;  %9672 = vmatpush.bf16.msra.mxu2 %v14413_v61 }
 0x2f9   : > { %v15871_v32 = vld [vmem:[%s17246_s10 + $0x1a0c] sm:$0xf0]  ;;  %v14524_v19 = vld [vmem:[%s17246_s10 + $0x1b00] sm:$0xf]  ;;  %v14269_v41 = vor.u32 %v15839_v15, %v14268_v13  ;;  %9685 = vmatpush.bf16.msra.mxu3 %v14541_v54 }
 0x2fa   : > { %v15903_v58 = vld [vmem:[%s17246_s10 + $0x1b0c] sm:$0xf0]  ;;  %v14764_v35 = vld [vmem:[%s17246_s10 + $0x1ce0] sm:$0xf]  ;;  %v14397_v50 = vor.u32 %v15871_v32, %v14396_v56  ;;  %9647 = vmatpush.bf16.msra.mxu0 %v14141_v47 }
 0x2fb   : > { %v15963_v63 = vld [vmem:[%s17246_s10 + $0x1cec] sm:$0xf0]  ;;  %v14892_v62 = vld [vmem:[%s17246_s10 + $0x1de0] sm:$0xf]  ;;  %v14525_v55 = vor.u32 %v15903_v58, %v14524_v19  ;;  %9660 = vmatpush.bf16.msra.mxu1 %v14269_v41 }
 0x2fc   : > { %v15995_v38 = vld [vmem:[%s17246_s10 + $0x1dec] sm:$0xf0]  ;;  %v15020_v44 = vld [vmem:[%s17246_s10 + $0x1ee0] sm:$0xf]  ;;  %v14765_v45 = vor.u32 %v15963_v63, %v14764_v35  ;;  %9673 = vmatpush.bf16.msra.mxu2 %v14397_v50  ;;  %v11169_v35 = vor.u32 %v15061_v51, %v11166_v53 }
 0x2fd   : > { %v16027_v29 = vld [vmem:[%s17246_s10 + $0x1eec] sm:$0xf0]  ;;  %v3297_v42 = vld.sshfl [vmem:[#allocation1] sm:$0xff pattern:$0x75316420]  ;;  %v14893_v60 = vor.u32 %v15995_v38, %v14892_v62  ;;  %9686 = vmatpush.bf16.msra.mxu3 %v14525_v55 }
 0x2fe   : > { %v3299_v52 = vld.sshfl [vmem:[#allocation1 + $0x10] sm:$0xff pattern:$0x75316420]  ;;  %v3298_v57 = vld.sshfl [vmem:[#allocation1 + $0x8] sm:$0xff pattern:$0x75316420]  ;;  %v15021_v0 = vor.u32 %v16027_v29, %v15020_v44  ;;  %v17910_v6 = vpack.c.bf16 %v3297_v42, %v3297_v42  ;;  %9692 = vmatpush.bf16.msrb.mxu0 %v14765_v45 }
 0x2ff   : > { %v3300_v59 = vld.sshfl [vmem:[#allocation1 + $0x18] sm:$0xff pattern:$0x75316420]  ;;  %v14748_v1 = vld [vmem:[%s17246_s10 + $0x1cc0] sm:$0xf]  ;;  %v17915_v13 = vpack.c.bf16 %v3299_v52, %v3299_v52  ;;  %v17917_v15 = vpack.c.bf16 %v3298_v57, %v3298_v57  ;;  %9705 = vmatpush.bf16.msrb.mxu1 %v14893_v60  ;;  %v9441_v57 = vpop.f32.mrf.mxu0 }
 0x300   : > { %v15959_v2 = vld [vmem:[%s17246_s10 + $0x1ccc] sm:$0xf0]  ;;  %v14876_v4 = vld [vmem:[%s17246_s10 + $0x1dc0] sm:$0xf]  ;;  %v17921_v61 = vpack.c.bf16 %v3300_v59, %v3300_v59  ;;  %9718 = vmatpush.bf16.msrb.mxu2 %v15021_v0  ;;  %9648 = vmatmul.bf16.vlgmr.msra.gmra.mxu0 %v17910_v6  ;;  %v15057_v38 = vld [vmem:[%s17246_s10 + $0xa4] sm:$0xf]  ;;  %v9442_v0 = vadd.f32 %v9441_v57, %v17887_v3 }
 0x301   : > { %v15991_v8 = vld [vmem:[%s17246_s10 + $0x1dcc] sm:$0xf0]  ;;  %v15004_v10 = vld [vmem:[%s17246_s10 + $0x1ec0] sm:$0xf]  ;;  %v14749_v56 = vor.u32 %v15959_v2, %v14748_v1  ;;  %9731 = vmatpush.bf16.msrb.mxu3 %v11185_v5  ;;  %9674 = vmatmul.bf16.vlgmr.msra.gmra.mxu2 %v17915_v13  ;;  %v11150_v44 = vld [vmem:[%s17246_s10 + $0xb0] sm:$0xf0]  ;;  %v9454_v2 = vpop.f32.mrf.mxu1 }
 0x302   : > { %v16023_v12 = vld [vmem:[%s17246_s10 + $0x1ecc] sm:$0xf0]  ;;  %v14877_v32 = vor.u32 %v15991_v8, %v14876_v4  ;;  %v14732_v33 = vld [vmem:[%s17246_s10 + $0x1ca0] sm:$0xf]  ;;  %9661 = vmatmul.bf16.vlgmr.msra.gmra.mxu1 %v17917_v15  ;;  %9687 = vmatmul.bf16.vlgmr.msra.gmra.mxu3 %v17921_v61  ;;  %v11153_v42 = vor.u32 %v15057_v38, %v11150_v44  ;;  %v15053_v59 = vld [vmem:[%s17246_s10 + $0x84] sm:$0xf]  ;;  %v9455_v53 = vadd.f32 %v9454_v2, %v9442_v0  ;;  %v9467_v44 = vpop.f32.mrf.mxu2 }
 0x303   : > { %v15005_v19 = vor.u32 %v16023_v12, %v15004_v10  ;;  %v15955_v54 = vld [vmem:[%s17246_s10 + $0x1cac] sm:$0xf0]  ;;  %v14860_v58 = vld [vmem:[%s17246_s10 + $0x1da0] sm:$0xf]  ;;  %9693 = vmatpush.bf16.msrb.mxu0 %v14749_v56  ;;  %v11134_v60 = vld [vmem:[%s17246_s10 + $0x90] sm:$0xf0] }
 0x304   : > { %v15987_v63 = vld [vmem:[%s17246_s10 + $0x1dac] sm:$0xf0]  ;;  %v14988_v36 = vld [vmem:[%s17246_s10 + $0x1ea0] sm:$0xf]  ;;  %v14733_v47 = vor.u32 %v15955_v54, %v14732_v33  ;;  %9706 = vmatpush.bf16.msrb.mxu1 %v14877_v32  ;;  %v11137_v51 = vor.u32 %v15053_v59, %v11134_v60  ;;  %v11118_v33 = vld [vmem:[%s17246_s10 + $0x70] sm:$0xf0] }
 0x305   : > { %v16019_v62 = vld [vmem:[%s17246_s10 + $0x1eac] sm:$0xf0]  ;;  %9719 = vmatpush.bf16.msrb.mxu2 %v15005_v19  ;;  %v14861_v29 = vor.u32 %v15987_v63, %v14860_v58  ;;  %v14716_v49 = vld [vmem:[%s17246_s10 + $0x1c80] sm:$0xf]  ;;  %9732 = vmatpush.bf16.msrb.mxu3 %v11169_v35  ;;  %v15049_v19 = vld [vmem:[%s17246_s10 + $0x64] sm:$0xf] }
 0x306   : > { %v14989_v48 = vor.u32 %v16019_v62, %v14988_v36  ;;  %v15951_v41 = vld [vmem:[%s17246_s10 + $0x1c8c] sm:$0xf0]  ;;  %v14844_v50 = vld [vmem:[%s17246_s10 + $0x1d80] sm:$0xf]  ;;  %v11121_v38 = vor.u32 %v15049_v19, %v11118_v33 }
 0x307   : > { %v15983_v52 = vld [vmem:[%s17246_s10 + $0x1d8c] sm:$0xf0]  ;;  %v14972_v55 = vld [vmem:[%s17246_s10 + $0x1e80] sm:$0xf]  ;;  %9694 = vmatpush.bf16.msrb.mxu0 %v14733_v47  ;;  %v14717_v1 = vor.u32 %v15951_v41, %v14716_v49  ;;  %v9468_v49 = vadd.f32 %v9467_v44, %v9455_v53  ;;  %v9480_v41 = vpop.f32.mrf.mxu3 }
 0x308   : > { %v16015_v45 = vld [vmem:[%s17246_s10 + $0x1e8c] sm:$0xf0]  ;;  %9707 = vmatpush.bf16.msrb.mxu1 %v14861_v29  ;;  %v14845_v4 = vor.u32 %v15983_v52, %v14844_v50  ;;  %v14700_v8 = vld [vmem:[%s17246_s10 + $0x1c60] sm:$0xf]  ;;  %v15045_v50 = vld [vmem:[%s17246_s10 + $0x44] sm:$0xf]  ;;  %v9443_v52 = vpop.f32.mrf.mxu0 }
 0x309   : > { %9720 = vmatpush.bf16.msrb.mxu2 %v14989_v48  ;;  %v14973_v5 = vor.u32 %v16015_v45, %v14972_v55  ;;  %v15947_v10 = vld [vmem:[%s17246_s10 + $0x1c6c] sm:$0xf0]  ;;  %v14828_v12 = vld [vmem:[%s17246_s10 + $0x1d60] sm:$0xf]  ;;  %9733 = vmatpush.bf16.msrb.mxu3 %v11153_v42  ;;  %v11102_v42 = vld [vmem:[%s17246_s10 + $0x50] sm:$0xf0]  ;;  %v9456_v45 = vpop.f32.mrf.mxu1  ;;  %v17960_v57 = vadd.f32 %v9480_v41, %v9468_v49 }
 0x30a   : > { %v15979_v56 = vld [vmem:[%s17246_s10 + $0x1d6c] sm:$0xf0]  ;;  %v14956_v32 = vld [vmem:[%s17246_s10 + $0x1e60] sm:$0xf]  ;;  %v14701_v54 = vor.u32 %v15947_v10, %v14700_v8  ;;  %v9469_v44 = vpop.f32.mrf.mxu2  ;;  %v15193_v52 = vld [vmem:[%s17246_s10 + $0x4e4] sm:$0xf] }
 0x30b   : > { %v16011_v3 = vld [vmem:[%s17246_s10 + $0x1e6c] sm:$0xf0]  ;;  %9695 = vmatpush.bf16.msrb.mxu0 %v14717_v1  ;;  %v14829_v58 = vor.u32 %v15979_v56, %v14828_v12  ;;  %v14684_v63 = vld [vmem:[%s17246_s10 + $0x1c40] sm:$0xf]  ;;  %v15041_v12 = vld [vmem:[%s17246_s10 + $0x24] sm:$0xf] }
 0x30c   : > { %9708 = vmatpush.bf16.msrb.mxu1 %v14845_v4  ;;  %v14957_v35 = vor.u32 %v16011_v3, %v14956_v32  ;;  %v15943_v36 = vld [vmem:[%s17246_s10 + $0x1c4c] sm:$0xf0]  ;;  %v14812_v62 = vld [vmem:[%s17246_s10 + $0x1d40] sm:$0xf]  ;;  %v11105_v4 = vor.u32 %v15045_v50, %v11102_v42  ;;  %v15161_v50 = vld [vmem:[%s17246_s10 + $0x3e4] sm:$0xf] }
 0x30d   : > { %9721 = vmatpush.bf16.msrb.mxu2 %v14973_v5  ;;  %9734 = vmatpush.bf16.msrb.mxu3 %v11137_v51  ;;  %v15975_v47 = vld [vmem:[%s17246_s10 + $0x1d4c] sm:$0xf0]  ;;  %v14940_v29 = vld [vmem:[%s17246_s10 + $0x1e40] sm:$0xf]  ;;  %v14685_v55 = vor.u32 %v15943_v36, %v14684_v63  ;;  %v11086_v51 = vld [vmem:[%s17246_s10 + $0x30] sm:$0xf0] }
 0x30e   : > { %v16007_v48 = vld [vmem:[%s17246_s10 + $0x1e4c] sm:$0xf0]  ;;  %v14813_v59 = vor.u32 %v15975_v47, %v14812_v62  ;;  %v14668_v0 = vld [vmem:[%s17246_s10 + $0x1c20] sm:$0xf]  ;;  %v11089_v63 = vor.u32 %v15041_v12, %v11086_v51  ;;  %v15037_v36 = vld [vmem:[%s17246_s10 + $0x4] sm:$0xf] }
 0x30f   : > { %9696 = vmatpush.bf16.msrb.mxu0 %v14701_v54  ;;  %v14941_v60 = vor.u32 %v16007_v48, %v14940_v29  ;;  %v15939_v1 = vld [vmem:[%s17246_s10 + $0x1c2c] sm:$0xf0]  ;;  %v14796_v2 = vld [vmem:[%s17246_s10 + $0x1d20] sm:$0xf]  ;;  %v11070_v62 = vld [vmem:[%s17246_s10 + $0x10] sm:$0xf0]  ;;  %v9482_v49 = vpop.f32.mrf.mxu3 }
 0x310   : > { %9709 = vmatpush.bf16.msrb.mxu1 %v14829_v58  ;;  %v15971_v5 = vld [vmem:[%s17246_s10 + $0x1d2c] sm:$0xf0]  ;;  %v14924_v8 = vld [vmem:[%s17246_s10 + $0x1e20] sm:$0xf]  ;;  %v14669_v53 = vor.u32 %v15939_v1, %v14668_v0  ;;  %v11310_v47 = vld [vmem:[%s17246_s10 + $0x1f0] sm:$0xf0]  ;;  %v11073_v0 = vor.u32 %v15037_v36, %v11070_v62 }
 0x311   : > { %9722 = vmatpush.bf16.msrb.mxu2 %v14957_v35  ;;  %9735 = vmatpush.bf16.msrb.mxu3 %v11121_v38  ;;  %v16003_v10 = vld [vmem:[%s17246_s10 + $0x1e2c] sm:$0xf0]  ;;  %v14652_v56 = vld [vmem:[%s17246_s10 + $0x1c00] sm:$0xf]  ;;  %v14797_v19 = vor.u32 %v15971_v5, %v14796_v2  ;;  %v15097_v38 = vld [vmem:[%s17246_s10 + $0x1e4] sm:$0xf] }
 0x312   : > { %v15935_v32 = vld [vmem:[%s17246_s10 + $0x1c0c] sm:$0xf0]  ;;  %v14780_v3 = vld [vmem:[%s17246_s10 + $0x1d00] sm:$0xf]  ;;  %v14925_v33 = vor.u32 %v16003_v10, %v14924_v8  ;;  %v15129_v29 = vld [vmem:[%s17246_s10 + $0x2e4] sm:$0xf]  ;;  %v11313_v1 = vor.u32 %v15097_v38, %v11310_v47 }
 0x313   : > { %9697 = vmatpush.bf16.msrb.mxu0 %v14685_v55  ;;  %v15967_v54 = vld [vmem:[%s17246_s10 + $0x1d0c] sm:$0xf0]  ;;  %v14908_v58 = vld [vmem:[%s17246_s10 + $0x1e00] sm:$0xf]  ;;  %v11438_v48 = vld [vmem:[%s17246_s10 + $0x2f0] sm:$0xf0]  ;;  %v14653_v41 = vor.u32 %v15935_v32, %v14652_v56 }
 0x314   : > { %9710 = vmatpush.bf16.msrb.mxu1 %v14813_v59  ;;  %v15999_v35 = vld [vmem:[%s17246_s10 + $0x1e0c] sm:$0xf0]  ;;  %v11566_v42 = vld [vmem:[%s17246_s10 + $0x3f0] sm:$0xf0]  ;;  %v14781_v55 = vor.u32 %v15967_v54, %v14780_v3  ;;  %v11441_v5 = vor.u32 %v15129_v29, %v11438_v48  ;;  %v15093_v10 = vld [vmem:[%s17246_s10 + $0x1c4] sm:$0xf] }
 0x315   : > { %9723 = vmatpush.bf16.msrb.mxu2 %v14941_v60  ;;  %9736 = vmatpush.bf16.msrb.mxu3 %v11105_v4  ;;  %v14909_v45 = vor.u32 %v15999_v35, %v14908_v58  ;;  %v11694_v59 = vld [vmem:[%s17246_s10 + $0x4f0] sm:$0xf0]  ;;  %v3301_v60 = vld.sshfl [vmem:[#allocation1 + $0x20] sm:$0xff pattern:$0x75316420]  ;;  %v11569_v8 = vor.u32 %v15161_v50, %v11566_v42 }
 0x316   : > { %v3303_v2 = vld.sshfl [vmem:[#allocation1 + $0x30] sm:$0xff pattern:$0x75316420]  ;;  %v3302_v4 = vld.sshfl [vmem:[#allocation1 + $0x28] sm:$0xff pattern:$0x75316420]  ;;  %v17989_v56 = vpack.c.bf16 %v3301_v60, %v3301_v60 }
 0x317   : > { %9698 = vmatpush.bf16.msrb.mxu0 %v14669_v53  ;;  %v11294_v12 = vld [vmem:[%s17246_s10 + $0x1d0] sm:$0xf0]  ;;  %v15125_v51 = vld [vmem:[%s17246_s10 + $0x2c4] sm:$0xf]  ;;  %v11697_v53 = vor.u32 %v15193_v52, %v11694_v59  ;;  %v17996_v54 = vpack.c.bf16 %v3302_v4, %v3302_v4 }
 0x318   : > { %9711 = vmatpush.bf16.msrb.mxu1 %v14797_v19  ;;  %v11422_v32 = vld [vmem:[%s17246_s10 + $0x2d0] sm:$0xf0]  ;;  %v15157_v3 = vld [vmem:[%s17246_s10 + $0x3c4] sm:$0xf] }
 0x319   : > { %9724 = vmatpush.bf16.msrb.mxu2 %v14925_v33  ;;  %9737 = vmatpush.bf16.msrb.mxu3 %v11089_v63  ;;  %v11550_v19 = vld [vmem:[%s17246_s10 + $0x3d0] sm:$0xf0]  ;;  %v17994_v33 = vpack.c.bf16 %v3303_v2, %v3303_v2  ;;  %v15189_v58 = vld [vmem:[%s17246_s10 + $0x4c4] sm:$0xf]  ;;  %v11297_v63 = vor.u32 %v15093_v10, %v11294_v12  ;;  %v11425_v36 = vor.u32 %v15125_v51, %v11422_v32  ;;  %v9506_v32 = vpop.f32.mrf.mxu1 }
 0x31a   : > { %v11678_v35 = vld [vmem:[%s17246_s10 + $0x4d0] sm:$0xf0]  ;;  %v11553_v62 = vor.u32 %v15157_v3, %v11550_v19  ;;  %v15089_v38 = vld [vmem:[%s17246_s10 + $0x1a4] sm:$0xf] }
 0x31b   : > { %9699 = vmatpush.bf16.msrb.mxu0 %v14653_v41  ;;  %v11278_v44 = vld [vmem:[%s17246_s10 + $0x1b0] sm:$0xf0]  ;;  %v15121_v47 = vld [vmem:[%s17246_s10 + $0x2a4] sm:$0xf]  ;;  %v11681_v29 = vor.u32 %v15189_v58, %v11678_v35 }
 0x31c   : > { %9712 = vmatpush.bf16.msrb.mxu1 %v14781_v55  ;;  %v11406_v48 = vld [vmem:[%s17246_s10 + $0x2b0] sm:$0xf0]  ;;  %v15153_v49 = vld [vmem:[%s17246_s10 + $0x3a4] sm:$0xf]  ;;  %v11281_v52 = vor.u32 %v15089_v38, %v11278_v44 }
 0x31d   : > { %9725 = vmatpush.bf16.msrb.mxu2 %v14909_v45  ;;  %9738 = vmatpush.bf16.msrb.mxu3 %v11073_v0  ;;  %v11534_v41 = vld [vmem:[%s17246_s10 + $0x3b0] sm:$0xf0]  ;;  %v15185_v50 = vld [vmem:[%s17246_s10 + $0x4a4] sm:$0xf]  ;;  %v11409_v55 = vor.u32 %v15121_v47, %v11406_v48 }
 0x31e   : > { %9700 = vmatmul.bf16.vlgmr.msrb.gmra.mxu0 %v17989_v56  ;;  %v11662_v42 = vld [vmem:[%s17246_s10 + $0x4b0] sm:$0xf0]  ;;  %v11537_v45 = vor.u32 %v15153_v49, %v11534_v41  ;;  %v15085_v59 = vld [vmem:[%s17246_s10 + $0x184] sm:$0xf] }
 0x31f   : > { %9744 = vmatpush.bf16.msra.mxu0 %v11313_v1  ;;  %9713 = vmatmul.bf16.vlgmr.msrb.gmra.mxu1 %v17996_v54  ;;  %v11262_v60 = vld [vmem:[%s17246_s10 + $0x190] sm:$0xf0]  ;;  %v15117_v0 = vld [vmem:[%s17246_s10 + $0x284] sm:$0xf]  ;;  %v11665_v1 = vor.u32 %v15185_v50, %v11662_v42 }
 0x320   : > { %9757 = vmatpush.bf16.msra.mxu1 %v11441_v5  ;;  %9726 = vmatmul.bf16.vlgmr.msrb.gmra.mxu2 %v17994_v33  ;;  %v11390_v2 = vld [vmem:[%s17246_s10 + $0x290] sm:$0xf0]  ;;  %v15149_v4 = vld [vmem:[%s17246_s10 + $0x384] sm:$0xf] }
 0x321   : > { %9770 = vmatpush.bf16.msra.mxu2 %v11569_v8  ;;  %9783 = vmatpush.bf16.msra.mxu3 %v11697_v53  ;;  %v11518_v5 = vld [vmem:[%s17246_s10 + $0x390] sm:$0xf0]  ;;  %v9493_v8 = vpop.f32.mrf.mxu0  ;;  %v15181_v10 = vld [vmem:[%s17246_s10 + $0x484] sm:$0xf]  ;;  %v11265_v53 = vor.u32 %v15085_v59, %v11262_v60  ;;  %v11393_v3 = vor.u32 %v15117_v0, %v11390_v2  ;;  %v9532_v2 = vpop.f32.mrf.mxu3 }
 0x322   : > { %9739 = vmatmul.bf16.vlgmr.msrb.gmra.mxu3 %v17374_v27  ;;  %v11646_v12 = vld [vmem:[%s17246_s10 + $0x490] sm:$0xf0]  ;;  %v9494_v51 = vadd.f32 %v9493_v8, %v17960_v57  ;;  %v11521_v19 = vor.u32 %v15149_v4, %v11518_v5  ;;  %v15081_v58 = vld [vmem:[%s17246_s10 + $0x164] sm:$0xf] }
 0x323   : > { %9745 = vmatpush.bf16.msra.mxu0 %v11297_v63  ;;  %v11246_v35 = vld [vmem:[%s17246_s10 + $0x170] sm:$0xf0]  ;;  %v15113_v63 = vld [vmem:[%s17246_s10 + $0x264] sm:$0xf] }
 0x324   : > { %9758 = vmatpush.bf16.msra.mxu1 %v11425_v36  ;;  %v11649_v36 = vor.u32 %v15181_v10, %v11646_v12  ;;  %v11374_v38 = vld [vmem:[%s17246_s10 + $0x270] sm:$0xf0]  ;;  %v15145_v44 = vld [vmem:[%s17246_s10 + $0x364] sm:$0xf]  ;;  %v11249_v48 = vor.u32 %v15081_v58, %v11246_v35  ;;  %v9508_v12 = vpop.f32.mrf.mxu1 }
 0x325   : > { %9771 = vmatpush.bf16.msra.mxu2 %v11553_v62  ;;  %9784 = vmatpush.bf16.msra.mxu3 %v11681_v29  ;;  %v9507_v62 = vadd.f32 %v9506_v32, %v9494_v51  ;;  %v11502_v57 = vld [vmem:[%s17246_s10 + $0x370] sm:$0xf0]  ;;  %v15177_v47 = vld [vmem:[%s17246_s10 + $0x464] sm:$0xf]  ;;  %v11377_v49 = vor.u32 %v15113_v63, %v11374_v38 }
 0x326   : > { %v11630_v29 = vld [vmem:[%s17246_s10 + $0x470] sm:$0xf0]  ;;  %v11505_v41 = vor.u32 %v15145_v44, %v11502_v57  ;;  %v15077_v50 = vld [vmem:[%s17246_s10 + $0x144] sm:$0xf] }
 0x327   : > { %9746 = vmatpush.bf16.msra.mxu0 %v11281_v52  ;;  %v11230_v42 = vld [vmem:[%s17246_s10 + $0x150] sm:$0xf0]  ;;  %v15109_v52 = vld [vmem:[%s17246_s10 + $0x244] sm:$0xf] }
 0x328   : > { %9759 = vmatpush.bf16.msra.mxu1 %v11409_v55  ;;  %v11633_v55 = vor.u32 %v15177_v47, %v11630_v29  ;;  %v11358_v59 = vld [vmem:[%s17246_s10 + $0x250] sm:$0xf0]  ;;  %v15141_v60 = vld [vmem:[%s17246_s10 + $0x344] sm:$0xf]  ;;  %v11233_v10 = vor.u32 %v15077_v50, %v11230_v42 }
 0x329   : > { %9772 = vmatpush.bf16.msra.mxu2 %v11537_v45  ;;  %9785 = vmatpush.bf16.msra.mxu3 %v11665_v1  ;;  %v9519_v45 = vpop.f32.mrf.mxu2  ;;  %v11486_v0 = vld [vmem:[%s17246_s10 + $0x350] sm:$0xf0]  ;;  %v15173_v4 = vld [vmem:[%s17246_s10 + $0x444] sm:$0xf]  ;;  %v9495_v8 = vpop.f32.mrf.mxu0 }
 0x32a   : > { %v9520_v1 = vadd.f32 %v9519_v45, %v9507_v62  ;;  %v11614_v5 = vld [vmem:[%s17246_s10 + $0x450] sm:$0xf0]  ;;  %v11489_v32 = vor.u32 %v15141_v60, %v11486_v0  ;;  %v15105_v58 = vld [vmem:[%s17246_s10 + $0x224] sm:$0xf] }
 0x32b   : > { %9747 = vmatpush.bf16.msra.mxu0 %v11265_v53  ;;  %v11361_v53 = vor.u32 %v15109_v52, %v11358_v59  ;;  %v11617_v35 = vor.u32 %v15173_v4, %v11614_v5  ;;  %v11342_v63 = vld [vmem:[%s17246_s10 + $0x230] sm:$0xf0]  ;;  %v15169_v38 = vld [vmem:[%s17246_s10 + $0x424] sm:$0xf]  ;;  %v9534_v4 = vpop.f32.mrf.mxu3 }
 0x32c   : > { %9760 = vmatpush.bf16.msra.mxu1 %v11393_v3  ;;  %v18037_v51 = vadd.f32 %v9532_v2, %v9520_v1  ;;  %v15073_v3 = vld [vmem:[%s17246_s10 + $0x124] sm:$0xf]  ;;  %v11470_v62 = vld [vmem:[%s17246_s10 + $0x330] sm:$0xf0] }
 0x32d   : > { %9773 = vmatpush.bf16.msra.mxu2 %v11521_v19  ;;  %9786 = vmatpush.bf16.msra.mxu3 %v11649_v36  ;;  %v11214_v19 = vld [vmem:[%s17246_s10 + $0x130] sm:$0xf0]  ;;  %v15137_v36 = vld [vmem:[%s17246_s10 + $0x324] sm:$0xf] }
 0x32e   : > { %v11598_v44 = vld [vmem:[%s17246_s10 + $0x430] sm:$0xf0]  ;;  %v11217_v57 = vor.u32 %v15073_v3, %v11214_v19  ;;  %v15069_v47 = vld [vmem:[%s17246_s10 + $0x104] sm:$0xf] }
 0x32f   : > { %9748 = vmatpush.bf16.msra.mxu0 %v11249_v48  ;;  %v11198_v29 = vld [vmem:[%s17246_s10 + $0x110] sm:$0xf0]  ;;  %v11345_v48 = vor.u32 %v15105_v58, %v11342_v63  ;;  %v15133_v42 = vld [vmem:[%s17246_s10 + $0x304] sm:$0xf]  ;;  %v11601_v52 = vor.u32 %v15169_v38, %v11598_v44 }
 0x330   : > { %9761 = vmatpush.bf16.msra.mxu1 %v11377_v49  ;;  %v11473_v49 = vor.u32 %v15137_v36, %v11470_v62  ;;  %v11326_v50 = vld [vmem:[%s17246_s10 + $0x210] sm:$0xf0]  ;;  %v15165_v45 = vld [vmem:[%s17246_s10 + $0x404] sm:$0xf]  ;;  %v11201_v5 = vor.u32 %v15069_v47, %v11198_v29 }
 0x331   : > { %9774 = vmatpush.bf16.msra.mxu2 %v11505_v41  ;;  %9787 = vmatpush.bf16.msra.mxu3 %v11633_v55  ;;  %v15101_v41 = vld [vmem:[%s17246_s10 + $0x204] sm:$0xf]  ;;  %v11454_v55 = vld [vmem:[%s17246_s10 + $0x310] sm:$0xf0]  ;;  %v9521_v60 = vpop.f32.mrf.mxu2 }
 0x332   : > { %v11582_v59 = vld [vmem:[%s17246_s10 + $0x410] sm:$0xf0]  ;;  %v15225_v0 = vld [vmem:[%s17246_s10 + $0x5e4] sm:$0xf] }
 0x333   : > { %9749 = vmatpush.bf16.msra.mxu0 %v11233_v10  ;;  %v11822_v1 = vld [vmem:[%s17246_s10 + $0x5f0] sm:$0xf0]  ;;  %v15257_v2 = vld [vmem:[%s17246_s10 + $0x6e4] sm:$0xf]  ;;  %v11585_v58 = vor.u32 %v15165_v45, %v11582_v59 }
 0x334   : > { %9762 = vmatpush.bf16.msra.mxu1 %v11361_v53  ;;  %v11950_v8 = vld [vmem:[%s17246_s10 + $0x6f0] sm:$0xf0]  ;;  %v15289_v10 = vld [vmem:[%s17246_s10 + $0x7e4] sm:$0xf]  ;;  %v11329_v53 = vor.u32 %v15101_v41, %v11326_v50 }
 0x335   : > { %9775 = vmatpush.bf16.msra.mxu2 %v11489_v32  ;;  %9788 = vmatpush.bf16.msra.mxu3 %v11617_v35  ;;  %v12078_v12 = vld [vmem:[%s17246_s10 + $0x7f0] sm:$0xf0]  ;;  %v11457_v32 = vor.u32 %v15133_v42, %v11454_v55  ;;  %v15321_v3 = vld [vmem:[%s17246_s10 + $0x8e4] sm:$0xf]  ;;  %v11825_v35 = vor.u32 %v15225_v0, %v11822_v1  ;;  %v11953_v63 = vor.u32 %v15257_v2, %v11950_v8 }
 0x336   : > { %v12206_v19 = vld [vmem:[%s17246_s10 + $0x8f0] sm:$0xf0]  ;;  %v12081_v36 = vor.u32 %v15289_v10, %v12078_v12  ;;  %v15221_v62 = vld [vmem:[%s17246_s10 + $0x5c4] sm:$0xf] }
 0x337   : > { %9750 = vmatpush.bf16.msra.mxu0 %v11217_v57  ;;  %v11806_v38 = vld [vmem:[%s17246_s10 + $0x5d0] sm:$0xf0]  ;;  %v15253_v44 = vld [vmem:[%s17246_s10 + $0x6c4] sm:$0xf]  ;;  %v12209_v57 = vor.u32 %v15321_v3, %v12206_v19 }
 0x338   : > { %9763 = vmatpush.bf16.msra.mxu1 %v11345_v48  ;;  %v11934_v47 = vld [vmem:[%s17246_s10 + $0x6d0] sm:$0xf0]  ;;  %v15285_v29 = vld [vmem:[%s17246_s10 + $0x7c4] sm:$0xf]  ;;  %v11809_v50 = vor.u32 %v15221_v62, %v11806_v38 }
 0x339   : > { %9776 = vmatpush.bf16.msra.mxu2 %v11473_v49  ;;  %9789 = vmatpush.bf16.msra.mxu3 %v11601_v52  ;;  %v12062_v48 = vld [vmem:[%s17246_s10 + $0x7d0] sm:$0xf0]  ;;  %v15317_v49 = vld [vmem:[%s17246_s10 + $0x8c4] sm:$0xf]  ;;  %v11937_v42 = vor.u32 %v15253_v44, %v11934_v47  ;;  %v9558_v47 = vpop.f32.mrf.mxu1 }
 0x33a   : > { %v12190_v41 = vld [vmem:[%s17246_s10 + $0x8d0] sm:$0xf0]  ;;  %v12065_v52 = vor.u32 %v15285_v29, %v12062_v48  ;;  %v15217_v55 = vld [vmem:[%s17246_s10 + $0x5a4] sm:$0xf] }
 0x33b   : > { %9751 = vmatpush.bf16.msra.mxu0 %v11201_v5  ;;  %v11790_v45 = vld [vmem:[%s17246_s10 + $0x5b0] sm:$0xf0]  ;;  %v15249_v59 = vld [vmem:[%s17246_s10 + $0x6a4] sm:$0xf]  ;;  %v12193_v60 = vor.u32 %v15317_v49, %v12190_v41 }
 0x33c   : > { %9764 = vmatpush.bf16.msra.mxu1 %v11329_v53  ;;  %v11918_v0 = vld [vmem:[%s17246_s10 + $0x6b0] sm:$0xf0]  ;;  %v15281_v1 = vld [vmem:[%s17246_s10 + $0x7a4] sm:$0xf]  ;;  %v11793_v8 = vor.u32 %v15217_v55, %v11790_v45 }
 0x33d   : > { %9777 = vmatpush.bf16.msra.mxu2 %v11457_v32  ;;  %9790 = vmatpush.bf16.msra.mxu3 %v11585_v58  ;;  %v12046_v2 = vld [vmem:[%s17246_s10 + $0x7b0] sm:$0xf0]  ;;  %v15313_v4 = vld [vmem:[%s17246_s10 + $0x8a4] sm:$0xf]  ;;  %v11921_v10 = vor.u32 %v15249_v59, %v11918_v0 }
 0x33e   : > { %v12174_v5 = vld [vmem:[%s17246_s10 + $0x8b0] sm:$0xf0]  ;;  %9752 = vmatmul.bf16.vlgmr.msra.gmra.mxu0 %v17380_v31  ;;  %v12049_v12 = vor.u32 %v15281_v1, %v12046_v2  ;;  %v15213_v53 = vld [vmem:[%s17246_s10 + $0x584] sm:$0xf] }
 0x33f   : > { %9796 = vmatpush.bf16.msrb.mxu0 %v11825_v35  ;;  %9765 = vmatmul.bf16.vlgmr.msra.gmra.mxu1 %v17369_v22  ;;  %v11774_v32 = vld [vmem:[%s17246_s10 + $0x590] sm:$0xf0]  ;;  %v15245_v3 = vld [vmem:[%s17246_s10 + $0x684] sm:$0xf]  ;;  %v12177_v19 = vor.u32 %v15313_v4, %v12174_v5 }
 0x340   : > { %9809 = vmatpush.bf16.msrb.mxu1 %v11953_v63  ;;  %9778 = vmatmul.bf16.vlgmr.msra.gmra.mxu2 %v17371_v24  ;;  %v11902_v58 = vld [vmem:[%s17246_s10 + $0x690] sm:$0xf0]  ;;  %v15277_v35 = vld [vmem:[%s17246_s10 + $0x784] sm:$0xf] }
 0x341   : > { %9822 = vmatpush.bf16.msrb.mxu2 %v12081_v36  ;;  %9835 = vmatpush.bf16.msrb.mxu3 %v12209_v57  ;;  %v12030_v63 = vld [vmem:[%s17246_s10 + $0x790] sm:$0xf0]  ;;  %v9545_v36 = vpop.f32.mrf.mxu0  ;;  %v15309_v62 = vld [vmem:[%s17246_s10 + $0x884] sm:$0xf]  ;;  %v11777_v57 = vor.u32 %v15213_v53, %v11774_v32  ;;  %v11905_v29 = vor.u32 %v15245_v3, %v11902_v58  ;;  %v9584_v58 = vpop.f32.mrf.mxu3 }
 0x342   : > { %9791 = vmatmul.bf16.vlgmr.msra.gmra.mxu3 %v17439_v40  ;;  %v12158_v38 = vld [vmem:[%s17246_s10 + $0x890] sm:$0xf0]  ;;  %v9546_v44 = vadd.f32 %v9545_v36, %v18037_v51  ;;  %v12033_v48 = vor.u32 %v15277_v35, %v12030_v63  ;;  %v15209_v49 = vld [vmem:[%s17246_s10 + $0x564] sm:$0xf] }
 0x343   : > { %9797 = vmatpush.bf16.msrb.mxu0 %v11809_v50  ;;  %v11758_v41 = vld [vmem:[%s17246_s10 + $0x570] sm:$0xf0]  ;;  %v15241_v50 = vld [vmem:[%s17246_s10 + $0x664] sm:$0xf] }
 0x344   : > { %9810 = vmatpush.bf16.msrb.mxu1 %v11937_v42  ;;  %v12161_v42 = vor.u32 %v15309_v62, %v12158_v38  ;;  %v11886_v55 = vld [vmem:[%s17246_s10 + $0x670] sm:$0xf0]  ;;  %v15273_v45 = vld [vmem:[%s17246_s10 + $0x764] sm:$0xf]  ;;  %v11761_v0 = vor.u32 %v15209_v49, %v11758_v41  ;;  %v9560_v38 = vpop.f32.mrf.mxu1 }
 0x345   : > { %9823 = vmatpush.bf16.msrb.mxu2 %v12065_v52  ;;  %9836 = vmatpush.bf16.msrb.mxu3 %v12193_v60  ;;  %v9559_v52 = vadd.f32 %v9558_v47, %v9546_v44  ;;  %v12014_v51 = vld [vmem:[%s17246_s10 + $0x770] sm:$0xf0]  ;;  %v15305_v59 = vld [vmem:[%s17246_s10 + $0x864] sm:$0xf]  ;;  %v11889_v1 = vor.u32 %v15241_v50, %v11886_v55 }
 0x346   : > { %v12142_v60 = vld [vmem:[%s17246_s10 + $0x870] sm:$0xf0]  ;;  %v12017_v2 = vor.u32 %v15273_v45, %v12014_v51  ;;  %v15205_v4 = vld [vmem:[%s17246_s10 + $0x544] sm:$0xf] }
 0x347   : > { %9798 = vmatpush.bf16.msrb.mxu0 %v11793_v8  ;;  %v11742_v5 = vld [vmem:[%s17246_s10 + $0x550] sm:$0xf0]  ;;  %v15237_v8 = vld [vmem:[%s17246_s10 + $0x644] sm:$0xf] }
 0x348   : > { %9811 = vmatpush.bf16.msrb.mxu1 %v11921_v10  ;;  %v12145_v10 = vor.u32 %v15305_v59, %v12142_v60  ;;  %v11870_v53 = vld [vmem:[%s17246_s10 + $0x650] sm:$0xf0]  ;;  %v15269_v32 = vld [vmem:[%s17246_s10 + $0x744] sm:$0xf]  ;;  %v11745_v62 = vor.u32 %v15205_v4, %v11742_v5 }
 0x349   : > { %9824 = vmatpush.bf16.msrb.mxu2 %v12049_v12  ;;  %9837 = vmatpush.bf16.msrb.mxu3 %v12177_v19  ;;  %v9571_v12 = vpop.f32.mrf.mxu2  ;;  %v11998_v3 = vld [vmem:[%s17246_s10 + $0x750] sm:$0xf0]  ;;  %v15301_v35 = vld [vmem:[%s17246_s10 + $0x844] sm:$0xf]  ;;  %v9547_v36 = vpop.f32.mrf.mxu0 }
 0x34a   : > { %v9572_v19 = vadd.f32 %v9571_v12, %v9559_v52  ;;  %v12126_v63 = vld [vmem:[%s17246_s10 + $0x850] sm:$0xf0]  ;;  %v12001_v47 = vor.u32 %v15269_v32, %v11998_v3  ;;  %v15233_v49 = vld [vmem:[%s17246_s10 + $0x624] sm:$0xf] }
 0x34b   : > { %9799 = vmatpush.bf16.msrb.mxu0 %v11777_v57  ;;  %v11873_v57 = vor.u32 %v15237_v8, %v11870_v53  ;;  %v12129_v41 = vor.u32 %v15301_v35, %v12126_v63  ;;  %v11854_v50 = vld [vmem:[%s17246_s10 + $0x630] sm:$0xf0]  ;;  %v15297_v55 = vld [vmem:[%s17246_s10 + $0x824] sm:$0xf]  ;;  %v9586_v35 = vpop.f32.mrf.mxu3 }
 0x34c   : > { %9812 = vmatpush.bf16.msrb.mxu1 %v11905_v29  ;;  %v18108_v44 = vadd.f32 %v9584_v58, %v9572_v19  ;;  %v15201_v29 = vld [vmem:[%s17246_s10 + $0x524] sm:$0xf]  ;;  %v11982_v52 = vld [vmem:[%s17246_s10 + $0x730] sm:$0xf0] }
 0x34d   : > { %9825 = vmatpush.bf16.msrb.mxu2 %v12033_v48  ;;  %9838 = vmatpush.bf16.msrb.mxu3 %v12161_v42  ;;  %v11726_v48 = vld [vmem:[%s17246_s10 + $0x530] sm:$0xf0]  ;;  %v15265_v42 = vld [vmem:[%s17246_s10 + $0x724] sm:$0xf] }
 0x34e   : > { %v12110_v45 = vld [vmem:[%s17246_s10 + $0x830] sm:$0xf0]  ;;  %v11729_v51 = vor.u32 %v15201_v29, %v11726_v48  ;;  %v15197_v59 = vld [vmem:[%s17246_s10 + $0x504] sm:$0xf] }
 0x34f   : > { %9800 = vmatpush.bf16.msrb.mxu0 %v11761_v0  ;;  %v11710_v60 = vld [vmem:[%s17246_s10 + $0x510] sm:$0xf0]  ;;  %v11857_v0 = vor.u32 %v15233_v49, %v11854_v50  ;;  %v15261_v5 = vld [vmem:[%s17246_s10 + $0x704] sm:$0xf]  ;;  %v12113_v8 = vor.u32 %v15297_v55, %v12110_v45 }
 0x350   : > { %9813 = vmatpush.bf16.msrb.mxu1 %v11889_v1  ;;  %v11985_v1 = vor.u32 %v15265_v42, %v11982_v52  ;;  %v11838_v4 = vld [vmem:[%s17246_s10 + $0x610] sm:$0xf0]  ;;  %v15293_v12 = vld [vmem:[%s17246_s10 + $0x804] sm:$0xf]  ;;  %v11713_v63 = vor.u32 %v15197_v59, %v11710_v60 }
 0x351   : > { %9826 = vmatpush.bf16.msrb.mxu2 %v12017_v2  ;;  %9839 = vmatpush.bf16.msrb.mxu3 %v12145_v10  ;;  %v15229_v2 = vld [vmem:[%s17246_s10 + $0x604] sm:$0xf]  ;;  %v11966_v10 = vld [vmem:[%s17246_s10 + $0x710] sm:$0xf0]  ;;  %v9573_v32 = vpop.f32.mrf.mxu2 }
 0x352   : > { %v12094_v53 = vld [vmem:[%s17246_s10 + $0x810] sm:$0xf0]  ;;  %v15353_v3 = vld [vmem:[%s17246_s10 + $0x9e4] sm:$0xf] }
 0x353   : > { %9801 = vmatpush.bf16.msrb.mxu0 %v11745_v62  ;;  %v12334_v19 = vld [vmem:[%s17246_s10 + $0x9f0] sm:$0xf0]  ;;  %v15385_v58 = vld [vmem:[%s17246_s10 + $0xae4] sm:$0xf]  ;;  %v12097_v49 = vor.u32 %v15293_v12, %v12094_v53 }
 0x354   : > { %9814 = vmatpush.bf16.msrb.mxu1 %v11873_v57  ;;  %v12462_v36 = vld [vmem:[%s17246_s10 + $0xaf0] sm:$0xf0]  ;;  %v15417_v62 = vld [vmem:[%s17246_s10 + $0xbe4] sm:$0xf]  ;;  %v11841_v57 = vor.u32 %v15229_v2, %v11838_v4 }
 0x355   : > { %9827 = vmatpush.bf16.msrb.mxu2 %v12001_v47  ;;  %9840 = vmatpush.bf16.msrb.mxu3 %v12129_v41  ;;  %v12590_v38 = vld [vmem:[%s17246_s10 + $0xbf0] sm:$0xf0]  ;;  %v11969_v47 = vor.u32 %v15261_v5, %v11966_v10  ;;  %v15449_v29 = vld [vmem:[%s17246_s10 + $0xce4] sm:$0xf]  ;;  %v12337_v41 = vor.u32 %v15353_v3, %v12334_v19  ;;  %v12465_v50 = vor.u32 %v15385_v58, %v12462_v36 }
 0x356   : > { %v12718_v48 = vld [vmem:[%s17246_s10 + $0xcf0] sm:$0xf0]  ;;  %v12593_v42 = vor.u32 %v15417_v62, %v12590_v38  ;;  %v15349_v52 = vld [vmem:[%s17246_s10 + $0x9c4] sm:$0xf] }
 0x357   : > { %9802 = vmatpush.bf16.msrb.mxu0 %v11729_v51  ;;  %v12318_v55 = vld [vmem:[%s17246_s10 + $0x9d0] sm:$0xf0]  ;;  %v15381_v45 = vld [vmem:[%s17246_s10 + $0xac4] sm:$0xf]  ;;  %v12721_v51 = vor.u32 %v15449_v29, %v12718_v48 }
 0x358   : > { %9815 = vmatpush.bf16.msrb.mxu1 %v11857_v0  ;;  %v12446_v59 = vld [vmem:[%s17246_s10 + $0xad0] sm:$0xf0]  ;;  %v15413_v60 = vld [vmem:[%s17246_s10 + $0xbc4] sm:$0xf]  ;;  %v12321_v4 = vor.u32 %v15349_v52, %v12318_v55 }
 0x359   : > { %9828 = vmatpush.bf16.msrb.mxu2 %v11985_v1  ;;  %9841 = vmatpush.bf16.msrb.mxu3 %v12113_v8  ;;  %v12574_v0 = vld [vmem:[%s17246_s10 + $0xbd0] sm:$0xf0]  ;;  %v15445_v1 = vld [vmem:[%s17246_s10 + $0xcc4] sm:$0xf]  ;;  %v12449_v5 = vor.u32 %v15381_v45, %v12446_v59 }
 0x35a   : > { %v12702_v2 = vld [vmem:[%s17246_s10 + $0xcd0] sm:$0xf0]  ;;  %v12577_v8 = vor.u32 %v15413_v60, %v12574_v0  ;;  %v15345_v10 = vld [vmem:[%s17246_s10 + $0x9a4] sm:$0xf] }
 0x35b   : > { %9803 = vmatpush.bf16.msrb.mxu0 %v11713_v63  ;;  %v12302_v12 = vld [vmem:[%s17246_s10 + $0x9b0] sm:$0xf0]  ;;  %v15377_v53 = vld [vmem:[%s17246_s10 + $0xaa4] sm:$0xf]  ;;  %v12705_v32 = vor.u32 %v15445_v1, %v12702_v2  ;;  %v9610_v59 = vpop.f32.mrf.mxu1 }
 0x35c   : > { %9816 = vmatpush.bf16.msrb.mxu1 %v11841_v57  ;;  %v12430_v3 = vld [vmem:[%s17246_s10 + $0xab0] sm:$0xf0]  ;;  %v15409_v19 = vld [vmem:[%s17246_s10 + $0xba4] sm:$0xf]  ;;  %v12305_v36 = vor.u32 %v15345_v10, %v12302_v12 }
 0x35d   : > { %9829 = vmatpush.bf16.msrb.mxu2 %v11969_v47  ;;  %9842 = vmatpush.bf16.msrb.mxu3 %v12097_v49  ;;  %v12558_v58 = vld [vmem:[%s17246_s10 + $0xbb0] sm:$0xf0]  ;;  %v15441_v35 = vld [vmem:[%s17246_s10 + $0xca4] sm:$0xf]  ;;  %v12433_v62 = vor.u32 %v15377_v53, %v12430_v3 }
 0x35e   : > { %9804 = vmatmul.bf16.vlgmr.msrb.gmra.mxu0 %v17444_v43  ;;  %v12686_v63 = vld [vmem:[%s17246_s10 + $0xcb0] sm:$0xf0]  ;;  %v12561_v38 = vor.u32 %v15409_v19, %v12558_v58  ;;  %v15341_v57 = vld [vmem:[%s17246_s10 + $0x984] sm:$0xf] }
 0x35f   : > { %9848 = vmatpush.bf16.msra.mxu0 %v12337_v41  ;;  %9817 = vmatmul.bf16.vlgmr.msrb.gmra.mxu1 %v17428_v23  ;;  %v12286_v47 = vld [vmem:[%s17246_s10 + $0x990] sm:$0xf0]  ;;  %v15373_v29 = vld [vmem:[%s17246_s10 + $0xa84] sm:$0xf]  ;;  %v12689_v48 = vor.u32 %v15441_v35, %v12686_v63 }
 0x360   : > { %9861 = vmatpush.bf16.msra.mxu1 %v12465_v50  ;;  %9830 = vmatmul.bf16.vlgmr.msrb.gmra.mxu2 %v17430_v26  ;;  %v12414_v49 = vld [vmem:[%s17246_s10 + $0xa90] sm:$0xf0]  ;;  %v15405_v41 = vld [vmem:[%s17246_s10 + $0xb84] sm:$0xf] }
 0x361   : > { %9874 = vmatpush.bf16.msra.mxu2 %v12593_v42  ;;  %9887 = vmatpush.bf16.msra.mxu3 %v12721_v51  ;;  %v12542_v50 = vld [vmem:[%s17246_s10 + $0xb90] sm:$0xf0]  ;;  %v9597_v42 = vpop.f32.mrf.mxu0  ;;  %v15437_v52 = vld [vmem:[%s17246_s10 + $0xc84] sm:$0xf]  ;;  %v12289_v51 = vor.u32 %v15341_v57, %v12286_v47  ;;  %v12417_v60 = vor.u32 %v15373_v29, %v12414_v49 }
 0x362   : > { %9843 = vmatmul.bf16.vlgmr.msrb.gmra.mxu3 %v17515_v9  ;;  %v12670_v55 = vld [vmem:[%s17246_s10 + $0xc90] sm:$0xf0]  ;;  %v9598_v45 = vadd.f32 %v9597_v42, %v18108_v44  ;;  %v12545_v0 = vor.u32 %v15405_v41, %v12542_v50  ;;  %v15337_v1 = vld [vmem:[%s17246_s10 + $0x964] sm:$0xf] }
 0x363   : > { %9849 = vmatpush.bf16.msra.mxu0 %v12321_v4  ;;  %v12270_v2 = vld [vmem:[%s17246_s10 + $0x970] sm:$0xf0]  ;;  %v15369_v4 = vld [vmem:[%s17246_s10 + $0xa64] sm:$0xf]  ;;  %v9636_v49 = vpop.f32.mrf.mxu3 }
 0x364   : > { %9862 = vmatpush.bf16.msra.mxu1 %v12449_v5  ;;  %v12673_v5 = vor.u32 %v15437_v52, %v12670_v55  ;;  %v12398_v10 = vld [vmem:[%s17246_s10 + $0xa70] sm:$0xf0]  ;;  %v15401_v12 = vld [vmem:[%s17246_s10 + $0xb64] sm:$0xf]  ;;  %v12273_v3 = vor.u32 %v15337_v1, %v12270_v2  ;;  %v9612_v55 = vpop.f32.mrf.mxu1 }
 0x365   : > { %9875 = vmatpush.bf16.msra.mxu2 %v12577_v8  ;;  %9888 = vmatpush.bf16.msra.mxu3 %v12705_v32  ;;  %v9611_v8 = vadd.f32 %v9610_v59, %v9598_v45  ;;  %v12526_v44 = vld [vmem:[%s17246_s10 + $0xb70] sm:$0xf0]  ;;  %v15433_v53 = vld [vmem:[%s17246_s10 + $0xc64] sm:$0xf]  ;;  %v12401_v19 = vor.u32 %v15369_v4, %v12398_v10 }
 0x366   : > { %v12654_v32 = vld [vmem:[%s17246_s10 + $0xc70] sm:$0xf0]  ;;  %v12529_v58 = vor.u32 %v15401_v12, %v12526_v44  ;;  %v15333_v35 = vld [vmem:[%s17246_s10 + $0x944] sm:$0xf] }
 0x367   : > { %9850 = vmatpush.bf16.msra.mxu0 %v12305_v36  ;;  %v12254_v63 = vld [vmem:[%s17246_s10 + $0x950] sm:$0xf0]  ;;  %v15365_v36 = vld [vmem:[%s17246_s10 + $0xa44] sm:$0xf] }
 0x368   : > { %9863 = vmatpush.bf16.msra.mxu1 %v12433_v62  ;;  %v12657_v62 = vor.u32 %v15433_v53, %v12654_v32  ;;  %v12382_v57 = vld [vmem:[%s17246_s10 + $0xa50] sm:$0xf0]  ;;  %v15397_v47 = vld [vmem:[%s17246_s10 + $0xb44] sm:$0xf]  ;;  %v12257_v52 = vor.u32 %v15333_v35, %v12254_v63 }
 0x369   : > { %9876 = vmatpush.bf16.msra.mxu2 %v12561_v38  ;;  %9889 = vmatpush.bf16.msra.mxu3 %v12689_v48  ;;  %v9623_v38 = vpop.f32.mrf.mxu2  ;;  %v12510_v29 = vld [vmem:[%s17246_s10 + $0xb50] sm:$0xf0]  ;;  %v15429_v41 = vld [vmem:[%s17246_s10 + $0xc44] sm:$0xf]  ;;  %v9599_v42 = vpop.f32.mrf.mxu0 }
 0x36a   : > { %v9624_v48 = vadd.f32 %v9623_v38, %v9611_v8  ;;  %v12638_v50 = vld [vmem:[%s17246_s10 + $0xc50] sm:$0xf0]  ;;  %v12513_v59 = vor.u32 %v15397_v47, %v12510_v29  ;;  %v15361_v1 = vld [vmem:[%s17246_s10 + $0xa24] sm:$0xf] }
 0x36b   : > { %9851 = vmatpush.bf16.msra.mxu0 %v12289_v51  ;;  %v12385_v51 = vor.u32 %v15365_v36, %v12382_v57  ;;  %v12641_v2 = vor.u32 %v15429_v41, %v12638_v50  ;;  %v12366_v4 = vld [vmem:[%s17246_s10 + $0xa30] sm:$0xf0]  ;;  %v15425_v10 = vld [vmem:[%s17246_s10 + $0xc24] sm:$0xf]  ;;  %v9638_v41 = vpop.f32.mrf.mxu3 }
 0x36c   : > { %9864 = vmatpush.bf16.msra.mxu1 %v12417_v60  ;;  %v18179_v45 = vadd.f32 %v9636_v49, %v9624_v48  ;;  %v15329_v60 = vld [vmem:[%s17246_s10 + $0x924] sm:$0xf]  ;;  %v12494_v8 = vld [vmem:[%s17246_s10 + $0xb30] sm:$0xf0] }
 0x36d   : > { %9877 = vmatpush.bf16.msra.mxu2 %v12545_v0  ;;  %9890 = vmatpush.bf16.msra.mxu3 %v12673_v5  ;;  %v12238_v0 = vld [vmem:[%s17246_s10 + $0x930] sm:$0xf0]  ;;  %v15393_v5 = vld [vmem:[%s17246_s10 + $0xb24] sm:$0xf] }
 0x36e   : > { %v12622_v12 = vld [vmem:[%s17246_s10 + $0xc30] sm:$0xf0]  ;;  %v12241_v44 = vor.u32 %v15329_v60, %v12238_v0  ;;  %v15325_v53 = vld [vmem:[%s17246_s10 + $0x904] sm:$0xf] }
 0x36f   : > { %9852 = vmatpush.bf16.msra.mxu0 %v12273_v3  ;;  %v12222_v32 = vld [vmem:[%s17246_s10 + $0x910] sm:$0xf0]  ;;  %v12369_v3 = vor.u32 %v15361_v1, %v12366_v4  ;;  %v15389_v63 = vld [vmem:[%s17246_s10 + $0xb04] sm:$0xf]  ;;  %v12625_v36 = vor.u32 %v15425_v10, %v12622_v12 }
 0x370   : > { %9865 = vmatpush.bf16.msra.mxu1 %v12401_v19  ;;  %v12497_v19 = vor.u32 %v15393_v5, %v12494_v8  ;;  %v12350_v35 = vld [vmem:[%s17246_s10 + $0xa10] sm:$0xf0]  ;;  %v15421_v38 = vld [vmem:[%s17246_s10 + $0xc04] sm:$0xf]  ;;  %v12225_v50 = vor.u32 %v15325_v53, %v12222_v32 }
 0x371   : > { %9878 = vmatpush.bf16.msra.mxu2 %v12529_v58  ;;  %9891 = vmatpush.bf16.msra.mxu3 %v12657_v62  ;;  %v15357_v58 = vld [vmem:[%s17246_s10 + $0xa04] sm:$0xf]  ;;  %v12478_v62 = vld [vmem:[%s17246_s10 + $0xb10] sm:$0xf0]  ;;  %v9625_v47 = vpop.f32.mrf.mxu2 }
 0x372   : > { %v12606_v57 = vld [vmem:[%s17246_s10 + $0xc10] sm:$0xf0]  ;;  %v15481_v29 = vld [vmem:[%s17246_s10 + $0xde4] sm:$0xf] }
 0x373   : > { %9853 = vmatpush.bf16.msra.mxu0 %v12257_v52  ;;  %v12846_v48 = vld [vmem:[%s17246_s10 + $0xdf0] sm:$0xf0]  ;;  %v15513_v49 = vld [vmem:[%s17246_s10 + $0xee4] sm:$0xf]  ;;  %v12609_v1 = vor.u32 %v15421_v38, %v12606_v57 }
 0x374   : > { %9866 = vmatpush.bf16.msra.mxu1 %v12385_v51  ;;  %v12974_v42 = vld [vmem:[%s17246_s10 + $0xef0] sm:$0xf0]  ;;  %v15545_v52 = vld [vmem:[%s17246_s10 + $0xfe4] sm:$0xf]  ;;  %v12353_v51 = vor.u32 %v15357_v58, %v12350_v35 }
 0x375   : > { %9879 = vmatpush.bf16.msra.mxu2 %v12513_v59  ;;  %9892 = vmatpush.bf16.msra.mxu3 %v12641_v2  ;;  %v13102_v55 = vld [vmem:[%s17246_s10 + $0xff0] sm:$0xf0]  ;;  %v12481_v59 = vor.u32 %v15389_v63, %v12478_v62  ;;  %v15577_v60 = vld [vmem:[%s17246_s10 + $0x10e4] sm:$0xf]  ;;  %v12849_v2 = vor.u32 %v15481_v29, %v12846_v48  ;;  %v12977_v4 = vor.u32 %v15513_v49, %v12974_v42 }
 0x376   : > { %v13230_v0 = vld [vmem:[%s17246_s10 + $0x10f0] sm:$0xf0]  ;;  %v13105_v5 = vor.u32 %v15545_v52, %v13102_v55  ;;  %v15477_v8 = vld [vmem:[%s17246_s10 + $0xdc4] sm:$0xf] }
 0x377   : > { %9854 = vmatpush.bf16.msra.mxu0 %v12241_v44  ;;  %v12830_v10 = vld [vmem:[%s17246_s10 + $0xdd0] sm:$0xf0]  ;;  %v15509_v12 = vld [vmem:[%s17246_s10 + $0xec4] sm:$0xf]  ;;  %v13233_v44 = vor.u32 %v15577_v60, %v13230_v0 }
 0x378   : > { %9867 = vmatpush.bf16.msra.mxu1 %v12369_v3  ;;  %v12958_v53 = vld [vmem:[%s17246_s10 + $0xed0] sm:$0xf0]  ;;  %v15541_v32 = vld [vmem:[%s17246_s10 + $0xfc4] sm:$0xf]  ;;  %v12833_v35 = vor.u32 %v15477_v8, %v12830_v10 }
 0x379   : > { %9880 = vmatpush.bf16.msra.mxu2 %v12497_v19  ;;  %9893 = vmatpush.bf16.msra.mxu3 %v12625_v36  ;;  %v13086_v3 = vld [vmem:[%s17246_s10 + $0xfd0] sm:$0xf0]  ;;  %v15573_v19 = vld [vmem:[%s17246_s10 + $0x10c4] sm:$0xf]  ;;  %v12961_v63 = vor.u32 %v15509_v12, %v12958_v53 }
 0x37a   : > { %v13214_v58 = vld [vmem:[%s17246_s10 + $0x10d0] sm:$0xf0]  ;;  %v13089_v36 = vor.u32 %v15541_v32, %v13086_v3  ;;  %v15473_v62 = vld [vmem:[%s17246_s10 + $0xda4] sm:$0xf] }
 0x37b   : > { %9855 = vmatpush.bf16.msra.mxu0 %v12225_v50  ;;  %v12814_v38 = vld [vmem:[%s17246_s10 + $0xdb0] sm:$0xf0]  ;;  %v15505_v57 = vld [vmem:[%s17246_s10 + $0xea4] sm:$0xf]  ;;  %v13217_v47 = vor.u32 %v15573_v19, %v13214_v58 }
 0x37c   : > { %9868 = vmatpush.bf16.msra.mxu1 %v12353_v51  ;;  %v12942_v29 = vld [vmem:[%s17246_s10 + $0xeb0] sm:$0xf0]  ;;  %v15537_v48 = vld [vmem:[%s17246_s10 + $0xfa4] sm:$0xf]  ;;  %v12817_v42 = vor.u32 %v15473_v62, %v12814_v38 }
 0x37d   : > { %9881 = vmatpush.bf16.msra.mxu2 %v12481_v59  ;;  %9894 = vmatpush.bf16.msra.mxu3 %v12609_v1  ;;  %v13070_v49 = vld [vmem:[%s17246_s10 + $0xfb0] sm:$0xf0]  ;;  %v15569_v41 = vld [vmem:[%s17246_s10 + $0x10a4] sm:$0xf]  ;;  %v12945_v52 = vor.u32 %v15505_v57, %v12942_v29 }
 0x37e   : > { %9856 = vmatmul.bf16.vlgmr.msra.gmra.mxu0 %v17526_v17  ;;  %v13198_v50 = vld [vmem:[%s17246_s10 + $0x10b0] sm:$0xf0]  ;;  %v13073_v55 = vor.u32 %v15537_v48, %v13070_v49  ;;  %v15469_v51 = vld [vmem:[%s17246_s10 + $0xd84] sm:$0xf] }
 0x37f   : > { %9900 = vmatpush.bf16.msrb.mxu0 %v12849_v2  ;;  %9869 = vmatmul.bf16.vlgmr.msra.gmra.mxu1 %v17522_v14  ;;  %v12798_v59 = vld [vmem:[%s17246_s10 + $0xd90] sm:$0xf0]  ;;  %v15501_v60 = vld [vmem:[%s17246_s10 + $0xe84] sm:$0xf]  ;;  %v13201_v0 = vor.u32 %v15569_v41, %v13198_v50  ;;  %v9662_v53 = vpop.f32.mrf.mxu1 }
 0x380   : > { %9913 = vmatpush.bf16.msrb.mxu1 %v12977_v4  ;;  %9882 = vmatmul.bf16.vlgmr.msra.gmra.mxu2 %v17532_v20  ;;  %v12926_v1 = vld [vmem:[%s17246_s10 + $0xe90] sm:$0xf0]  ;;  %v15533_v2 = vld [vmem:[%s17246_s10 + $0xf84] sm:$0xf] }
 0x381   : > { %9926 = vmatpush.bf16.msrb.mxu2 %v13105_v5  ;;  %9939 = vmatpush.bf16.msrb.mxu3 %v13233_v44  ;;  %v13054_v4 = vld [vmem:[%s17246_s10 + $0xf90] sm:$0xf0]  ;;  %v9649_v5 = vpop.f32.mrf.mxu0  ;;  %v15565_v8 = vld [vmem:[%s17246_s10 + $0x1084] sm:$0xf]  ;;  %v12801_v44 = vor.u32 %v15469_v51, %v12798_v59  ;;  %v12929_v32 = vor.u32 %v15501_v60, %v12926_v1 }
 0x382   : > { %9895 = vmatmul.bf16.vlgmr.msra.gmra.mxu3 %v17614_v18  ;;  %v13182_v10 = vld [vmem:[%s17246_s10 + $0x1090] sm:$0xf0]  ;;  %v9650_v12 = vadd.f32 %v9649_v5, %v18179_v45  ;;  %v13057_v3 = vor.u32 %v15533_v2, %v13054_v4  ;;  %v15465_v19 = vld [vmem:[%s17246_s10 + $0xd64] sm:$0xf] }
 0x383   : > { %9901 = vmatpush.bf16.msrb.mxu0 %v12833_v35  ;;  %v12782_v58 = vld [vmem:[%s17246_s10 + $0xd70] sm:$0xf0]  ;;  %v15497_v35 = vld [vmem:[%s17246_s10 + $0xe64] sm:$0xf] }
 0x384   : > { %9914 = vmatpush.bf16.msrb.mxu1 %v12961_v63  ;;  %v13185_v63 = vor.u32 %v15565_v8, %v13182_v10  ;;  %v12910_v62 = vld [vmem:[%s17246_s10 + $0xe70] sm:$0xf0]  ;;  %v15529_v38 = vld [vmem:[%s17246_s10 + $0xf64] sm:$0xf]  ;;  %v12785_v29 = vor.u32 %v15465_v19, %v12782_v58 }
 0x385   : > { %9927 = vmatpush.bf16.msrb.mxu2 %v13089_v36  ;;  %9940 = vmatpush.bf16.msrb.mxu3 %v13217_v47  ;;  %v9663_v36 = vadd.f32 %v9662_v53, %v9650_v12  ;;  %v13038_v45 = vld [vmem:[%s17246_s10 + $0xf70] sm:$0xf0]  ;;  %v15561_v57 = vld [vmem:[%s17246_s10 + $0x1064] sm:$0xf]  ;;  %v12913_v48 = vor.u32 %v15497_v35, %v12910_v62  ;;  %v9688_v1 = vpop.f32.mrf.mxu3 }
 0x386   : > { %v13166_v47 = vld [vmem:[%s17246_s10 + $0x1070] sm:$0xf0]  ;;  %v13041_v49 = vor.u32 %v15529_v38, %v13038_v45  ;;  %v15461_v41 = vld [vmem:[%s17246_s10 + $0xd44] sm:$0xf] }
 0x387   : > { %9902 = vmatpush.bf16.msrb.mxu0 %v12817_v42  ;;  %v12766_v50 = vld [vmem:[%s17246_s10 + $0xd50] sm:$0xf0]  ;;  %v15493_v42 = vld [vmem:[%s17246_s10 + $0xe44] sm:$0xf]  ;;  %v9664_v10 = vpop.f32.mrf.mxu1 }
 0x388   : > { %9915 = vmatpush.bf16.msrb.mxu1 %v12945_v52  ;;  %v13169_v52 = vor.u32 %v15561_v57, %v13166_v47  ;;  %v12894_v51 = vld [vmem:[%s17246_s10 + $0xe50] sm:$0xf0]  ;;  %v15525_v59 = vld [vmem:[%s17246_s10 + $0xf44] sm:$0xf]  ;;  %v12769_v8 = vor.u32 %v15461_v41, %v12766_v50 }
 0x389   : > { %9928 = vmatpush.bf16.msrb.mxu2 %v13073_v55  ;;  %9941 = vmatpush.bf16.msrb.mxu3 %v13201_v0  ;;  %v9675_v55 = vpop.f32.mrf.mxu2  ;;  %v13022_v60 = vld [vmem:[%s17246_s10 + $0xf50] sm:$0xf0]  ;;  %v15557_v2 = vld [vmem:[%s17246_s10 + $0x1044] sm:$0xf]  ;;  %v9651_v5 = vpop.f32.mrf.mxu0 }
 0x38a   : > { %v9676_v0 = vadd.f32 %v9675_v55, %v9663_v36  ;;  %v13150_v4 = vld [vmem:[%s17246_s10 + $0x1050] sm:$0xf0]  ;;  %v13025_v53 = vor.u32 %v15525_v59, %v13022_v60  ;;  %v15489_v19 = vld [vmem:[%s17246_s10 + $0xe24] sm:$0xf] }
 0x38b   : > { %9903 = vmatpush.bf16.msrb.mxu0 %v12801_v44  ;;  %v12897_v44 = vor.u32 %v15493_v42, %v12894_v51  ;;  %v13153_v58 = vor.u32 %v15557_v2, %v13150_v4  ;;  %v12878_v35 = vld [vmem:[%s17246_s10 + $0xe30] sm:$0xf0]  ;;  %v15553_v62 = vld [vmem:[%s17246_s10 + $0x1024] sm:$0xf] }
 0x38c   : > { %9916 = vmatpush.bf16.msrb.mxu1 %v12929_v32  ;;  %v18250_v12 = vadd.f32 %v9688_v1, %v9676_v0  ;;  %v15457_v32 = vld [vmem:[%s17246_s10 + $0xd24] sm:$0xf]  ;;  %v13006_v36 = vld [vmem:[%s17246_s10 + $0xf30] sm:$0xf0] }
 0x38d   : > { %9929 = vmatpush.bf16.msrb.mxu2 %v13057_v3  ;;  %9942 = vmatpush.bf16.msrb.mxu3 %v13185_v63  ;;  %v12750_v3 = vld [vmem:[%s17246_s10 + $0xd30] sm:$0xf0]  ;;  %v15521_v63 = vld [vmem:[%s17246_s10 + $0xf24] sm:$0xf]  ;;  %v9690_v2 = vpop.f32.mrf.mxu3 }
 0x38e   : > { %v13134_v38 = vld [vmem:[%s17246_s10 + $0x1030] sm:$0xf0]  ;;  %v12753_v45 = vor.u32 %v15457_v32, %v12750_v3  ;;  %v15453_v57 = vld [vmem:[%s17246_s10 + $0xd04] sm:$0xf] }
 0x38f   : > { %9904 = vmatpush.bf16.msrb.mxu0 %v12785_v29  ;;  %v12734_v47 = vld [vmem:[%s17246_s10 + $0xd10] sm:$0xf0]  ;;  %v12881_v29 = vor.u32 %v15489_v19, %v12878_v35  ;;  %v15517_v50 = vld [vmem:[%s17246_s10 + $0xf04] sm:$0xf]  ;;  %v13137_v42 = vor.u32 %v15553_v62, %v13134_v38 }
 0x390   : > { %9917 = vmatpush.bf16.msrb.mxu1 %v12913_v48  ;;  %v13009_v48 = vor.u32 %v15521_v63, %v13006_v36  ;;  %v12862_v41 = vld [vmem:[%s17246_s10 + $0xe10] sm:$0xf0]  ;;  %v15549_v55 = vld [vmem:[%s17246_s10 + $0x1004] sm:$0xf]  ;;  %v12737_v4 = vor.u32 %v15453_v57, %v12734_v47 }
 0x391   : > { %9930 = vmatpush.bf16.msrb.mxu2 %v13041_v49  ;;  %9943 = vmatpush.bf16.msrb.mxu3 %v13169_v52  ;;  %v15485_v49 = vld [vmem:[%s17246_s10 + $0xe04] sm:$0xf]  ;;  %v12990_v52 = vld [vmem:[%s17246_s10 + $0xf10] sm:$0xf0]  ;;  %v9677_v59 = vpop.f32.mrf.mxu2 }
 0x392   : > { %v13118_v51 = vld [vmem:[%s17246_s10 + $0x1010] sm:$0xf0]  ;;  %v15609_v60 = vld [vmem:[%s17246_s10 + $0x11e4] sm:$0xf] }
 0x393   : > { %9905 = vmatpush.bf16.msrb.mxu0 %v12769_v8  ;;  %v13358_v0 = vld [vmem:[%s17246_s10 + $0x11f0] sm:$0xf0]  ;;  %v15641_v1 = vld [vmem:[%s17246_s10 + $0x12e4] sm:$0xf]  ;;  %v13121_v19 = vor.u32 %v15549_v55, %v13118_v51 }
 0x394   : > { %9918 = vmatpush.bf16.msrb.mxu1 %v12897_v44  ;;  %v13486_v5 = vld [vmem:[%s17246_s10 + $0x12f0] sm:$0xf0]  ;;  %v15673_v8 = vld [vmem:[%s17246_s10 + $0x13e4] sm:$0xf]  ;;  %v12865_v44 = vor.u32 %v15485_v49, %v12862_v41 }
 0x395   : > { %9931 = vmatpush.bf16.msrb.mxu2 %v13025_v53  ;;  %9944 = vmatpush.bf16.msrb.mxu3 %v13153_v58  ;;  %v13614_v10 = vld [vmem:[%s17246_s10 + $0x13f0] sm:$0xf0]  ;;  %v12993_v53 = vor.u32 %v15517_v50, %v12990_v52  ;;  %v15705_v32 = vld [vmem:[%s17246_s10 + $0x14e4] sm:$0xf]  ;;  %v13361_v58 = vor.u32 %v15609_v60, %v13358_v0  ;;  %v13489_v35 = vor.u32 %v15641_v1, %v13486_v5 }
 0x396   : > { %v13742_v3 = vld [vmem:[%s17246_s10 + $0x14f0] sm:$0xf0]  ;;  %v13617_v63 = vor.u32 %v15673_v8, %v13614_v10  ;;  %v15605_v36 = vld [vmem:[%s17246_s10 + $0x11c4] sm:$0xf] }
 0x397   : > { %9906 = vmatpush.bf16.msrb.mxu0 %v12753_v45  ;;  %v13342_v62 = vld [vmem:[%s17246_s10 + $0x11d0] sm:$0xf0]  ;;  %v15637_v38 = vld [vmem:[%s17246_s10 + $0x12c4] sm:$0xf]  ;;  %v13745_v45 = vor.u32 %v15705_v32, %v13742_v3 }
 0x398   : > { %9919 = vmatpush.bf16.msrb.mxu1 %v12881_v29  ;;  %v13470_v57 = vld [vmem:[%s17246_s10 + $0x12d0] sm:$0xf0]  ;;  %v15669_v47 = vld [vmem:[%s17246_s10 + $0x13c4] sm:$0xf]  ;;  %v13345_v41 = vor.u32 %v15605_v36, %v13342_v62 }
 0x399   : > { %9932 = vmatpush.bf16.msrb.mxu2 %v13009_v48  ;;  %9945 = vmatpush.bf16.msrb.mxu3 %v13137_v42  ;;  %v13598_v29 = vld [vmem:[%s17246_s10 + $0x13d0] sm:$0xf0]  ;;  %v15701_v48 = vld [vmem:[%s17246_s10 + $0x14c4] sm:$0xf]  ;;  %v13473_v50 = vor.u32 %v15637_v38, %v13470_v57 }
 0x39a   : > { %v13726_v49 = vld [vmem:[%s17246_s10 + $0x14d0] sm:$0xf0]  ;;  %v13601_v42 = vor.u32 %v15669_v47, %v13598_v29  ;;  %v15601_v52 = vld [vmem:[%s17246_s10 + $0x11a4] sm:$0xf] }
 0x39b   : > { %9907 = vmatpush.bf16.msrb.mxu0 %v12737_v4  ;;  %v13326_v55 = vld [vmem:[%s17246_s10 + $0x11b0] sm:$0xf0]  ;;  %v15633_v51 = vld [vmem:[%s17246_s10 + $0x12a4] sm:$0xf]  ;;  %v13729_v59 = vor.u32 %v15701_v48, %v13726_v49 }
 0x39c   : > { %9920 = vmatpush.bf16.msrb.mxu1 %v12865_v44  ;;  %v13454_v60 = vld [vmem:[%s17246_s10 + $0x12b0] sm:$0xf0]  ;;  %v15665_v0 = vld [vmem:[%s17246_s10 + $0x13a4] sm:$0xf]  ;;  %v13329_v5 = vor.u32 %v15601_v52, %v13326_v55  ;;  %v9714_v57 = vpop.f32.mrf.mxu1 }
 0x39d   : > { %9933 = vmatpush.bf16.msrb.mxu2 %v12993_v53  ;;  %9946 = vmatpush.bf16.msrb.mxu3 %v13121_v19  ;;  %v13582_v1 = vld [vmem:[%s17246_s10 + $0x13b0] sm:$0xf0]  ;;  %v15697_v2 = vld [vmem:[%s17246_s10 + $0x14a4] sm:$0xf]  ;;  %v13457_v8 = vor.u32 %v15633_v51, %v13454_v60 }
 0x39e   : > { %9908 = vmatmul.bf16.vlgmr.msrb.gmra.mxu0 %v17625_v16  ;;  %v13710_v4 = vld [vmem:[%s17246_s10 + $0x14b0] sm:$0xf0]  ;;  %v13585_v10 = vor.u32 %v15665_v0, %v13582_v1  ;;  %v15597_v44 = vld [vmem:[%s17246_s10 + $0x1184] sm:$0xf] }
 0x39f   : > { %9952 = vmatpush.bf16.msra.mxu0 %v13361_v58  ;;  %9921 = vmatmul.bf16.vlgmr.msrb.gmra.mxu1 %v17621_v25  ;;  %v13310_v53 = vld [vmem:[%s17246_s10 + $0x1190] sm:$0xf0]  ;;  %v15629_v32 = vld [vmem:[%s17246_s10 + $0x1284] sm:$0xf]  ;;  %v13713_v3 = vor.u32 %v15697_v2, %v13710_v4 }
 0x3a0   : > { %9965 = vmatpush.bf16.msra.mxu1 %v13489_v35  ;;  %9934 = vmatmul.bf16.vlgmr.msrb.gmra.mxu2 %v17632_v30  ;;  %v13438_v19 = vld [vmem:[%s17246_s10 + $0x1290] sm:$0xf0]  ;;  %v15661_v58 = vld [vmem:[%s17246_s10 + $0x1384] sm:$0xf] }
 0x3a1   : > { %9978 = vmatpush.bf16.msra.mxu2 %v13617_v63  ;;  %9991 = vmatpush.bf16.msra.mxu3 %v13745_v45  ;;  %v13566_v35 = vld [vmem:[%s17246_s10 + $0x1390] sm:$0xf0]  ;;  %v9701_v63 = vpop.f32.mrf.mxu0  ;;  %v15693_v36 = vld [vmem:[%s17246_s10 + $0x1484] sm:$0xf]  ;;  %v13313_v45 = vor.u32 %v15597_v44, %v13310_v53  ;;  %v13441_v47 = vor.u32 %v15629_v32, %v13438_v19 }
 0x3a2   : > { %9947 = vmatmul.bf16.vlgmr.msrb.gmra.mxu3 %v17712_v34  ;;  %v13694_v62 = vld [vmem:[%s17246_s10 + $0x1490] sm:$0xf0]  ;;  %v9702_v38 = vadd.f32 %v9701_v63, %v18250_v12  ;;  %v13569_v29 = vor.u32 %v15661_v58, %v13566_v35  ;;  %v15593_v48 = vld [vmem:[%s17246_s10 + $0x1164] sm:$0xf] }
 0x3a3   : > { %9953 = vmatpush.bf16.msra.mxu0 %v13345_v41  ;;  %v13294_v49 = vld [vmem:[%s17246_s10 + $0x1170] sm:$0xf0]  ;;  %v15625_v41 = vld [vmem:[%s17246_s10 + $0x1264] sm:$0xf] }
 0x3a4   : > { %9966 = vmatpush.bf16.msra.mxu1 %v13473_v50  ;;  %v13697_v50 = vor.u32 %v15693_v36, %v13694_v62  ;;  %v13422_v52 = vld [vmem:[%s17246_s10 + $0x1270] sm:$0xf0]  ;;  %v15657_v55 = vld [vmem:[%s17246_s10 + $0x1364] sm:$0xf]  ;;  %v13297_v60 = vor.u32 %v15593_v48, %v13294_v49  ;;  %v9716_v62 = vpop.f32.mrf.mxu1 }
 0x3a5   : > { %9979 = vmatpush.bf16.msra.mxu2 %v13601_v42  ;;  %9992 = vmatpush.bf16.msra.mxu3 %v13729_v59  ;;  %v9715_v42 = vadd.f32 %v9714_v57, %v9702_v38  ;;  %v13550_v12 = vld [vmem:[%s17246_s10 + $0x1370] sm:$0xf0]  ;;  %v15689_v51 = vld [vmem:[%s17246_s10 + $0x1464] sm:$0xf]  ;;  %v13425_v0 = vor.u32 %v15625_v41, %v13422_v52  ;;  %v18323_v35 = vpop.f32.mrf.mxu3 }
 0x3a6   : > { %v13678_v59 = vld [vmem:[%s17246_s10 + $0x1470] sm:$0xf0]  ;;  %v13553_v1 = vor.u32 %v15657_v55, %v13550_v12  ;;  %v15589_v2 = vld [vmem:[%s17246_s10 + $0x1144] sm:$0xf] }
 0x3a7   : > { %9954 = vmatpush.bf16.msra.mxu0 %v13329_v5  ;;  %v13278_v4 = vld [vmem:[%s17246_s10 + $0x1150] sm:$0xf0]  ;;  %v15621_v5 = vld [vmem:[%s17246_s10 + $0x1244] sm:$0xf] }
 0x3a8   : > { %9967 = vmatpush.bf16.msra.mxu1 %v13457_v8  ;;  %v13681_v8 = vor.u32 %v15689_v51, %v13678_v59  ;;  %v13406_v44 = vld [vmem:[%s17246_s10 + $0x1250] sm:$0xf0]  ;;  %v15653_v53 = vld [vmem:[%s17246_s10 + $0x1344] sm:$0xf]  ;;  %v13281_v36 = vor.u32 %v15589_v2, %v13278_v4 }
 0x3a9   : > { %9980 = vmatpush.bf16.msra.mxu2 %v13585_v10  ;;  %9993 = vmatpush.bf16.msra.mxu3 %v13713_v3  ;;  %v9727_v10 = vpop.f32.mrf.mxu2  ;;  %v13534_v32 = vld [vmem:[%s17246_s10 + $0x1350] sm:$0xf0]  ;;  %v15685_v19 = vld [vmem:[%s17246_s10 + $0x1444] sm:$0xf]  ;;  %v9703_v63 = vpop.f32.mrf.mxu0  ;;  %v13409_v38 = vor.u32 %v15621_v5, %v13406_v44 }
 0x3aa   : > { %v18319_v3 = vadd.f32 %v9727_v10, %v9715_v42  ;;  %v13662_v58 = vld [vmem:[%s17246_s10 + $0x1450] sm:$0xf0]  ;;  %v15585_v57 = vld [vmem:[%s17246_s10 + $0x1124] sm:$0xf] }
 0x3ab   : > { %9955 = vmatpush.bf16.msra.mxu0 %v13313_v45  ;;  %v13537_v45 = vor.u32 %v15653_v53, %v13534_v32  ;;  %v13665_v48 = vor.u32 %v15685_v19, %v13662_v58  ;;  %v13390_v49 = vld [vmem:[%s17246_s10 + $0x1230] sm:$0xf0]  ;;  %v15649_v41 = vld [vmem:[%s17246_s10 + $0x1324] sm:$0xf] }
 0x3ac   : > { %9968 = vmatpush.bf16.msra.mxu1 %v13441_v47  ;;  %v13262_v47 = vld [vmem:[%s17246_s10 + $0x1130] sm:$0xf0]  ;;  %v15681_v42 = vld [vmem:[%s17246_s10 + $0x1424] sm:$0xf]  ;;  %vm10940_vm0 = vcmp.ge.f32.partialorder %v18319_v3, 0.0 }
 0x3ad   : > { %9981 = vmatpush.bf16.msra.mxu2 %v13569_v29  ;;  %9994 = vmatpush.bf16.msra.mxu3 %v13697_v50  ;;  %v15617_v29 = vld [vmem:[%s17246_s10 + $0x1224] sm:$0xf]  ;;  %v13518_v50 = vld [vmem:[%s17246_s10 + $0x1330] sm:$0xf0]  ;;  %v13265_v55 = vor.u32 %v15585_v57, %v13262_v47  ;;  %v9742_v58 = vpop.f32.mrf.mxu3 }
 0x3ae   : > { %v13646_v52 = vld [vmem:[%s17246_s10 + $0x1430] sm:$0xf0]  ;;  %v15581_v12 = vld [vmem:[%s17246_s10 + $0x1104] sm:$0xf]  ;;  %v13393_v59 = vor.u32 %v15617_v29, %v13390_v49 }
 0x3af   : > { %9956 = vmatpush.bf16.msra.mxu0 %v13297_v60  ;;  %v13246_v51 = vld [vmem:[%s17246_s10 + $0x1110] sm:$0xf0]  ;;  %v13521_v60 = vor.u32 %v15649_v41, %v13518_v50  ;;  %v15645_v2 = vld [vmem:[%s17246_s10 + $0x1304] sm:$0xf]  ;;  %v13649_v4 = vor.u32 %v15681_v42, %v13646_v52 }
 0x3b0   : > { %9969 = vmatpush.bf16.msra.mxu1 %v13425_v0  ;;  %v15613_v0 = vld [vmem:[%s17246_s10 + $0x1204] sm:$0xf]  ;;  %v13502_v5 = vld [vmem:[%s17246_s10 + $0x1310] sm:$0xf0]  ;;  %v13249_v63 = vor.u32 %v15581_v12, %v13246_v51 }
 0x3b1   : > { %9982 = vmatpush.bf16.msra.mxu2 %v13553_v1  ;;  %9995 = vmatpush.bf16.msra.mxu3 %v13681_v8  ;;  %v13374_v1 = vld [vmem:[%s17246_s10 + $0x1210] sm:$0xf0]  ;;  %v15677_v8 = vld [vmem:[%s17246_s10 + $0x1404] sm:$0xf]  ;;  %v9729_v44 = vpop.f32.mrf.mxu2  ;;  %v13505_v57 = vor.u32 %v15645_v2, %v13502_v5 }
 0x3b2   : > { %v13630_v10 = vld [vmem:[%s17246_s10 + $0x1410] sm:$0xf0]  ;;  %v15737_v53 = vld [vmem:[%s17246_s10 + $0x15e4] sm:$0xf] }
 0x3b3   : > { %9957 = vmatpush.bf16.msra.mxu0 %v13281_v36  ;;  %v13870_v32 = vld [vmem:[%s17246_s10 + $0x15f0] sm:$0xf0]  ;;  %v15769_v19 = vld [vmem:[%s17246_s10 + $0x16e4] sm:$0xf] }
 0x3b4   : > { %9970 = vmatpush.bf16.msra.mxu1 %v13409_v38  ;;  %v13998_v36 = vld [vmem:[%s17246_s10 + $0x16f0] sm:$0xf0]  ;;  %v15801_v62 = vld [vmem:[%s17246_s10 + $0x17e4] sm:$0xf]  ;;  %v13873_v49 = vor.u32 %v15737_v53, %v13870_v32  ;;  %v16087_v53 = vld [vmem:[%s17792_s28] sm:$0xf] }
 0x3b5   : > { %9983 = vmatpush.bf16.msra.mxu2 %v13537_v45  ;;  %9996 = vmatpush.bf16.msra.mxu3 %v13665_v48  ;;  %v14126_v38 = vld [vmem:[%s17246_s10 + $0x17f0] sm:$0xf0]  ;;  %v13377_v45 = vor.u32 %v15613_v0, %v13374_v1  ;;  %v15833_v47 = vld [vmem:[%s17246_s10 + $0x18e4] sm:$0xf]  ;;  %v13633_v48 = vor.u32 %v15677_v8, %v13630_v10  ;;  %v14001_v41 = vor.u32 %v15769_v19, %v13998_v36  ;;  %v4361_v32 = vperm.slane %v16087_v53, 1 }
 0x3b6   : > { %v14254_v29 = vld [vmem:[%s17246_s10 + $0x18f0] sm:$0xf0]  ;;  %v14129_v50 = vor.u32 %v15801_v62, %v14126_v38  ;;  %v15733_v42 = vld [vmem:[%s17246_s10 + $0x15c4] sm:$0xf] }
 0x3b7   : > { %9958 = vmatpush.bf16.msra.mxu0 %v13265_v55  ;;  %v13854_v52 = vld [vmem:[%s17246_s10 + $0x15d0] sm:$0xf0]  ;;  %v15765_v55 = vld [vmem:[%s17246_s10 + $0x16c4] sm:$0xf]  ;;  %v14257_v12 = vor.u32 %v15833_v47, %v14254_v29  ;;  %v9741_v29 = vadd.f32 %v18323_v35, %v4361_v32 }
 0x3b8   : > { %9971 = vmatpush.bf16.msra.mxu1 %v13393_v59  ;;  %v13982_v51 = vld [vmem:[%s17246_s10 + $0x16d0] sm:$0xf0]  ;;  %v15797_v59 = vld [vmem:[%s17246_s10 + $0x17c4] sm:$0xf]  ;;  %v13857_v2 = vor.u32 %v15733_v42, %v13854_v52 }
 0x3b9   : > { %9984 = vmatpush.bf16.msra.mxu2 %v13521_v60  ;;  %9997 = vmatpush.bf16.msra.mxu3 %v13649_v4  ;;  %v14110_v60 = vld [vmem:[%s17246_s10 + $0x17d0] sm:$0xf0]  ;;  %v15829_v0 = vld [vmem:[%s17246_s10 + $0x18c4] sm:$0xf]  ;;  %v13985_v5 = vor.u32 %v15765_v55, %v13982_v51 }
 0x3ba   : > { %v14238_v1 = vld [vmem:[%s17246_s10 + $0x18d0] sm:$0xf0]  ;;  %v15729_v4 = vld [vmem:[%s17246_s10 + $0x15a4] sm:$0xf]  ;;  %v14113_v8 = vor.u32 %v15797_v59, %v14110_v60 }
 0x3bb   : > { %9959 = vmatpush.bf16.msra.mxu0 %v13249_v63  ;;  %v13838_v10 = vld [vmem:[%s17246_s10 + $0x15b0] sm:$0xf0]  ;;  %v15761_v44 = vld [vmem:[%s17246_s10 + $0x16a4] sm:$0xf]  ;;  %v14241_v19 = vor.u32 %v15829_v0, %v14238_v1  ;;  %v9753_v35 = vpop.f32.mrf.mxu0 }
 0x3bc   : > { %9972 = vmatpush.bf16.msra.mxu1 %v13377_v45  ;;  %v13966_v58 = vld [vmem:[%s17246_s10 + $0x16b0] sm:$0xf0]  ;;  %v15793_v63 = vld [vmem:[%s17246_s10 + $0x17a4] sm:$0xf]  ;;  %v13841_v45 = vor.u32 %v15729_v4, %v13838_v10 }
 0x3bd   : > { %9985 = vmatpush.bf16.msra.mxu2 %v13505_v57  ;;  %9998 = vmatpush.bf16.msra.mxu3 %v13633_v48  ;;  %v14094_v36 = vld [vmem:[%s17246_s10 + $0x17b0] sm:$0xf0]  ;;  %v15825_v62 = vld [vmem:[%s17246_s10 + $0x18a4] sm:$0xf]  ;;  %v13969_v57 = vor.u32 %v15761_v44, %v13966_v58 }
 0x3be   : > { %9960 = vmatmul.bf16.vlgmr.msra.gmra.mxu0 %v17723_v39  ;;  %v14222_v38 = vld [vmem:[%s17246_s10 + $0x18b0] sm:$0xf0]  ;;  %v14097_v47 = vor.u32 %v15793_v63, %v14094_v36  ;;  %v15725_v48 = vld [vmem:[%s17246_s10 + $0x1584] sm:$0xf] }
 0x3bf   : > { %10004 = vmatpush.bf16.msrb.mxu0 %v13873_v49  ;;  %9973 = vmatmul.bf16.vlgmr.msra.gmra.mxu1 %v17719_v37  ;;  %v13822_v49 = vld [vmem:[%s17246_s10 + $0x1590] sm:$0xf0]  ;;  %v15789_v52 = vld [vmem:[%s17246_s10 + $0x1784] sm:$0xf] }
 0x3c0   : > { %10017 = vmatpush.bf16.msrb.mxu1 %v14001_v41  ;;  %9986 = vmatmul.bf16.vlgmr.msra.gmra.mxu2 %v17730_v46  ;;  %v15757_v41 = vld [vmem:[%s17246_s10 + $0x1684] sm:$0xf]  ;;  %v13950_v42 = vld [vmem:[%s17246_s10 + $0x1690] sm:$0xf0]  ;;  %v13825_v59 = vor.u32 %v15725_v48, %v13822_v49 }
 0x3c1   : > { %10030 = vmatpush.bf16.msrb.mxu2 %v14129_v50  ;;  %10043 = vmatpush.bf16.msrb.mxu3 %v14257_v12  ;;  %v14225_v50 = vor.u32 %v15825_v62, %v14222_v38  ;;  %v14078_v55 = vld [vmem:[%s17246_s10 + $0x1790] sm:$0xf0]  ;;  %v15821_v12 = vld [vmem:[%s17246_s10 + $0x1884] sm:$0xf]  ;;  %v13953_v60 = vor.u32 %v15757_v41, %v13950_v42 }
 0x3c2   : > { %9999 = vmatmul.bf16.vlgmr.msra.gmra.mxu3 %v17826_v7  ;;  %v14206_v51 = vld [vmem:[%s17246_s10 + $0x1890] sm:$0xf0]  ;;  %v14081_v0 = vor.u32 %v15789_v52, %v14078_v55  ;;  %v15721_v1 = vld [vmem:[%s17246_s10 + $0x1564] sm:$0xf] }
 0x3c3   : > { %10005 = vmatpush.bf16.msrb.mxu0 %v13857_v2  ;;  %v13806_v2 = vld [vmem:[%s17246_s10 + $0x1570] sm:$0xf0]  ;;  %v15753_v4 = vld [vmem:[%s17246_s10 + $0x1664] sm:$0xf]  ;;  %v14209_v10 = vor.u32 %v15821_v12, %v14206_v51 }
 0x3c4   : > { %10018 = vmatpush.bf16.msrb.mxu1 %v13985_v5  ;;  %v9754_v5 = vadd.f32 %v9753_v35, %v9741_v29  ;;  %v13934_v44 = vld [vmem:[%s17246_s10 + $0x1670] sm:$0xf0]  ;;  %v15785_v53 = vld [vmem:[%s17246_s10 + $0x1764] sm:$0xf]  ;;  %v13809_v36 = vor.u32 %v15721_v1, %v13806_v2  ;;  %v9779_v29 = vpop.f32.mrf.mxu2  ;;  %v9755_v35 = vpop.f32.mrf.mxu0 }
 0x3c5   : > { %10031 = vmatpush.bf16.msrb.mxu2 %v14113_v8  ;;  %10044 = vmatpush.bf16.msrb.mxu3 %v14241_v19  ;;  %v9766_v8 = vpop.f32.mrf.mxu1  ;;  %v14062_v32 = vld [vmem:[%s17246_s10 + $0x1770] sm:$0xf0]  ;;  %v15817_v19 = vld [vmem:[%s17246_s10 + $0x1864] sm:$0xf]  ;;  %v13937_v62 = vor.u32 %v15753_v4, %v13934_v44  ;;  %v9792_v52 = vpop.f32.mrf.mxu3 }
 0x3c6   : > { %v14190_v58 = vld [vmem:[%s17246_s10 + $0x1870] sm:$0xf0]  ;;  %v9767_v63 = vadd.f32 %v9766_v8, %v9754_v5  ;;  %v14065_v38 = vor.u32 %v15785_v53, %v14062_v32  ;;  %v15781_v41 = vld [vmem:[%s17246_s10 + $0x1744] sm:$0xf] }
 0x3c7   : > { %10006 = vmatpush.bf16.msrb.mxu0 %v13841_v45  ;;  %v15717_v45 = vld [vmem:[%s17246_s10 + $0x1544] sm:$0xf]  ;;  %v14193_v48 = vor.u32 %v15817_v19, %v14190_v58  ;;  %v13918_v49 = vld [vmem:[%s17246_s10 + $0x1650] sm:$0xf0] }
 0x3c8   : > { %10019 = vmatpush.bf16.msrb.mxu1 %v13969_v57  ;;  %v13790_v57 = vld [vmem:[%s17246_s10 + $0x1550] sm:$0xf0]  ;;  %v9780_v42 = vadd.f32 %v9779_v29, %v9767_v63  ;;  %v15813_v55 = vld [vmem:[%s17246_s10 + $0x1844] sm:$0xf] }
 0x3c9   : > { %10032 = vmatpush.bf16.msrb.mxu2 %v14097_v47  ;;  %10045 = vmatpush.bf16.msrb.mxu3 %v14225_v50  ;;  %v15749_v47 = vld [vmem:[%s17246_s10 + $0x1644] sm:$0xf]  ;;  %v14046_v50 = vld [vmem:[%s17246_s10 + $0x1750] sm:$0xf0]  ;;  %v13793_v51 = vor.u32 %v15717_v45, %v13790_v57 }
 0x3ca   : > { %v14174_v12 = vld [vmem:[%s17246_s10 + $0x1850] sm:$0xf0]  ;;  %v15713_v1 = vld [vmem:[%s17246_s10 + $0x1524] sm:$0xf] }
 0x3cb   : > { %10007 = vmatpush.bf16.msrb.mxu0 %v13825_v59  ;;  %v18395_v59 = vadd.f32 %v9792_v52, %v9780_v42  ;;  %v13774_v2 = vld [vmem:[%s17246_s10 + $0x1530] sm:$0xf0]  ;;  %v15745_v4 = vld [vmem:[%s17246_s10 + $0x1624] sm:$0xf]  ;;  %v14177_v8 = vor.u32 %v15813_v55, %v14174_v12 }
 0x3cc   : > { %10020 = vmatpush.bf16.msrb.mxu1 %v13953_v60  ;;  %v13921_v60 = vor.u32 %v15749_v47, %v13918_v49  ;;  %v15777_v44 = vld [vmem:[%s17246_s10 + $0x1724] sm:$0xf]  ;;  %v14030_v53 = vld [vmem:[%s17246_s10 + $0x1730] sm:$0xf0]  ;;  %v13777_v58 = vor.u32 %v15713_v1, %v13774_v2  ;;  %v9781_v29 = vpop.f32.mrf.mxu2 }
 0x3cd   : > { %10033 = vmatpush.bf16.msrb.mxu2 %v14081_v0  ;;  %10046 = vmatpush.bf16.msrb.mxu3 %v14209_v10  ;;  %v14049_v0 = vor.u32 %v15781_v41, %v14046_v50  ;;  %v9768_v5 = vpop.f32.mrf.mxu1  ;;  %v13902_v10 = vld [vmem:[%s17246_s10 + $0x1630] sm:$0xf0]  ;;  %v15809_v32 = vld [vmem:[%s17246_s10 + $0x1824] sm:$0xf]  ;;  %v9794_v42 = vpop.f32.mrf.mxu3 }
 0x3ce   : > { %v14158_v19 = vld [vmem:[%s17246_s10 + $0x1830] sm:$0xf0]  ;;  %v15709_v63 = vld [vmem:[%s17246_s10 + $0x1504] sm:$0xf] }
 0x3cf   : > { %10008 = vmatpush.bf16.msrb.mxu0 %v13809_v36  ;;  %v13758_v36 = vld [vmem:[%s17246_s10 + $0x1510] sm:$0xf0]  ;;  %v15741_v45 = vld [vmem:[%s17246_s10 + $0x1604] sm:$0xf] }
 0x3d0   : > { %10021 = vmatpush.bf16.msrb.mxu1 %v13937_v62  ;;  %v13905_v62 = vor.u32 %v15745_v4, %v13902_v10  ;;  %v13886_v57 = vld [vmem:[%s17246_s10 + $0x1610] sm:$0xf0]  ;;  %v15773_v47 = vld [vmem:[%s17246_s10 + $0x1704] sm:$0xf] }
 0x3d1   : > { %10034 = vmatpush.bf16.msrb.mxu2 %v14065_v38  ;;  %10047 = vmatpush.bf16.msrb.mxu3 %v14193_v48  ;;  %v14033_v38 = vor.u32 %v15777_v44, %v14030_v53  ;;  %v14161_v48 = vor.u32 %v15809_v32, %v14158_v19  ;;  %v14014_v49 = vld [vmem:[%s17246_s10 + $0x1710] sm:$0xf0]  ;;  %v15805_v41 = vld [vmem:[%s17246_s10 + $0x1804] sm:$0xf]  ;;  %v13889_v1 = vor.u32 %v15741_v45, %v13886_v57 }
 0x3d2   : > { %v14142_v50 = vld [vmem:[%s17246_s10 + $0x1810] sm:$0xf0]  ;;  %v15865_v52 = vld [vmem:[%s17246_s10 + $0x19e4] sm:$0xf]  ;;  %v14017_v2 = vor.u32 %v15773_v47, %v14014_v49 }
 0x3d3   : > { %10009 = vmatpush.bf16.msrb.mxu0 %v13793_v51  ;;  %v14382_v55 = vld [vmem:[%s17246_s10 + $0x19f0] sm:$0xf0]  ;;  %v15897_v12 = vld [vmem:[%s17246_s10 + $0x1ae4] sm:$0xf]  ;;  %v13761_v51 = vor.u32 %v15709_v63, %v13758_v36 }
 0x3d4   : > { %10022 = vmatpush.bf16.msrb.mxu1 %v13921_v60  ;;  %v14510_v35 = vld [vmem:[%s17246_s10 + $0x1af0] sm:$0xf0]  ;;  %v15929_v60 = vld [vmem:[%s17246_s10 + $0x1be4] sm:$0xf]  ;;  %v14385_v10 = vor.u32 %v15865_v52, %v14382_v55 }
 0x3d5   : > { %10035 = vmatpush.bf16.msrb.mxu2 %v14049_v0  ;;  %10048 = vmatpush.bf16.msrb.mxu3 %v14177_v8  ;;  %v14638_v0 = vld [vmem:[%s17246_s10 + $0x1bf0] sm:$0xf0]  ;;  %v15961_v4 = vld [vmem:[%s17246_s10 + $0x1ce4] sm:$0xf]  ;;  %v14145_v8 = vor.u32 %v15805_v41, %v14142_v50  ;;  %v14513_v44 = vor.u32 %v15897_v12, %v14510_v35 }
 0x3d6   : > { %v14766_v5 = vld [vmem:[%s17246_s10 + $0x1cf0] sm:$0xf0]  ;;  %v14641_v53 = vor.u32 %v15929_v60, %v14638_v0  ;;  %v15861_v32 = vld [vmem:[%s17246_s10 + $0x19c4] sm:$0xf] }
 0x3d7   : > { %10010 = vmatpush.bf16.msrb.mxu0 %v13777_v58  ;;  %v14366_v19 = vld [vmem:[%s17246_s10 + $0x19d0] sm:$0xf0]  ;;  %v15893_v58 = vld [vmem:[%s17246_s10 + $0x1ac4] sm:$0xf]  ;;  %v14769_v63 = vor.u32 %v15961_v4, %v14766_v5 }
 0x3d8   : > { %10023 = vmatpush.bf16.msrb.mxu1 %v13905_v62  ;;  %v14494_v36 = vld [vmem:[%s17246_s10 + $0x1ad0] sm:$0xf0]  ;;  %v15925_v62 = vld [vmem:[%s17246_s10 + $0x1bc4] sm:$0xf]  ;;  %v14369_v47 = vor.u32 %v15861_v32, %v14366_v19 }
 0x3d9   : > { %10036 = vmatpush.bf16.msrb.mxu2 %v14033_v38  ;;  %10049 = vmatpush.bf16.msrb.mxu3 %v14161_v48  ;;  %v14622_v38 = vld [vmem:[%s17246_s10 + $0x1bd0] sm:$0xf0]  ;;  %v15957_v45 = vld [vmem:[%s17246_s10 + $0x1cc4] sm:$0xf]  ;;  %v14497_v29 = vor.u32 %v15893_v58, %v14494_v36 }
 0x3da   : > { %v14750_v57 = vld [vmem:[%s17246_s10 + $0x1cd0] sm:$0xf0]  ;;  %v14625_v48 = vor.u32 %v15925_v62, %v14622_v38  ;;  %v15857_v49 = vld [vmem:[%s17246_s10 + $0x19a4] sm:$0xf] }
 0x3db   : > { %10011 = vmatpush.bf16.msrb.mxu0 %v13761_v51  ;;  %v14350_v41 = vld [vmem:[%s17246_s10 + $0x19b0] sm:$0xf0]  ;;  %v15889_v50 = vld [vmem:[%s17246_s10 + $0x1aa4] sm:$0xf]  ;;  %v14753_v42 = vor.u32 %v15957_v45, %v14750_v57  ;;  %v9805_v32 = vpop.f32.mrf.mxu0 }
 0x3dc   : > { %10024 = vmatpush.bf16.msrb.mxu1 %v13889_v1  ;;  %v14478_v52 = vld [vmem:[%s17246_s10 + $0x1ab0] sm:$0xf0]  ;;  %v15921_v55 = vld [vmem:[%s17246_s10 + $0x1ba4] sm:$0xf]  ;;  %v14353_v60 = vor.u32 %v15857_v49, %v14350_v41  ;;  %v9818_v62 = vpop.f32.mrf.mxu1 }
 0x3dd   : > { %10037 = vmatpush.bf16.msrb.mxu2 %v14017_v2  ;;  %10050 = vmatpush.bf16.msrb.mxu3 %v14145_v8  ;;  %v14606_v12 = vld [vmem:[%s17246_s10 + $0x1bb0] sm:$0xf0]  ;;  %v15953_v51 = vld [vmem:[%s17246_s10 + $0x1ca4] sm:$0xf]  ;;  %v14481_v0 = vor.u32 %v15889_v50, %v14478_v52 }
 0x3de   : > { %10012 = vmatmul.bf16.vlgmr.msrb.gmra.mxu0 %v17837_v21  ;;  %v14734_v35 = vld [vmem:[%s17246_s10 + $0x1cb0] sm:$0xf0]  ;;  %v14609_v1 = vor.u32 %v15921_v55, %v14606_v12  ;;  %v15853_v2 = vld [vmem:[%s17246_s10 + $0x1984] sm:$0xf] }
 0x3df   : > { %10056 = vmatpush.bf16.msra.mxu0 %v14385_v10  ;;  %10025 = vmatmul.bf16.vlgmr.msrb.gmra.mxu1 %v17833_v11  ;;  %v14334_v4 = vld [vmem:[%s17246_s10 + $0x1990] sm:$0xf0]  ;;  %v15885_v5 = vld [vmem:[%s17246_s10 + $0x1a84] sm:$0xf]  ;;  %v14737_v8 = vor.u32 %v15953_v51, %v14734_v35 }
 0x3e0   : > { %10069 = vmatpush.bf16.msra.mxu1 %v14513_v44  ;;  %10038 = vmatmul.bf16.vlgmr.msrb.gmra.mxu2 %v17843_v28  ;;  %v14462_v10 = vld [vmem:[%s17246_s10 + $0x1a90] sm:$0xf0]  ;;  %v15917_v44 = vld [vmem:[%s17246_s10 + $0x1b84] sm:$0xf]  ;;  %v14337_v36 = vor.u32 %v15853_v2, %v14334_v4 }
 0x3e1   : > { %10082 = vmatpush.bf16.msra.mxu2 %v14641_v53  ;;  %10095 = vmatpush.bf16.msra.mxu3 %v14769_v63  ;;  %v14590_v53 = vld [vmem:[%s17246_s10 + $0x1b90] sm:$0xf0]  ;;  %v15949_v19 = vld [vmem:[%s17246_s10 + $0x1c84] sm:$0xf]  ;;  %v9806_v63 = vadd.f32 %v9805_v32, %v18395_v59  ;;  %v14465_v38 = vor.u32 %v15885_v5, %v14462_v10 }
 0x3e2   : > { %10051 = vmatmul.bf16.vlgmr.msrb.gmra.mxu3 %v17910_v6  ;;  %v14718_v58 = vld [vmem:[%s17246_s10 + $0x1c90] sm:$0xf0]  ;;  %v14593_v45 = vor.u32 %v15917_v44, %v14590_v53  ;;  %v15849_v57 = vld [vmem:[%s17246_s10 + $0x1964] sm:$0xf] }
 0x3e3   : > { %10057 = vmatpush.bf16.msra.mxu0 %v14369_v47  ;;  %v14318_v47 = vld [vmem:[%s17246_s10 + $0x1970] sm:$0xf0]  ;;  %v9819_v49 = vadd.f32 %v9818_v62, %v9806_v63  ;;  %v15913_v50 = vld [vmem:[%s17246_s10 + $0x1b64] sm:$0xf]  ;;  %v9831_v2 = vpop.f32.mrf.mxu2 }
 0x3e4   : > { %10070 = vmatpush.bf16.msra.mxu1 %v14497_v29  ;;  %v15881_v29 = vld [vmem:[%s17246_s10 + $0x1a64] sm:$0xf]  ;;  %v14446_v41 = vld [vmem:[%s17246_s10 + $0x1a70] sm:$0xf0]  ;;  %v14321_v55 = vor.u32 %v15849_v57, %v14318_v47  ;;  %v9820_v63 = vpop.f32.mrf.mxu1 }
 0x3e5   : > { %10083 = vmatpush.bf16.msra.mxu2 %v14625_v48  ;;  %10096 = vmatpush.bf16.msra.mxu3 %v14753_v42  ;;  %v14721_v48 = vor.u32 %v15949_v19, %v14718_v58  ;;  %v14574_v59 = vld [vmem:[%s17246_s10 + $0x1b70] sm:$0xf0]  ;;  %v15945_v42 = vld [vmem:[%s17246_s10 + $0x1c64] sm:$0xf]  ;;  %v14449_v12 = vor.u32 %v15881_v29, %v14446_v41  ;;  %v9832_v10 = vadd.f32 %v9831_v2, %v9819_v49  ;;  %v9844_v44 = vpop.f32.mrf.mxu3  ;;  %v9807_v19 = vpop.f32.mrf.mxu0  ;;  %v11188_v63 = vld [vmem:[%s17246_s10 + $0xe8] sm:$0xf] }
 0x3e6   : > { %v14702_v52 = vld [vmem:[%s17246_s10 + $0x1c70] sm:$0xf0]  ;;  %v14577_v51 = vor.u32 %v15913_v50, %v14574_v59  ;;  %v15845_v35 = vld [vmem:[%s17246_s10 + $0x1944] sm:$0xf] }
 0x3e7   : > { %10058 = vmatpush.bf16.msra.mxu0 %v14353_v60  ;;  %v14302_v60 = vld [vmem:[%s17246_s10 + $0x1950] sm:$0xf0]  ;;  %v15909_v5 = vld [vmem:[%s17246_s10 + $0x1b44] sm:$0xf] }
 0x3e8   : > { %10071 = vmatpush.bf16.msra.mxu1 %v14481_v0  ;;  %v15877_v0 = vld [vmem:[%s17246_s10 + $0x1a44] sm:$0xf]  ;;  %v14430_v4 = vld [vmem:[%s17246_s10 + $0x1a50] sm:$0xf0]  ;;  %v14305_v58 = vor.u32 %v15845_v35, %v14302_v60 }
 0x3e9   : > { %10084 = vmatpush.bf16.msra.mxu2 %v14609_v1  ;;  %10097 = vmatpush.bf16.msra.mxu3 %v14737_v8  ;;  %v14705_v1 = vor.u32 %v15945_v42, %v14702_v52  ;;  %v14558_v8 = vld [vmem:[%s17246_s10 + $0x1b50] sm:$0xf0]  ;;  %v15941_v53 = vld [vmem:[%s17246_s10 + $0x1c44] sm:$0xf]  ;;  %v14433_v62 = vor.u32 %v15877_v0, %v14430_v4 }
 0x3ea   : > { %v14686_v32 = vld [vmem:[%s17246_s10 + $0x1c50] sm:$0xf0]  ;;  %v15873_v47 = vld [vmem:[%s17246_s10 + $0x1a24] sm:$0xf] }
 0x3eb   : > { %10059 = vmatpush.bf16.msra.mxu0 %v14337_v36  ;;  %v18466_v36 = vadd.f32 %v9844_v44, %v9832_v10  ;;  %v14286_v57 = vld [vmem:[%s17246_s10 + $0x1930] sm:$0xf0]  ;;  %v14689_v29 = vor.u32 %v15941_v53, %v14686_v32  ;;  %v15905_v49 = vld [vmem:[%s17246_s10 + $0x1b24] sm:$0xf] }
 0x3ec   : > { %10072 = vmatpush.bf16.msra.mxu1 %v14465_v38  ;;  %v14561_v38 = vor.u32 %v15909_v5, %v14558_v8  ;;  %v14542_v41 = vld [vmem:[%s17246_s10 + $0x1b30] sm:$0xf0]  ;;  %v15937_v50 = vld [vmem:[%s17246_s10 + $0x1c24] sm:$0xf]  ;;  %v9833_v8 = vpop.f32.mrf.mxu2 }
 0x3ed   : > { %10085 = vmatpush.bf16.msra.mxu2 %v14593_v45  ;;  %10098 = vmatpush.bf16.msra.mxu3 %v14721_v48  ;;  %v15841_v45 = vld [vmem:[%s17246_s10 + $0x1924] sm:$0xf]  ;;  %v14414_v48 = vld [vmem:[%s17246_s10 + $0x1a30] sm:$0xf0]  ;;  %v9846_v32 = vpop.f32.mrf.mxu3 }
 0x3ee   : > { %v14670_v59 = vld [vmem:[%s17246_s10 + $0x1c30] sm:$0xf0]  ;;  %v14289_v42 = vor.u32 %v15841_v45, %v14286_v57  ;;  %v15837_v52 = vld [vmem:[%s17246_s10 + $0x1904] sm:$0xf]  ;;  %v11316_v57 = vld [vmem:[%s17246_s10 + $0x1e8] sm:$0xf] }
 0x3ef   : > { %10060 = vmatpush.bf16.msra.mxu0 %v14321_v55  ;;  %v14270_v55 = vld [vmem:[%s17246_s10 + $0x1910] sm:$0xf0]  ;;  %v15869_v35 = vld [vmem:[%s17246_s10 + $0x1a04] sm:$0xf]  ;;  %v15060_v32 = vld [vmem:[%s17246_s10 + $0xb4] sm:$0xf0] }
 0x3f0   : > { %10073 = vmatpush.bf16.msra.mxu1 %v14449_v12  ;;  %v14417_v12 = vor.u32 %v15873_v47, %v14414_v48  ;;  %v14398_v60 = vld [vmem:[%s17246_s10 + $0x1a10] sm:$0xf0]  ;;  %v15901_v0 = vld [vmem:[%s17246_s10 + $0x1b04] sm:$0xf]  ;;  %v14273_v19 = vor.u32 %v15837_v52, %v14270_v55  ;;  %v15100_v47 = vld [vmem:[%s17246_s10 + $0x1f4] sm:$0xf0] }
 0x3f1   : > { %10086 = vmatpush.bf16.msra.mxu2 %v14577_v51  ;;  %10099 = vmatpush.bf16.msra.mxu3 %v14705_v1  ;;  %v14545_v51 = vor.u32 %v15905_v49, %v14542_v41  ;;  %v14673_v1 = vor.u32 %v15937_v50, %v14670_v59  ;;  %v14526_v2 = vld [vmem:[%s17246_s10 + $0x1b10] sm:$0xf0]  ;;  %v15933_v4 = vld [vmem:[%s17246_s10 + $0x1c04] sm:$0xf]  ;;  %v11317_v52 = vor.u32 %v15100_v47, %v11316_v57 }
 0x3f2   : > { %v14654_v5 = vld [vmem:[%s17246_s10 + $0x1c10] sm:$0xf0]  ;;  %v15993_v10 = vld [vmem:[%s17246_s10 + $0x1de4] sm:$0xf]  ;;  %v14529_v45 = vor.u32 %v15901_v0, %v14526_v2 }
 0x3f3   : > { %10061 = vmatpush.bf16.msra.mxu0 %v14305_v58  ;;  %v14894_v44 = vld [vmem:[%s17246_s10 + $0x1df0] sm:$0xf0]  ;;  %v16025_v53 = vld [vmem:[%s17246_s10 + $0x1ee4] sm:$0xf] }
 0x3f4   : > { %10074 = vmatpush.bf16.msra.mxu1 %v14433_v62  ;;  %v15022_v58 = vld [vmem:[%s17246_s10 + $0x1ef0] sm:$0xf0]  ;;  %v15068_v62 = vld [vmem:[%s17246_s10 + $0xf4] sm:$0xf0]  ;;  %v14897_v48 = vor.u32 %v15993_v10, %v14894_v44  ;;  %v15989_v50 = vld [vmem:[%s17246_s10 + $0x1dc4] sm:$0xf] }
 0x3f5   : > { %10087 = vmatpush.bf16.msra.mxu2 %v14561_v38  ;;  %10100 = vmatpush.bf16.msra.mxu3 %v14689_v29  ;;  %v14401_v38 = vor.u32 %v15869_v35, %v14398_v60  ;;  %v14657_v29 = vor.u32 %v15933_v4, %v14654_v5  ;;  %v15025_v49 = vor.u32 %v16025_v53, %v15022_v58  ;;  %v14878_v59 = vld [vmem:[%s17246_s10 + $0x1dd0] sm:$0xf0]  ;;  %v11300_v35 = vld [vmem:[%s17246_s10 + $0x1c8] sm:$0xf]  ;;  %v15096_v60 = vld [vmem:[%s17246_s10 + $0x1d4] sm:$0xf0] }
 0x3f6   : > { %v11189_v41 = vor.u32 %v15068_v62, %v11188_v63  ;;  %v15006_v55 = vld [vmem:[%s17246_s10 + $0x1ed0] sm:$0xf0]  ;;  %v14881_v0 = vor.u32 %v15989_v50, %v14878_v59  ;;  %v15985_v4 = vld [vmem:[%s17246_s10 + $0x1da4] sm:$0xf]  ;;  %v11301_v10 = vor.u32 %v15096_v60, %v11300_v35  ;;  %v11156_v53 = vld [vmem:[%s17246_s10 + $0xa8] sm:$0xf] }
 0x3f7   : > { %10062 = vmatpush.bf16.msra.mxu0 %v14289_v42  ;;  %v16021_v42 = vld [vmem:[%s17246_s10 + $0x1ec4] sm:$0xf]  ;;  %v14862_v5 = vld [vmem:[%s17246_s10 + $0x1db0] sm:$0xf0]  ;;  %v15092_v58 = vld [vmem:[%s17246_s10 + $0x1b4] sm:$0xf0] }
 0x3f8   : > { %10075 = vmatpush.bf16.msra.mxu1 %v14417_v12  ;;  %v11172_v12 = vld [vmem:[%s17246_s10 + $0xc8] sm:$0xf]  ;;  %v16017_v8 = vld [vmem:[%s17246_s10 + $0x1ea4] sm:$0xf]  ;;  %v14990_v44 = vld [vmem:[%s17246_s10 + $0x1eb0] sm:$0xf0]  ;;  %v14865_v63 = vor.u32 %v15985_v4, %v14862_v5 }
 0x3f9   : > { %10088 = vmatpush.bf16.msra.mxu2 %v14545_v51  ;;  %10101 = vmatpush.bf16.msra.mxu3 %v14673_v1  ;;  %v15064_v51 = vld [vmem:[%s17246_s10 + $0xd4] sm:$0xf0]  ;;  %v15009_v1 = vor.u32 %v16021_v42, %v15006_v55  ;;  %v14993_v62 = vor.u32 %v16017_v8, %v14990_v44  ;;  %v14846_v57 = vld [vmem:[%s17246_s10 + $0x1d90] sm:$0xf0]  ;;  %v16013_v47 = vld [vmem:[%s17246_s10 + $0x1e84] sm:$0xf] }
 0x3fa   : > { %v11173_v2 = vor.u32 %v15064_v51, %v11172_v12  ;;  %v11268_v59 = vld [vmem:[%s17246_s10 + $0x188] sm:$0xf]  ;;  %v15088_v42 = vld [vmem:[%s17246_s10 + $0x194] sm:$0xf0]  ;;  %v15977_v60 = vld [vmem:[%s17246_s10 + $0x1d64] sm:$0xf] }
 0x3fb   : > { %10063 = vmatpush.bf16.msra.mxu0 %v14273_v19  ;;  %v11284_v19 = vld [vmem:[%s17246_s10 + $0x1a8] sm:$0xf]  ;;  %v9857_v50 = vpop.f32.mrf.mxu0  ;;  %v14958_v5 = vld [vmem:[%s17246_s10 + $0x1e70] sm:$0xf0]  ;;  %v15084_v44 = vld [vmem:[%s17246_s10 + $0x174] sm:$0xf0] }
 0x3fc   : > { %10076 = vmatpush.bf16.msra.mxu1 %v14401_v38  ;;  %v11157_v38 = vor.u32 %v15060_v32, %v11156_v53  ;;  %v9870_v12 = vpop.f32.mrf.mxu1  ;;  %v11124_v8 = vld [vmem:[%s17246_s10 + $0x68] sm:$0xf] }
 0x3fd   : > { %10089 = vmatpush.bf16.msra.mxu2 %v14529_v45  ;;  %10102 = vmatpush.bf16.msra.mxu3 %v14657_v29  ;;  %v15981_v45 = vld [vmem:[%s17246_s10 + $0x1d84] sm:$0xf]  ;;  %v11285_v29 = vor.u32 %v15092_v58, %v11284_v19 }
 0x3fe   : > { %10064 = vmatmul.bf16.vlgmr.msra.gmra.mxu0 %v17917_v15  ;;  %v14849_v55 = vor.u32 %v15981_v45, %v14846_v57  ;;  %v15973_v58 = vld [vmem:[%s17246_s10 + $0x1d44] sm:$0xf]  ;;  %v14942_v57 = vld [vmem:[%s17246_s10 + $0x1e50] sm:$0xf0] }
 0x3ff   : > { %10108 = vmatpush.bf16.msrb.mxu0 %v14897_v48  ;;  %10077 = vmatmul.bf16.vlgmr.msra.gmra.mxu1 %v17915_v13  ;;  %v14974_v48 = vld [vmem:[%s17246_s10 + $0x1e90] sm:$0xf0] }
 0x400   : > { %10121 = vmatpush.bf16.msrb.mxu1 %v15025_v49  ;;  %10090 = vmatmul.bf16.vlgmr.msra.gmra.mxu2 %v17921_v61  ;;  %v11140_v49 = vld [vmem:[%s17246_s10 + $0x88] sm:$0xf]  ;;  %v14977_v51 = vor.u32 %v16013_v47, %v14974_v48 }
 0x401   : > { %10134 = vmatpush.bf16.msrb.mxu2 %v11189_v41  ;;  %10147 = vmatpush.bf16.msrb.mxu3 %v11317_v52  ;;  %v15056_v41 = vld [vmem:[%s17246_s10 + $0x94] sm:$0xf0]  ;;  %v9858_v52 = vadd.f32 %v9857_v50, %v18466_v36  ;;  %v11108_v47 = vld [vmem:[%s17246_s10 + $0x48] sm:$0xf] }
 0x402   : > { %10103 = vmatmul.bf16.vlgmr.msra.gmra.mxu3 %v17989_v56  ;;  %v11141_v35 = vor.u32 %v15056_v41, %v11140_v49  ;;  %v15052_v36 = vld [vmem:[%s17246_s10 + $0x74] sm:$0xf0]  ;;  %v11236_v41 = vld [vmem:[%s17246_s10 + $0x148] sm:$0xf] }
 0x403   : > { %10109 = vmatpush.bf16.msrb.mxu0 %v14881_v0  ;;  %v14830_v0 = vld [vmem:[%s17246_s10 + $0x1d70] sm:$0xf0]  ;;  %v9871_v4 = vadd.f32 %v9870_v12, %v9858_v52  ;;  %v11125_v19 = vor.u32 %v15052_v36, %v11124_v8  ;;  %v9883_v45 = vpop.f32.mrf.mxu2  ;;  %v15080_v50 = vld [vmem:[%s17246_s10 + $0x154] sm:$0xf0]  ;;  %v11220_v8 = vld [vmem:[%s17246_s10 + $0x128] sm:$0xf] }
 0x404   : > { %10122 = vmatpush.bf16.msrb.mxu1 %v15009_v1  ;;  %v16009_v1 = vld [vmem:[%s17246_s10 + $0x1e64] sm:$0xf]  ;;  %v14833_v53 = vor.u32 %v15977_v60, %v14830_v0  ;;  %v9872_v52 = vpop.f32.mrf.mxu1  ;;  %v14798_v60 = vld [vmem:[%s17246_s10 + $0x1d30] sm:$0xf0]  ;;  %v15076_v36 = vld [vmem:[%s17246_s10 + $0x134] sm:$0xf0] }
 0x405   : > { %10135 = vmatpush.bf16.msrb.mxu2 %v11173_v2  ;;  %10148 = vmatpush.bf16.msrb.mxu3 %v11301_v10  ;;  %v11269_v2 = vor.u32 %v15088_v42, %v11268_v59  ;;  %v11252_v10 = vld [vmem:[%s17246_s10 + $0x168] sm:$0xf]  ;;  %v14961_v32 = vor.u32 %v16009_v1, %v14958_v5  ;;  %v9884_v48 = vadd.f32 %v9883_v45, %v9871_v4  ;;  %v9896_v49 = vpop.f32.mrf.mxu3  ;;  %v9859_v59 = vpop.f32.mrf.mxu0  ;;  %v16001_v0 = vld [vmem:[%s17246_s10 + $0x1e24] sm:$0xf]  ;;  %v15044_v5 = vld [vmem:[%s17246_s10 + $0x34] sm:$0xf0] }
 0x406   : > { %v11237_v1 = vor.u32 %v15080_v50, %v11236_v41  ;;  %v11092_v4 = vld [vmem:[%s17246_s10 + $0x28] sm:$0xf]  ;;  %v15040_v45 = vld [vmem:[%s17246_s10 + $0x14] sm:$0xf0] }
 0x407   : > { %10110 = vmatpush.bf16.msrb.mxu0 %v14865_v63  ;;  %v14814_v63 = vld [vmem:[%s17246_s10 + $0x1d50] sm:$0xf0]  ;;  %v11572_v41 = vld [vmem:[%s17246_s10 + $0x3e8] sm:$0xf] }
 0x408   : > { %10123 = vmatpush.bf16.msrb.mxu1 %v14993_v62  ;;  %v16005_v62 = vld [vmem:[%s17246_s10 + $0x1e44] sm:$0xf]  ;;  %v14817_v42 = vor.u32 %v15973_v58, %v14814_v63  ;;  %v14910_v63 = vld [vmem:[%s17246_s10 + $0x1e10] sm:$0xf0]  ;;  %v11700_v52 = vld [vmem:[%s17246_s10 + $0x4e8] sm:$0xf] }
 0x409   : > { %10136 = vmatpush.bf16.msrb.mxu2 %v11157_v38  ;;  %10149 = vmatpush.bf16.msrb.mxu3 %v11285_v29  ;;  %v11253_v38 = vor.u32 %v15084_v44, %v11252_v10  ;;  %v15048_v29 = vld [vmem:[%s17246_s10 + $0x54] sm:$0xf0]  ;;  %v14945_v12 = vor.u32 %v16005_v62, %v14942_v57  ;;  %v15965_v44 = vld [vmem:[%s17246_s10 + $0x1d04] sm:$0xf]  ;;  %v11076_v62 = vld [vmem:[%s17246_s10 + $0x8] sm:$0xf] }
 0x40a   : > { %v15997_v58 = vld [vmem:[%s17246_s10 + $0x1e04] sm:$0xf]  ;;  %v11204_v57 = vld [vmem:[%s17246_s10 + $0x108] sm:$0xf] }
 0x40b   : > { %10111 = vmatpush.bf16.msrb.mxu0 %v14849_v55  ;;  %v18537_v55 = vadd.f32 %v9896_v49, %v9884_v48  ;;  %v11444_v48 = vld [vmem:[%s17246_s10 + $0x2e8] sm:$0xf]  ;;  %v15132_v49 = vld [vmem:[%s17246_s10 + $0x2f4] sm:$0xf0] }
 0x40c   : > { %10124 = vmatpush.bf16.msrb.mxu1 %v14977_v51  ;;  %v11109_v51 = vor.u32 %v15048_v29, %v11108_v47  ;;  %v15072_v47 = vld [vmem:[%s17246_s10 + $0x114] sm:$0xf0]  ;;  %v9885_v29 = vpop.f32.mrf.mxu2 }
 0x40d   : > { %10137 = vmatpush.bf16.msrb.mxu2 %v11141_v35  ;;  %10150 = vmatpush.bf16.msrb.mxu3 %v11269_v2  ;;  %v15969_v35 = vld [vmem:[%s17246_s10 + $0x1d24] sm:$0xf]  ;;  %v14926_v2 = vld [vmem:[%s17246_s10 + $0x1e30] sm:$0xf0]  ;;  %v9898_v50 = vpop.f32.mrf.mxu3  ;;  %v11540_v29 = vld [vmem:[%s17246_s10 + $0x3a8] sm:$0xf] }
 0x40e   : > { %v14801_v10 = vor.u32 %v15969_v35, %v14798_v60  ;;  %v11077_v35 = vor.u32 %v15040_v45, %v11076_v62  ;;  %v11828_v60 = vld [vmem:[%s17246_s10 + $0x5e8] sm:$0xf]  ;;  %v15188_v50 = vld [vmem:[%s17246_s10 + $0x4b4] sm:$0xf0] }
 0x40f   : > { %10112 = vmatpush.bf16.msrb.mxu0 %v14833_v53  ;;  %v14782_v53 = vld [vmem:[%s17246_s10 + $0x1d10] sm:$0xf0] }
 0x410   : > { %10125 = vmatpush.bf16.msrb.mxu1 %v14961_v32  ;;  %v14929_v32 = vor.u32 %v16001_v0, %v14926_v2  ;;  %v14785_v59 = vor.u32 %v15965_v44, %v14782_v53  ;;  %v15228_v0 = vld [vmem:[%s17246_s10 + $0x5f4] sm:$0xf0]  ;;  %v11445_v2 = vor.u32 %v15132_v49, %v11444_v48 }
 0x411   : > { %10138 = vmatpush.bf16.msrb.mxu2 %v11125_v19  ;;  %10151 = vmatpush.bf16.msrb.mxu3 %v11253_v38  ;;  %v11093_v19 = vor.u32 %v15044_v5, %v11092_v4  ;;  %v11221_v38 = vor.u32 %v15076_v36, %v11220_v8  ;;  %v11428_v8 = vld [vmem:[%s17246_s10 + $0x2c8] sm:$0xf]  ;;  %v15128_v36 = vld [vmem:[%s17246_s10 + $0x2d4] sm:$0xf0]  ;;  %v11829_v44 = vor.u32 %v15228_v0, %v11828_v60 }
 0x412   : > { %v15160_v53 = vld [vmem:[%s17246_s10 + $0x3d4] sm:$0xf0]  ;;  %v11429_v62 = vor.u32 %v15128_v36, %v11428_v8  ;;  %v11524_v0 = vld [vmem:[%s17246_s10 + $0x388] sm:$0xf] }
 0x413   : > { %10113 = vmatpush.bf16.msrb.mxu0 %v14817_v42  ;;  %v15164_v42 = vld [vmem:[%s17246_s10 + $0x3f4] sm:$0xf0]  ;;  %v11780_v36 = vld [vmem:[%s17246_s10 + $0x588] sm:$0xf] }
 0x414   : > { %10126 = vmatpush.bf16.msrb.mxu1 %v14945_v12  ;;  %v15196_v12 = vld [vmem:[%s17246_s10 + $0x4f4] sm:$0xf0]  ;;  %v11573_v4 = vor.u32 %v15164_v42, %v11572_v41  ;;  %v11668_v41 = vld [vmem:[%s17246_s10 + $0x4a8] sm:$0xf] }
 0x415   : > { %10139 = vmatpush.bf16.msrb.mxu2 %v11109_v51  ;;  %10152 = vmatpush.bf16.msrb.mxu3 %v11237_v1  ;;  %v14913_v51 = vor.u32 %v15997_v58, %v14910_v63  ;;  %v11205_v1 = vor.u32 %v15072_v47, %v11204_v57  ;;  %v11701_v5 = vor.u32 %v15196_v12, %v11700_v52  ;;  %v11812_v58 = vld [vmem:[%s17246_s10 + $0x5c8] sm:$0xf]  ;;  %v15224_v63 = vld [vmem:[%s17246_s10 + $0x5d4] sm:$0xf0] }
 0x416   : > { %v11412_v57 = vld [vmem:[%s17246_s10 + $0x2a8] sm:$0xf]  ;;  %v15124_v47 = vld [vmem:[%s17246_s10 + $0x2b4] sm:$0xf0]  ;;  %v11813_v48 = vor.u32 %v15224_v63, %v11812_v58 }
 0x417   : > { %10114 = vmatpush.bf16.msrb.mxu0 %v14801_v10  ;;  %v11556_v10 = vld [vmem:[%s17246_s10 + $0x3c8] sm:$0xf]  ;;  %v15156_v49 = vld [vmem:[%s17246_s10 + $0x3b4] sm:$0xf0]  ;;  %v11413_v52 = vor.u32 %v15124_v47, %v11412_v57 }
 0x418   : > { %10127 = vmatpush.bf16.msrb.mxu1 %v14929_v32  ;;  %v11684_v32 = vld [vmem:[%s17246_s10 + $0x4c8] sm:$0xf]  ;;  %v15220_v42 = vld [vmem:[%s17246_s10 + $0x5b4] sm:$0xf0]  ;;  %v11541_v12 = vor.u32 %v15156_v49, %v11540_v29 }
 0x419   : > { %10140 = vmatpush.bf16.msrb.mxu2 %v11093_v19  ;;  %10153 = vmatpush.bf16.msrb.mxu3 %v11221_v38  ;;  %v15192_v19 = vld [vmem:[%s17246_s10 + $0x4d4] sm:$0xf0]  ;;  %v11557_v38 = vor.u32 %v15160_v53, %v11556_v10  ;;  %v11380_v63 = vld [vmem:[%s17246_s10 + $0x268] sm:$0xf] }
 0x41a   : > { %v11685_v45 = vor.u32 %v15192_v19, %v11684_v32  ;;  %v15120_v60 = vld [vmem:[%s17246_s10 + $0x294] sm:$0xf0]  ;;  %v11636_v29 = vld [vmem:[%s17246_s10 + $0x468] sm:$0xf] }
 0x41b   : > { %10115 = vmatpush.bf16.msrb.mxu0 %v14785_v59  ;;  %v11796_v59 = vld [vmem:[%s17246_s10 + $0x5a8] sm:$0xf]  ;;  %v9909_v8 = vpop.f32.mrf.mxu0  ;;  %v15216_v10 = vld [vmem:[%s17246_s10 + $0x594] sm:$0xf0] }
 0x41c   : > { %10128 = vmatpush.bf16.msrb.mxu1 %v14913_v51  ;;  %v11669_v51 = vor.u32 %v15188_v50, %v11668_v41  ;;  %v9922_v32 = vpop.f32.mrf.mxu1  ;;  %v15148_v47 = vld [vmem:[%s17246_s10 + $0x374] sm:$0xf0] }
 0x41d   : > { %10141 = vmatpush.bf16.msrb.mxu2 %v11077_v35  ;;  %10154 = vmatpush.bf16.msrb.mxu3 %v11205_v1  ;;  %v11396_v35 = vld [vmem:[%s17246_s10 + $0x288] sm:$0xf]  ;;  %v11797_v1 = vor.u32 %v15220_v42, %v11796_v59  ;;  %v15212_v49 = vld [vmem:[%s17246_s10 + $0x574] sm:$0xf0] }
 0x41e   : > { %10116 = vmatmul.bf16.vlgmr.msrb.gmra.mxu0 %v17996_v54  ;;  %v11397_v53 = vor.u32 %v15120_v60, %v11396_v35  ;;  %v11364_v42 = vld [vmem:[%s17246_s10 + $0x248] sm:$0xf]  ;;  %v15144_v60 = vld [vmem:[%s17246_s10 + $0x354] sm:$0xf0] }
 0x41f   : > { %10160 = vmatpush.bf16.msra.mxu0 %v11445_v2  ;;  %10129 = vmatmul.bf16.vlgmr.msrb.gmra.mxu1 %v17994_v33  ;;  %v15152_v2 = vld [vmem:[%s17246_s10 + $0x394] sm:$0xf0] }
 0x420   : > { %10173 = vmatpush.bf16.msra.mxu1 %v11573_v4  ;;  %10142 = vmatmul.bf16.vlgmr.msrb.gmra.mxu2 %v17374_v27  ;;  %v11652_v4 = vld [vmem:[%s17246_s10 + $0x488] sm:$0xf]  ;;  %v11525_v19 = vor.u32 %v15152_v2, %v11524_v0 }
 0x421   : > { %10186 = vmatpush.bf16.msra.mxu2 %v11701_v5  ;;  %10199 = vmatpush.bf16.msra.mxu3 %v11829_v44  ;;  %v15184_v5 = vld [vmem:[%s17246_s10 + $0x494] sm:$0xf0]  ;;  %v9910_v44 = vadd.f32 %v9909_v8, %v18537_v55  ;;  %v11620_v0 = vld [vmem:[%s17246_s10 + $0x448] sm:$0xf] }
 0x422   : > { %10155 = vmatmul.bf16.vlgmr.msrb.gmra.mxu3 %v17380_v31  ;;  %v11653_v58 = vor.u32 %v15184_v5, %v11652_v4  ;;  %v15180_v55 = vld [vmem:[%s17246_s10 + $0x474] sm:$0xf0]  ;;  %v11748_v5 = vld [vmem:[%s17246_s10 + $0x548] sm:$0xf] }
 0x423   : > { %10161 = vmatpush.bf16.msra.mxu0 %v11429_v62  ;;  %v15116_v62 = vld [vmem:[%s17246_s10 + $0x274] sm:$0xf0]  ;;  %v9923_v57 = vadd.f32 %v9922_v32, %v9910_v44  ;;  %v11637_v59 = vor.u32 %v15180_v55, %v11636_v29  ;;  %v9935_v35 = vpop.f32.mrf.mxu2  ;;  %v11732_v29 = vld [vmem:[%s17246_s10 + $0x528] sm:$0xf] }
 0x424   : > { %10174 = vmatpush.bf16.msra.mxu1 %v11557_v38  ;;  %v11508_v38 = vld [vmem:[%s17246_s10 + $0x368] sm:$0xf]  ;;  %v11381_v41 = vor.u32 %v15116_v62, %v11380_v63  ;;  %v15208_v8 = vld [vmem:[%s17246_s10 + $0x554] sm:$0xf0]  ;;  %v9924_v44 = vpop.f32.mrf.mxu1 }
 0x425   : > { %10187 = vmatpush.bf16.msra.mxu2 %v11685_v45  ;;  %10200 = vmatpush.bf16.msra.mxu3 %v11813_v48  ;;  %v11781_v45 = vor.u32 %v15216_v10, %v11780_v36  ;;  %v11764_v48 = vld [vmem:[%s17246_s10 + $0x568] sm:$0xf]  ;;  %v11509_v50 = vor.u32 %v15148_v47, %v11508_v38  ;;  %v9936_v2 = vadd.f32 %v9935_v35, %v9923_v57  ;;  %v9948_v4 = vpop.f32.mrf.mxu3  ;;  %v9911_v36 = vpop.f32.mrf.mxu0  ;;  %v15108_v63 = vld [vmem:[%s17246_s10 + $0x234] sm:$0xf0] }
 0x426   : > { %v11476_v62 = vld [vmem:[%s17246_s10 + $0x328] sm:$0xf]  ;;  %v11749_v38 = vor.u32 %v15208_v8, %v11748_v5  ;;  %v15172_v47 = vld [vmem:[%s17246_s10 + $0x434] sm:$0xf0] }
 0x427   : > { %10162 = vmatpush.bf16.msra.mxu0 %v11413_v52  ;;  %v15112_v52 = vld [vmem:[%s17246_s10 + $0x254] sm:$0xf0]  ;;  %v11604_v57 = vld [vmem:[%s17246_s10 + $0x428] sm:$0xf] }
 0x428   : > { %10175 = vmatpush.bf16.msra.mxu1 %v11541_v12  ;;  %v11492_v12 = vld [vmem:[%s17246_s10 + $0x348] sm:$0xf]  ;;  %v11365_v10 = vor.u32 %v15112_v52, %v11364_v42  ;;  %v15204_v55 = vld [vmem:[%s17246_s10 + $0x534] sm:$0xf0] }
 0x429   : > { %10188 = vmatpush.bf16.msra.mxu2 %v11669_v51  ;;  %10201 = vmatpush.bf16.msra.mxu3 %v11797_v1  ;;  %v11765_v51 = vor.u32 %v15212_v49, %v11764_v48  ;;  %v15176_v1 = vld [vmem:[%s17246_s10 + $0x454] sm:$0xf0]  ;;  %v11493_v32 = vor.u32 %v15144_v60, %v11492_v12  ;;  %v11332_v49 = vld [vmem:[%s17246_s10 + $0x208] sm:$0xf] }
 0x42a   : > { %v11460_v42 = vld [vmem:[%s17246_s10 + $0x308] sm:$0xf]  ;;  %v15136_v52 = vld [vmem:[%s17246_s10 + $0x314] sm:$0xf0] }
 0x42b   : > { %10163 = vmatpush.bf16.msra.mxu0 %v11397_v53  ;;  %v18608_v53 = vadd.f32 %v9948_v4, %v9936_v2  ;;  %v11588_v12 = vld [vmem:[%s17246_s10 + $0x408] sm:$0xf]  ;;  %v15168_v35 = vld [vmem:[%s17246_s10 + $0x414] sm:$0xf0] }
 0x42c   : > { %10176 = vmatpush.bf16.msra.mxu1 %v11525_v19  ;;  %v11621_v19 = vor.u32 %v15176_v1, %v11620_v0  ;;  %v11716_v60 = vld [vmem:[%s17246_s10 + $0x508] sm:$0xf]  ;;  %v15200_v0 = vld [vmem:[%s17246_s10 + $0x514] sm:$0xf0]  ;;  %v9937_v1 = vpop.f32.mrf.mxu2 }
 0x42d   : > { %10189 = vmatpush.bf16.msra.mxu2 %v11653_v58  ;;  %10202 = vmatpush.bf16.msra.mxu3 %v11781_v45  ;;  %v11348_v58 = vld [vmem:[%s17246_s10 + $0x228] sm:$0xf]  ;;  %v15140_v45 = vld [vmem:[%s17246_s10 + $0x334] sm:$0xf0]  ;;  %v9950_v8 = vpop.f32.mrf.mxu3 }
 0x42e   : > { %v11349_v48 = vor.u32 %v15108_v63, %v11348_v58  ;;  %v11956_v2 = vld [vmem:[%s17246_s10 + $0x6e8] sm:$0xf]  ;;  %v15260_v4 = vld [vmem:[%s17246_s10 + $0x6f4] sm:$0xf0]  ;;  %v11589_v58 = vor.u32 %v15168_v35, %v11588_v12 }
 0x42f   : > { %10164 = vmatpush.bf16.msra.mxu0 %v11381_v41  ;;  %v15104_v41 = vld [vmem:[%s17246_s10 + $0x214] sm:$0xf0]  ;;  %v12084_v5 = vld [vmem:[%s17246_s10 + $0x7e8] sm:$0xf] }
 0x430   : > { %10177 = vmatpush.bf16.msra.mxu1 %v11509_v50  ;;  %v11477_v50 = vor.u32 %v15140_v45, %v11476_v62  ;;  %v11333_v36 = vor.u32 %v15104_v41, %v11332_v49  ;;  %v12212_v44 = vld [vmem:[%s17246_s10 + $0x8e8] sm:$0xf]  ;;  %v15356_v62 = vld [vmem:[%s17246_s10 + $0x9f4] sm:$0xf0]  ;;  %v11957_v45 = vor.u32 %v15260_v4, %v11956_v2 }
 0x431   : > { %10190 = vmatpush.bf16.msra.mxu2 %v11637_v59  ;;  %10203 = vmatpush.bf16.msra.mxu3 %v11765_v51  ;;  %v11605_v59 = vor.u32 %v15172_v47, %v11604_v57  ;;  %v11733_v51 = vor.u32 %v15204_v55, %v11732_v29  ;;  %v12340_v63 = vld [vmem:[%s17246_s10 + $0x9e8] sm:$0xf]  ;;  %v15256_v55 = vld [vmem:[%s17246_s10 + $0x6d4] sm:$0xf0] }
 0x432   : > { %v11940_v29 = vld [vmem:[%s17246_s10 + $0x6c8] sm:$0xf]  ;;  %v12341_v49 = vor.u32 %v15356_v62, %v12340_v63  ;;  %v15288_v41 = vld [vmem:[%s17246_s10 + $0x7d4] sm:$0xf0] }
 0x433   : > { %10165 = vmatpush.bf16.msra.mxu0 %v11365_v10  ;;  %v15292_v10 = vld [vmem:[%s17246_s10 + $0x7f4] sm:$0xf0]  ;;  %v11941_v12 = vor.u32 %v15256_v55, %v11940_v29  ;;  %v12052_v1 = vld [vmem:[%s17246_s10 + $0x7a8] sm:$0xf] }
 0x434   : > { %10178 = vmatpush.bf16.msra.mxu1 %v11493_v32  ;;  %v15324_v32 = vld [vmem:[%s17246_s10 + $0x8f4] sm:$0xf0]  ;;  %v12085_v57 = vor.u32 %v15292_v10, %v12084_v5  ;;  %v12180_v5 = vld [vmem:[%s17246_s10 + $0x8a8] sm:$0xf] }
 0x435   : > { %10191 = vmatpush.bf16.msra.mxu2 %v11621_v19  ;;  %10204 = vmatpush.bf16.msra.mxu3 %v11749_v38  ;;  %v11461_v19 = vor.u32 %v15136_v52, %v11460_v42  ;;  %v11717_v38 = vor.u32 %v15200_v0, %v11716_v60  ;;  %v12213_v47 = vor.u32 %v15324_v32, %v12212_v44  ;;  %v12324_v42 = vld [vmem:[%s17246_s10 + $0x9c8] sm:$0xf]  ;;  %v15352_v52 = vld [vmem:[%s17246_s10 + $0x9d4] sm:$0xf0] }
 0x436   : > { %v11924_v60 = vld [vmem:[%s17246_s10 + $0x6a8] sm:$0xf]  ;;  %v15252_v0 = vld [vmem:[%s17246_s10 + $0x6b4] sm:$0xf0]  ;;  %v12325_v2 = vor.u32 %v15352_v52, %v12324_v42 }
 0x437   : > { %10166 = vmatpush.bf16.msra.mxu0 %v11349_v48  ;;  %v12068_v48 = vld [vmem:[%s17246_s10 + $0x7c8] sm:$0xf]  ;;  %v15284_v4 = vld [vmem:[%s17246_s10 + $0x7b4] sm:$0xf0]  ;;  %v11925_v44 = vor.u32 %v15252_v0, %v11924_v60 }
 0x438   : > { %10179 = vmatpush.bf16.msra.mxu1 %v11477_v50  ;;  %v12196_v50 = vld [vmem:[%s17246_s10 + $0x8c8] sm:$0xf]  ;;  %v15316_v8 = vld [vmem:[%s17246_s10 + $0x8b4] sm:$0xf0]  ;;  %v12053_v32 = vor.u32 %v15284_v4, %v12052_v1 }
 0x439   : > { %10192 = vmatpush.bf16.msra.mxu2 %v11605_v59  ;;  %10205 = vmatpush.bf16.msra.mxu3 %v11733_v51  ;;  %v15320_v59 = vld [vmem:[%s17246_s10 + $0x8d4] sm:$0xf0]  ;;  %v12069_v51 = vor.u32 %v15288_v41, %v12068_v48  ;;  %v12036_v62 = vld [vmem:[%s17246_s10 + $0x788] sm:$0xf] }
 0x43a   : > { %v12197_v35 = vor.u32 %v15320_v59, %v12196_v50  ;;  %v15348_v10 = vld [vmem:[%s17246_s10 + $0x9b4] sm:$0xf0]  ;;  %v12292_v55 = vld [vmem:[%s17246_s10 + $0x988] sm:$0xf] }
 0x43b   : > { %10167 = vmatpush.bf16.msra.mxu0 %v11333_v36  ;;  %v12308_v36 = vld [vmem:[%s17246_s10 + $0x9a8] sm:$0xf]  ;;  %v15248_v63 = vld [vmem:[%s17246_s10 + $0x694] sm:$0xf0]  ;;  %v9961_v29 = vpop.f32.mrf.mxu0 }
 0x43c   : > { %10180 = vmatpush.bf16.msra.mxu1 %v11461_v19  ;;  %v12181_v19 = vor.u32 %v15316_v8, %v12180_v5  ;;  %v15344_v48 = vld [vmem:[%s17246_s10 + $0x994] sm:$0xf0]  ;;  %v9974_v50 = vpop.f32.mrf.mxu1  ;;  %v11892_v52 = vld [vmem:[%s17246_s10 + $0x668] sm:$0xf] }
 0x43d   : > { %10193 = vmatpush.bf16.msra.mxu2 %v11589_v58  ;;  %10206 = vmatpush.bf16.msra.mxu3 %v11717_v38  ;;  %v11908_v58 = vld [vmem:[%s17246_s10 + $0x688] sm:$0xf]  ;;  %v12309_v38 = vor.u32 %v15348_v10, %v12308_v36  ;;  %v15276_v0 = vld [vmem:[%s17246_s10 + $0x774] sm:$0xf0] }
 0x43e   : > { %10168 = vmatmul.bf16.vlgmr.msra.gmra.mxu0 %v17369_v22  ;;  %v11909_v41 = vor.u32 %v15248_v63, %v11908_v58  ;;  %v12148_v1 = vld [vmem:[%s17246_s10 + $0x868] sm:$0xf]  ;;  %v15340_v4 = vld [vmem:[%s17246_s10 + $0x974] sm:$0xf0] }
 0x43f   : > { %10212 = vmatpush.bf16.msrb.mxu0 %v11957_v45  ;;  %10181 = vmatmul.bf16.vlgmr.msra.gmra.mxu1 %v17371_v24  ;;  %v15280_v45 = vld [vmem:[%s17246_s10 + $0x794] sm:$0xf0]  ;;  %v11876_v10 = vld [vmem:[%s17246_s10 + $0x648] sm:$0xf] }
 0x440   : > { %10225 = vmatpush.bf16.msrb.mxu1 %v12085_v57  ;;  %10194 = vmatmul.bf16.vlgmr.msra.gmra.mxu2 %v17439_v40  ;;  %v12164_v57 = vld [vmem:[%s17246_s10 + $0x888] sm:$0xf]  ;;  %v12037_v59 = vor.u32 %v15280_v45, %v12036_v62  ;;  %v15272_v63 = vld [vmem:[%s17246_s10 + $0x754] sm:$0xf0] }
 0x441   : > { %10238 = vmatpush.bf16.msrb.mxu2 %v12213_v47  ;;  %10251 = vmatpush.bf16.msrb.mxu3 %v12341_v49  ;;  %v15312_v47 = vld [vmem:[%s17246_s10 + $0x894] sm:$0xf0]  ;;  %v9962_v49 = vadd.f32 %v9961_v29, %v18608_v53  ;;  %v12132_v62 = vld [vmem:[%s17246_s10 + $0x848] sm:$0xf] }
 0x442   : > { %10207 = vmatmul.bf16.vlgmr.msra.gmra.mxu3 %v17444_v43  ;;  %v12165_v42 = vor.u32 %v15312_v47, %v12164_v57  ;;  %v15308_v53 = vld [vmem:[%s17246_s10 + $0x874] sm:$0xf0]  ;;  %v12260_v47 = vld [vmem:[%s17246_s10 + $0x948] sm:$0xf] }
 0x443   : > { %10213 = vmatpush.bf16.msrb.mxu0 %v11941_v12  ;;  %v15244_v12 = vld [vmem:[%s17246_s10 + $0x674] sm:$0xf0]  ;;  %v9975_v60 = vadd.f32 %v9974_v50, %v9962_v49  ;;  %v12149_v36 = vor.u32 %v15308_v53, %v12148_v1  ;;  %v9987_v58 = vpop.f32.mrf.mxu2  ;;  %v12244_v1 = vld [vmem:[%s17246_s10 + $0x928] sm:$0xf] }
 0x444   : > { %10226 = vmatpush.bf16.msrb.mxu1 %v12069_v51  ;;  %v12020_v51 = vld [vmem:[%s17246_s10 + $0x768] sm:$0xf]  ;;  %v11893_v5 = vor.u32 %v15244_v12, %v11892_v52  ;;  %v15336_v29 = vld [vmem:[%s17246_s10 + $0x954] sm:$0xf0]  ;;  %v9976_v49 = vpop.f32.mrf.mxu1 }
 0x445   : > { %10239 = vmatpush.bf16.msrb.mxu2 %v12197_v35  ;;  %10252 = vmatpush.bf16.msrb.mxu3 %v12325_v2  ;;  %v12293_v35 = vor.u32 %v15344_v48, %v12292_v55  ;;  %v12276_v2 = vld [vmem:[%s17246_s10 + $0x968] sm:$0xf]  ;;  %v12021_v8 = vor.u32 %v15276_v0, %v12020_v51  ;;  %v9988_v45 = vadd.f32 %v9987_v58, %v9975_v60  ;;  %v10000_v57 = vpop.f32.mrf.mxu3  ;;  %v9963_v55 = vpop.f32.mrf.mxu0  ;;  %v15236_v52 = vld [vmem:[%s17246_s10 + $0x634] sm:$0xf0] }
 0x446   : > { %v11988_v12 = vld [vmem:[%s17246_s10 + $0x728] sm:$0xf]  ;;  %v12261_v51 = vor.u32 %v15336_v29, %v12260_v47  ;;  %v15300_v0 = vld [vmem:[%s17246_s10 + $0x834] sm:$0xf0] }
 0x447   : > { %10214 = vmatpush.bf16.msrb.mxu0 %v11925_v44  ;;  %v15240_v44 = vld [vmem:[%s17246_s10 + $0x654] sm:$0xf0]  ;;  %v12116_v60 = vld [vmem:[%s17246_s10 + $0x828] sm:$0xf] }
 0x448   : > { %10227 = vmatpush.bf16.msrb.mxu1 %v12053_v32  ;;  %v12004_v32 = vld [vmem:[%s17246_s10 + $0x748] sm:$0xf]  ;;  %v11877_v48 = vor.u32 %v15240_v44, %v11876_v10  ;;  %v15332_v53 = vld [vmem:[%s17246_s10 + $0x934] sm:$0xf0] }
 0x449   : > { %10240 = vmatpush.bf16.msrb.mxu2 %v12181_v19  ;;  %10253 = vmatpush.bf16.msrb.mxu3 %v12309_v38  ;;  %v12277_v19 = vor.u32 %v15340_v4, %v12276_v2  ;;  %v15304_v38 = vld [vmem:[%s17246_s10 + $0x854] sm:$0xf0]  ;;  %v12005_v50 = vor.u32 %v15272_v63, %v12004_v32  ;;  %v11844_v4 = vld [vmem:[%s17246_s10 + $0x608] sm:$0xf] }
 0x44a   : > { %v11972_v10 = vld [vmem:[%s17246_s10 + $0x708] sm:$0xf]  ;;  %v15264_v44 = vld [vmem:[%s17246_s10 + $0x714] sm:$0xf0] }
 0x44b   : > { %10215 = vmatpush.bf16.msrb.mxu0 %v11909_v41  ;;  %v18679_v41 = vadd.f32 %v10000_v57, %v9988_v45  ;;  %v12100_v32 = vld [vmem:[%s17246_s10 + $0x808] sm:$0xf]  ;;  %v15296_v58 = vld [vmem:[%s17246_s10 + $0x814] sm:$0xf0] }
 0x44c   : > { %10228 = vmatpush.bf16.msrb.mxu1 %v12037_v59  ;;  %v12133_v59 = vor.u32 %v15304_v38, %v12132_v62  ;;  %v12228_v63 = vld [vmem:[%s17246_s10 + $0x908] sm:$0xf]  ;;  %v15328_v62 = vld [vmem:[%s17246_s10 + $0x914] sm:$0xf0]  ;;  %v9989_v38 = vpop.f32.mrf.mxu2 }
 0x44d   : > { %10241 = vmatpush.bf16.msrb.mxu2 %v12165_v42  ;;  %10254 = vmatpush.bf16.msrb.mxu3 %v12293_v35  ;;  %v11860_v42 = vld [vmem:[%s17246_s10 + $0x628] sm:$0xf]  ;;  %v15268_v35 = vld [vmem:[%s17246_s10 + $0x734] sm:$0xf0]  ;;  %v10002_v29 = vpop.f32.mrf.mxu3 }
 0x44e   : > { %v11861_v2 = vor.u32 %v15236_v52, %v11860_v42  ;;  %v12468_v45 = vld [vmem:[%s17246_s10 + $0xae8] sm:$0xf]  ;;  %v15388_v57 = vld [vmem:[%s17246_s10 + $0xaf4] sm:$0xf0]  ;;  %v12101_v42 = vor.u32 %v15296_v58, %v12100_v32 }
 0x44f   : > { %10216 = vmatpush.bf16.msrb.mxu0 %v11893_v5  ;;  %v15232_v5 = vld [vmem:[%s17246_s10 + $0x614] sm:$0xf0]  ;;  %v12596_v47 = vld [vmem:[%s17246_s10 + $0xbe8] sm:$0xf] }
 0x450   : > { %10229 = vmatpush.bf16.msrb.mxu1 %v12021_v8  ;;  %v11989_v8 = vor.u32 %v15268_v35, %v11988_v12  ;;  %v11845_v55 = vor.u32 %v15232_v5, %v11844_v4  ;;  %v12724_v49 = vld [vmem:[%s17246_s10 + $0xce8] sm:$0xf]  ;;  %v15484_v12 = vld [vmem:[%s17246_s10 + $0xdf4] sm:$0xf0]  ;;  %v12469_v35 = vor.u32 %v15388_v57, %v12468_v45 }
 0x451   : > { %10242 = vmatpush.bf16.msrb.mxu2 %v12149_v36  ;;  %10255 = vmatpush.bf16.msrb.mxu3 %v12277_v19  ;;  %v12117_v36 = vor.u32 %v15300_v0, %v12116_v60  ;;  %v12245_v19 = vor.u32 %v15332_v53, %v12244_v1  ;;  %v12852_v52 = vld [vmem:[%s17246_s10 + $0xde8] sm:$0xf]  ;;  %v15384_v53 = vld [vmem:[%s17246_s10 + $0xad4] sm:$0xf0] }
 0x452   : > { %v12452_v1 = vld [vmem:[%s17246_s10 + $0xac8] sm:$0xf]  ;;  %v12853_v4 = vor.u32 %v15484_v12, %v12852_v52  ;;  %v15416_v5 = vld [vmem:[%s17246_s10 + $0xbd4] sm:$0xf0] }
 0x453   : > { %10217 = vmatpush.bf16.msrb.mxu0 %v11877_v48  ;;  %v15420_v48 = vld [vmem:[%s17246_s10 + $0xbf4] sm:$0xf0]  ;;  %v12453_v32 = vor.u32 %v15384_v53, %v12452_v1  ;;  %v12564_v38 = vld [vmem:[%s17246_s10 + $0xba8] sm:$0xf] }
 0x454   : > { %10230 = vmatpush.bf16.msrb.mxu1 %v12005_v50  ;;  %v15452_v50 = vld [vmem:[%s17246_s10 + $0xcf4] sm:$0xf0]  ;;  %v12597_v60 = vor.u32 %v15420_v48, %v12596_v47  ;;  %v12692_v47 = vld [vmem:[%s17246_s10 + $0xca8] sm:$0xf] }
 0x455   : > { %10243 = vmatpush.bf16.msrb.mxu2 %v12133_v59  ;;  %10256 = vmatpush.bf16.msrb.mxu3 %v12261_v51  ;;  %v11973_v59 = vor.u32 %v15264_v44, %v11972_v10  ;;  %v12229_v51 = vor.u32 %v15328_v62, %v12228_v63  ;;  %v12725_v0 = vor.u32 %v15452_v50, %v12724_v49  ;;  %v12836_v10 = vld [vmem:[%s17246_s10 + $0xdc8] sm:$0xf]  ;;  %v15480_v44 = vld [vmem:[%s17246_s10 + $0xdd4] sm:$0xf0] }
 0x456   : > { %v12436_v63 = vld [vmem:[%s17246_s10 + $0xaa8] sm:$0xf]  ;;  %v15380_v62 = vld [vmem:[%s17246_s10 + $0xab4] sm:$0xf0]  ;;  %v12837_v45 = vor.u32 %v15480_v44, %v12836_v10 }
 0x457   : > { %10218 = vmatpush.bf16.msrb.mxu0 %v11861_v2  ;;  %v12580_v2 = vld [vmem:[%s17246_s10 + $0xbc8] sm:$0xf]  ;;  %v15412_v57 = vld [vmem:[%s17246_s10 + $0xbb4] sm:$0xf0]  ;;  %v12437_v49 = vor.u32 %v15380_v62, %v12436_v63 }
 0x458   : > { %10231 = vmatpush.bf16.msrb.mxu1 %v11989_v8  ;;  %v12708_v8 = vld [vmem:[%s17246_s10 + $0xcc8] sm:$0xf]  ;;  %v15444_v29 = vld [vmem:[%s17246_s10 + $0xcb4] sm:$0xf0]  ;;  %v12565_v50 = vor.u32 %v15412_v57, %v12564_v38 }
 0x459   : > { %10244 = vmatpush.bf16.msrb.mxu2 %v12117_v36  ;;  %10257 = vmatpush.bf16.msrb.mxu3 %v12245_v19  ;;  %v15448_v36 = vld [vmem:[%s17246_s10 + $0xcd4] sm:$0xf0]  ;;  %v12581_v19 = vor.u32 %v15416_v5, %v12580_v2  ;;  %v12548_v12 = vld [vmem:[%s17246_s10 + $0xb88] sm:$0xf] }
 0x45a   : > { %v12709_v58 = vor.u32 %v15448_v36, %v12708_v8  ;;  %v15476_v48 = vld [vmem:[%s17246_s10 + $0xdb4] sm:$0xf0]  ;;  %v12804_v53 = vld [vmem:[%s17246_s10 + $0xd88] sm:$0xf] }
 0x45b   : > { %10219 = vmatpush.bf16.msrb.mxu0 %v11845_v55  ;;  %v12820_v55 = vld [vmem:[%s17246_s10 + $0xda8] sm:$0xf]  ;;  %v15376_v52 = vld [vmem:[%s17246_s10 + $0xa94] sm:$0xf0]  ;;  %v18731_v1 = vpop.f32.mrf.mxu0 }
 0x45c   : > { %10232 = vmatpush.bf16.msrb.mxu1 %v11973_v59  ;;  %v12693_v59 = vor.u32 %v15444_v29, %v12692_v47  ;;  %v15472_v2 = vld [vmem:[%s17246_s10 + $0xd94] sm:$0xf0]  ;;  %v18735_v5 = vpop.f32.mrf.mxu1  ;;  %v12404_v10 = vld [vmem:[%s17246_s10 + $0xa68] sm:$0xf] }
 0x45d   : > { %10245 = vmatpush.bf16.msrb.mxu2 %v12101_v42  ;;  %10258 = vmatpush.bf16.msrb.mxu3 %v12229_v51  ;;  %v12420_v42 = vld [vmem:[%s17246_s10 + $0xa88] sm:$0xf]  ;;  %v12821_v51 = vor.u32 %v15476_v48, %v12820_v55  ;;  %v15372_v44 = vld [vmem:[%s17246_s10 + $0xa74] sm:$0xf0] }
 0x45e   : > { %10220 = vmatmul.bf16.vlgmr.msrb.gmra.mxu0 %v17428_v23  ;;  %v12660_v63 = vld [vmem:[%s17246_s10 + $0xc68] sm:$0xf]  ;;  %v15436_v62 = vld [vmem:[%s17246_s10 + $0xc74] sm:$0xf0]  ;;  %v12405_v57 = vor.u32 %v15372_v44, %v12404_v10 }
 0x45f   : > { %10264 = vmatpush.bf16.msra.mxu0 %v12469_v35  ;;  %10233 = vmatmul.bf16.vlgmr.msrb.gmra.mxu1 %v17430_v26  ;;  %v15408_v35 = vld [vmem:[%s17246_s10 + $0xb94] sm:$0xf0]  ;;  %v12788_v38 = vld [vmem:[%s17246_s10 + $0xd68] sm:$0xf]  ;;  %v12661_v29 = vor.u32 %v15436_v62, %v12660_v63 }
 0x460   : > { %10277 = vmatpush.bf16.msra.mxu1 %v12597_v60  ;;  %10246 = vmatmul.bf16.vlgmr.msrb.gmra.mxu2 %v17515_v9  ;;  %v12676_v60 = vld [vmem:[%s17246_s10 + $0xc88] sm:$0xf]  ;;  %v12549_v8 = vor.u32 %v15408_v35, %v12548_v12  ;;  %v15368_v48 = vld [vmem:[%s17246_s10 + $0xa54] sm:$0xf0] }
 0x461   : > { %10290 = vmatpush.bf16.msra.mxu2 %v12725_v0  ;;  %10303 = vmatpush.bf16.msra.mxu3 %v12853_v4  ;;  %v15440_v0 = vld [vmem:[%s17246_s10 + $0xc94] sm:$0xf0]  ;;  %v12421_v4 = vor.u32 %v15376_v52, %v12420_v42  ;;  %v12388_v55 = vld [vmem:[%s17246_s10 + $0xa48] sm:$0xf] }
 0x462   : > { %10259 = vmatmul.bf16.vlgmr.msrb.gmra.mxu3 %v17526_v17  ;;  %v12677_v36 = vor.u32 %v15440_v0, %v12676_v60  ;;  %v15400_v42 = vld [vmem:[%s17246_s10 + $0xb54] sm:$0xf0]  ;;  %v12644_v52 = vld [vmem:[%s17246_s10 + $0xc48] sm:$0xf] }
 0x463   : > { %10265 = vmatpush.bf16.msra.mxu0 %v12453_v32  ;;  %v12532_v32 = vld [vmem:[%s17246_s10 + $0xb68] sm:$0xf]  ;;  %v15432_v12 = vld [vmem:[%s17246_s10 + $0xc54] sm:$0xf0]  ;;  %v10015_v0 = vpop.f32.mrf.mxu0 }
 0x464   : > { %10278 = vmatpush.bf16.msra.mxu1 %v12581_v19  ;;  %v12805_v19 = vor.u32 %v15472_v2, %v12804_v53  ;;  %v12772_v35 = vld [vmem:[%s17246_s10 + $0xd48] sm:$0xf]  ;;  %v15464_v60 = vld [vmem:[%s17246_s10 + $0xd54] sm:$0xf0]  ;;  %v12389_v53 = vor.u32 %v15368_v48, %v12388_v55  ;;  %v10028_v2 = vpop.f32.mrf.mxu1 }
 0x465   : > { %10291 = vmatpush.bf16.msra.mxu2 %v12709_v58  ;;  %10304 = vmatpush.bf16.msra.mxu3 %v12837_v45  ;;  %v15404_v58 = vld [vmem:[%s17246_s10 + $0xb74] sm:$0xf0]  ;;  %v12500_v44 = vld [vmem:[%s17246_s10 + $0xb28] sm:$0xf] }
 0x466   : > { %v15468_v45 = vld [vmem:[%s17246_s10 + $0xd74] sm:$0xf0]  ;;  %v12533_v47 = vor.u32 %v15404_v58, %v12532_v32  ;;  %v12773_v32 = vor.u32 %v15464_v60, %v12772_v35  ;;  %v12628_v58 = vld [vmem:[%s17246_s10 + $0xc28] sm:$0xf] }
 0x467   : > { %10266 = vmatpush.bf16.msra.mxu0 %v12437_v49  ;;  %v12516_v49 = vld [vmem:[%s17246_s10 + $0xb48] sm:$0xf]  ;;  %v15364_v10 = vld [vmem:[%s17246_s10 + $0xa34] sm:$0xf0] }
 0x468   : > { %10279 = vmatpush.bf16.msra.mxu1 %v12565_v50  ;;  %v12789_v50 = vor.u32 %v15468_v45, %v12788_v38  ;;  %v15428_v63 = vld [vmem:[%s17246_s10 + $0xc34] sm:$0xf0]  ;;  %v12756_v62 = vld [vmem:[%s17246_s10 + $0xd28] sm:$0xf] }
 0x469   : > { %10292 = vmatpush.bf16.msra.mxu2 %v12693_v59  ;;  %10305 = vmatpush.bf16.msra.mxu3 %v12821_v51  ;;  %v18748_v59 = vpop.f32.mrf.mxu2  ;;  %v18753_v51 = vpop.f32.mrf.mxu3  ;;  %v15460_v38 = vld [vmem:[%s17246_s10 + $0xd34] sm:$0xf0]  ;;  %v12629_v55 = vor.u32 %v15428_v63, %v12628_v58  ;;  %v12484_v48 = vld [vmem:[%s17246_s10 + $0xb08] sm:$0xf] }
 0x46a   : > { %v15456_v35 = vld [vmem:[%s17246_s10 + $0xd14] sm:$0xf0]  ;;  %v12980_v0 = vld [vmem:[%s17246_s10 + $0xee8] sm:$0xf] }
 0x46b   : > { %10267 = vmatpush.bf16.msra.mxu0 %v12421_v4  ;;  %v12517_v4 = vor.u32 %v15400_v42, %v12516_v49  ;;  %v15392_v49 = vld [vmem:[%s17246_s10 + $0xb14] sm:$0xf0]  ;;  %v12757_v42 = vor.u32 %v15460_v38, %v12756_v62  ;;  %v13108_v2 = vld [vmem:[%s17246_s10 + $0xfe8] sm:$0xf] }
 0x46c   : > { %10280 = vmatpush.bf16.msra.mxu1 %v12549_v8  ;;  %v12645_v8 = vor.u32 %v15432_v12, %v12644_v52  ;;  %v15424_v52 = vld [vmem:[%s17246_s10 + $0xc14] sm:$0xf0]  ;;  %v12740_v12 = vld [vmem:[%s17246_s10 + $0xd08] sm:$0xf] }
 0x46d   : > { %10293 = vmatpush.bf16.msra.mxu2 %v12677_v36  ;;  %10306 = vmatpush.bf16.msra.mxu3 %v12805_v19  ;;  %v12372_v36 = vld [vmem:[%s17246_s10 + $0xa28] sm:$0xf]  ;;  %v15396_v19 = vld [vmem:[%s17246_s10 + $0xb34] sm:$0xf0]  ;;  %v12741_v62 = vor.u32 %v15456_v35, %v12740_v12 }
 0x46e   : > { %v12373_v45 = vor.u32 %v15364_v10, %v12372_v36  ;;  %v15548_v36 = vld [vmem:[%s17246_s10 + $0xff4] sm:$0xf0]  ;;  %v13236_v10 = vld [vmem:[%s17246_s10 + $0x10e8] sm:$0xf] }
 0x46f   : > { %10268 = vmatpush.bf16.msra.mxu0 %v12405_v57  ;;  %v12356_v57 = vld [vmem:[%s17246_s10 + $0xa08] sm:$0xf]  ;;  %v15612_v63 = vld [vmem:[%s17246_s10 + $0x11f4] sm:$0xf0] }
 0x470   : > { %10281 = vmatpush.bf16.msra.mxu1 %v12533_v47  ;;  %v15360_v47 = vld [vmem:[%s17246_s10 + $0xa14] sm:$0xf0]  ;;  %v13364_v58 = vld [vmem:[%s17246_s10 + $0x11e8] sm:$0xf] }
 0x471   : > { %10294 = vmatpush.bf16.msra.mxu2 %v12661_v29  ;;  %10307 = vmatpush.bf16.msra.mxu3 %v12789_v50  ;;  %v12501_v29 = vor.u32 %v15396_v19, %v12500_v44  ;;  %v12612_v50 = vld [vmem:[%s17246_s10 + $0xc08] sm:$0xf]  ;;  %v10041_v60 = vpop.f32.mrf.mxu2  ;;  %v15580_v44 = vld [vmem:[%s17246_s10 + $0x10f4] sm:$0xf0] }
 0x472   : > { %v12613_v19 = vor.u32 %v15424_v52, %v12612_v50  ;;  %v15512_v60 = vld [vmem:[%s17246_s10 + $0xed4] sm:$0xf0]  ;;  %v13348_v50 = vld [vmem:[%s17246_s10 + $0x11c8] sm:$0xf] }
 0x473   : > { %10269 = vmatpush.bf16.msra.mxu0 %v12389_v53  ;;  %v15516_v53 = vld [vmem:[%s17246_s10 + $0xef4] sm:$0xf0] }
 0x474   : > { %10282 = vmatpush.bf16.msra.mxu1 %v12517_v4  ;;  %v10054_v4 = vpop.f32.mrf.mxu3  ;;  %v12981_v38 = vor.u32 %v15516_v53, %v12980_v0  ;;  %v12948_v0 = vld [vmem:[%s17246_s10 + $0xea8] sm:$0xf]  ;;  %v15508_v53 = vld [vmem:[%s17246_s10 + $0xeb4] sm:$0xf0] }
 0x475   : > { %10295 = vmatpush.bf16.msra.mxu2 %v12645_v8  ;;  %10308 = vmatpush.bf16.msra.mxu3 %v12773_v32  ;;  %v12357_v8 = vor.u32 %v15360_v47, %v12356_v57  ;;  %v12485_v32 = vor.u32 %v15392_v49, %v12484_v48  ;;  %v13237_v57 = vor.u32 %v15580_v44, %v13236_v10  ;;  %v12964_v47 = vld [vmem:[%s17246_s10 + $0xec8] sm:$0xf]  ;;  %v15576_v49 = vld [vmem:[%s17246_s10 + $0x10d4] sm:$0xf0] }
 0x476   : > { %v13092_v4 = vld [vmem:[%s17246_s10 + $0xfc8] sm:$0xf]  ;;  %v12965_v52 = vor.u32 %v15512_v60, %v12964_v47  ;;  %v15572_v44 = vld [vmem:[%s17246_s10 + $0x10b4] sm:$0xf0] }
 0x477   : > { %10270 = vmatpush.bf16.msra.mxu0 %v12373_v45  ;;  %v13109_v45 = vor.u32 %v15548_v36, %v13108_v2  ;;  %v13220_v48 = vld [vmem:[%s17246_s10 + $0x10c8] sm:$0xf]  ;;  %v15540_v36 = vld [vmem:[%s17246_s10 + $0xfb4] sm:$0xf0] }
 0x478   : > { %10283 = vmatpush.bf16.msra.mxu1 %v12501_v29  ;;  %v13365_v29 = vor.u32 %v15612_v63, %v13364_v58  ;;  %v13221_v35 = vor.u32 %v15576_v49, %v13220_v48  ;;  %v13076_v2 = vld [vmem:[%s17246_s10 + $0xfa8] sm:$0xf]  ;;  %v12949_v58 = vor.u32 %v15508_v53, %v12948_v0  ;;  %v15536_v60 = vld [vmem:[%s17246_s10 + $0xf94] sm:$0xf0] }
 0x479   : > { %10296 = vmatpush.bf16.msra.mxu2 %v12629_v55  ;;  %10309 = vmatpush.bf16.msra.mxu3 %v12757_v42  ;;  %v15544_v55 = vld [vmem:[%s17246_s10 + $0xfd4] sm:$0xf0]  ;;  %v13204_v10 = vld [vmem:[%s17246_s10 + $0x10a8] sm:$0xf]  ;;  %v13077_v63 = vor.u32 %v15540_v36, %v13076_v2 }
 0x47a   : > { %v15608_v42 = vld [vmem:[%s17246_s10 + $0x11d4] sm:$0xf0]  ;;  %v13093_v12 = vor.u32 %v15544_v55, %v13092_v4  ;;  %v13188_v4 = vld [vmem:[%s17246_s10 + $0x1088] sm:$0xf] }
 0x47b   : > { %10271 = vmatpush.bf16.msra.mxu0 %v12357_v8  ;;  %v13349_v8 = vor.u32 %v15608_v42, %v13348_v50  ;;  %v18807_v55 = vpop.f32.mrf.mxu0  ;;  %v13316_v48 = vld [vmem:[%s17246_s10 + $0x1188] sm:$0xf]  ;;  %v15600_v49 = vld [vmem:[%s17246_s10 + $0x1194] sm:$0xf0] }
 0x47c   : > { %10284 = vmatpush.bf16.msra.mxu1 %v12485_v32  ;;  %v13332_v32 = vld [vmem:[%s17246_s10 + $0x11a8] sm:$0xf]  ;;  %v18811_v42 = vpop.f32.mrf.mxu1  ;;  %v15500_v0 = vld [vmem:[%s17246_s10 + $0xe74] sm:$0xf0]  ;;  %v13317_v2 = vor.u32 %v15600_v49, %v13316_v48 }
 0x47d   : > { %10297 = vmatpush.bf16.msra.mxu2 %v12613_v19  ;;  %10310 = vmatpush.bf16.msra.mxu3 %v12741_v62  ;;  %v15604_v19 = vld [vmem:[%s17246_s10 + $0x11b4] sm:$0xf0]  ;;  %v13205_v62 = vor.u32 %v15572_v44, %v13204_v10  ;;  %v13044_v53 = vld [vmem:[%s17246_s10 + $0xf68] sm:$0xf] }
 0x47e   : > { %10272 = vmatmul.bf16.vlgmr.msra.gmra.mxu0 %v17522_v14  ;;  %v13333_v47 = vor.u32 %v15604_v19, %v13332_v32  ;;  %v13172_v36 = vld [vmem:[%s17246_s10 + $0x1068] sm:$0xf]  ;;  %v15564_v10 = vld [vmem:[%s17246_s10 + $0x1074] sm:$0xf0] }
 0x47f   : > { %10316 = vmatpush.bf16.msrb.mxu0 %v12981_v38  ;;  %10285 = vmatmul.bf16.vlgmr.msra.gmra.mxu1 %v17532_v20  ;;  %v12932_v38 = vld [vmem:[%s17246_s10 + $0xe88] sm:$0xf]  ;;  %v15596_v32 = vld [vmem:[%s17246_s10 + $0x1174] sm:$0xf0] }
 0x480   : > { %10329 = vmatpush.bf16.msrb.mxu1 %v13109_v45  ;;  %10298 = vmatmul.bf16.vlgmr.msra.gmra.mxu2 %v17614_v18  ;;  %v15504_v45 = vld [vmem:[%s17246_s10 + $0xe94] sm:$0xf0]  ;;  %v13300_v44 = vld [vmem:[%s17246_s10 + $0x1168] sm:$0xf] }
 0x481   : > { %10342 = vmatpush.bf16.msrb.mxu2 %v13237_v57  ;;  %10355 = vmatpush.bf16.msrb.mxu3 %v13365_v29  ;;  %v13060_v57 = vld [vmem:[%s17246_s10 + $0xf88] sm:$0xf]  ;;  %v15568_v29 = vld [vmem:[%s17246_s10 + $0x1094] sm:$0xf0]  ;;  %v12933_v50 = vor.u32 %v15504_v45, %v12932_v38 }
 0x482   : > { %10311 = vmatmul.bf16.vlgmr.msra.gmra.mxu3 %v17625_v16  ;;  %v15496_v38 = vld [vmem:[%s17246_s10 + $0xe54] sm:$0xf0]  ;;  %v13028_v45 = vld [vmem:[%s17246_s10 + $0xf48] sm:$0xf] }
 0x483   : > { %10317 = vmatpush.bf16.msrb.mxu0 %v12965_v52  ;;  %v13061_v52 = vor.u32 %v15536_v60, %v13060_v57  ;;  %v10014_v57 = vadd.f32 %v18731_v1, %v18679_v41  ;;  %v18826_v60 = vpop.f32.mrf.mxu2  ;;  %v15560_v48 = vld [vmem:[%s17246_s10 + $0x1054] sm:$0xf0] }
 0x484   : > { %10330 = vmatpush.bf16.msrb.mxu1 %v13093_v12  ;;  %v13189_v12 = vor.u32 %v15568_v29, %v13188_v4  ;;  %v15528_v4 = vld [vmem:[%s17246_s10 + $0xf54] sm:$0xf0]  ;;  %v13156_v29 = vld [vmem:[%s17246_s10 + $0x1048] sm:$0xf]  ;;  %v10080_v1 = vpop.f32.mrf.mxu1 }
 0x485   : > { %10343 = vmatpush.bf16.msrb.mxu2 %v13221_v35  ;;  %10356 = vmatpush.bf16.msrb.mxu3 %v13349_v8  ;;  %v12916_v35 = vld [vmem:[%s17246_s10 + $0xe68] sm:$0xf]  ;;  %v15532_v8 = vld [vmem:[%s17246_s10 + $0xf74] sm:$0xf0]  ;;  %v18831_v49 = vpop.f32.mrf.mxu3 }
 0x486   : > { %v12917_v19 = vor.u32 %v15500_v0, %v12916_v35  ;;  %v13029_v35 = vor.u32 %v15528_v4, %v13028_v45  ;;  %v13157_v0 = vor.u32 %v15560_v48, %v13156_v29  ;;  %v12868_v45 = vld [vmem:[%s17246_s10 + $0xe08] sm:$0xf]  ;;  %v15520_v29 = vld [vmem:[%s17246_s10 + $0xf14] sm:$0xf0] }
 0x487   : > { %10318 = vmatpush.bf16.msrb.mxu0 %v12949_v58  ;;  %v13045_v58 = vor.u32 %v15532_v8, %v13044_v53  ;;  %v12884_v53 = vld [vmem:[%s17246_s10 + $0xe28] sm:$0xf] }
 0x488   : > { %10331 = vmatpush.bf16.msrb.mxu1 %v13077_v63  ;;  %v13173_v63 = vor.u32 %v15564_v10, %v13172_v36  ;;  %v13012_v8 = vld [vmem:[%s17246_s10 + $0xf28] sm:$0xf]  ;;  %v10027_v36 = vadd.f32 %v18735_v5, %v10014_v57  ;;  %v15488_v5 = vld [vmem:[%s17246_s10 + $0xe14] sm:$0xf0] }
 0x489   : > { %10344 = vmatpush.bf16.msrb.mxu2 %v13205_v62  ;;  %10357 = vmatpush.bf16.msrb.mxu3 %v13333_v47  ;;  %v12900_v62 = vld [vmem:[%s17246_s10 + $0xe48] sm:$0xf]  ;;  %v13301_v47 = vor.u32 %v15596_v32, %v13300_v44  ;;  %v15524_v44 = vld [vmem:[%s17246_s10 + $0xf34] sm:$0xf0] }
 0x48a   : > { %v12901_v41 = vor.u32 %v15496_v38, %v12900_v62  ;;  %v13140_v32 = vld [vmem:[%s17246_s10 + $0x1028] sm:$0xf]  ;;  %v13013_v57 = vor.u32 %v15524_v44, %v13012_v8  ;;  %v12869_v8 = vor.u32 %v15488_v5, %v12868_v45 }
 0x48b   : > { %10319 = vmatpush.bf16.msrb.mxu0 %v12933_v50  ;;  %v13284_v50 = vld [vmem:[%s17246_s10 + $0x1148] sm:$0xf] }
 0x48c   : > { %10332 = vmatpush.bf16.msrb.mxu1 %v13061_v52  ;;  %v15592_v52 = vld [vmem:[%s17246_s10 + $0x1154] sm:$0xf0]  ;;  %v13268_v62 = vld [vmem:[%s17246_s10 + $0x1128] sm:$0xf] }
 0x48d   : > { %10345 = vmatpush.bf16.msrb.mxu2 %v13189_v12  ;;  %10358 = vmatpush.bf16.msrb.mxu3 %v13317_v2  ;;  %v10067_v12 = vpop.f32.mrf.mxu0  ;;  %v15492_v2 = vld [vmem:[%s17246_s10 + $0xe34] sm:$0xf0]  ;;  %v13285_v10 = vor.u32 %v15592_v52, %v13284_v50  ;;  %v12996_v4 = vld [vmem:[%s17246_s10 + $0xf08] sm:$0xf] }
 0x48e   : > { %v12885_v38 = vor.u32 %v15492_v2, %v12884_v53  ;;  %v13124_v48 = vld [vmem:[%s17246_s10 + $0x1008] sm:$0xf]  ;;  %v15552_v50 = vld [vmem:[%s17246_s10 + $0x1014] sm:$0xf0] }
 0x48f   : > { %10320 = vmatpush.bf16.msrb.mxu0 %v12917_v19  ;;  %v15556_v19 = vld [vmem:[%s17246_s10 + $0x1034] sm:$0xf0]  ;;  %v13252_v52 = vld [vmem:[%s17246_s10 + $0x1108] sm:$0xf] }
 0x490   : > { %10333 = vmatpush.bf16.msrb.mxu1 %v13045_v58  ;;  %v15588_v58 = vld [vmem:[%s17246_s10 + $0x1134] sm:$0xf0]  ;;  %v13492_v1 = vld [vmem:[%s17246_s10 + $0x12e8] sm:$0xf] }
 0x491   : > { %10346 = vmatpush.bf16.msrb.mxu2 %v13173_v63  ;;  %10359 = vmatpush.bf16.msrb.mxu3 %v13301_v47  ;;  %v10040_v63 = vadd.f32 %v18748_v59, %v10027_v36  ;;  %v13141_v47 = vor.u32 %v15556_v19, %v13140_v32  ;;  %v13269_v59 = vor.u32 %v15588_v58, %v13268_v62  ;;  %v15584_v12 = vld [vmem:[%s17246_s10 + $0x1114] sm:$0xf0]  ;;  %v13748_v44 = vld [vmem:[%s17246_s10 + $0x14e8] sm:$0xf] }
 0x492   : > { %v15644_v53 = vld [vmem:[%s17246_s10 + $0x12f4] sm:$0xf0]  ;;  %v12997_v32 = vor.u32 %v15520_v29, %v12996_v4  ;;  %v13125_v19 = vor.u32 %v15552_v50, %v13124_v48  ;;  %v13876_v62 = vld [vmem:[%s17246_s10 + $0x15e8] sm:$0xf] }
 0x493   : > { %10321 = vmatpush.bf16.msrb.mxu0 %v12901_v41  ;;  %v10093_v41 = vpop.f32.mrf.mxu2  ;;  %v10053_v2 = vadd.f32 %v18753_v51, %v10040_v63  ;;  %v15676_v36 = vld [vmem:[%s17246_s10 + $0x13f4] sm:$0xf0]  ;;  %v13253_v51 = vor.u32 %v15584_v12, %v13252_v52  ;;  %v13493_v63 = vor.u32 %v15644_v53, %v13492_v1  ;;  %v13476_v5 = vld [vmem:[%s17246_s10 + $0x12c8] sm:$0xf] }
 0x494   : > { %10334 = vmatpush.bf16.msrb.mxu1 %v13029_v35  ;;  %v13620_v35 = vld [vmem:[%s17246_s10 + $0x13e8] sm:$0xf]  ;;  %v15740_v58 = vld [vmem:[%s17246_s10 + $0x15f4] sm:$0xf0] }
 0x495   : > { %10347 = vmatpush.bf16.msrb.mxu2 %v13157_v0  ;;  %10360 = vmatpush.bf16.msrb.mxu3 %v13285_v10  ;;  %v10106_v0 = vpop.f32.mrf.mxu3  ;;  %v15708_v10 = vld [vmem:[%s17246_s10 + $0x14f4] sm:$0xf0]  ;;  %v10066_v41 = vadd.f32 %v18807_v55, %v10053_v2  ;;  %v13732_v29 = vld [vmem:[%s17246_s10 + $0x14c8] sm:$0xf] }
 0x496   : > { %v13749_v45 = vor.u32 %v15708_v10, %v13748_v44  ;;  %v15640_v0 = vld [vmem:[%s17246_s10 + $0x12d4] sm:$0xf0]  ;;  %v13860_v55 = vld [vmem:[%s17246_s10 + $0x15c8] sm:$0xf] }
 0x497   : > { %10322 = vmatpush.bf16.msrb.mxu0 %v12885_v38  ;;  %v13621_v38 = vor.u32 %v15676_v36, %v13620_v35  ;;  %v15672_v4 = vld [vmem:[%s17246_s10 + $0x13d4] sm:$0xf0]  ;;  %v10079_v50 = vadd.f32 %v18811_v42, %v10066_v41  ;;  %v13477_v52 = vor.u32 %v15640_v0, %v13476_v5  ;;  %v13460_v53 = vld [vmem:[%s17246_s10 + $0x12a8] sm:$0xf] }
 0x498   : > { %10335 = vmatpush.bf16.msrb.mxu1 %v13013_v57  ;;  %v13604_v57 = vld [vmem:[%s17246_s10 + $0x13c8] sm:$0xf]  ;;  %v15704_v48 = vld [vmem:[%s17246_s10 + $0x14d4] sm:$0xf0] }
 0x499   : > { %10348 = vmatpush.bf16.msrb.mxu2 %v13141_v47  ;;  %10361 = vmatpush.bf16.msrb.mxu3 %v13269_v59  ;;  %v13877_v47 = vor.u32 %v15740_v58, %v13876_v62  ;;  %v15736_v59 = vld [vmem:[%s17246_s10 + $0x15d4] sm:$0xf0]  ;;  %v13605_v12 = vor.u32 %v15672_v4, %v13604_v57  ;;  %v13733_v1 = vor.u32 %v15704_v48, %v13732_v29  ;;  %v13588_v2 = vld [vmem:[%s17246_s10 + $0x13a8] sm:$0xf]  ;;  %v10944_v48 = vmul.f32 0.01, %v18319_v3 }
 0x49a   : > { %v15636_v35 = vld [vmem:[%s17246_s10 + $0x12b4] sm:$0xf0]  ;;  %v13861_v42 = vor.u32 %v15736_v59, %v13860_v55  ;;  %v13716_v44 = vld [vmem:[%s17246_s10 + $0x14a8] sm:$0xf] }
 0x49b   : > { %10323 = vmatpush.bf16.msrb.mxu0 %v12869_v8  ;;  %v10092_v8 = vadd.f32 %v18826_v60, %v10079_v50  ;;  %v15668_v36 = vld [vmem:[%s17246_s10 + $0x13b4] sm:$0xf0]  ;;  %v13461_v60 = vor.u32 %v15636_v35, %v13460_v53  ;;  %v13444_v41 = vld [vmem:[%s17246_s10 + $0x1288] sm:$0xf] }
 0x49c   : > { %10336 = vmatpush.bf16.msrb.mxu1 %v12997_v32  ;;  %v15700_v10 = vld [vmem:[%s17246_s10 + $0x14b4] sm:$0xf0]  ;;  %v13844_v32 = vld [vmem:[%s17246_s10 + $0x15a8] sm:$0xf]  ;;  %v13589_v62 = vor.u32 %v15668_v36, %v13588_v2 }
 0x49d   : > { %10349 = vmatpush.bf16.msrb.mxu2 %v13125_v19  ;;  %10362 = vmatpush.bf16.msrb.mxu3 %v13253_v51  ;;  %v15732_v19 = vld [vmem:[%s17246_s10 + $0x15b4] sm:$0xf0]  ;;  %v13717_v58 = vor.u32 %v15700_v10, %v13716_v44  ;;  %v13700_v0 = vld [vmem:[%s17246_s10 + $0x1488] sm:$0xf] }
 0x49e   : > { %10324 = vmatmul.bf16.vlgmr.msrb.gmra.mxu0 %v17621_v25  ;;  %v15632_v51 = vld [vmem:[%s17246_s10 + $0x1294] sm:$0xf0]  ;;  %v13828_v4 = vld [vmem:[%s17246_s10 + $0x1588] sm:$0xf] }
 0x49f   : > { %10368 = vmatpush.bf16.msra.mxu0 %v13493_v63  ;;  %10337 = vmatmul.bf16.vlgmr.msrb.gmra.mxu1 %v17632_v30  ;;  %v13572_v63 = vld [vmem:[%s17246_s10 + $0x1388] sm:$0xf]  ;;  %v15664_v5 = vld [vmem:[%s17246_s10 + $0x1394] sm:$0xf0]  ;;  %v13445_v59 = vor.u32 %v15632_v51, %v13444_v41 }
 0x4a0   : > { %10381 = vmatpush.bf16.msra.mxu1 %v13621_v38  ;;  %10350 = vmatmul.bf16.vlgmr.msrb.gmra.mxu2 %v17712_v34  ;;  %v10105_v38 = vadd.f32 %v18831_v49, %v10092_v8  ;;  %v15696_v57 = vld [vmem:[%s17246_s10 + $0x1494] sm:$0xf0]  ;;  %v10130_v49 = vpop.f32.mrf.mxu1  ;;  %v13573_v50 = vor.u32 %v15664_v5, %v13572_v63  ;;  %v13556_v53 = vld [vmem:[%s17246_s10 + $0x1368] sm:$0xf] }
 0x4a1   : > { %10394 = vmatpush.bf16.msra.mxu2 %v13749_v45  ;;  %10407 = vmatpush.bf16.msra.mxu3 %v13877_v47  ;;  %v13845_v45 = vor.u32 %v15732_v19, %v13844_v32  ;;  %v10117_v47 = vpop.f32.mrf.mxu0  ;;  %v15728_v29 = vld [vmem:[%s17246_s10 + $0x1594] sm:$0xf0]  ;;  %v13812_v44 = vld [vmem:[%s17246_s10 + $0x1568] sm:$0xf] }
 0x4a2   : > { %10363 = vmatmul.bf16.vlgmr.msrb.gmra.mxu3 %v17723_v39  ;;  %v10118_v55 = vadd.f32 %v10117_v47, %v10105_v38  ;;  %v13829_v35 = vor.u32 %v15728_v29, %v13828_v4  ;;  %v15660_v8 = vld [vmem:[%s17246_s10 + $0x1374] sm:$0xf0]  ;;  %v13540_v38 = vld [vmem:[%s17246_s10 + $0x1348] sm:$0xf] }
 0x4a3   : > { %10369 = vmatpush.bf16.msra.mxu0 %v13477_v52  ;;  %v13701_v52 = vor.u32 %v15696_v57, %v13700_v0  ;;  %v15692_v36 = vld [vmem:[%s17246_s10 + $0x1474] sm:$0xf0]  ;;  %v13557_v41 = vor.u32 %v15660_v8, %v13556_v53  ;;  %v13668_v57 = vld [vmem:[%s17246_s10 + $0x1448] sm:$0xf]  ;;  %v10143_v4 = vpop.f32.mrf.mxu2 }
 0x4a4   : > { %10382 = vmatpush.bf16.msra.mxu1 %v13605_v12  ;;  %v13428_v12 = vld [vmem:[%s17246_s10 + $0x1268] sm:$0xf]  ;;  %v10131_v2 = vadd.f32 %v10130_v49, %v10118_v55  ;;  %v15724_v10 = vld [vmem:[%s17246_s10 + $0x1574] sm:$0xf0] }
 0x4a5   : > { %10395 = vmatpush.bf16.msra.mxu2 %v13733_v1  ;;  %10408 = vmatpush.bf16.msra.mxu3 %v13861_v42  ;;  %v15628_v1 = vld [vmem:[%s17246_s10 + $0x1274] sm:$0xf0]  ;;  %v13684_v42 = vld [vmem:[%s17246_s10 + $0x1468] sm:$0xf]  ;;  %v13813_v0 = vor.u32 %v15724_v10, %v13812_v44 }
 0x4a6   : > { %v16088_v32 = vld [vmem:[%s17792_s28] sm:$0xf]  ;;  %vm10941_vm1 = vcmp.ge.f32.partialorder %v10131_v2, 0.0  ;;  %v13685_v51 = vor.u32 %v15692_v36, %v13684_v42  ;;  %v13796_v55 = vld [vmem:[%s17246_s10 + $0x1548] sm:$0xf] }
 0x4a7   : > { %10370 = vmatpush.bf16.msra.mxu0 %v13461_v60  ;;  %v4362_v19 = vperm.slane %v16088_v32, 2  ;;  %v10945_v60 = vmul.f32 0.01, %v10131_v2  ;;  %v15624_v63 = vld [vmem:[%s17246_s10 + $0x1254] sm:$0xf0] }
 0x4a8   : > { %10383 = vmatpush.bf16.msra.mxu1 %v13589_v62  ;;  %v13429_v62 = vor.u32 %v15628_v1, %v13428_v12  ;;  %v15688_v47 = vld [vmem:[%s17246_s10 + $0x1454] sm:$0xf0]  ;;  %v10948_v12 = vsel %vm10940_vm0, %v18319_v3, %v10944_v48  ;;  %v13396_v42 = vld [vmem:[%s17246_s10 + $0x1228] sm:$0xf] }
 0x4a9   : > { %10396 = vmatpush.bf16.msra.mxu2 %v13717_v58  ;;  %10409 = vmatpush.bf16.msra.mxu3 %v13845_v45  ;;  %v13412_v58 = vld [vmem:[%s17246_s10 + $0x1248] sm:$0xf]  ;;  %v15656_v45 = vld [vmem:[%s17246_s10 + $0x1354] sm:$0xf0]  ;;  %v10949_v5 = vsel %vm10941_vm1, %v10131_v2, %v10945_v60  ;;  %v10144_v49 = vadd.f32 %v10143_v4, %v4362_v19  ;;  %v13669_v8 = vor.u32 %v15688_v47, %v13668_v57 }
 0x4aa   : > { %v10956_v29 = vrot.slane %v10949_v5, 4  ;;  %v13413_v1 = vor.u32 %v15624_v63, %v13412_v58  ;;  %v13541_v53 = vor.u32 %v15656_v45, %v13540_v38  ;;  %v15620_v36 = vld [vmem:[%s17246_s10 + $0x1234] sm:$0xf0]  ;;  %v13524_v44 = vld [vmem:[%s17246_s10 + $0x1328] sm:$0xf] }
 0x4ab   : > { %10371 = vmatpush.bf16.msra.mxu0 %v13445_v59  ;;  %v15720_v59 = vld [vmem:[%s17246_s10 + $0x1554] sm:$0xf0]  ;;  %v13652_v32 = vld [vmem:[%s17246_s10 + $0x1428] sm:$0xf]  ;;  %v13397_v58 = vor.u32 %v15620_v36, %v13396_v42 }
 0x4ac   : > { %10384 = vmatpush.bf16.msra.mxu1 %v13573_v50  ;;  %v10156_v50 = vpop.f32.mrf.mxu3  ;;  %v10959_v2 = vsel %vm10958_vm2, %v10948_v12, %v10956_v29  ;;  %v13797_v48 = vor.u32 %v15720_v59, %v13796_v55  ;;  %v15652_v10 = vld [vmem:[%s17246_s10 + $0x1334] sm:$0xf0]  ;;  %v13780_v60 = vld [vmem:[%s17246_s10 + $0x1528] sm:$0xf]  ;;  %v10145_v55 = vpop.f32.mrf.mxu2 }
 0x4ad   : > { %10397 = vmatpush.bf16.msra.mxu2 %v13701_v52  ;;  %10410 = vmatpush.bf16.msra.mxu3 %v13829_v35  ;;  %v10119_v52 = vpop.f32.mrf.mxu0  ;;  %v10132_v35 = vpop.f32.mrf.mxu1  ;;  %v18926_v3 = vadd.f32 %v10156_v50, %v10144_v49  ;;  %10963 = vst [vmem:[%s18915_s5] sm:$0xff] %v10959_v2  ;;  %v15684_v19 = vld [vmem:[%s17246_s10 + $0x1434] sm:$0xf0]  ;;  %v13525_v63 = vor.u32 %v15652_v10, %v13524_v44  ;;  %v13508_v45 = vld [vmem:[%s17246_s10 + $0x1308] sm:$0xf] }
 0x4ae   : > { %v13653_v38 = vor.u32 %v15684_v19, %v13652_v32  ;;  %v15648_v5 = vld [vmem:[%s17246_s10 + $0x1314] sm:$0xf0]  ;;  %v13764_v4 = vld [vmem:[%s17246_s10 + $0x1508] sm:$0xf] }
 0x4af   : > { %10372 = vmatpush.bf16.msra.mxu0 %v13429_v62  ;;  %v15716_v62 = vld [vmem:[%s17246_s10 + $0x1534] sm:$0xf0]  ;;  %v14004_v59 = vld [vmem:[%s17246_s10 + $0x16e8] sm:$0xf]  ;;  %v13509_v2 = vor.u32 %v15648_v5, %v13508_v45 }
 0x4b0   : > { %10385 = vmatpush.bf16.msra.mxu1 %v13557_v41  ;;  %v13380_v41 = vld [vmem:[%s17246_s10 + $0x1208] sm:$0xf]  ;;  %v13781_v57 = vor.u32 %v15716_v62, %v13780_v60  ;;  %v15680_v47 = vld [vmem:[%s17246_s10 + $0x1414] sm:$0xf0] }
 0x4b1   : > { %10398 = vmatpush.bf16.msra.mxu2 %v13685_v51  ;;  %10411 = vmatpush.bf16.msra.mxu3 %v13813_v0  ;;  %v15616_v51 = vld [vmem:[%s17246_s10 + $0x1214] sm:$0xf0]  ;;  %v13636_v0 = vld [vmem:[%s17246_s10 + $0x1408] sm:$0xf] }
 0x4b2   : > { %v15712_v29 = vld [vmem:[%s17246_s10 + $0x1514] sm:$0xf0]  ;;  %v14132_v50 = vld [vmem:[%s17246_s10 + $0x17e8] sm:$0xf]  ;;  %v13381_v12 = vor.u32 %v15616_v51, %v13380_v41 }
 0x4b3   : > { %10373 = vmatpush.bf16.msra.mxu0 %v13413_v1  ;;  %v15772_v49 = vld [vmem:[%s17246_s10 + $0x16f4] sm:$0xf0]  ;;  %v14388_v42 = vld [vmem:[%s17246_s10 + $0x19e8] sm:$0xf]  ;;  %v13765_v44 = vor.u32 %v15712_v29, %v13764_v4 }
 0x4b4   : > { %10386 = vmatpush.bf16.msra.mxu1 %v13541_v53  ;;  %v10158_v52 = vpop.f32.mrf.mxu3  ;;  %v15804_v1 = vld [vmem:[%s17246_s10 + $0x17f4] sm:$0xf0]  ;;  %v14260_v53 = vld [vmem:[%s17246_s10 + $0x18e8] sm:$0xf] }
 0x4b5   : > { %10399 = vmatpush.bf16.msra.mxu2 %v13669_v8  ;;  %10412 = vmatpush.bf16.msra.mxu3 %v13797_v48  ;;  %v15836_v35 = vld [vmem:[%s17246_s10 + $0x18f4] sm:$0xf0]  ;;  %v13637_v8 = vor.u32 %v15680_v47, %v13636_v0  ;;  %v14005_v48 = vor.u32 %v15772_v49, %v14004_v59  ;;  %v14133_v10 = vor.u32 %v15804_v1, %v14132_v50  ;;  %v13988_v19 = vld [vmem:[%s17246_s10 + $0x16c8] sm:$0xf] }
 0x4b6   : > { %v15868_v36 = vld [vmem:[%s17246_s10 + $0x19f4] sm:$0xf0]  ;;  %v14261_v32 = vor.u32 %v15836_v35, %v14260_v53  ;;  %v14116_v62 = vld [vmem:[%s17246_s10 + $0x17c8] sm:$0xf] }
 0x4b7   : > { %10374 = vmatpush.bf16.msra.mxu0 %v13397_v58  ;;  %v15768_v60 = vld [vmem:[%s17246_s10 + $0x16d4] sm:$0xf0]  ;;  %v14389_v58 = vor.u32 %v15868_v36, %v14388_v42  ;;  %v14244_v51 = vld [vmem:[%s17246_s10 + $0x18c8] sm:$0xf] }
 0x4b8   : > { %10387 = vmatpush.bf16.msra.mxu1 %v13525_v63  ;;  %v15800_v41 = vld [vmem:[%s17246_s10 + $0x17d4] sm:$0xf0]  ;;  %v13989_v5 = vor.u32 %v15768_v60, %v13988_v19  ;;  %v13972_v47 = vld [vmem:[%s17246_s10 + $0x16a8] sm:$0xf] }
 0x4b9   : > { %10400 = vmatpush.bf16.msra.mxu2 %v13653_v38  ;;  %10413 = vmatpush.bf16.msra.mxu3 %v13781_v57  ;;  %v15832_v63 = vld [vmem:[%s17246_s10 + $0x18d4] sm:$0xf0]  ;;  %v14372_v38 = vld [vmem:[%s17246_s10 + $0x19c8] sm:$0xf]  ;;  %v14117_v0 = vor.u32 %v15800_v41, %v14116_v62 }
 0x4ba   : > { %v15864_v45 = vld [vmem:[%s17246_s10 + $0x19d4] sm:$0xf0]  ;;  %v14245_v57 = vor.u32 %v15832_v63, %v14244_v51  ;;  %v14100_v29 = vld [vmem:[%s17246_s10 + $0x17a8] sm:$0xf] }
 0x4bb   : > { %10375 = vmatpush.bf16.msra.mxu0 %v13381_v12  ;;  %v15764_v4 = vld [vmem:[%s17246_s10 + $0x16b4] sm:$0xf0]  ;;  %v14373_v55 = vor.u32 %v15864_v45, %v14372_v38  ;;  %v14228_v49 = vld [vmem:[%s17246_s10 + $0x18a8] sm:$0xf]  ;;  %v10169_v62 = vpop.f32.mrf.mxu0 }
 0x4bc   : > { %10388 = vmatpush.bf16.msra.mxu1 %v13509_v2  ;;  %v15796_v59 = vld [vmem:[%s17246_s10 + $0x17b4] sm:$0xf0]  ;;  %v14356_v52 = vld [vmem:[%s17246_s10 + $0x19a8] sm:$0xf]  ;;  %v13973_v1 = vor.u32 %v15764_v4, %v13972_v47  ;;  %v10170_v45 = vadd.f32 %v10169_v62, %v18926_v3 }
 0x4bd   : > { %10401 = vmatpush.bf16.msra.mxu2 %v13637_v8  ;;  %10414 = vmatpush.bf16.msra.mxu3 %v13765_v44  ;;  %v15828_v50 = vld [vmem:[%s17246_s10 + $0x18b4] sm:$0xf0]  ;;  %v14101_v53 = vor.u32 %v15796_v59, %v14100_v29  ;;  %v13956_v2 = vld [vmem:[%s17246_s10 + $0x1688] sm:$0xf] }
 0x4be   : > { %10376 = vmatmul.bf16.vlgmr.msra.gmra.mxu0 %v17719_v37  ;;  %v15860_v12 = vld [vmem:[%s17246_s10 + $0x19b4] sm:$0xf0]  ;;  %v14229_v35 = vor.u32 %v15828_v50, %v14228_v49  ;;  %v14084_v42 = vld [vmem:[%s17246_s10 + $0x1788] sm:$0xf] }
 0x4bf   : > { %10420 = vmatpush.bf16.msrb.mxu0 %v14005_v48  ;;  %10389 = vmatmul.bf16.vlgmr.msra.gmra.mxu1 %v17730_v46  ;;  %v15760_v8 = vld [vmem:[%s17246_s10 + $0x1694] sm:$0xf0]  ;;  %v14357_v36 = vor.u32 %v15860_v12, %v14356_v52  ;;  %v14212_v48 = vld [vmem:[%s17246_s10 + $0x1888] sm:$0xf] }
 0x4c0   : > { %10433 = vmatpush.bf16.msrb.mxu1 %v14133_v10  ;;  %10402 = vmatmul.bf16.vlgmr.msra.gmra.mxu2 %v17826_v7  ;;  %v15792_v44 = vld [vmem:[%s17246_s10 + $0x1794] sm:$0xf0]  ;;  %v13957_v60 = vor.u32 %v15760_v8, %v13956_v2  ;;  %v13940_v51 = vld [vmem:[%s17246_s10 + $0x1668] sm:$0xf] }
 0x4c1   : > { %10446 = vmatpush.bf16.msrb.mxu2 %v14261_v32  ;;  %10459 = vmatpush.bf16.msrb.mxu3 %v14389_v58  ;;  %v15824_v10 = vld [vmem:[%s17246_s10 + $0x1894] sm:$0xf0]  ;;  %v14340_v32 = vld [vmem:[%s17246_s10 + $0x1988] sm:$0xf]  ;;  %v14085_v58 = vor.u32 %v15792_v44, %v14084_v42 }
 0x4c2   : > { %10415 = vmatmul.bf16.vlgmr.msra.gmra.mxu3 %v17837_v21  ;;  %v15856_v19 = vld [vmem:[%s17246_s10 + $0x1994] sm:$0xf0]  ;;  %v14213_v41 = vor.u32 %v15824_v10, %v14212_v48  ;;  %v14068_v38 = vld [vmem:[%s17246_s10 + $0x1768] sm:$0xf] }
 0x4c3   : > { %10421 = vmatpush.bf16.msrb.mxu0 %v13989_v5  ;;  %v15756_v63 = vld [vmem:[%s17246_s10 + $0x1674] sm:$0xf0]  ;;  %v10182_v5 = vpop.f32.mrf.mxu1  ;;  %v14196_v47 = vld [vmem:[%s17246_s10 + $0x1868] sm:$0xf] }
 0x4c4   : > { %10434 = vmatpush.bf16.msrb.mxu1 %v14117_v0  ;;  %v14341_v0 = vor.u32 %v15856_v19, %v14340_v32  ;;  %v15820_v4 = vld [vmem:[%s17246_s10 + $0x1874] sm:$0xf0]  ;;  %v14324_v29 = vld [vmem:[%s17246_s10 + $0x1968] sm:$0xf]  ;;  %v10183_v59 = vadd.f32 %v10182_v5, %v10170_v45  ;;  %v13941_v49 = vor.u32 %v15756_v63, %v13940_v51 }
 0x4c5   : > { %10447 = vmatpush.bf16.msrb.mxu2 %v14245_v57  ;;  %10460 = vmatpush.bf16.msrb.mxu3 %v14373_v55  ;;  %v15788_v57 = vld [vmem:[%s17246_s10 + $0x1774] sm:$0xf0]  ;;  %v14197_v50 = vor.u32 %v15820_v4, %v14196_v47  ;;  %v13924_v52 = vld [vmem:[%s17246_s10 + $0x1648] sm:$0xf]  ;;  %v10208_v44 = vpop.f32.mrf.mxu3 }
 0x4c6   : > { %v15852_v55 = vld [vmem:[%s17246_s10 + $0x1974] sm:$0xf0]  ;;  %v14069_v3 = vor.u32 %v15788_v57, %v14068_v38  ;;  %v14180_v8 = vld [vmem:[%s17246_s10 + $0x1848] sm:$0xf] }
 0x4c7   : > { %10422 = vmatpush.bf16.msrb.mxu0 %v13973_v1  ;;  %v15752_v12 = vld [vmem:[%s17246_s10 + $0x1654] sm:$0xf0]  ;;  %v14052_v1 = vld [vmem:[%s17246_s10 + $0x1748] sm:$0xf] }
 0x4c8   : > { %10435 = vmatpush.bf16.msrb.mxu1 %v14101_v53  ;;  %v10195_v53 = vpop.f32.mrf.mxu2  ;;  %v15784_v2 = vld [vmem:[%s17246_s10 + $0x1754] sm:$0xf0]  ;;  %v14308_v48 = vld [vmem:[%s17246_s10 + $0x1948] sm:$0xf]  ;;  %v13925_v32 = vor.u32 %v15752_v12, %v13924_v52 }
 0x4c9   : > { %10448 = vmatpush.bf16.msrb.mxu2 %v14229_v35  ;;  %10461 = vmatpush.bf16.msrb.mxu3 %v14357_v36  ;;  %v14325_v35 = vor.u32 %v15852_v55, %v14324_v29  ;;  %v15816_v42 = vld [vmem:[%s17246_s10 + $0x1854] sm:$0xf0]  ;;  %v10196_v36 = vadd.f32 %v10195_v53, %v10183_v59  ;;  %v14053_v62 = vor.u32 %v15784_v2, %v14052_v1  ;;  %v14036_v63 = vld [vmem:[%s17246_s10 + $0x1728] sm:$0xf] }
 0x4ca   : > { %v15848_v10 = vld [vmem:[%s17246_s10 + $0x1954] sm:$0xf0]  ;;  %v14292_v47 = vld [vmem:[%s17246_s10 + $0x1928] sm:$0xf] }
 0x4cb   : > { %10423 = vmatpush.bf16.msrb.mxu0 %v13957_v60  ;;  %v18995_v19 = vadd.f32 %v10208_v44, %v10196_v36  ;;  %v10171_v60 = vpop.f32.mrf.mxu0  ;;  %v15748_v51 = vld [vmem:[%s17246_s10 + $0x1634] sm:$0xf0]  ;;  %v10184_v38 = vpop.f32.mrf.mxu1  ;;  %v14309_v45 = vor.u32 %v15848_v10, %v14308_v48  ;;  %v13892_v55 = vld [vmem:[%s17246_s10 + $0x1608] sm:$0xf] }
 0x4cc   : > { %10436 = vmatpush.bf16.msrb.mxu1 %v14085_v58  ;;  %v14181_v58 = vor.u32 %v15816_v42, %v14180_v8  ;;  %v15780_v5 = vld [vmem:[%s17246_s10 + $0x1734] sm:$0xf0]  ;;  %v14148_v12 = vld [vmem:[%s17246_s10 + $0x1808] sm:$0xf] }
 0x4cd   : > { %10449 = vmatpush.bf16.msrb.mxu2 %v14213_v41  ;;  %10462 = vmatpush.bf16.msrb.mxu3 %v14341_v0  ;;  %v13908_v41 = vld [vmem:[%s17246_s10 + $0x1628] sm:$0xf]  ;;  %v15812_v57 = vld [vmem:[%s17246_s10 + $0x1834] sm:$0xf0]  ;;  %v10210_v42 = vpop.f32.mrf.mxu3 }
 0x4ce   : > { %v14164_v0 = vld [vmem:[%s17246_s10 + $0x1828] sm:$0xf]  ;;  %v15844_v4 = vld [vmem:[%s17246_s10 + $0x1934] sm:$0xf0]  ;;  %v13909_v29 = vor.u32 %v15748_v51, %v13908_v41 }
 0x4cf   : > { %10424 = vmatpush.bf16.msrb.mxu0 %v13941_v49  ;;  %v15744_v59 = vld [vmem:[%s17246_s10 + $0x1614] sm:$0xf0]  ;;  %v14037_v49 = vor.u32 %v15780_v5, %v14036_v63  ;;  %v14293_v53 = vor.u32 %v15844_v4, %v14292_v47  ;;  %v14276_v2 = vld [vmem:[%s17246_s10 + $0x1908] sm:$0xf] }
 0x4d0   : > { %10437 = vmatpush.bf16.msrb.mxu1 %v14069_v3  ;;  %v14165_v3 = vor.u32 %v15812_v57, %v14164_v0  ;;  %v15776_v52 = vld [vmem:[%s17246_s10 + $0x1714] sm:$0xf0]  ;;  %v10197_v1 = vpop.f32.mrf.mxu2  ;;  %v14516_v36 = vld [vmem:[%s17246_s10 + $0x1ae8] sm:$0xf]  ;;  %v13893_v10 = vor.u32 %v15744_v59, %v13892_v55 }
 0x4d1   : > { %10450 = vmatpush.bf16.msrb.mxu2 %v14197_v50  ;;  %10463 = vmatpush.bf16.msrb.mxu3 %v14325_v35  ;;  %v14020_v50 = vld [vmem:[%s17246_s10 + $0x1708] sm:$0xf]  ;;  %v15808_v35 = vld [vmem:[%s17246_s10 + $0x1814] sm:$0xf0] }
 0x4d2   : > { %v15840_v8 = vld [vmem:[%s17246_s10 + $0x1914] sm:$0xf0]  ;;  %v14644_v48 = vld [vmem:[%s17246_s10 + $0x1be8] sm:$0xf]  ;;  %v14149_v41 = vor.u32 %v15808_v35, %v14148_v12 }
 0x4d3   : > { %10425 = vmatpush.bf16.msrb.mxu0 %v13925_v32  ;;  %v15900_v44 = vld [vmem:[%s17246_s10 + $0x1af4] sm:$0xf0]  ;;  %v14772_v60 = vld [vmem:[%s17246_s10 + $0x1ce8] sm:$0xf]  ;;  %v14277_v38 = vor.u32 %v15840_v8, %v14276_v2 }
 0x4d4   : > { %10438 = vmatpush.bf16.msrb.mxu1 %v14053_v62  ;;  %v15932_v32 = vld [vmem:[%s17246_s10 + $0x1bf4] sm:$0xf0]  ;;  %v14900_v51 = vld [vmem:[%s17246_s10 + $0x1de8] sm:$0xf] }
 0x4d5   : > { %10451 = vmatpush.bf16.msrb.mxu2 %v14181_v58  ;;  %10464 = vmatpush.bf16.msrb.mxu3 %v14309_v45  ;;  %v15964_v62 = vld [vmem:[%s17246_s10 + $0x1cf4] sm:$0xf0]  ;;  %v14021_v58 = vor.u32 %v15776_v52, %v14020_v50  ;;  %v14517_v45 = vor.u32 %v15900_v44, %v14516_v36  ;;  %v14645_v5 = vor.u32 %v15932_v32, %v14644_v48  ;;  %v14500_v57 = vld [vmem:[%s17246_s10 + $0x1ac8] sm:$0xf] }
 0x4d6   : > { %v15996_v63 = vld [vmem:[%s17246_s10 + $0x1df4] sm:$0xf0]  ;;  %v14773_v0 = vor.u32 %v15964_v62, %v14772_v60  ;;  %v14628_v4 = vld [vmem:[%s17246_s10 + $0x1bc8] sm:$0xf] }
 0x4d7   : > { %10426 = vmatpush.bf16.msrb.mxu0 %v13909_v29  ;;  %v15896_v47 = vld [vmem:[%s17246_s10 + $0x1ad4] sm:$0xf0]  ;;  %v14901_v29 = vor.u32 %v15996_v63, %v14900_v51  ;;  %v14756_v59 = vld [vmem:[%s17246_s10 + $0x1cc8] sm:$0xf] }
 0x4d8   : > { %10439 = vmatpush.bf16.msrb.mxu1 %v14037_v49  ;;  %v15928_v55 = vld [vmem:[%s17246_s10 + $0x1bd4] sm:$0xf0]  ;;  %v14501_v52 = vor.u32 %v15896_v47, %v14500_v57  ;;  %v14612_v2 = vld [vmem:[%s17246_s10 + $0x1ba8] sm:$0xf] }
 0x4d9   : > { %10452 = vmatpush.bf16.msrb.mxu2 %v14165_v3  ;;  %10465 = vmatpush.bf16.msrb.mxu3 %v14293_v53  ;;  %v15960_v49 = vld [vmem:[%s17246_s10 + $0x1cd4] sm:$0xf0]  ;;  %v14884_v3 = vld [vmem:[%s17246_s10 + $0x1dc8] sm:$0xf]  ;;  %v14629_v12 = vor.u32 %v15928_v55, %v14628_v4 }
 0x4da   : > { %v15992_v50 = vld [vmem:[%s17246_s10 + $0x1dd4] sm:$0xf0]  ;;  %v14757_v1 = vor.u32 %v15960_v49, %v14756_v59  ;;  %v14484_v53 = vld [vmem:[%s17246_s10 + $0x1aa8] sm:$0xf] }
 0x4db   : > { %10427 = vmatpush.bf16.msrb.mxu0 %v13893_v10  ;;  %v15892_v35 = vld [vmem:[%s17246_s10 + $0x1ab4] sm:$0xf0]  ;;  %v14885_v8 = vor.u32 %v15992_v50, %v14884_v3  ;;  %v14740_v36 = vld [vmem:[%s17246_s10 + $0x1ca8] sm:$0xf] }
 0x4dc   : > { %10440 = vmatpush.bf16.msrb.mxu1 %v14021_v58  ;;  %v15924_v42 = vld [vmem:[%s17246_s10 + $0x1bb4] sm:$0xf0]  ;;  %v14868_v48 = vld [vmem:[%s17246_s10 + $0x1da8] sm:$0xf]  ;;  %v14485_v32 = vor.u32 %v15892_v35, %v14484_v53  ;;  %v10234_v55 = vpop.f32.mrf.mxu1 }
 0x4dd   : > { %10453 = vmatpush.bf16.msrb.mxu2 %v14149_v41  ;;  %10466 = vmatpush.bf16.msrb.mxu3 %v14277_v38  ;;  %v15956_v44 = vld [vmem:[%s17246_s10 + $0x1cb4] sm:$0xf0]  ;;  %v14613_v60 = vor.u32 %v15924_v42, %v14612_v2  ;;  %v14468_v58 = vld [vmem:[%s17246_s10 + $0x1a88] sm:$0xf] }
 0x4de   : > { %10428 = vmatmul.bf16.vlgmr.msrb.gmra.mxu0 %v17833_v11  ;;  %v15988_v10 = vld [vmem:[%s17246_s10 + $0x1db4] sm:$0xf0]  ;;  %v14741_v62 = vor.u32 %v15956_v44, %v14740_v36  ;;  %v14596_v51 = vld [vmem:[%s17246_s10 + $0x1b88] sm:$0xf] }
 0x4df   : > { %10472 = vmatpush.bf16.msra.mxu0 %v14517_v45  ;;  %10441 = vmatmul.bf16.vlgmr.msrb.gmra.mxu1 %v17843_v28  ;;  %v15888_v41 = vld [vmem:[%s17246_s10 + $0x1a94] sm:$0xf0]  ;;  %v14869_v63 = vor.u32 %v15988_v10, %v14868_v48  ;;  %v14724_v45 = vld [vmem:[%s17246_s10 + $0x1c88] sm:$0xf] }
 0x4e0   : > { %10485 = vmatpush.bf16.msra.mxu1 %v14645_v5  ;;  %10454 = vmatmul.bf16.vlgmr.msrb.gmra.mxu2 %v17910_v6  ;;  %v15920_v38 = vld [vmem:[%s17246_s10 + $0x1b94] sm:$0xf0]  ;;  %v14852_v57 = vld [vmem:[%s17246_s10 + $0x1d88] sm:$0xf] }
 0x4e1   : > { %10498 = vmatpush.bf16.msra.mxu2 %v14773_v0  ;;  %10511 = vmatpush.bf16.msra.mxu3 %v14901_v29  ;;  %v15952_v5 = vld [vmem:[%s17246_s10 + $0x1c94] sm:$0xf0]  ;;  %v10221_v0 = vpop.f32.mrf.mxu0  ;;  %v14469_v29 = vor.u32 %v15888_v41, %v14468_v58  ;;  %v14597_v59 = vor.u32 %v15920_v38, %v14596_v51  ;;  %v14452_v3 = vld [vmem:[%s17246_s10 + $0x1a68] sm:$0xf] }
 0x4e2   : > { %10467 = vmatmul.bf16.vlgmr.msrb.gmra.mxu3 %v17917_v15  ;;  %v15984_v47 = vld [vmem:[%s17246_s10 + $0x1d94] sm:$0xf0]  ;;  %v10222_v4 = vadd.f32 %v10221_v0, %v18995_v19  ;;  %v14725_v49 = vor.u32 %v15952_v5, %v14724_v45  ;;  %v14708_v35 = vld [vmem:[%s17246_s10 + $0x1c68] sm:$0xf] }
 0x4e3   : > { %10473 = vmatpush.bf16.msra.mxu0 %v14501_v52  ;;  %v15884_v50 = vld [vmem:[%s17246_s10 + $0x1a74] sm:$0xf0]  ;;  %v14580_v52 = vld [vmem:[%s17246_s10 + $0x1b68] sm:$0xf] }
 0x4e4   : > { %10486 = vmatpush.bf16.msra.mxu1 %v14629_v12  ;;  %v14853_v12 = vor.u32 %v15984_v47, %v14852_v57  ;;  %v15916_v53 = vld [vmem:[%s17246_s10 + $0x1b74] sm:$0xf0]  ;;  %v14836_v2 = vld [vmem:[%s17246_s10 + $0x1d68] sm:$0xf]  ;;  %v14453_v42 = vor.u32 %v15884_v50, %v14452_v3  ;;  %v10236_v47 = vpop.f32.mrf.mxu1 }
 0x4e5   : > { %10499 = vmatpush.bf16.msra.mxu2 %v14757_v1  ;;  %10512 = vmatpush.bf16.msra.mxu3 %v14885_v8  ;;  %v10235_v1 = vadd.f32 %v10234_v55, %v10222_v4  ;;  %v15948_v19 = vld [vmem:[%s17246_s10 + $0x1c74] sm:$0xf0]  ;;  %v14581_v36 = vor.u32 %v15916_v53, %v14580_v52  ;;  %v14436_v48 = vld [vmem:[%s17246_s10 + $0x1a48] sm:$0xf]  ;;  %v10260_v38 = vpop.f32.mrf.mxu3  ;;  %v11318_v47 = vld [vmem:[%s17246_s10 + $0x1f8] sm:$0xf0] }
 0x4e6   : > { %v15980_v8 = vld [vmem:[%s17246_s10 + $0x1d74] sm:$0xf0]  ;;  %v14709_v44 = vor.u32 %v15948_v19, %v14708_v35  ;;  %v14692_v41 = vld [vmem:[%s17246_s10 + $0x1c48] sm:$0xf] }
 0x4e7   : > { %10474 = vmatpush.bf16.msra.mxu0 %v14485_v32  ;;  %v15880_v10 = vld [vmem:[%s17246_s10 + $0x1a54] sm:$0xf0]  ;;  %v14564_v32 = vld [vmem:[%s17246_s10 + $0x1b48] sm:$0xf] }
 0x4e8   : > { %10487 = vmatpush.bf16.msra.mxu1 %v14613_v60  ;;  %v14837_v60 = vor.u32 %v15980_v8, %v14836_v2  ;;  %v15912_v58 = vld [vmem:[%s17246_s10 + $0x1b54] sm:$0xf0]  ;;  %v14820_v45 = vld [vmem:[%s17246_s10 + $0x1d48] sm:$0xf]  ;;  %v14437_v57 = vor.u32 %v15880_v10, %v14436_v48 }
 0x4e9   : > { %10500 = vmatpush.bf16.msra.mxu2 %v14741_v62  ;;  %10513 = vmatpush.bf16.msra.mxu3 %v14869_v63  ;;  %v10247_v62 = vpop.f32.mrf.mxu2  ;;  %v15944_v51 = vld [vmem:[%s17246_s10 + $0x1c54] sm:$0xf0]  ;;  %v10223_v0 = vpop.f32.mrf.mxu0  ;;  %v14548_v3 = vld [vmem:[%s17246_s10 + $0x1b28] sm:$0xf] }
 0x4ea   : > { %v10248_v63 = vadd.f32 %v10247_v62, %v10235_v1  ;;  %v15976_v5 = vld [vmem:[%s17246_s10 + $0x1d54] sm:$0xf0]  ;;  %v14693_v55 = vor.u32 %v15944_v51, %v14692_v41  ;;  %v14804_v53 = vld [vmem:[%s17246_s10 + $0x1d28] sm:$0xf]  ;;  %v11190_v0 = vld [vmem:[%s17246_s10 + $0xf8] sm:$0xf0] }
 0x4eb   : > { %10475 = vmatpush.bf16.msra.mxu0 %v14469_v29  ;;  %v14565_v29 = vor.u32 %v15912_v58, %v14564_v32  ;;  %v14821_v50 = vor.u32 %v15976_v5, %v14820_v45  ;;  %v15908_v52 = vld [vmem:[%s17246_s10 + $0x1b34] sm:$0xf0]  ;;  %v14404_v2 = vld [vmem:[%s17246_s10 + $0x1a08] sm:$0xf] }
 0x4ec   : > { %10488 = vmatpush.bf16.msra.mxu1 %v14597_v59  ;;  %v19066_v4 = vadd.f32 %v10260_v38, %v10248_v63  ;;  %v14420_v59 = vld [vmem:[%s17246_s10 + $0x1a28] sm:$0xf]  ;;  %v15940_v1 = vld [vmem:[%s17246_s10 + $0x1c34] sm:$0xf0]  ;;  %v15066_v38 = vld [vmem:[%s17246_s10 + $0xec] sm:$0xf] }
 0x4ed   : > { %10501 = vmatpush.bf16.msra.mxu2 %v14725_v49  ;;  %10514 = vmatpush.bf16.msra.mxu3 %v14853_v12  ;;  %v15876_v49 = vld [vmem:[%s17246_s10 + $0x1a34] sm:$0xf0]  ;;  %v14676_v12 = vld [vmem:[%s17246_s10 + $0x1c28] sm:$0xf]  ;;  %v10262_v45 = vpop.f32.mrf.mxu3 }
 0x4ee   : > { %v15972_v35 = vld [vmem:[%s17246_s10 + $0x1d34] sm:$0xf0]  ;;  %v14421_v19 = vor.u32 %v15876_v49, %v14420_v59  ;;  %v14660_v10 = vld [vmem:[%s17246_s10 + $0x1c08] sm:$0xf]  ;;  %v15130_v59 = vld [vmem:[%s17246_s10 + $0x2ec] sm:$0xf] }
 0x4ef   : > { %10476 = vmatpush.bf16.msra.mxu0 %v14453_v42  ;;  %v15872_v8 = vld [vmem:[%s17246_s10 + $0x1a14] sm:$0xf0]  ;;  %v14549_v42 = vor.u32 %v15908_v52, %v14548_v3  ;;  %v14805_v32 = vor.u32 %v15972_v35, %v14804_v53  ;;  %v14788_v62 = vld [vmem:[%s17246_s10 + $0x1d08] sm:$0xf]  ;;  %v11446_v49 = vld [vmem:[%s17246_s10 + $0x2f8] sm:$0xf0]  ;;  %v11193_v52 = vor.u32 %v15066_v38, %v11190_v0 }
 0x4f0   : > { %10489 = vmatpush.bf16.msra.mxu1 %v14581_v36  ;;  %v14677_v36 = vor.u32 %v15940_v1, %v14676_v12  ;;  %v15904_v48 = vld [vmem:[%s17246_s10 + $0x1b14] sm:$0xf0]  ;;  %v15028_v51 = vld [vmem:[%s17246_s10 + $0x1ee8] sm:$0xf]  ;;  %v14405_v5 = vor.u32 %v15872_v8, %v14404_v2  ;;  %v15062_v35 = vld [vmem:[%s17246_s10 + $0xcc] sm:$0xf] }
 0x4f1   : > { %10502 = vmatpush.bf16.msra.mxu2 %v14709_v44  ;;  %10515 = vmatpush.bf16.msra.mxu3 %v14837_v60  ;;  %v14532_v44 = vld [vmem:[%s17246_s10 + $0x1b08] sm:$0xf]  ;;  %v15936_v60 = vld [vmem:[%s17246_s10 + $0x1c14] sm:$0xf0]  ;;  %v10249_v41 = vpop.f32.mrf.mxu2  ;;  %v11174_v2 = vld [vmem:[%s17246_s10 + $0xd8] sm:$0xf0] }
 0x4f2   : > { %v15968_v58 = vld [vmem:[%s17246_s10 + $0x1d14] sm:$0xf0]  ;;  %v15012_v1 = vld [vmem:[%s17246_s10 + $0x1ec8] sm:$0xf]  ;;  %v15094_v8 = vld [vmem:[%s17246_s10 + $0x1cc] sm:$0xf] }
 0x4f3   : > { %10477 = vmatpush.bf16.msra.mxu0 %v14437_v57  ;;  %v16028_v63 = vld [vmem:[%s17246_s10 + $0x1ef4] sm:$0xf0]  ;;  %v15098_v57 = vld [vmem:[%s17246_s10 + $0x1ec] sm:$0xf]  ;;  %v14789_v3 = vor.u32 %v15968_v58, %v14788_v62  ;;  %v11286_v38 = vld [vmem:[%s17246_s10 + $0x1b8] sm:$0xf0] }
 0x4f4   : > { %10490 = vmatpush.bf16.msra.mxu1 %v14565_v29  ;;  %v14533_v29 = vor.u32 %v15904_v48, %v14532_v44  ;;  %v11321_v12 = vor.u32 %v15098_v57, %v11318_v47  ;;  %v16024_v53 = vld [vmem:[%s17246_s10 + $0x1ed4] sm:$0xf0]  ;;  %v11430_v44 = vld [vmem:[%s17246_s10 + $0x2d8] sm:$0xf0]  ;;  %v15058_v58 = vld [vmem:[%s17246_s10 + $0xac] sm:$0xf] }
 0x4f5   : > { %10503 = vmatpush.bf16.msra.mxu2 %v14693_v55  ;;  %10516 = vmatpush.bf16.msra.mxu3 %v14821_v50  ;;  %v14661_v55 = vor.u32 %v15936_v60, %v14660_v10  ;;  %v15029_v50 = vor.u32 %v16028_v63, %v15028_v51  ;;  %v15013_v48 = vor.u32 %v16024_v53, %v15012_v1  ;;  %v14996_v60 = vld [vmem:[%s17246_s10 + $0x1ea8] sm:$0xf]  ;;  %v16020_v62 = vld [vmem:[%s17246_s10 + $0x1eb4] sm:$0xf0]  ;;  %v11158_v51 = vld [vmem:[%s17246_s10 + $0xb8] sm:$0xf0] }
 0x4f6   : > { %v11177_v10 = vor.u32 %v15062_v35, %v11174_v2  ;;  %v15090_v63 = vld [vmem:[%s17246_s10 + $0x1ac] sm:$0xf]  ;;  %v14997_v0 = vor.u32 %v16020_v62, %v14996_v60  ;;  %v11161_v57 = vor.u32 %v15058_v58, %v11158_v51  ;;  %v11398_v53 = vld [vmem:[%s17246_s10 + $0x298] sm:$0xf0] }
 0x4f7   : > { %10478 = vmatpush.bf16.msra.mxu0 %v14421_v19  ;;  %v11449_v19 = vor.u32 %v15130_v59, %v11446_v49  ;;  %v15122_v45 = vld [vmem:[%s17246_s10 + $0x2ac] sm:$0xf]  ;;  %v11289_v47 = vor.u32 %v15090_v63, %v11286_v38  ;;  %v11126_v60 = vld [vmem:[%s17246_s10 + $0x78] sm:$0xf0] }
 0x4f8   : > { %10491 = vmatpush.bf16.msra.mxu1 %v14549_v42  ;;  %v11302_v42 = vld [vmem:[%s17246_s10 + $0x1d8] sm:$0xf0]  ;;  %v15054_v59 = vld [vmem:[%s17246_s10 + $0x8c] sm:$0xf] }
 0x4f9   : > { %10504 = vmatpush.bf16.msra.mxu2 %v14677_v36  ;;  %10517 = vmatpush.bf16.msra.mxu3 %v14805_v32  ;;  %v15126_v36 = vld [vmem:[%s17246_s10 + $0x2cc] sm:$0xf]  ;;  %v11305_v32 = vor.u32 %v15094_v8, %v11302_v42 }
 0x4fa   : > { %v11433_v41 = vor.u32 %v15126_v36, %v11430_v44  ;;  %v15118_v1 = vld [vmem:[%s17246_s10 + $0x28c] sm:$0xf]  ;;  %v14964_v36 = vld [vmem:[%s17246_s10 + $0x1e68] sm:$0xf]  ;;  %v16012_v44 = vld [vmem:[%s17246_s10 + $0x1e74] sm:$0xf0] }
 0x4fb   : > { %10479 = vmatpush.bf16.msra.mxu0 %v14405_v5  ;;  %v11414_v5 = vld [vmem:[%s17246_s10 + $0x2b8] sm:$0xf0]  ;;  %v15082_v62 = vld [vmem:[%s17246_s10 + $0x16c] sm:$0xf]  ;;  %v14965_v51 = vor.u32 %v16012_v44, %v14964_v36 }
 0x4fc   : > { %10492 = vmatpush.bf16.msra.mxu1 %v14533_v29  ;;  %v14980_v29 = vld [vmem:[%s17246_s10 + $0x1e88] sm:$0xf]  ;;  %v11417_v49 = vor.u32 %v15122_v45, %v11414_v5  ;;  %v10286_v2 = vpop.f32.mrf.mxu1  ;;  %v15114_v58 = vld [vmem:[%s17246_s10 + $0x26c] sm:$0xf]  ;;  %v16008_v5 = vld [vmem:[%s17246_s10 + $0x1e54] sm:$0xf0] }
 0x4fd   : > { %10505 = vmatpush.bf16.msra.mxu2 %v14661_v55  ;;  %10518 = vmatpush.bf16.msra.mxu3 %v14789_v3  ;;  %v16016_v55 = vld [vmem:[%s17246_s10 + $0x1e94] sm:$0xf0]  ;;  %v11142_v3 = vld [vmem:[%s17246_s10 + $0x98] sm:$0xf0]  ;;  %v14948_v45 = vld [vmem:[%s17246_s10 + $0x1e48] sm:$0xf] }
 0x4fe   : > { %10480 = vmatmul.bf16.vlgmr.msra.gmra.mxu0 %v17915_v13  ;;  %v11145_v8 = vor.u32 %v15054_v59, %v11142_v3  ;;  %v11238_v59 = vld [vmem:[%s17246_s10 + $0x158] sm:$0xf0]  ;;  %v15042_v36 = vld [vmem:[%s17246_s10 + $0x2c] sm:$0xf] }
 0x4ff   : > { %10524 = vmatpush.bf16.msrb.mxu0 %v15029_v50  ;;  %10493 = vmatmul.bf16.vlgmr.msra.gmra.mxu1 %v17921_v61  ;;  %v15086_v50 = vld [vmem:[%s17246_s10 + $0x18c] sm:$0xf] }
 0x500   : > { %10537 = vmatpush.bf16.msrb.mxu1 %v11193_v52  ;;  %10506 = vmatmul.bf16.vlgmr.msra.gmra.mxu2 %v17989_v56  ;;  %v11270_v52 = vld [vmem:[%s17246_s10 + $0x198] sm:$0xf0] }
 0x501   : > { %10550 = vmatpush.bf16.msrb.mxu2 %v11321_v12  ;;  %10563 = vmatpush.bf16.msrb.mxu3 %v11449_v19  ;;  %v10273_v12 = vpop.f32.mrf.mxu0  ;;  %v14981_v19 = vor.u32 %v16016_v55, %v14980_v29  ;;  %v11273_v42 = vor.u32 %v15086_v50, %v11270_v52  ;;  %v11110_v29 = vld [vmem:[%s17246_s10 + $0x58] sm:$0xf0]  ;;  %v15078_v55 = vld [vmem:[%s17246_s10 + $0x14c] sm:$0xf] }
 0x502   : > { %10519 = vmatmul.bf16.vlgmr.msra.gmra.mxu3 %v17996_v54  ;;  %v10274_v35 = vadd.f32 %v10273_v12, %v19066_v4  ;;  %v11254_v4 = vld [vmem:[%s17246_s10 + $0x178] sm:$0xf0]  ;;  %v15110_v50 = vld [vmem:[%s17246_s10 + $0x24c] sm:$0xf] }
 0x503   : > { %10525 = vmatpush.bf16.msrb.mxu0 %v15013_v48  ;;  %v15050_v48 = vld [vmem:[%s17246_s10 + $0x6c] sm:$0xf]  ;;  %v11257_v38 = vor.u32 %v15082_v62, %v11254_v4  ;;  %v11366_v52 = vld [vmem:[%s17246_s10 + $0x258] sm:$0xf0] }
 0x504   : > { %10538 = vmatpush.bf16.msrb.mxu1 %v11177_v10  ;;  %v11401_v10 = vor.u32 %v15118_v1, %v11398_v53  ;;  %v11129_v63 = vor.u32 %v15050_v48, %v11126_v60  ;;  %v14949_v1 = vor.u32 %v16008_v5, %v14948_v45  ;;  %v10288_v53 = vpop.f32.mrf.mxu1  ;;  %v11369_v44 = vor.u32 %v15110_v50, %v11366_v52  ;;  %v11094_v48 = vld [vmem:[%s17246_s10 + $0x38] sm:$0xf0]  ;;  %v15106_v60 = vld [vmem:[%s17246_s10 + $0x22c] sm:$0xf] }
 0x505   : > { %10551 = vmatpush.bf16.msrb.mxu2 %v11305_v32  ;;  %10564 = vmatpush.bf16.msrb.mxu3 %v11433_v41  ;;  %v10287_v32 = vadd.f32 %v10286_v2, %v10274_v35  ;;  %v11382_v41 = vld [vmem:[%s17246_s10 + $0x278] sm:$0xf0]  ;;  %v10312_v3 = vpop.f32.mrf.mxu3  ;;  %v11241_v2 = vor.u32 %v15078_v55, %v11238_v59  ;;  %v15070_v5 = vld [vmem:[%s17246_s10 + $0x10c] sm:$0xf] }
 0x506   : > { %v11350_v62 = vld [vmem:[%s17246_s10 + $0x238] sm:$0xf0]  ;;  %v15162_v59 = vld [vmem:[%s17246_s10 + $0x3ec] sm:$0xf] }
 0x507   : > { %10526 = vmatpush.bf16.msrb.mxu0 %v14997_v0  ;;  %v15046_v0 = vld [vmem:[%s17246_s10 + $0x4c] sm:$0xf]  ;;  %v11078_v45 = vld [vmem:[%s17246_s10 + $0x18] sm:$0xf0] }
 0x508   : > { %10539 = vmatpush.bf16.msrb.mxu1 %v11161_v57  ;;  %v11385_v57 = vor.u32 %v15114_v58, %v11382_v41  ;;  %v14916_v58 = vld [vmem:[%s17246_s10 + $0x1e08] sm:$0xf]  ;;  %v16000_v41 = vld [vmem:[%s17246_s10 + $0x1e14] sm:$0xf0]  ;;  %v11830_v53 = vld [vmem:[%s17246_s10 + $0x5f8] sm:$0xf0] }
 0x509   : > { %10552 = vmatpush.bf16.msrb.mxu2 %v11289_v47  ;;  %10565 = vmatpush.bf16.msrb.mxu3 %v11417_v49  ;;  %v10299_v47 = vpop.f32.mrf.mxu2  ;;  %v10275_v12 = vpop.f32.mrf.mxu0  ;;  %v14917_v52 = vor.u32 %v16000_v41, %v14916_v58  ;;  %v11686_v58 = vld [vmem:[%s17246_s10 + $0x4d8] sm:$0xf0]  ;;  %v15222_v41 = vld [vmem:[%s17246_s10 + $0x5cc] sm:$0xf] }
 0x50a   : > { %v10300_v49 = vadd.f32 %v10299_v47, %v10287_v32  ;;  %v11222_v32 = vld [vmem:[%s17246_s10 + $0x138] sm:$0xf0]  ;;  %v15102_v47 = vld [vmem:[%s17246_s10 + $0x20c] sm:$0xf] }
 0x50b   : > { %10527 = vmatpush.bf16.msrb.mxu0 %v14981_v19  ;;  %v11113_v19 = vor.u32 %v15046_v0, %v11110_v29  ;;  %v11353_v0 = vor.u32 %v15106_v60, %v11350_v62  ;;  %v11334_v29 = vld [vmem:[%s17246_s10 + $0x218] sm:$0xf0]  ;;  %v15190_v62 = vld [vmem:[%s17246_s10 + $0x4cc] sm:$0xf] }
 0x50c   : > { %10540 = vmatpush.bf16.msrb.mxu1 %v11145_v8  ;;  %v19137_v35 = vadd.f32 %v10312_v3, %v10300_v49  ;;  %v14932_v8 = vld [vmem:[%s17246_s10 + $0x1e28] sm:$0xf]  ;;  %v11574_v49 = vld [vmem:[%s17246_s10 + $0x3f8] sm:$0xf0]  ;;  %v15194_v3 = vld [vmem:[%s17246_s10 + $0x4ec] sm:$0xf] }
 0x50d   : > { %10553 = vmatpush.bf16.msrb.mxu2 %v11273_v42  ;;  %10566 = vmatpush.bf16.msrb.mxu3 %v11401_v10  ;;  %v16004_v42 = vld [vmem:[%s17246_s10 + $0x1e34] sm:$0xf0]  ;;  %v15074_v10 = vld [vmem:[%s17246_s10 + $0x12c] sm:$0xf]  ;;  %v10314_v50 = vpop.f32.mrf.mxu3  ;;  %v11702_v12 = vld [vmem:[%s17246_s10 + $0x4f8] sm:$0xf0] }
 0x50e   : > { %v14933_v4 = vor.u32 %v16004_v42, %v14932_v8  ;;  %v15258_v8 = vld [vmem:[%s17246_s10 + $0x6ec] sm:$0xf]  ;;  %v11958_v42 = vld [vmem:[%s17246_s10 + $0x6f8] sm:$0xf0] }
 0x50f   : > { %10528 = vmatpush.bf16.msrb.mxu0 %v14965_v51  ;;  %v11097_v51 = vor.u32 %v15042_v36, %v11094_v48  ;;  %v11337_v36 = vor.u32 %v15102_v47, %v11334_v29  ;;  %v11705_v48 = vor.u32 %v15194_v3, %v11702_v12  ;;  %v11558_v60 = vld [vmem:[%s17246_s10 + $0x3d8] sm:$0xf0]  ;;  %v15186_v29 = vld [vmem:[%s17246_s10 + $0x4ac] sm:$0xf] }
 0x510   : > { %10541 = vmatpush.bf16.msrb.mxu1 %v11129_v63  ;;  %v11225_v63 = vor.u32 %v15074_v10, %v11222_v32  ;;  %v15158_v32 = vld [vmem:[%s17246_s10 + $0x3cc] sm:$0xf]  ;;  %v11542_v47 = vld [vmem:[%s17246_s10 + $0x3b8] sm:$0xf0] }
 0x511   : > { %10554 = vmatpush.bf16.msrb.mxu2 %v11257_v38  ;;  %10567 = vmatpush.bf16.msrb.mxu3 %v11385_v57  ;;  %v15038_v38 = vld [vmem:[%s17246_s10 + $0xc] sm:$0xf]  ;;  %v11206_v57 = vld [vmem:[%s17246_s10 + $0x118] sm:$0xf0]  ;;  %v10301_v55 = vpop.f32.mrf.mxu2 }
 0x512   : > { %v11798_v3 = vld [vmem:[%s17246_s10 + $0x5b8] sm:$0xf0]  ;;  %v15250_v50 = vld [vmem:[%s17246_s10 + $0x6ac] sm:$0xf] }
 0x513   : > { %10529 = vmatpush.bf16.msrb.mxu0 %v14949_v1  ;;  %v15226_v1 = vld [vmem:[%s17246_s10 + $0x5ec] sm:$0xf] }
 0x514   : > { %10542 = vmatpush.bf16.msrb.mxu1 %v11113_v19  ;;  %v11081_v19 = vor.u32 %v15038_v38, %v11078_v45  ;;  %v11833_v10 = vor.u32 %v15226_v1, %v11830_v53  ;;  %v11942_v38 = vld [vmem:[%s17246_s10 + $0x6d8] sm:$0xf0]  ;;  %v11561_v45 = vor.u32 %v15158_v32, %v11558_v60 }
 0x515   : > { %10555 = vmatpush.bf16.msrb.mxu2 %v11241_v2  ;;  %10568 = vmatpush.bf16.msrb.mxu3 %v11369_v44  ;;  %v11209_v2 = vor.u32 %v15070_v5, %v11206_v57  ;;  %v11577_v44 = vor.u32 %v15162_v59, %v11574_v49  ;;  %v11689_v5 = vor.u32 %v15190_v62, %v11686_v58  ;;  %v15154_v57 = vld [vmem:[%s17246_s10 + $0x3ac] sm:$0xf]  ;;  %v11670_v59 = vld [vmem:[%s17246_s10 + $0x4b8] sm:$0xf0] }
 0x516   : > { %v15218_v49 = vld [vmem:[%s17246_s10 + $0x5ac] sm:$0xf]  ;;  %v11545_v12 = vor.u32 %v15154_v57, %v11542_v47  ;;  %v11673_v1 = vor.u32 %v15186_v29, %v11670_v59  ;;  %v11894_v57 = vld [vmem:[%s17246_s10 + $0x678] sm:$0xf0] }
 0x517   : > { %10530 = vmatpush.bf16.msrb.mxu0 %v14933_v4  ;;  %v11961_v4 = vor.u32 %v15258_v8, %v11958_v42  ;;  %v11801_v53 = vor.u32 %v15218_v49, %v11798_v3  ;;  %v15182_v8 = vld [vmem:[%s17246_s10 + $0x48c] sm:$0xf]  ;;  %v11494_v49 = vld [vmem:[%s17246_s10 + $0x358] sm:$0xf0] }
 0x518   : > { %10543 = vmatpush.bf16.msrb.mxu1 %v11097_v51  ;;  %v11814_v51 = vld [vmem:[%s17246_s10 + $0x5d8] sm:$0xf0]  ;;  %v15146_v58 = vld [vmem:[%s17246_s10 + $0x36c] sm:$0xf] }
 0x519   : > { %10556 = vmatpush.bf16.msrb.mxu2 %v11225_v63  ;;  %10569 = vmatpush.bf16.msrb.mxu3 %v11353_v0  ;;  %v15254_v63 = vld [vmem:[%s17246_s10 + $0x6cc] sm:$0xf]  ;;  %v11817_v0 = vor.u32 %v15222_v41, %v11814_v51  ;;  %v11510_v41 = vld [vmem:[%s17246_s10 + $0x378] sm:$0xf0] }
 0x51a   : > { %v11945_v55 = vor.u32 %v15254_v63, %v11942_v38  ;;  %v15178_v51 = vld [vmem:[%s17246_s10 + $0x46c] sm:$0xf]  ;;  %v11513_v47 = vor.u32 %v15146_v58, %v11510_v41  ;;  %v11734_v41 = vld [vmem:[%s17246_s10 + $0x538] sm:$0xf0] }
 0x51b   : > { %10531 = vmatpush.bf16.msrb.mxu0 %v14917_v52  ;;  %v11926_v52 = vld [vmem:[%s17246_s10 + $0x6b8] sm:$0xf0]  ;;  %v15142_v59 = vld [vmem:[%s17246_s10 + $0x34c] sm:$0xf] }
 0x51c   : > { %10544 = vmatpush.bf16.msrb.mxu1 %v11081_v19  ;;  %v15150_v19 = vld [vmem:[%s17246_s10 + $0x38c] sm:$0xf]  ;;  %v11929_v42 = vor.u32 %v15250_v50, %v11926_v52  ;;  %v10338_v60 = vpop.f32.mrf.mxu1 }
 0x51d   : > { %10557 = vmatpush.bf16.msrb.mxu2 %v11209_v2  ;;  %10570 = vmatpush.bf16.msrb.mxu3 %v11337_v36  ;;  %v11526_v2 = vld [vmem:[%s17246_s10 + $0x398] sm:$0xf0]  ;;  %v15174_v3 = vld [vmem:[%s17246_s10 + $0x44c] sm:$0xf] }
 0x51e   : > { %10532 = vmatmul.bf16.vlgmr.msrb.gmra.mxu0 %v17994_v33  ;;  %v11782_v36 = vld [vmem:[%s17246_s10 + $0x598] sm:$0xf0]  ;;  %v11529_v32 = vor.u32 %v15150_v19, %v11526_v2  ;;  %v15202_v58 = vld [vmem:[%s17246_s10 + $0x52c] sm:$0xf] }
 0x51f   : > { %10576 = vmatpush.bf16.msra.mxu0 %v11577_v44  ;;  %10545 = vmatmul.bf16.vlgmr.msrb.gmra.mxu1 %v17374_v27  ;;  %v10325_v44 = vpop.f32.mrf.mxu0 }
 0x520   : > { %10589 = vmatpush.bf16.msra.mxu1 %v11705_v48  ;;  %10558 = vmatmul.bf16.vlgmr.msrb.gmra.mxu2 %v17380_v31  ;;  %v11654_v31 = vld [vmem:[%s17246_s10 + $0x498] sm:$0xf0]  ;;  %v15246_v48 = vld [vmem:[%s17246_s10 + $0x68c] sm:$0xf]  ;;  %v10326_v27 = vadd.f32 %v10325_v44, %v19137_v35 }
 0x521   : > { %10602 = vmatpush.bf16.msra.mxu2 %v11833_v10  ;;  %10615 = vmatpush.bf16.msra.mxu3 %v11961_v4  ;;  %v11910_v10 = vld [vmem:[%s17246_s10 + $0x698] sm:$0xf0]  ;;  %v11657_v62 = vor.u32 %v15182_v8, %v11654_v31  ;;  %v15238_v8 = vld [vmem:[%s17246_s10 + $0x64c] sm:$0xf] }
 0x522   : > { %10571 = vmatmul.bf16.vlgmr.msrb.gmra.mxu3 %v17369_v22  ;;  %v15214_v22 = vld [vmem:[%s17246_s10 + $0x58c] sm:$0xf]  ;;  %v11913_v63 = vor.u32 %v15246_v48, %v11910_v10  ;;  %v10339_v38 = vadd.f32 %v10338_v60, %v10326_v27  ;;  %v11766_v35 = vld [vmem:[%s17246_s10 + $0x578] sm:$0xf0] }
 0x523   : > { %10577 = vmatpush.bf16.msra.mxu0 %v11561_v45  ;;  %v11785_v4 = vor.u32 %v15214_v22, %v11782_v36  ;;  %v11638_v45 = vld [vmem:[%s17246_s10 + $0x478] sm:$0xf0]  ;;  %v10351_v52 = vpop.f32.mrf.mxu2  ;;  %v11497_v22 = vor.u32 %v15142_v59, %v11494_v49  ;;  %v15138_v27 = vld [vmem:[%s17246_s10 + $0x32c] sm:$0xf] }
 0x524   : > { %10590 = vmatpush.bf16.msra.mxu1 %v11689_v5  ;;  %v15210_v5 = vld [vmem:[%s17246_s10 + $0x56c] sm:$0xf]  ;;  %v11641_v29 = vor.u32 %v15178_v51, %v11638_v45  ;;  %v10352_v19 = vadd.f32 %v10351_v52, %v10339_v38  ;;  %v10340_v36 = vpop.f32.mrf.mxu1  ;;  %v11718_v59 = vld [vmem:[%s17246_s10 + $0x518] sm:$0xf0] }
 0x525   : > { %10603 = vmatpush.bf16.msra.mxu2 %v11817_v0  ;;  %10616 = vmatpush.bf16.msra.mxu3 %v11945_v55  ;;  %v15242_v0 = vld [vmem:[%s17246_s10 + $0x66c] sm:$0xf]  ;;  %v11769_v55 = vor.u32 %v15210_v5, %v11766_v35  ;;  %v10364_v2 = vpop.f32.mrf.mxu3  ;;  %v11462_v5 = vld [vmem:[%s17246_s10 + $0x318] sm:$0xf0] }
 0x526   : > { %v11897_v50 = vor.u32 %v15242_v0, %v11894_v57  ;;  %v19208_v44 = vadd.f32 %v10364_v2, %v10352_v19  ;;  %v15170_v60 = vld [vmem:[%s17246_s10 + $0x42c] sm:$0xf]  ;;  %v11737_v0 = vor.u32 %v15202_v58, %v11734_v41  ;;  %v12214_v2 = vld [vmem:[%s17246_s10 + $0x8f8] sm:$0xf0] }
 0x527   : > { %10578 = vmatpush.bf16.msra.mxu0 %v11545_v12  ;;  %v11622_v12 = vld [vmem:[%s17246_s10 + $0x458] sm:$0xf0]  ;;  %v10327_v31 = vpop.f32.mrf.mxu0  ;;  %v15234_v51 = vld [vmem:[%s17246_s10 + $0x62c] sm:$0xf] }
 0x528   : > { %10591 = vmatpush.bf16.msra.mxu1 %v11673_v1  ;;  %v15206_v1 = vld [vmem:[%s17246_s10 + $0x54c] sm:$0xf]  ;;  %v11625_v48 = vor.u32 %v15174_v3, %v11622_v12  ;;  %v11846_v3 = vld [vmem:[%s17246_s10 + $0x618] sm:$0xf0] }
 0x529   : > { %10604 = vmatpush.bf16.msra.mxu2 %v11801_v53  ;;  %10617 = vmatpush.bf16.msra.mxu3 %v11929_v42  ;;  %v11750_v53 = vld [vmem:[%s17246_s10 + $0x558] sm:$0xf0]  ;;  %v15134_v45 = vld [vmem:[%s17246_s10 + $0x30c] sm:$0xf] }
 0x52a   : > { %v11878_v42 = vld [vmem:[%s17246_s10 + $0x658] sm:$0xf0]  ;;  %v11753_v10 = vor.u32 %v15206_v1, %v11750_v53  ;;  %v15166_v57 = vld [vmem:[%s17246_s10 + $0x40c] sm:$0xf]  ;;  %v11465_v19 = vor.u32 %v15134_v45, %v11462_v5 }
 0x52b   : > { %10579 = vmatpush.bf16.msra.mxu0 %v11529_v32  ;;  %v11478_v32 = vld [vmem:[%s17246_s10 + $0x338] sm:$0xf0]  ;;  %v15230_v49 = vld [vmem:[%s17246_s10 + $0x60c] sm:$0xf] }
 0x52c   : > { %10592 = vmatpush.bf16.msra.mxu1 %v11657_v62  ;;  %v11881_v62 = vor.u32 %v15238_v8, %v11878_v42  ;;  %v11481_v38 = vor.u32 %v15138_v27, %v11478_v32  ;;  %v15290_v52 = vld [vmem:[%s17246_s10 + $0x7ec] sm:$0xf]  ;;  %v12086_v12 = vld [vmem:[%s17246_s10 + $0x7f8] sm:$0xf0] }
 0x52d   : > { %10605 = vmatpush.bf16.msra.mxu2 %v11785_v4  ;;  %10618 = vmatpush.bf16.msra.mxu3 %v11913_v63  ;;  %v11606_v4 = vld [vmem:[%s17246_s10 + $0x438] sm:$0xf0]  ;;  %v15322_v1 = vld [vmem:[%s17246_s10 + $0x8ec] sm:$0xf]  ;;  %v10366_v53 = vpop.f32.mrf.mxu3  ;;  %v12089_v27 = vor.u32 %v15290_v52, %v12086_v12 }
 0x52e   : > { %v11862_v63 = vld [vmem:[%s17246_s10 + $0x638] sm:$0xf0]  ;;  %v11609_v35 = vor.u32 %v15170_v60, %v11606_v4  ;;  %v15354_v8 = vld [vmem:[%s17246_s10 + $0x9ec] sm:$0xf]  ;;  %v12217_v32 = vor.u32 %v15322_v1, %v12214_v2 }
 0x52f   : > { %10580 = vmatpush.bf16.msra.mxu0 %v11513_v47  ;;  %v11590_v47 = vld [vmem:[%s17246_s10 + $0x418] sm:$0xf0]  ;;  %v15386_v36 = vld [vmem:[%s17246_s10 + $0xaec] sm:$0xf] }
 0x530   : > { %10593 = vmatpush.bf16.msra.mxu1 %v11641_v29  ;;  %v15198_v29 = vld [vmem:[%s17246_s10 + $0x50c] sm:$0xf]  ;;  %v12342_v42 = vld [vmem:[%s17246_s10 + $0x9f8] sm:$0xf0]  ;;  %v11593_v31 = vor.u32 %v15166_v57, %v11590_v47 }
 0x531   : > { %10606 = vmatpush.bf16.msra.mxu2 %v11769_v55  ;;  %10619 = vmatpush.bf16.msra.mxu3 %v11897_v50  ;;  %v11865_v55 = vor.u32 %v15234_v51, %v11862_v63  ;;  %v10353_v50 = vpop.f32.mrf.mxu2  ;;  %v12345_v60 = vor.u32 %v15354_v8, %v12342_v42  ;;  %v12070_v4 = vld [vmem:[%s17246_s10 + $0x7d8] sm:$0xf0]  ;;  %v15318_v58 = vld [vmem:[%s17246_s10 + $0x8cc] sm:$0xf] }
 0x532   : > { %v12198_v51 = vld [vmem:[%s17246_s10 + $0x8d8] sm:$0xf0]  ;;  %v15350_v63 = vld [vmem:[%s17246_s10 + $0x9cc] sm:$0xf] }
 0x533   : > { %10581 = vmatpush.bf16.msra.mxu0 %v11497_v22  ;;  %v11721_v22 = vor.u32 %v15198_v29, %v11718_v59  ;;  %v15382_v45 = vld [vmem:[%s17246_s10 + $0xacc] sm:$0xf]  ;;  %v12454_v5 = vld [vmem:[%s17246_s10 + $0xad8] sm:$0xf0] }
 0x534   : > { %10594 = vmatpush.bf16.msra.mxu1 %v11625_v48  ;;  %v12470_v48 = vld [vmem:[%s17246_s10 + $0xaf8] sm:$0xf0]  ;;  %v15282_v47 = vld [vmem:[%s17246_s10 + $0x7ac] sm:$0xf]  ;;  %v12457_v59 = vor.u32 %v15382_v45, %v12454_v5 }
 0x535   : > { %10607 = vmatpush.bf16.msra.mxu2 %v11753_v10  ;;  %10620 = vmatpush.bf16.msra.mxu3 %v11881_v62  ;;  %v11849_v10 = vor.u32 %v15230_v49, %v11846_v3  ;;  %v15286_v62 = vld [vmem:[%s17246_s10 + $0x7cc] sm:$0xf]  ;;  %v12473_v41 = vor.u32 %v15386_v36, %v12470_v48  ;;  %v12054_v29 = vld [vmem:[%s17246_s10 + $0x7b8] sm:$0xf0] }
 0x536   : > { %v12182_v49 = vld [vmem:[%s17246_s10 + $0x8b8] sm:$0xf0]  ;;  %v15346_v3 = vld [vmem:[%s17246_s10 + $0x9ac] sm:$0xf]  ;;  %v12057_v1 = vor.u32 %v15282_v47, %v12054_v29 }
 0x537   : > { %10582 = vmatpush.bf16.msra.mxu0 %v11481_v38  ;;  %v12326_v38 = vld [vmem:[%s17246_s10 + $0x9d8] sm:$0xf0]  ;;  %v15378_v52 = vld [vmem:[%s17246_s10 + $0xaac] sm:$0xf] }
 0x538   : > { %10595 = vmatpush.bf16.msra.mxu1 %v11609_v35  ;;  %v12073_v35 = vor.u32 %v15286_v62, %v12070_v4  ;;  %v12329_v57 = vor.u32 %v15350_v63, %v12326_v38  ;;  %v12310_v50 = vld [vmem:[%s17246_s10 + $0x9b8] sm:$0xf0]  ;;  %v15310_v8 = vld [vmem:[%s17246_s10 + $0x88c] sm:$0xf] }
 0x539   : > { %10608 = vmatpush.bf16.msra.mxu2 %v11737_v0  ;;  %10621 = vmatpush.bf16.msra.mxu3 %v11865_v55  ;;  %v12201_v0 = vor.u32 %v15318_v58, %v12198_v51  ;;  %v15314_v55 = vld [vmem:[%s17246_s10 + $0x8ac] sm:$0xf]  ;;  %v12438_v12 = vld [vmem:[%s17246_s10 + $0xab8] sm:$0xf0]  ;;  %v12313_v53 = vor.u32 %v15346_v3, %v12310_v50 }
 0x53a   : > { %v12038_v2 = vld [vmem:[%s17246_s10 + $0x798] sm:$0xf0]  ;;  %v12441_v42 = vor.u32 %v15378_v52, %v12438_v12  ;;  %v15374_v36 = vld [vmem:[%s17246_s10 + $0xa8c] sm:$0xf] }
 0x53b   : > { %10583 = vmatpush.bf16.msra.mxu0 %v11465_v19  ;;  %v15278_v19 = vld [vmem:[%s17246_s10 + $0x78c] sm:$0xf]  ;;  %v12422_v48 = vld [vmem:[%s17246_s10 + $0xa98] sm:$0xf0] }
 0x53c   : > { %10596 = vmatpush.bf16.msra.mxu1 %v11593_v31  ;;  %v12294_v31 = vld [vmem:[%s17246_s10 + $0x998] sm:$0xf0]  ;;  %v15274_v62 = vld [vmem:[%s17246_s10 + $0x76c] sm:$0xf] }
 0x53d   : > { %10609 = vmatpush.bf16.msra.mxu2 %v11721_v22  ;;  %10622 = vmatpush.bf16.msra.mxu3 %v11849_v10  ;;  %v10377_v22 = vpop.f32.mrf.mxu0  ;;  %v12041_v10 = vor.u32 %v15278_v19, %v12038_v2  ;;  %v12022_v4 = vld [vmem:[%s17246_s10 + $0x778] sm:$0xf0]  ;;  %v15306_v58 = vld [vmem:[%s17246_s10 + $0x86c] sm:$0xf] }
 0x53e   : > { %10584 = vmatmul.bf16.vlgmr.msra.gmra.mxu0 %v17371_v24  ;;  %v12166_v24 = vld [vmem:[%s17246_s10 + $0x898] sm:$0xf0]  ;;  %v15338_v38 = vld [vmem:[%s17246_s10 + $0x96c] sm:$0xf] }
 0x53f   : > { %10628 = vmatpush.bf16.msrb.mxu0 %v12089_v27  ;;  %10597 = vmatmul.bf16.vlgmr.msra.gmra.mxu1 %v17439_v40  ;;  %v10378_v40 = vadd.f32 %v10377_v22, %v19208_v44  ;;  %v10390_v27 = vpop.f32.mrf.mxu1  ;;  %v12150_v63 = vld [vmem:[%s17246_s10 + $0x878] sm:$0xf0]  ;;  %v15370_v45 = vld [vmem:[%s17246_s10 + $0xa6c] sm:$0xf] }
 0x540   : > { %10641 = vmatpush.bf16.msrb.mxu1 %v12217_v32  ;;  %10610 = vmatmul.bf16.vlgmr.msra.gmra.mxu2 %v17444_v43  ;;  %v12185_v43 = vor.u32 %v15314_v55, %v12182_v49  ;;  %v12169_v32 = vor.u32 %v15310_v8, %v12166_v24  ;;  %v12278_v44 = vld [vmem:[%s17246_s10 + $0x978] sm:$0xf0]  ;;  %v15270_v47 = vld [vmem:[%s17246_s10 + $0x74c] sm:$0xf] }
 0x541   : > { %10654 = vmatpush.bf16.msrb.mxu2 %v12345_v60  ;;  %10667 = vmatpush.bf16.msrb.mxu3 %v12473_v41  ;;  %v12425_v41 = vor.u32 %v15374_v36, %v12422_v48  ;;  %v10391_v51 = vadd.f32 %v10390_v27, %v10378_v40  ;;  %v12406_v5 = vld [vmem:[%s17246_s10 + $0xa78] sm:$0xf0]  ;;  %v15302_v55 = vld [vmem:[%s17246_s10 + $0x84c] sm:$0xf] }
 0x542   : > { %10623 = vmatmul.bf16.vlgmr.msra.gmra.mxu3 %v17428_v23  ;;  %v15342_v23 = vld [vmem:[%s17246_s10 + $0x98c] sm:$0xf]  ;;  %v12006_v29 = vld [vmem:[%s17246_s10 + $0x758] sm:$0xf0] }
 0x543   : > { %10629 = vmatpush.bf16.msrb.mxu0 %v12073_v35  ;;  %v12297_v60 = vor.u32 %v15342_v23, %v12294_v31  ;;  %v12025_v35 = vor.u32 %v15274_v62, %v12022_v4  ;;  %v10403_v49 = vpop.f32.mrf.mxu2  ;;  %v12134_v3 = vld [vmem:[%s17246_s10 + $0x858] sm:$0xf0]  ;;  %v15334_v50 = vld [vmem:[%s17246_s10 + $0x94c] sm:$0xf]  ;;  %v12009_v2 = vor.u32 %v15270_v47, %v12006_v29 }
 0x544   : > { %10642 = vmatpush.bf16.msrb.mxu1 %v12201_v0  ;;  %v12153_v0 = vor.u32 %v15306_v58, %v12150_v63  ;;  %v12262_v52 = vld [vmem:[%s17246_s10 + $0x958] sm:$0xf0]  ;;  %v10404_v12 = vadd.f32 %v10403_v49, %v10391_v51  ;;  %v12137_v24 = vor.u32 %v15302_v55, %v12134_v3  ;;  %v15266_v31 = vld [vmem:[%s17246_s10 + $0x72c] sm:$0xf] }
 0x545   : > { %10655 = vmatpush.bf16.msrb.mxu2 %v12329_v57  ;;  %10668 = vmatpush.bf16.msrb.mxu3 %v12457_v59  ;;  %v12281_v57 = vor.u32 %v15338_v38, %v12278_v44  ;;  %v12409_v59 = vor.u32 %v15370_v45, %v12406_v5  ;;  %v10379_v19 = vpop.f32.mrf.mxu0  ;;  %v12265_v23 = vor.u32 %v15334_v50, %v12262_v52  ;;  %v11990_v22 = vld [vmem:[%s17246_s10 + $0x738] sm:$0xf0]  ;;  %v15298_v36 = vld [vmem:[%s17246_s10 + $0x82c] sm:$0xf] }
 0x546   : > { %v12118_v40 = vld [vmem:[%s17246_s10 + $0x838] sm:$0xf0]  ;;  %v11993_v62 = vor.u32 %v15266_v31, %v11990_v22  ;;  %v15262_v4 = vld [vmem:[%s17246_s10 + $0x70c] sm:$0xf] }
 0x547   : > { %10630 = vmatpush.bf16.msrb.mxu0 %v12057_v1  ;;  %v10416_v1 = vpop.f32.mrf.mxu3  ;;  %v10392_v8 = vpop.f32.mrf.mxu1  ;;  %v12246_v27 = vld [vmem:[%s17246_s10 + $0x938] sm:$0xf0]  ;;  %v15294_v63 = vld [vmem:[%s17246_s10 + $0x80c] sm:$0xf] }
 0x548   : > { %10643 = vmatpush.bf16.msrb.mxu1 %v12185_v43  ;;  %v15366_v43 = vld [vmem:[%s17246_s10 + $0xa4c] sm:$0xf]  ;;  %v11974_v58 = vld [vmem:[%s17246_s10 + $0x718] sm:$0xf0] }
 0x549   : > { %10656 = vmatpush.bf16.msrb.mxu2 %v12313_v53  ;;  %10669 = vmatpush.bf16.msrb.mxu3 %v12441_v42  ;;  %v12390_v53 = vld [vmem:[%s17246_s10 + $0xa58] sm:$0xf0]  ;;  %v19279_v42 = vadd.f32 %v10416_v1, %v10404_v12  ;;  %v15326_v44 = vld [vmem:[%s17246_s10 + $0x90c] sm:$0xf]  ;;  %v11977_v49 = vor.u32 %v15262_v4, %v11974_v58 }
 0x54a   : > { %v12393_v48 = vor.u32 %v15366_v43, %v12390_v53  ;;  %v12102_v38 = vld [vmem:[%s17246_s10 + $0x818] sm:$0xf0]  ;;  %v15418_v47 = vld [vmem:[%s17246_s10 + $0xbec] sm:$0xf] }
 0x54b   : > { %10631 = vmatpush.bf16.msrb.mxu0 %v12041_v10  ;;  %v15330_v10 = vld [vmem:[%s17246_s10 + $0x92c] sm:$0xf]  ;;  %v12230_v5 = vld [vmem:[%s17246_s10 + $0x918] sm:$0xf0]  ;;  %v12105_v12 = vor.u32 %v15294_v63, %v12102_v38 }
 0x54c   : > { %10644 = vmatpush.bf16.msrb.mxu1 %v12169_v32  ;;  %v15362_v32 = vld [vmem:[%s17246_s10 + $0xa2c] sm:$0xf]  ;;  %v12249_v51 = vor.u32 %v15330_v10, %v12246_v27  ;;  %v12598_v29 = vld [vmem:[%s17246_s10 + $0xbf8] sm:$0xf0]  ;;  %v12233_v1 = vor.u32 %v15326_v44, %v12230_v5 }
 0x54d   : > { %10657 = vmatpush.bf16.msrb.mxu2 %v12297_v60  ;;  %10670 = vmatpush.bf16.msrb.mxu3 %v12425_v41  ;;  %v12374_v60 = vld [vmem:[%s17246_s10 + $0xa38] sm:$0xf0]  ;;  %v12121_v41 = vor.u32 %v15298_v36, %v12118_v40  ;;  %v15450_v55 = vld [vmem:[%s17246_s10 + $0xcec] sm:$0xf] }
 0x54e   : > { %v12377_v45 = vor.u32 %v15362_v32, %v12374_v60  ;;  %v12726_v3 = vld [vmem:[%s17246_s10 + $0xcf8] sm:$0xf0]  ;;  %v15482_v50 = vld [vmem:[%s17246_s10 + $0xdec] sm:$0xf] }
 0x54f   : > { %10632 = vmatpush.bf16.msrb.mxu0 %v12025_v35  ;;  %v15358_v35 = vld [vmem:[%s17246_s10 + $0xa0c] sm:$0xf]  ;;  %v12854_v52 = vld [vmem:[%s17246_s10 + $0xdf8] sm:$0xf0]  ;;  %v12729_v8 = vor.u32 %v15450_v55, %v12726_v3 }
 0x550   : > { %10645 = vmatpush.bf16.msrb.mxu1 %v12153_v0  ;;  %v12358_v0 = vld [vmem:[%s17246_s10 + $0xa18] sm:$0xf0]  ;;  %v15514_v43 = vld [vmem:[%s17246_s10 + $0xeec] sm:$0xf] }
 0x551   : > { %10658 = vmatpush.bf16.msrb.mxu2 %v12281_v57  ;;  %10671 = vmatpush.bf16.msrb.mxu3 %v12409_v59  ;;  %v10405_v57 = vpop.f32.mrf.mxu2  ;;  %v10418_v59 = vpop.f32.mrf.mxu3  ;;  %v12982_v53 = vld [vmem:[%s17246_s10 + $0xef8] sm:$0xf0]  ;;  %v12361_v19 = vor.u32 %v15358_v35, %v12358_v0  ;;  %v15446_v22 = vld [vmem:[%s17246_s10 + $0xccc] sm:$0xf] }
 0x552   : > { %v12582_v31 = vld [vmem:[%s17246_s10 + $0xbd8] sm:$0xf0]  ;;  %v12985_v36 = vor.u32 %v15514_v43, %v12982_v53  ;;  %v15478_v40 = vld [vmem:[%s17246_s10 + $0xdcc] sm:$0xf] }
 0x553   : > { %10633 = vmatpush.bf16.msrb.mxu0 %v12009_v2  ;;  %v12601_v2 = vor.u32 %v15418_v47, %v12598_v29  ;;  %v12838_v10 = vld [vmem:[%s17246_s10 + $0xdd8] sm:$0xf0]  ;;  %v15510_v27 = vld [vmem:[%s17246_s10 + $0xecc] sm:$0xf] }
 0x554   : > { %10646 = vmatpush.bf16.msrb.mxu1 %v12137_v24  ;;  %v12857_v24 = vor.u32 %v15482_v50, %v12854_v52  ;;  %v12966_v32 = vld [vmem:[%s17246_s10 + $0xed8] sm:$0xf0]  ;;  %v12841_v4 = vor.u32 %v15478_v40, %v12838_v10  ;;  %v15410_v58 = vld [vmem:[%s17246_s10 + $0xbac] sm:$0xf] }
 0x555   : > { %10659 = vmatpush.bf16.msrb.mxu2 %v12265_v23  ;;  %10672 = vmatpush.bf16.msrb.mxu3 %v12393_v48  ;;  %v15414_v23 = vld [vmem:[%s17246_s10 + $0xbcc] sm:$0xf]  ;;  %v12710_v48 = vld [vmem:[%s17246_s10 + $0xcd8] sm:$0xf0]  ;;  %v12969_v63 = vor.u32 %v15510_v27, %v12966_v32 }
 0x556   : > { %v12585_v60 = vor.u32 %v15414_v23, %v12582_v31  ;;  %v12694_v38 = vld [vmem:[%s17246_s10 + $0xcb8] sm:$0xf0]  ;;  %v15474_v44 = vld [vmem:[%s17246_s10 + $0xdac] sm:$0xf] }
 0x557   : > { %10634 = vmatpush.bf16.msrb.mxu0 %v11993_v62  ;;  %v12713_v62 = vor.u32 %v15446_v22, %v12710_v48  ;;  %v15506_v5 = vld [vmem:[%s17246_s10 + $0xeac] sm:$0xf]  ;;  %v12950_v35 = vld [vmem:[%s17246_s10 + $0xeb8] sm:$0xf0] }
 0x558   : > { %10647 = vmatpush.bf16.msrb.mxu1 %v12121_v41  ;;  %v12566_v41 = vld [vmem:[%s17246_s10 + $0xbb8] sm:$0xf0]  ;;  %v15406_v47 = vld [vmem:[%s17246_s10 + $0xb8c] sm:$0xf] }
 0x559   : > { %10660 = vmatpush.bf16.msrb.mxu2 %v12249_v51  ;;  %10673 = vmatpush.bf16.msrb.mxu3 %v12377_v45  ;;  %v15442_v51 = vld [vmem:[%s17246_s10 + $0xcac] sm:$0xf]  ;;  %v12822_v45 = vld [vmem:[%s17246_s10 + $0xdb8] sm:$0xf0] }
 0x55a   : > { %v12697_v0 = vor.u32 %v15442_v51, %v12694_v38  ;;  %v12825_v57 = vor.u32 %v15474_v44, %v12822_v45  ;;  %v12550_v29 = vld [vmem:[%s17246_s10 + $0xb98] sm:$0xf0]  ;;  %v15470_v59 = vld [vmem:[%s17246_s10 + $0xd8c] sm:$0xf] }
 0x55b   : > { %10635 = vmatpush.bf16.msrb.mxu0 %v11977_v49  ;;  %v12678_v55 = vld [vmem:[%s17246_s10 + $0xc98] sm:$0xf0]  ;;  %v15502_v3 = vld [vmem:[%s17246_s10 + $0xe8c] sm:$0xf] }
 0x55c   : > { %10648 = vmatpush.bf16.msrb.mxu1 %v12105_v12  ;;  %v12806_v49 = vld [vmem:[%s17246_s10 + $0xd98] sm:$0xf0]  ;;  %v12553_v12 = vor.u32 %v15406_v47, %v12550_v29  ;;  %v15466_v22 = vld [vmem:[%s17246_s10 + $0xd6c] sm:$0xf] }
 0x55d   : > { %10661 = vmatpush.bf16.msrb.mxu2 %v12233_v1  ;;  %10674 = vmatpush.bf16.msrb.mxu3 %v12361_v19  ;;  %v12934_v50 = vld [vmem:[%s17246_s10 + $0xe98] sm:$0xf0]  ;;  %v10442_v1 = vpop.f32.mrf.mxu1  ;;  %v12809_v53 = vor.u32 %v15470_v59, %v12806_v49  ;;  %v15402_v19 = vld [vmem:[%s17246_s10 + $0xb6c] sm:$0xf] }
 0x55e   : > { %10636 = vmatmul.bf16.vlgmr.msrb.gmra.mxu0 %v17430_v26  ;;  %v12569_v26 = vor.u32 %v15410_v58, %v12566_v41  ;;  %v12662_v31 = vld [vmem:[%s17246_s10 + $0xc78] sm:$0xf0]  ;;  %v15398_v32 = vld [vmem:[%s17246_s10 + $0xb4c] sm:$0xf] }
 0x55f   : > { %10680 = vmatpush.bf16.msra.mxu0 %v12601_v2  ;;  %10649 = vmatmul.bf16.vlgmr.msrb.gmra.mxu1 %v17515_v9  ;;  %v12953_v9 = vor.u32 %v15506_v5, %v12950_v35  ;;  %v12534_v2 = vld [vmem:[%s17246_s10 + $0xb78] sm:$0xf0]  ;;  %v15462_v51 = vld [vmem:[%s17246_s10 + $0xd4c] sm:$0xf] }
 0x560   : > { %10693 = vmatpush.bf16.msra.mxu1 %v12729_v8  ;;  %10662 = vmatmul.bf16.vlgmr.msrb.gmra.mxu2 %v17526_v17  ;;  %v15438_v17 = vld [vmem:[%s17246_s10 + $0xc8c] sm:$0xf]  ;;  %v12918_v48 = vld [vmem:[%s17246_s10 + $0xe78] sm:$0xf0]  ;;  %v12537_v40 = vor.u32 %v15402_v19, %v12534_v2 }
 0x561   : > { %10706 = vmatpush.bf16.msra.mxu2 %v12857_v24  ;;  %10719 = vmatpush.bf16.msra.mxu3 %v12985_v36  ;;  %v12681_v43 = vor.u32 %v15438_v17, %v12678_v55  ;;  %v15434_v8 = vld [vmem:[%s17246_s10 + $0xc6c] sm:$0xf]  ;;  %v12937_v24 = vor.u32 %v15502_v3, %v12934_v50  ;;  %v12646_v41 = vld [vmem:[%s17246_s10 + $0xc58] sm:$0xf0] }
 0x562   : > { %10675 = vmatmul.bf16.vlgmr.msrb.gmra.mxu3 %v17522_v14  ;;  %v10429_v14 = vpop.f32.mrf.mxu0  ;;  %v15498_v36 = vld [vmem:[%s17246_s10 + $0xe6c] sm:$0xf]  ;;  %v12665_v10 = vor.u32 %v15434_v8, %v12662_v31  ;;  %v12902_v5 = vld [vmem:[%s17246_s10 + $0xe58] sm:$0xf0] }
 0x563   : > { %10681 = vmatpush.bf16.msra.mxu0 %v12585_v60  ;;  %v10430_v52 = vadd.f32 %v10429_v14, %v19279_v42  ;;  %v12790_v42 = vld [vmem:[%s17246_s10 + $0xd78] sm:$0xf0]  ;;  %v10455_v58 = vpop.f32.mrf.mxu2  ;;  %v15494_v45 = vld [vmem:[%s17246_s10 + $0xe4c] sm:$0xf] }
 0x564   : > { %10694 = vmatpush.bf16.msra.mxu1 %v12713_v62  ;;  %v12793_v27 = vor.u32 %v15466_v22, %v12790_v42  ;;  %v12518_v60 = vld [vmem:[%s17246_s10 + $0xb58] sm:$0xf0]  ;;  %v15430_v62 = vld [vmem:[%s17246_s10 + $0xc4c] sm:$0xf]  ;;  %v12905_v59 = vor.u32 %v15494_v45, %v12902_v5 }
 0x565   : > { %10707 = vmatpush.bf16.msra.mxu2 %v12841_v4  ;;  %10720 = vmatpush.bf16.msra.mxu3 %v12969_v63  ;;  %v10443_v23 = vadd.f32 %v10442_v1, %v10430_v52  ;;  %v12921_v4 = vor.u32 %v15498_v36, %v12918_v48  ;;  %v12774_v63 = vld [vmem:[%s17246_s10 + $0xd58] sm:$0xf0]  ;;  %v10468_v44 = vpop.f32.mrf.mxu3  ;;  %v12649_v47 = vor.u32 %v15430_v62, %v12646_v41  ;;  %v15394_v17 = vld [vmem:[%s17246_s10 + $0xb2c] sm:$0xf] }
 0x566   : > { %v12777_v29 = vor.u32 %v15462_v51, %v12774_v63  ;;  %v15426_v55 = vld [vmem:[%s17246_s10 + $0xc2c] sm:$0xf]  ;;  %v12630_v49 = vld [vmem:[%s17246_s10 + $0xc38] sm:$0xf0] }
 0x567   : > { %10682 = vmatpush.bf16.msra.mxu0 %v12569_v26  ;;  %v10456_v38 = vadd.f32 %v10455_v58, %v10443_v23  ;;  %v12521_v26 = vor.u32 %v15398_v32, %v12518_v60  ;;  %v15458_v14 = vld [vmem:[%s17246_s10 + $0xd2c] sm:$0xf]  ;;  %v12758_v3 = vld [vmem:[%s17246_s10 + $0xd38] sm:$0xf0] }
 0x568   : > { %10695 = vmatpush.bf16.msra.mxu1 %v12697_v0  ;;  %v10444_v0 = vpop.f32.mrf.mxu1  ;;  %v15490_v50 = vld [vmem:[%s17246_s10 + $0xe2c] sm:$0xf]  ;;  %v12886_v52 = vld [vmem:[%s17246_s10 + $0xe38] sm:$0xf0]  ;;  %v12761_v19 = vor.u32 %v15458_v14, %v12758_v3 }
 0x569   : > { %10708 = vmatpush.bf16.msra.mxu2 %v12825_v57  ;;  %10721 = vmatpush.bf16.msra.mxu3 %v12953_v9  ;;  %v19350_v57 = vadd.f32 %v10468_v44, %v10456_v38  ;;  %v12502_v9 = vld [vmem:[%s17246_s10 + $0xb38] sm:$0xf0]  ;;  %v15390_v1 = vld [vmem:[%s17246_s10 + $0xb0c] sm:$0xf]  ;;  %v12889_v23 = vor.u32 %v15490_v50, %v12886_v52 }
 0x56a   : > { %v10431_v35 = vpop.f32.mrf.mxu0  ;;  %v15422_v2 = vld [vmem:[%s17246_s10 + $0xc0c] sm:$0xf]  ;;  %v12614_v8 = vld [vmem:[%s17246_s10 + $0xc18] sm:$0xf0] }
 0x56b   : > { %10683 = vmatpush.bf16.msra.mxu0 %v12553_v12  ;;  %v12505_v12 = vor.u32 %v15394_v17, %v12502_v9  ;;  %v12742_v31 = vld [vmem:[%s17246_s10 + $0xd18] sm:$0xf0]  ;;  %v15486_v22 = vld [vmem:[%s17246_s10 + $0xe0c] sm:$0xf]  ;;  %v10457_v36 = vpop.f32.mrf.mxu2  ;;  %v12617_v58 = vor.u32 %v15422_v2, %v12614_v8 }
 0x56c   : > { %10696 = vmatpush.bf16.msra.mxu1 %v12681_v43  ;;  %v12486_v43 = vld [vmem:[%s17246_s10 + $0xb18] sm:$0xf0]  ;;  %v15546_v48 = vld [vmem:[%s17246_s10 + $0xfec] sm:$0xf] }
 0x56d   : > { %10709 = vmatpush.bf16.msra.mxu2 %v12809_v53  ;;  %10722 = vmatpush.bf16.msra.mxu3 %v12937_v24  ;;  %v12633_v53 = vor.u32 %v15426_v55, %v12630_v49  ;;  %v15454_v24 = vld [vmem:[%s17246_s10 + $0xd0c] sm:$0xf]  ;;  %v12870_v42 = vld [vmem:[%s17246_s10 + $0xe18] sm:$0xf0]  ;;  %v12489_v32 = vor.u32 %v15390_v1, %v12486_v43 }
 0x56e   : > { %v13238_v60 = vld [vmem:[%s17246_s10 + $0x10f8] sm:$0xf0]  ;;  %v15610_v62 = vld [vmem:[%s17246_s10 + $0x11ec] sm:$0xf]  ;;  %v12745_v41 = vor.u32 %v15454_v24, %v12742_v31  ;;  %v12873_v38 = vor.u32 %v15486_v22, %v12870_v42 }
 0x56f   : > { %10684 = vmatpush.bf16.msra.mxu0 %v12537_v40  ;;  %v13110_v40 = vld [vmem:[%s17246_s10 + $0xff8] sm:$0xf0]  ;;  %v15642_v51 = vld [vmem:[%s17246_s10 + $0x12ec] sm:$0xf] }
 0x570   : > { %10697 = vmatpush.bf16.msra.mxu1 %v12665_v10  ;;  %v15578_v10 = vld [vmem:[%s17246_s10 + $0x10ec] sm:$0xf]  ;;  %v13494_v63 = vld [vmem:[%s17246_s10 + $0x12f8] sm:$0xf0]  ;;  %v13113_v44 = vor.u32 %v15546_v48, %v13110_v40 }
 0x571   : > { %10710 = vmatpush.bf16.msra.mxu2 %v12793_v27  ;;  %10723 = vmatpush.bf16.msra.mxu3 %v12921_v4  ;;  %v10470_v27 = vpop.f32.mrf.mxu3  ;;  %v13366_v4 = vld [vmem:[%s17246_s10 + $0x11f8] sm:$0xf0]  ;;  %v13241_v45 = vor.u32 %v15578_v10, %v13238_v60  ;;  %v15542_v35 = vld [vmem:[%s17246_s10 + $0xfcc] sm:$0xf] }
 0x572   : > { %v13369_v5 = vor.u32 %v15610_v62, %v13366_v4  ;;  %v15574_v0 = vld [vmem:[%s17246_s10 + $0x10cc] sm:$0xf]  ;;  %v13350_v9 = vld [vmem:[%s17246_s10 + $0x11d8] sm:$0xf0] }
 0x573   : > { %10685 = vmatpush.bf16.msra.mxu0 %v12521_v26  ;;  %v13094_v26 = vld [vmem:[%s17246_s10 + $0xfd8] sm:$0xf0]  ;;  %v15606_v17 = vld [vmem:[%s17246_s10 + $0x11cc] sm:$0xf] }
 0x574   : > { %10698 = vmatpush.bf16.msra.mxu1 %v12649_v47  ;;  %v13497_v47 = vor.u32 %v15642_v51, %v13494_v63  ;;  %v15638_v55 = vld [vmem:[%s17246_s10 + $0x12cc] sm:$0xf]  ;;  %v13097_v49 = vor.u32 %v15542_v35, %v13094_v26  ;;  %v13353_v3 = vor.u32 %v15606_v17, %v13350_v9  ;;  %v13078_v52 = vld [vmem:[%s17246_s10 + $0xfb8] sm:$0xf0] }
 0x575   : > { %10711 = vmatpush.bf16.msra.mxu2 %v12777_v29  ;;  %10724 = vmatpush.bf16.msra.mxu3 %v12905_v59  ;;  %v13222_v29 = vld [vmem:[%s17246_s10 + $0x10d8] sm:$0xf0]  ;;  %v15538_v50 = vld [vmem:[%s17246_s10 + $0xfac] sm:$0xf] }
 0x576   : > { %v13478_v59 = vld [vmem:[%s17246_s10 + $0x12d8] sm:$0xf0]  ;;  %v13225_v14 = vor.u32 %v15574_v0, %v13222_v29  ;;  %v15634_v2 = vld [vmem:[%s17246_s10 + $0x12ac] sm:$0xf] }
 0x577   : > { %10686 = vmatpush.bf16.msra.mxu0 %v12505_v12  ;;  %v15570_v12 = vld [vmem:[%s17246_s10 + $0x10ac] sm:$0xf]  ;;  %v13481_v1 = vor.u32 %v15638_v55, %v13478_v59  ;;  %v13206_v43 = vld [vmem:[%s17246_s10 + $0x10b8] sm:$0xf0] }
 0x578   : > { %10699 = vmatpush.bf16.msra.mxu1 %v12633_v53  ;;  %v15602_v53 = vld [vmem:[%s17246_s10 + $0x11ac] sm:$0xf]  ;;  %v13462_v8 = vld [vmem:[%s17246_s10 + $0x12b8] sm:$0xf0]  ;;  %v13209_v24 = vor.u32 %v15570_v12, %v13206_v43 }
 0x579   : > { %10712 = vmatpush.bf16.msra.mxu2 %v12761_v19  ;;  %10725 = vmatpush.bf16.msra.mxu3 %v12889_v23  ;;  %v13334_v19 = vld [vmem:[%s17246_s10 + $0x11b8] sm:$0xf0]  ;;  %v15534_v31 = vld [vmem:[%s17246_s10 + $0xf8c] sm:$0xf] }
 0x57a   : > { %v13337_v23 = vor.u32 %v15602_v53, %v13334_v19  ;;  %v13062_v22 = vld [vmem:[%s17246_s10 + $0xf98] sm:$0xf0]  ;;  %v15598_v36 = vld [vmem:[%s17246_s10 + $0x118c] sm:$0xf] }
 0x57b   : > { %10687 = vmatpush.bf16.msra.mxu0 %v12489_v32  ;;  %v13190_v42 = vld [vmem:[%s17246_s10 + $0x1098] sm:$0xf0]  ;;  %v15630_v40 = vld [vmem:[%s17246_s10 + $0x128c] sm:$0xf]  ;;  %v13065_v32 = vor.u32 %v15534_v31, %v13062_v22 }
 0x57c   : > { %10700 = vmatpush.bf16.msra.mxu1 %v12617_v58  ;;  %v13318_v48 = vld [vmem:[%s17246_s10 + $0x1198] sm:$0xf0]  ;;  %v10494_v60 = vpop.f32.mrf.mxu1  ;;  %v15530_v58 = vld [vmem:[%s17246_s10 + $0xf6c] sm:$0xf] }
 0x57d   : > { %10713 = vmatpush.bf16.msra.mxu2 %v12745_v41  ;;  %10726 = vmatpush.bf16.msra.mxu3 %v12873_v38  ;;  %v13446_v10 = vld [vmem:[%s17246_s10 + $0x1298] sm:$0xf0]  ;;  %v13321_v4 = vor.u32 %v15598_v36, %v13318_v48  ;;  %v15562_v51 = vld [vmem:[%s17246_s10 + $0x106c] sm:$0xf] }
 0x57e   : > { %10688 = vmatmul.bf16.vlgmr.msra.gmra.mxu0 %v17532_v20  ;;  %v13081_v20 = vor.u32 %v15538_v50, %v13078_v52  ;;  %v13046_v41 = vld [vmem:[%s17246_s10 + $0xf78] sm:$0xf0]  ;;  %v13449_v63 = vor.u32 %v15630_v40, %v13446_v10  ;;  %v15526_v29 = vld [vmem:[%s17246_s10 + $0xf4c] sm:$0xf] }
 0x57f   : > { %10732 = vmatpush.bf16.msrb.mxu0 %v13113_v44  ;;  %10701 = vmatmul.bf16.vlgmr.msra.gmra.mxu1 %v17614_v18  ;;  %v13465_v18 = vor.u32 %v15634_v2, %v13462_v8  ;;  %v13174_v44 = vld [vmem:[%s17246_s10 + $0x1078] sm:$0xf0]  ;;  %v13049_v26 = vor.u32 %v15530_v58, %v13046_v41  ;;  %v15558_v9 = vld [vmem:[%s17246_s10 + $0x104c] sm:$0xf] }
 0x580   : > { %10745 = vmatpush.bf16.msrb.mxu1 %v13241_v45  ;;  %10714 = vmatmul.bf16.vlgmr.msra.gmra.mxu2 %v17625_v16  ;;  %v15566_v16 = vld [vmem:[%s17246_s10 + $0x108c] sm:$0xf]  ;;  %v13430_v35 = vld [vmem:[%s17246_s10 + $0x1278] sm:$0xf0]  ;;  %v13177_v0 = vor.u32 %v15562_v51, %v13174_v44 }
 0x581   : > { %10758 = vmatpush.bf16.msrb.mxu2 %v13369_v5  ;;  %10771 = vmatpush.bf16.msrb.mxu3 %v13497_v47  ;;  %v13193_v62 = vor.u32 %v15566_v16, %v13190_v42  ;;  %v15594_v45 = vld [vmem:[%s17246_s10 + $0x116c] sm:$0xf]  ;;  %v13030_v17 = vld [vmem:[%s17246_s10 + $0xf58] sm:$0xf0] }
 0x582   : > { %10727 = vmatmul.bf16.vlgmr.msra.gmra.mxu3 %v17621_v25  ;;  %v10481_v25 = vpop.f32.mrf.mxu0  ;;  %v15626_v5 = vld [vmem:[%s17246_s10 + $0x126c] sm:$0xf]  ;;  %v13033_v53 = vor.u32 %v15526_v29, %v13030_v17  ;;  %v13142_v16 = vld [vmem:[%s17246_s10 + $0x1038] sm:$0xf0] }
 0x583   : > { %10733 = vmatpush.bf16.msrb.mxu0 %v13097_v49  ;;  %v10482_v27 = vadd.f32 %v10481_v25, %v19350_v57  ;;  %v13302_v57 = vld [vmem:[%s17246_s10 + $0x1178] sm:$0xf0]  ;;  %v13433_v55 = vor.u32 %v15626_v5, %v13430_v35  ;;  %v10507_v59 = vpop.f32.mrf.mxu2  ;;  %v15622_v12 = vld [vmem:[%s17246_s10 + $0x124c] sm:$0xf] }
 0x584   : > { %10746 = vmatpush.bf16.msrb.mxu1 %v13225_v14  ;;  %v13305_v47 = vor.u32 %v15594_v45, %v13302_v57  ;;  %v13158_v49 = vld [vmem:[%s17246_s10 + $0x1058] sm:$0xf0]  ;;  %v15590_v14 = vld [vmem:[%s17246_s10 + $0x114c] sm:$0xf]  ;;  %v10496_v19 = vpop.f32.mrf.mxu1 }
 0x585   : > { %10759 = vmatpush.bf16.msrb.mxu2 %v13353_v3  ;;  %10772 = vmatpush.bf16.msrb.mxu3 %v13481_v1  ;;  %v10495_v38 = vadd.f32 %v10494_v60, %v10482_v27  ;;  %v13286_v3 = vld [vmem:[%s17246_s10 + $0x1158] sm:$0xf0]  ;;  %v10520_v52 = vpop.f32.mrf.mxu3  ;;  %v13161_v8 = vor.u32 %v15558_v9, %v13158_v49  ;;  %v15554_v31 = vld [vmem:[%s17246_s10 + $0x102c] sm:$0xf] }
 0x586   : > { %v13414_v1 = vld [vmem:[%s17246_s10 + $0x1258] sm:$0xf0]  ;;  %v15618_v36 = vld [vmem:[%s17246_s10 + $0x122c] sm:$0xf]  ;;  %v13145_v27 = vor.u32 %v15554_v31, %v13142_v16 }
 0x587   : > { %10734 = vmatpush.bf16.msrb.mxu0 %v13081_v20  ;;  %v10508_v50 = vadd.f32 %v10507_v59, %v10495_v38  ;;  %v13289_v20 = vor.u32 %v15590_v14, %v13286_v3  ;;  %v13417_v22 = vor.u32 %v15622_v12, %v13414_v1  ;;  %v13270_v42 = vld [vmem:[%s17246_s10 + $0x1138] sm:$0xf0]  ;;  %v15518_v40 = vld [vmem:[%s17246_s10 + $0xf0c] sm:$0xf] }
 0x588   : > { %10747 = vmatpush.bf16.msrb.mxu1 %v13209_v24  ;;  %v15522_v24 = vld [vmem:[%s17246_s10 + $0xf2c] sm:$0xf]  ;;  %v13398_v48 = vld [vmem:[%s17246_s10 + $0x1238] sm:$0xf0] }
 0x589   : > { %10760 = vmatpush.bf16.msrb.mxu2 %v13337_v23  ;;  %10773 = vmatpush.bf16.msrb.mxu3 %v13465_v18  ;;  %v19421_v2 = vadd.f32 %v10520_v52, %v10508_v50  ;;  %v13014_v23 = vld [vmem:[%s17246_s10 + $0xf38] sm:$0xf0]  ;;  %v15586_v18 = vld [vmem:[%s17246_s10 + $0x112c] sm:$0xf]  ;;  %v13401_v58 = vor.u32 %v15618_v36, %v13398_v48 }
 0x58a   : > { %v10483_v43 = vpop.f32.mrf.mxu0  ;;  %v13017_v25 = vor.u32 %v15522_v24, %v13014_v23  ;;  %v12998_v10 = vld [vmem:[%s17246_s10 + $0xf18] sm:$0xf0]  ;;  %v15550_v60 = vld [vmem:[%s17246_s10 + $0x100c] sm:$0xf] }
 0x58b   : > { %10735 = vmatpush.bf16.msrb.mxu0 %v13065_v32  ;;  %v13273_v32 = vor.u32 %v15586_v18, %v13270_v42  ;;  %v13254_v41 = vld [vmem:[%s17246_s10 + $0x1118] sm:$0xf0]  ;;  %v15614_v51 = vld [vmem:[%s17246_s10 + $0x120c] sm:$0xf]  ;;  %v10509_v38 = vpop.f32.mrf.mxu2  ;;  %v13001_v35 = vor.u32 %v15518_v40, %v12998_v10 }
 0x58c   : > { %10748 = vmatpush.bf16.msrb.mxu1 %v13193_v62  ;;  %v13126_v62 = vld [vmem:[%s17246_s10 + $0x1018] sm:$0xf0]  ;;  %v15674_v44 = vld [vmem:[%s17246_s10 + $0x13ec] sm:$0xf]  ;;  %v16089_v38 = vld [vmem:[%s17792_s28] sm:$0xf] }
 0x58d   : > { %10761 = vmatpush.bf16.msrb.mxu2 %v13321_v4  ;;  %10774 = vmatpush.bf16.msrb.mxu3 %v13449_v63  ;;  %v15582_v4 = vld [vmem:[%s17246_s10 + $0x110c] sm:$0xf]  ;;  %v13382_v63 = vld [vmem:[%s17246_s10 + $0x1218] sm:$0xf0]  ;;  %v10522_v5 = vpop.f32.mrf.mxu3  ;;  %v13129_v29 = vor.u32 %v15550_v60, %v13126_v62 }
 0x58e   : > { %v13622_v45 = vld [vmem:[%s17246_s10 + $0x13f8] sm:$0xf0]  ;;  %v15706_v57 = vld [vmem:[%s17246_s10 + $0x14ec] sm:$0xf]  ;;  %v13257_v17 = vor.u32 %v15582_v4, %v13254_v41  ;;  %v13385_v59 = vor.u32 %v15614_v51, %v13382_v63 }
 0x58f   : > { %10736 = vmatpush.bf16.msrb.mxu0 %v13049_v26  ;;  %v13750_v26 = vld [vmem:[%s17246_s10 + $0x14f8] sm:$0xf0]  ;;  %v15770_v9 = vld [vmem:[%s17246_s10 + $0x16ec] sm:$0xf]  ;;  %v13625_v49 = vor.u32 %v15674_v44, %v13622_v45  ;;  %v4363_v44 = vperm.slane %v16089_v38, 3 }
 0x590   : > { %10749 = vmatpush.bf16.msrb.mxu1 %v13177_v0  ;;  %v15738_v0 = vld [vmem:[%s17246_s10 + $0x15ec] sm:$0xf]  ;;  %v13753_v14 = vor.u32 %v15706_v57, %v13750_v26  ;;  %v13606_v52 = vld [vmem:[%s17246_s10 + $0x13d8] sm:$0xf0] }
 0x591   : > { %10762 = vmatpush.bf16.msrb.mxu2 %v13305_v47  ;;  %10775 = vmatpush.bf16.msrb.mxu3 %v13433_v55  ;;  %v13878_v47 = vld [vmem:[%s17246_s10 + $0x15f8] sm:$0xf0]  ;;  %v15670_v50 = vld [vmem:[%s17246_s10 + $0x13cc] sm:$0xf] }
 0x592   : > { %v14006_v55 = vld [vmem:[%s17246_s10 + $0x16f8] sm:$0xf0]  ;;  %v13881_v3 = vor.u32 %v15738_v0, %v13878_v47  ;;  %v15702_v12 = vld [vmem:[%s17246_s10 + $0x14cc] sm:$0xf]  ;;  %v13609_v24 = vor.u32 %v15670_v50, %v13606_v52 }
 0x593   : > { %10737 = vmatpush.bf16.msrb.mxu0 %v13033_v53  ;;  %v14009_v1 = vor.u32 %v15770_v9, %v14006_v55  ;;  %v13734_v43 = vld [vmem:[%s17246_s10 + $0x14d8] sm:$0xf0]  ;;  %v15734_v53 = vld [vmem:[%s17246_s10 + $0x15cc] sm:$0xf] }
 0x594   : > { %10750 = vmatpush.bf16.msrb.mxu1 %v13161_v8  ;;  %v13862_v19 = vld [vmem:[%s17246_s10 + $0x15d8] sm:$0xf0]  ;;  %v15766_v8 = vld [vmem:[%s17246_s10 + $0x16cc] sm:$0xf]  ;;  %v13737_v23 = vor.u32 %v15702_v12, %v13734_v43 }
 0x595   : > { %10763 = vmatpush.bf16.msrb.mxu2 %v13289_v20  ;;  %10776 = vmatpush.bf16.msrb.mxu3 %v13417_v22  ;;  %v13990_v20 = vld [vmem:[%s17246_s10 + $0x16d8] sm:$0xf0]  ;;  %v13865_v31 = vor.u32 %v15734_v53, %v13862_v19  ;;  %v15666_v22 = vld [vmem:[%s17246_s10 + $0x13ac] sm:$0xf] }
 0x596   : > { %v13590_v16 = vld [vmem:[%s17246_s10 + $0x13b8] sm:$0xf0]  ;;  %v15698_v18 = vld [vmem:[%s17246_s10 + $0x14ac] sm:$0xf]  ;;  %v13993_v42 = vor.u32 %v15766_v8, %v13990_v20 }
 0x597   : > { %10738 = vmatpush.bf16.msrb.mxu0 %v13017_v25  ;;  %v13718_v36 = vld [vmem:[%s17246_s10 + $0x14b8] sm:$0xf0]  ;;  %v15730_v48 = vld [vmem:[%s17246_s10 + $0x15ac] sm:$0xf] }
 0x598   : > { %10751 = vmatpush.bf16.msrb.mxu1 %v13145_v27  ;;  %v13846_v25 = vld [vmem:[%s17246_s10 + $0x15b8] sm:$0xf0]  ;;  %v15762_v40 = vld [vmem:[%s17246_s10 + $0x16ac] sm:$0xf]  ;;  %v13721_v27 = vor.u32 %v15698_v18, %v13718_v36 }
 0x599   : > { %10764 = vmatpush.bf16.msrb.mxu2 %v13273_v32  ;;  %10777 = vmatpush.bf16.msrb.mxu3 %v13401_v58  ;;  %v13974_v10 = vld [vmem:[%s17246_s10 + $0x16b8] sm:$0xf0]  ;;  %v13849_v32 = vor.u32 %v15730_v48, %v13846_v25  ;;  %v15662_v60 = vld [vmem:[%s17246_s10 + $0x138c] sm:$0xf] }
 0x59a   : > { %v15694_v62 = vld [vmem:[%s17246_s10 + $0x148c] sm:$0xf]  ;;  %v13702_v4 = vld [vmem:[%s17246_s10 + $0x1498] sm:$0xf0] }
 0x59b   : > { %10739 = vmatpush.bf16.msrb.mxu0 %v13001_v35  ;;  %v15726_v58 = vld [vmem:[%s17246_s10 + $0x158c] sm:$0xf]  ;;  %v10533_v41 = vpop.f32.mrf.mxu0  ;;  %v13958_v63 = vld [vmem:[%s17246_s10 + $0x1698] sm:$0xf0]  ;;  %v13705_v5 = vor.u32 %v15694_v62, %v13702_v4 }
 0x59c   : > { %10752 = vmatpush.bf16.msrb.mxu1 %v13129_v29  ;;  %v15758_v51 = vld [vmem:[%s17246_s10 + $0x168c] sm:$0xf]  ;;  %v19477_v45 = vadd.f32 %v10533_v41, %v19421_v2  ;;  %v13558_v0 = vld [vmem:[%s17246_s10 + $0x1378] sm:$0xf0]  ;;  %v10546_v29 = vpop.f32.mrf.mxu1 }
 0x59d   : > { %10765 = vmatpush.bf16.msrb.mxu2 %v13257_v17  ;;  %10778 = vmatpush.bf16.msrb.mxu3 %v13385_v59  ;;  %v15658_v26 = vld [vmem:[%s17246_s10 + $0x136c] sm:$0xf]  ;;  %v13961_v17 = vor.u32 %v15758_v51, %v13958_v63  ;;  %v13686_v9 = vld [vmem:[%s17246_s10 + $0x1478] sm:$0xf0] }
 0x59e   : > { %10740 = vmatmul.bf16.vlgmr.msrb.gmra.mxu0 %v17632_v30  ;;  %v13593_v30 = vor.u32 %v15666_v22, %v13590_v16  ;;  %v15690_v47 = vld [vmem:[%s17246_s10 + $0x146c] sm:$0xf]  ;;  %v13814_v2 = vld [vmem:[%s17246_s10 + $0x1578] sm:$0xf0]  ;;  %vm10942_vm4 = vcmp.ge.f32.partialorder %v19477_v45, 0.0 }
 0x59f   : > { %10784 = vmatpush.bf16.msra.mxu0 %v13625_v49  ;;  %10753 = vmatmul.bf16.vlgmr.msrb.gmra.mxu1 %v17712_v34  ;;  %v13977_v34 = vor.u32 %v15762_v40, %v13974_v10  ;;  %v15722_v55 = vld [vmem:[%s17246_s10 + $0x156c] sm:$0xf]  ;;  %v13942_v49 = vld [vmem:[%s17246_s10 + $0x1678] sm:$0xf0]  ;;  %v13689_v50 = vor.u32 %v15690_v47, %v13686_v9 }
 0x5a0   : > { %10797 = vmatpush.bf16.msra.mxu1 %v13753_v14  ;;  %10766 = vmatmul.bf16.vlgmr.msrb.gmra.mxu2 %v17723_v39  ;;  %v13574_v39 = vld [vmem:[%s17246_s10 + $0x1398] sm:$0xf0]  ;;  %v15754_v59 = vld [vmem:[%s17246_s10 + $0x166c] sm:$0xf]  ;;  %v10547_v14 = vadd.f32 %v10546_v29, %v4363_v44  ;;  %v13817_v52 = vor.u32 %v15722_v55, %v13814_v2 }
 0x5a1   : > { %10810 = vmatpush.bf16.msra.mxu2 %v13881_v3  ;;  %10823 = vmatpush.bf16.msra.mxu3 %v14009_v1  ;;  %v13577_v57 = vor.u32 %v15662_v60, %v13574_v39  ;;  %v13561_v3 = vor.u32 %v15658_v26, %v13558_v0  ;;  %v15654_v12 = vld [vmem:[%s17246_s10 + $0x134c] sm:$0xf]  ;;  %v13542_v1 = vld [vmem:[%s17246_s10 + $0x1358] sm:$0xf0]  ;;  %v13945_v53 = vor.u32 %v15754_v59, %v13942_v49 }
 0x5a2   : > { %10779 = vmatmul.bf16.vlgmr.msrb.gmra.mxu3 %v17719_v37  ;;  %v13830_v37 = vld [vmem:[%s17246_s10 + $0x1598] sm:$0xf0]  ;;  %v15686_v43 = vld [vmem:[%s17246_s10 + $0x144c] sm:$0xf] }
 0x5a3   : > { %10785 = vmatpush.bf16.msra.mxu0 %v13609_v24  ;;  %v13833_v35 = vor.u32 %v15726_v58, %v13830_v37  ;;  %v13670_v19 = vld [vmem:[%s17246_s10 + $0x1458] sm:$0xf0]  ;;  %v15718_v8 = vld [vmem:[%s17246_s10 + $0x154c] sm:$0xf]  ;;  %v10559_v24 = vpop.f32.mrf.mxu2  ;;  %v10535_v18 = vpop.f32.mrf.mxu0 }
 0x5a4   : > { %10798 = vmatpush.bf16.msra.mxu1 %v13737_v23  ;;  %v13798_v20 = vld [vmem:[%s17246_s10 + $0x1558] sm:$0xf0]  ;;  %v10560_v16 = vadd.f32 %v10559_v24, %v10547_v14  ;;  %v13673_v36 = vor.u32 %v15686_v43, %v13670_v19  ;;  %v15650_v25 = vld [vmem:[%s17246_s10 + $0x132c] sm:$0xf] }
 0x5a5   : > { %10811 = vmatpush.bf16.msra.mxu2 %v13865_v31  ;;  %10824 = vmatpush.bf16.msra.mxu3 %v13993_v42  ;;  %v10572_v23 = vpop.f32.mrf.mxu3  ;;  %v15750_v31 = vld [vmem:[%s17246_s10 + $0x164c] sm:$0xf]  ;;  %v13926_v22 = vld [vmem:[%s17246_s10 + $0x1658] sm:$0xf0]  ;;  %v13545_v42 = vor.u32 %v15654_v12, %v13542_v1  ;;  %v13801_v48 = vor.u32 %v15718_v8, %v13798_v20 }
 0x5a6   : > { %v13526_v40 = vld [vmem:[%s17246_s10 + $0x1338] sm:$0xf0]  ;;  %v15682_v10 = vld [vmem:[%s17246_s10 + $0x142c] sm:$0xf] }
 0x5a7   : > { %10786 = vmatpush.bf16.msra.mxu0 %v13593_v30  ;;  %v19498_v30 = vadd.f32 %v10572_v23, %v10560_v16  ;;  %v13654_v60 = vld [vmem:[%s17246_s10 + $0x1438] sm:$0xf0]  ;;  %v15714_v39 = vld [vmem:[%s17246_s10 + $0x152c] sm:$0xf]  ;;  %v13529_v58 = vor.u32 %v15650_v25, %v13526_v40 }
 0x5a8   : > { %10799 = vmatpush.bf16.msra.mxu1 %v13721_v27  ;;  %v10548_v27 = vpop.f32.mrf.mxu1  ;;  %v13782_v62 = vld [vmem:[%s17246_s10 + $0x1538] sm:$0xf0]  ;;  %v15646_v37 = vld [vmem:[%s17246_s10 + $0x130c] sm:$0xf]  ;;  %v13657_v51 = vor.u32 %v15682_v10, %v13654_v60 }
 0x5a9   : > { %10812 = vmatpush.bf16.msra.mxu2 %v13849_v32  ;;  %10825 = vmatpush.bf16.msra.mxu3 %v13977_v34  ;;  %v13929_v32 = vor.u32 %v15750_v31, %v13926_v22  ;;  %v15746_v34 = vld [vmem:[%s17246_s10 + $0x162c] sm:$0xf]  ;;  %v13910_v4 = vld [vmem:[%s17246_s10 + $0x1638] sm:$0xf0]  ;;  %v13785_v63 = vor.u32 %v15714_v39, %v13782_v62 }
 0x5aa   : > { %v13510_v41 = vld [vmem:[%s17246_s10 + $0x1318] sm:$0xf0]  ;;  %v15678_v38 = vld [vmem:[%s17246_s10 + $0x140c] sm:$0xf] }
 0x5ab   : > { %10787 = vmatpush.bf16.msra.mxu0 %v13577_v57  ;;  %v13638_v44 = vld [vmem:[%s17246_s10 + $0x1418] sm:$0xf0]  ;;  %v15710_v57 = vld [vmem:[%s17246_s10 + $0x150c] sm:$0xf]  ;;  %v10561_v47 = vpop.f32.mrf.mxu2  ;;  %v13513_v2 = vor.u32 %v15646_v37, %v13510_v41 }
 0x5ac   : > { %10800 = vmatpush.bf16.msra.mxu1 %v13705_v5  ;;  %v13913_v5 = vor.u32 %v15746_v34, %v13910_v4  ;;  %v15742_v26 = vld [vmem:[%s17246_s10 + $0x160c] sm:$0xf]  ;;  %v13894_v0 = vld [vmem:[%s17246_s10 + $0x1618] sm:$0xf0] }
 0x5ad   : > { %10813 = vmatpush.bf16.msra.mxu2 %v13833_v35  ;;  %10826 = vmatpush.bf16.msra.mxu3 %v13961_v17  ;;  %v13766_v35 = vld [vmem:[%s17246_s10 + $0x1518] sm:$0xf0]  ;;  %v10574_v29 = vpop.f32.mrf.mxu3  ;;  %v15802_v17 = vld [vmem:[%s17246_s10 + $0x17ec] sm:$0xf]  ;;  %v13897_v1 = vor.u32 %v15742_v26, %v13894_v0 }
 0x5ae   : > { %v14134_v9 = vld [vmem:[%s17246_s10 + $0x17f8] sm:$0xf0]  ;;  %v15834_v55 = vld [vmem:[%s17246_s10 + $0x18ec] sm:$0xf] }
 0x5af   : > { %10788 = vmatpush.bf16.msra.mxu0 %v13561_v3  ;;  %v14262_v59 = vld [vmem:[%s17246_s10 + $0x18f8] sm:$0xf0]  ;;  %v15866_v49 = vld [vmem:[%s17246_s10 + $0x19ec] sm:$0xf]  ;;  %v13641_v3 = vor.u32 %v15678_v38, %v13638_v44  ;;  %v14137_v43 = vor.u32 %v15802_v17, %v14134_v9 }
 0x5b0   : > { %10801 = vmatpush.bf16.msra.mxu1 %v13689_v50  ;;  %v14390_v14 = vld [vmem:[%s17246_s10 + $0x19f8] sm:$0xf0]  ;;  %v13769_v50 = vor.u32 %v15710_v57, %v13766_v35  ;;  %v15798_v8 = vld [vmem:[%s17246_s10 + $0x17cc] sm:$0xf] }
 0x5b1   : > { %10814 = vmatpush.bf16.msra.mxu2 %v13817_v52  ;;  %10827 = vmatpush.bf16.msra.mxu3 %v13945_v53  ;;  %v15898_v52 = vld [vmem:[%s17246_s10 + $0x1aec] sm:$0xf]  ;;  %v14518_v12 = vld [vmem:[%s17246_s10 + $0x1af8] sm:$0xf0]  ;;  %v14265_v53 = vor.u32 %v15834_v55, %v14262_v59  ;;  %v14393_v19 = vor.u32 %v15866_v49, %v14390_v14 }
 0x5b2   : > { %v14118_v20 = vld [vmem:[%s17246_s10 + $0x17d8] sm:$0xf0]  ;;  %v15830_v24 = vld [vmem:[%s17246_s10 + $0x18cc] sm:$0xf]  ;;  %v14521_v23 = vor.u32 %v15898_v52, %v14518_v12 }
 0x5b3   : > { %10789 = vmatpush.bf16.msra.mxu0 %v13545_v42  ;;  %v14246_v31 = vld [vmem:[%s17246_s10 + $0x18d8] sm:$0xf0]  ;;  %v15862_v22 = vld [vmem:[%s17246_s10 + $0x19cc] sm:$0xf] }
 0x5b4   : > { %10802 = vmatpush.bf16.msra.mxu1 %v13673_v36  ;;  %v14374_v16 = vld [vmem:[%s17246_s10 + $0x19d8] sm:$0xf0]  ;;  %v15894_v18 = vld [vmem:[%s17246_s10 + $0x1acc] sm:$0xf]  ;;  %v14121_v36 = vor.u32 %v15798_v8, %v14118_v20 }
 0x5b5   : > { %10815 = vmatpush.bf16.msra.mxu2 %v13801_v48  ;;  %10828 = vmatpush.bf16.msra.mxu3 %v13929_v32  ;;  %v14502_v42 = vld [vmem:[%s17246_s10 + $0x1ad8] sm:$0xf0]  ;;  %v14249_v48 = vor.u32 %v15830_v24, %v14246_v31  ;;  %v14377_v25 = vor.u32 %v15862_v22, %v14374_v16  ;;  %v15794_v40 = vld [vmem:[%s17246_s10 + $0x17ac] sm:$0xf] }
 0x5b6   : > { %v14102_v10 = vld [vmem:[%s17246_s10 + $0x17b8] sm:$0xf0]  ;;  %v15826_v27 = vld [vmem:[%s17246_s10 + $0x18ac] sm:$0xf]  ;;  %v14505_v32 = vor.u32 %v15894_v18, %v14502_v42 }
 0x5b7   : > { %10790 = vmatpush.bf16.msra.mxu0 %v13529_v58  ;;  %v14230_v60 = vld [vmem:[%s17246_s10 + $0x18b8] sm:$0xf0]  ;;  %v15858_v39 = vld [vmem:[%s17246_s10 + $0x19ac] sm:$0xf] }
 0x5b8   : > { %10803 = vmatpush.bf16.msra.mxu1 %v13657_v51  ;;  %v14358_v62 = vld [vmem:[%s17246_s10 + $0x19b8] sm:$0xf0]  ;;  %v15890_v34 = vld [vmem:[%s17246_s10 + $0x1aac] sm:$0xf]  ;;  %v14233_v58 = vor.u32 %v15826_v27, %v14230_v60 }
 0x5b9   : > { %10816 = vmatpush.bf16.msra.mxu2 %v13785_v63  ;;  %10829 = vmatpush.bf16.msra.mxu3 %v13913_v5  ;;  %v14486_v4 = vld [vmem:[%s17246_s10 + $0x1ab8] sm:$0xf0]  ;;  %v14361_v37 = vor.u32 %v15858_v39, %v14358_v62  ;;  %v15790_v41 = vld [vmem:[%s17246_s10 + $0x178c] sm:$0xf] }
 0x5ba   : > { %v14086_v51 = vld [vmem:[%s17246_s10 + $0x1798] sm:$0xf0]  ;;  %v15854_v38 = vld [vmem:[%s17246_s10 + $0x198c] sm:$0xf] }
 0x5bb   : > { %10791 = vmatpush.bf16.msra.mxu0 %v13513_v2  ;;  %v14214_v63 = vld [vmem:[%s17246_s10 + $0x1898] sm:$0xf0]  ;;  %v15886_v57 = vld [vmem:[%s17246_s10 + $0x1a8c] sm:$0xf]  ;;  %v14089_v5 = vor.u32 %v15790_v41, %v14086_v51  ;;  %v10585_v35 = vpop.f32.mrf.mxu0 }
 0x5bc   : > { %10804 = vmatpush.bf16.msra.mxu1 %v13641_v3  ;;  %v14342_v44 = vld [vmem:[%s17246_s10 + $0x1998] sm:$0xf0]  ;;  %v15786_v47 = vld [vmem:[%s17246_s10 + $0x176c] sm:$0xf]  ;;  %v10586_v9 = vadd.f32 %v10585_v35, %v19498_v30  ;;  %v10598_v55 = vpop.f32.mrf.mxu1 }
 0x5bd   : > { %10817 = vmatpush.bf16.msra.mxu2 %v13769_v50  ;;  %10830 = vmatpush.bf16.msra.mxu3 %v13897_v1  ;;  %v14345_v0 = vor.u32 %v15854_v38, %v14342_v44  ;;  %v14070_v29 = vld [vmem:[%s17246_s10 + $0x1778] sm:$0xf0]  ;;  %v15818_v17 = vld [vmem:[%s17246_s10 + $0x186c] sm:$0xf] }
 0x5be   : > { %10792 = vmatmul.bf16.vlgmr.msra.gmra.mxu0 %v17730_v46  ;;  %v14105_v46 = vor.u32 %v15794_v40, %v14102_v10  ;;  %v14198_v59 = vld [vmem:[%s17246_s10 + $0x1878] sm:$0xf0]  ;;  %v15850_v49 = vld [vmem:[%s17246_s10 + $0x196c] sm:$0xf]  ;;  %v10599_v52 = vadd.f32 %v10598_v55, %v10586_v9  ;;  %v14073_v12 = vor.u32 %v15786_v47, %v14070_v29 }
 0x5bf   : > { %10836 = vmatpush.bf16.msrb.mxu0 %v14137_v43  ;;  %10805 = vmatmul.bf16.vlgmr.msra.gmra.mxu1 %v17826_v7  ;;  %v14489_v7 = vor.u32 %v15890_v34, %v14486_v4  ;;  %v14326_v14 = vld [vmem:[%s17246_s10 + $0x1978] sm:$0xf0]  ;;  %v15882_v3 = vld [vmem:[%s17246_s10 + $0x1a6c] sm:$0xf]  ;;  %v14201_v30 = vor.u32 %v15818_v17, %v14198_v59 }
 0x5c0   : > { %10849 = vmatpush.bf16.msrb.mxu1 %v14265_v53  ;;  %10818 = vmatmul.bf16.vlgmr.msra.gmra.mxu2 %v17837_v21  ;;  %v15822_v21 = vld [vmem:[%s17246_s10 + $0x188c] sm:$0xf]  ;;  %v14454_v50 = vld [vmem:[%s17246_s10 + $0x1a78] sm:$0xf0]  ;;  %v14329_v1 = vor.u32 %v15850_v49, %v14326_v14 }
 0x5c1   : > { %10862 = vmatpush.bf16.msrb.mxu2 %v14393_v19  ;;  %10875 = vmatpush.bf16.msrb.mxu3 %v14521_v23  ;;  %v14217_v26 = vor.u32 %v15822_v21, %v14214_v63  ;;  %v15782_v43 = vld [vmem:[%s17246_s10 + $0x174c] sm:$0xf]  ;;  %v14054_v53 = vld [vmem:[%s17246_s10 + $0x1758] sm:$0xf0]  ;;  %v14457_v20 = vor.u32 %v15882_v3, %v14454_v50 }
 0x5c2   : > { %10831 = vmatmul.bf16.vlgmr.msra.gmra.mxu3 %v17833_v11  ;;  %v14470_v11 = vld [vmem:[%s17246_s10 + $0x1a98] sm:$0xf0]  ;;  %v15814_v19 = vld [vmem:[%s17246_s10 + $0x184c] sm:$0xf] }
 0x5c3   : > { %10837 = vmatpush.bf16.msrb.mxu0 %v14121_v36  ;;  %v14473_v2 = vor.u32 %v15886_v57, %v14470_v11  ;;  %v10611_v8 = vpop.f32.mrf.mxu2  ;;  %v14182_v24 = vld [vmem:[%s17246_s10 + $0x1858] sm:$0xf0]  ;;  %v15846_v23 = vld [vmem:[%s17246_s10 + $0x194c] sm:$0xf]  ;;  %v14057_v36 = vor.u32 %v15782_v43, %v14054_v53 }
 0x5c4   : > { %10850 = vmatpush.bf16.msrb.mxu1 %v14249_v48  ;;  %v14310_v31 = vld [vmem:[%s17246_s10 + $0x1958] sm:$0xf0]  ;;  %v10612_v22 = vadd.f32 %v10611_v8, %v10599_v52  ;;  %v15878_v18 = vld [vmem:[%s17246_s10 + $0x1a4c] sm:$0xf]  ;;  %v14185_v40 = vor.u32 %v15814_v19, %v14182_v24  ;;  %v10600_v39 = vpop.f32.mrf.mxu1 }
 0x5c5   : > { %10863 = vmatpush.bf16.msrb.mxu2 %v14377_v25  ;;  %10876 = vmatpush.bf16.msrb.mxu3 %v14505_v32  ;;  %v10624_v16 = vpop.f32.mrf.mxu3  ;;  %v14438_v42 = vld [vmem:[%s17246_s10 + $0x1a58] sm:$0xf0]  ;;  %v10587_v25 = vpop.f32.mrf.mxu0  ;;  %v14313_v10 = vor.u32 %v15846_v23, %v14310_v31  ;;  %v15778_v27 = vld [vmem:[%s17246_s10 + $0x172c] sm:$0xf] }
 0x5c6   : > { %v19566_v48 = vadd.f32 %v10624_v16, %v10612_v22  ;;  %v14038_v32 = vld [vmem:[%s17246_s10 + $0x1738] sm:$0xf0]  ;;  %v15810_v60 = vld [vmem:[%s17246_s10 + $0x182c] sm:$0xf]  ;;  %v14441_v62 = vor.u32 %v15878_v18, %v14438_v42 }
 0x5c7   : > { %10838 = vmatpush.bf16.msrb.mxu0 %v14105_v46  ;;  %v14166_v34 = vld [vmem:[%s17246_s10 + $0x1838] sm:$0xf0]  ;;  %v15842_v4 = vld [vmem:[%s17246_s10 + $0x192c] sm:$0xf]  ;;  %v14041_v41 = vor.u32 %v15778_v27, %v14038_v32 }
 0x5c8   : > { %10851 = vmatpush.bf16.msrb.mxu1 %v14233_v58  ;;  %v14294_v46 = vld [vmem:[%s17246_s10 + $0x1938] sm:$0xf0]  ;;  %v15874_v58 = vld [vmem:[%s17246_s10 + $0x1a2c] sm:$0xf] }
 0x5c9   : > { %10864 = vmatpush.bf16.msrb.mxu2 %v14361_v37  ;;  %10877 = vmatpush.bf16.msrb.mxu3 %v14489_v7  ;;  %v14422_v37 = vld [vmem:[%s17246_s10 + $0x1a38] sm:$0xf0]  ;;  %v15774_v51 = vld [vmem:[%s17246_s10 + $0x170c] sm:$0xf]  ;;  %v14169_v7 = vor.u32 %v15810_v60, %v14166_v34  ;;  %v14297_v63 = vor.u32 %v15842_v4, %v14294_v46 }
 0x5ca   : > { %v14022_v21 = vld [vmem:[%s17246_s10 + $0x1718] sm:$0xf0]  ;;  %v15806_v38 = vld [vmem:[%s17246_s10 + $0x180c] sm:$0xf] }
 0x5cb   : > { %10839 = vmatpush.bf16.msrb.mxu0 %v14089_v5  ;;  %v14150_v44 = vld [vmem:[%s17246_s10 + $0x1818] sm:$0xf0]  ;;  %v15838_v57 = vld [vmem:[%s17246_s10 + $0x190c] sm:$0xf]  ;;  %v10613_v11 = vpop.f32.mrf.mxu2  ;;  %v14425_v5 = vor.u32 %v15874_v58, %v14422_v37  ;;  %v14025_v55 = vor.u32 %v15774_v51, %v14022_v21 }
 0x5cc   : > { %10852 = vmatpush.bf16.msrb.mxu1 %v14217_v26  ;;  %v14278_v35 = vld [vmem:[%s17246_s10 + $0x1918] sm:$0xf0]  ;;  %v15870_v26 = vld [vmem:[%s17246_s10 + $0x1a0c] sm:$0xf]  ;;  %v14153_v14 = vor.u32 %v15806_v38, %v14150_v44 }
 0x5cd   : > { %10865 = vmatpush.bf16.msrb.mxu2 %v14345_v0  ;;  %10878 = vmatpush.bf16.msrb.mxu3 %v14473_v2  ;;  %v14406_v0 = vld [vmem:[%s17246_s10 + $0x1a18] sm:$0xf0]  ;;  %v10626_v47 = vpop.f32.mrf.mxu3  ;;  %v15930_v29 = vld [vmem:[%s17246_s10 + $0x1bec] sm:$0xf]  ;;  %v14281_v3 = vor.u32 %v15838_v57, %v14278_v35 }
 0x5ce   : > { %v14646_v17 = vld [vmem:[%s17246_s10 + $0x1bf8] sm:$0xf0]  ;;  %v15962_v9 = vld [vmem:[%s17246_s10 + $0x1cec] sm:$0xf] }
 0x5cf   : > { %10840 = vmatpush.bf16.msrb.mxu0 %v14073_v12  ;;  %v14774_v2 = vld [vmem:[%s17246_s10 + $0x1cf8] sm:$0xf0]  ;;  %v15994_v59 = vld [vmem:[%s17246_s10 + $0x1dec] sm:$0xf]  ;;  %v14409_v12 = vor.u32 %v15870_v26, %v14406_v0 }
 0x5d0   : > { %10853 = vmatpush.bf16.msrb.mxu1 %v14201_v30  ;;  %v14902_v49 = vld [vmem:[%s17246_s10 + $0x1df8] sm:$0xf0]  ;;  %v16026_v50 = vld [vmem:[%s17246_s10 + $0x1eec] sm:$0xf]  ;;  %v14649_v30 = vor.u32 %v15930_v29, %v14646_v17 }
 0x5d1   : > { %10866 = vmatpush.bf16.msrb.mxu2 %v14329_v1  ;;  %10879 = vmatpush.bf16.msrb.mxu3 %v14457_v20  ;;  %v15030_v52 = vld [vmem:[%s17246_s10 + $0x1ef8] sm:$0xf0]  ;;  %v14777_v1 = vor.u32 %v15962_v9, %v14774_v2  ;;  %v14905_v43 = vor.u32 %v15994_v59, %v14902_v49  ;;  %v15926_v53 = vld [vmem:[%s17246_s10 + $0x1bcc] sm:$0xf] }
 0x5d2   : > { %v14630_v19 = vld [vmem:[%s17246_s10 + $0x1bd8] sm:$0xf0]  ;;  %v15958_v8 = vld [vmem:[%s17246_s10 + $0x1ccc] sm:$0xf]  ;;  %v15033_v20 = vor.u32 %v16026_v50, %v15030_v52 }
 0x5d3   : > { %10841 = vmatpush.bf16.msrb.mxu0 %v14057_v36  ;;  %v14758_v24 = vld [vmem:[%s17246_s10 + $0x1cd8] sm:$0xf0]  ;;  %v15990_v23 = vld [vmem:[%s17246_s10 + $0x1dcc] sm:$0xf]  ;;  %v14633_v18 = vor.u32 %v15926_v53, %v14630_v19 }
 0x5d4   : > { %10854 = vmatpush.bf16.msrb.mxu1 %v14185_v40  ;;  %v14886_v31 = vld [vmem:[%s17246_s10 + $0x1dd8] sm:$0xf0]  ;;  %v16022_v22 = vld [vmem:[%s17246_s10 + $0x1ecc] sm:$0xf]  ;;  %v14761_v42 = vor.u32 %v15958_v8, %v14758_v24 }
 0x5d5   : > { %10867 = vmatpush.bf16.msrb.mxu2 %v14313_v10  ;;  %10880 = vmatpush.bf16.msrb.mxu3 %v14441_v62  ;;  %v15014_v16 = vld [vmem:[%s17246_s10 + $0x1ed8] sm:$0xf0]  ;;  %v14889_v36 = vor.u32 %v15990_v23, %v14886_v31  ;;  %v15922_v25 = vld [vmem:[%s17246_s10 + $0x1bac] sm:$0xf] }
 0x5d6   : > { %v14614_v40 = vld [vmem:[%s17246_s10 + $0x1bb8] sm:$0xf0]  ;;  %v15954_v10 = vld [vmem:[%s17246_s10 + $0x1cac] sm:$0xf]  ;;  %v15017_v27 = vor.u32 %v16022_v22, %v15014_v16 }
 0x5d7   : > { %10842 = vmatpush.bf16.msrb.mxu0 %v14041_v41  ;;  %v14742_v32 = vld [vmem:[%s17246_s10 + $0x1cb8] sm:$0xf0]  ;;  %v15986_v60 = vld [vmem:[%s17246_s10 + $0x1dac] sm:$0xf] }
 0x5d8   : > { %10855 = vmatpush.bf16.msrb.mxu1 %v14169_v7  ;;  %v14870_v39 = vld [vmem:[%s17246_s10 + $0x1db8] sm:$0xf0]  ;;  %v16018_v62 = vld [vmem:[%s17246_s10 + $0x1eac] sm:$0xf]  ;;  %v14745_v4 = vor.u32 %v15954_v10, %v14742_v32 }
 0x5d9   : > { %10868 = vmatpush.bf16.msrb.mxu2 %v14297_v63  ;;  %10881 = vmatpush.bf16.msrb.mxu3 %v14425_v5  ;;  %v14998_v34 = vld [vmem:[%s17246_s10 + $0x1eb8] sm:$0xf0]  ;;  %v14873_v46 = vor.u32 %v15986_v60, %v14870_v39  ;;  %v15918_v58 = vld [vmem:[%s17246_s10 + $0x1b8c] sm:$0xf] }
 0x5da   : > { %v14598_v37 = vld [vmem:[%s17246_s10 + $0x1b98] sm:$0xf0]  ;;  %v15982_v51 = vld [vmem:[%s17246_s10 + $0x1d8c] sm:$0xf] }
 0x5db   : > { %10843 = vmatpush.bf16.msrb.mxu0 %v14025_v55  ;;  %v14726_v41 = vld [vmem:[%s17246_s10 + $0x1c98] sm:$0xf0]  ;;  %v16014_v7 = vld [vmem:[%s17246_s10 + $0x1e8c] sm:$0xf]  ;;  %v14601_v44 = vor.u32 %v15918_v58, %v14598_v37 }
 0x5dc   : > { %10856 = vmatpush.bf16.msrb.mxu1 %v14153_v14  ;;  %v14854_v21 = vld [vmem:[%s17246_s10 + $0x1d98] sm:$0xf0]  ;;  %v10650_v57 = vpop.f32.mrf.mxu1  ;;  %v15914_v35 = vld [vmem:[%s17246_s10 + $0x1b6c] sm:$0xf] }
 0x5dd   : > { %10869 = vmatpush.bf16.msrb.mxu2 %v14281_v3  ;;  %10882 = vmatpush.bf16.msrb.mxu3 %v14409_v12  ;;  %v14982_v63 = vld [vmem:[%s17246_s10 + $0x1e98] sm:$0xf0]  ;;  %v14857_v5 = vor.u32 %v15982_v51, %v14854_v21  ;;  %v15946_v0 = vld [vmem:[%s17246_s10 + $0x1c6c] sm:$0xf] }
 0x5de   : > { %10844 = vmatmul.bf16.vlgmr.msrb.gmra.mxu0 %v17843_v28  ;;  %v14617_v28 = vor.u32 %v15922_v25, %v14614_v40  ;;  %v14582_v26 = vld [vmem:[%s17246_s10 + $0x1b78] sm:$0xf0]  ;;  %v14985_v47 = vor.u32 %v16014_v7, %v14982_v63  ;;  %v15978_v9 = vld [vmem:[%s17246_s10 + $0x1d6c] sm:$0xf] }
 0x5df   : > { %10888 = vmatpush.bf16.msra.mxu0 %v14649_v30  ;;  %10857 = vmatmul.bf16.vlgmr.msrb.gmra.mxu1 %v17910_v6  ;;  %v15001_v6 = vor.u32 %v16018_v62, %v14998_v34  ;;  %v14710_v17 = vld [vmem:[%s17246_s10 + $0x1c78] sm:$0xf0]  ;;  %v16010_v55 = vld [vmem:[%s17246_s10 + $0x1e6c] sm:$0xf]  ;;  %v14585_v59 = vor.u32 %v15914_v35, %v14582_v26 }
 0x5e0   : > { %10901 = vmatpush.bf16.msra.mxu1 %v14777_v1  ;;  %10870 = vmatmul.bf16.vlgmr.msrb.gmra.mxu2 %v17917_v15  ;;  %v15950_v15 = vld [vmem:[%s17246_s10 + $0x1c8c] sm:$0xf]  ;;  %v14966_v2 = vld [vmem:[%s17246_s10 + $0x1e78] sm:$0xf0]  ;;  %v14713_v49 = vor.u32 %v15946_v0, %v14710_v17 }
 0x5e1   : > { %10914 = vmatpush.bf16.msra.mxu2 %v14905_v43  ;;  %10927 = vmatpush.bf16.msra.mxu3 %v15033_v20  ;;  %v14729_v11 = vor.u32 %v15950_v15, %v14726_v41  ;;  %v15910_v3 = vld [vmem:[%s17246_s10 + $0x1b4c] sm:$0xf]  ;;  %v14566_v50 = vld [vmem:[%s17246_s10 + $0x1b58] sm:$0xf0]  ;;  %v14969_v12 = vor.u32 %v16010_v55, %v14966_v2 }
 0x5e2   : > { %10883 = vmatmul.bf16.vlgmr.msrb.gmra.mxu3 %v17915_v13  ;;  %v10637_v13 = vpop.f32.mrf.mxu0  ;;  %v15942_v52 = vld [vmem:[%s17246_s10 + $0x1c4c] sm:$0xf]  ;;  %v14694_v1 = vld [vmem:[%s17246_s10 + $0x1c58] sm:$0xf0]  ;;  %v14569_v31 = vor.u32 %v15910_v3, %v14566_v50 }
 0x5e3   : > { %10889 = vmatpush.bf16.msra.mxu0 %v14633_v18  ;;  %v10638_v38 = vadd.f32 %v10637_v13, %v19566_v48  ;;  %v14838_v48 = vld [vmem:[%s17246_s10 + $0x1d78] sm:$0xf0]  ;;  %v10663_v30 = vpop.f32.mrf.mxu2  ;;  %v15974_v43 = vld [vmem:[%s17246_s10 + $0x1d4c] sm:$0xf]  ;;  %v14697_v18 = vor.u32 %v15942_v52, %v14694_v1 }
 0x5e4   : > { %10902 = vmatpush.bf16.msra.mxu1 %v14761_v42  ;;  %v14841_v14 = vor.u32 %v15978_v9, %v14838_v48  ;;  %v14822_v53 = vld [vmem:[%s17246_s10 + $0x1d58] sm:$0xf0]  ;;  %v16006_v20 = vld [vmem:[%s17246_s10 + $0x1e4c] sm:$0xf]  ;;  %v10652_v22 = vpop.f32.mrf.mxu1 }
 0x5e5   : > { %10915 = vmatpush.bf16.msra.mxu2 %v14889_v36  ;;  %10928 = vmatpush.bf16.msra.mxu3 %v15017_v27  ;;  %v10651_v29 = vadd.f32 %v10650_v57, %v10638_v38  ;;  %v10676_v8 = vpop.f32.mrf.mxu3  ;;  %v14950_v24 = vld [vmem:[%s17246_s10 + $0x1e58] sm:$0xf0]  ;;  %v14825_v42 = vor.u32 %v15974_v43, %v14822_v53  ;;  %v15906_v36 = vld [vmem:[%s17246_s10 + $0x1b2c] sm:$0xf] }
 0x5e6   : > { %v14550_v25 = vld [vmem:[%s17246_s10 + $0x1b38] sm:$0xf0]  ;;  %v15938_v40 = vld [vmem:[%s17246_s10 + $0x1c2c] sm:$0xf]  ;;  %v14953_v10 = vor.u32 %v16006_v20, %v14950_v24 }
 0x5e7   : > { %10890 = vmatpush.bf16.msra.mxu0 %v14617_v28  ;;  %v10664_v19 = vadd.f32 %v10663_v30, %v10651_v29  ;;  %v14678_v27 = vld [vmem:[%s17246_s10 + $0x1c38] sm:$0xf0]  ;;  %v15970_v32 = vld [vmem:[%s17246_s10 + $0x1d2c] sm:$0xf]  ;;  %v14553_v34 = vor.u32 %v15906_v36, %v14550_v25 }
 0x5e8   : > { %10903 = vmatpush.bf16.msra.mxu1 %v14745_v4  ;;  %v14806_v60 = vld [vmem:[%s17246_s10 + $0x1d38] sm:$0xf0]  ;;  %v16002_v39 = vld [vmem:[%s17246_s10 + $0x1e2c] sm:$0xf]  ;;  %v14681_v28 = vor.u32 %v15938_v40, %v14678_v27 }
 0x5e9   : > { %10916 = vmatpush.bf16.msra.mxu2 %v14873_v46  ;;  %10929 = vmatpush.bf16.msra.mxu3 %v15001_v6  ;;  %v10677_v16 = vadd.f32 %v10676_v8, %v10664_v19  ;;  %v14934_v62 = vld [vmem:[%s17246_s10 + $0x1e38] sm:$0xf0]  ;;  %v14809_v4 = vor.u32 %v15970_v32, %v14806_v60  ;;  %v15902_v46 = vld [vmem:[%s17246_s10 + $0x1b0c] sm:$0xf] }
 0x5ea   : > { %v10639_v23 = vpop.f32.mrf.mxu0  ;;  %v14534_v58 = vld [vmem:[%s17246_s10 + $0x1b18] sm:$0xf0]  ;;  %v15934_v37 = vld [vmem:[%s17246_s10 + $0x1c0c] sm:$0xf]  ;;  %v14937_v15 = vor.u32 %v16002_v39, %v14934_v62 }
 0x5eb   : > { %10891 = vmatpush.bf16.msra.mxu0 %v14601_v44  ;;  %v14662_v6 = vld [vmem:[%s17246_s10 + $0x1c18] sm:$0xf0]  ;;  %v15966_v41 = vld [vmem:[%s17246_s10 + $0x1d0c] sm:$0xf]  ;;  %v10665_v21 = vpop.f32.mrf.mxu2  ;;  %v14537_v38 = vor.u32 %v15902_v46, %v14534_v58 }
 0x5ec   : > { %10904 = vmatpush.bf16.msra.mxu1 %v14729_v11  ;;  %v14790_v51 = vld [vmem:[%s17246_s10 + $0x1d18] sm:$0xf0]  ;;  %v15998_v13 = vld [vmem:[%s17246_s10 + $0x1e0c] sm:$0xf]  ;;  %v14665_v44 = vor.u32 %v15934_v37, %v14662_v6 }
 0x5ed   : > { %10917 = vmatpush.bf16.msra.mxu2 %v14857_v5  ;;  %10930 = vmatpush.bf16.msra.mxu3 %v14985_v47  ;;  %v14918_v7 = vld [vmem:[%s17246_s10 + $0x1e18] sm:$0xf0]  ;;  %v10678_v63 = vpop.f32.mrf.mxu3  ;;  %v14793_v57 = vor.u32 %v15966_v41, %v14790_v51 }
 0x5ee   : > { %v14921_v11 = vor.u32 %v15998_v13, %v14918_v7  ;;  %v10946_v63 = vmul.f32 0.01, %v19477_v45 }
 0x5ef   : > { %10892 = vmatpush.bf16.msra.mxu0 %v14585_v59 }
 0x5f0   : > { %10905 = vmatpush.bf16.msra.mxu1 %v14713_v49 }
 0x5f1   : > { %10918 = vmatpush.bf16.msra.mxu2 %v14841_v14  ;;  %10931 = vmatpush.bf16.msra.mxu3 %v14969_v12 }
 0x5f3   : > { %10893 = vmatpush.bf16.msra.mxu0 %v14569_v31 }
 0x5f4   : > { %10906 = vmatpush.bf16.msra.mxu1 %v14697_v18 }
 0x5f5   : > { %10919 = vmatpush.bf16.msra.mxu2 %v14825_v42  ;;  %10932 = vmatpush.bf16.msra.mxu3 %v14953_v10 }
 0x5f7   : > { %10894 = vmatpush.bf16.msra.mxu0 %v14553_v34 }
 0x5f8   : > { %10907 = vmatpush.bf16.msra.mxu1 %v14681_v28 }
 0x5f9   : > { %10920 = vmatpush.bf16.msra.mxu2 %v14809_v4  ;;  %10933 = vmatpush.bf16.msra.mxu3 %v14937_v15 }
 0x5fb   : > { %10895 = vmatpush.bf16.msra.mxu0 %v14537_v38  ;;  %v10689_v5 = vpop.f32.mrf.mxu0 }
 0x5fc   : > { %10908 = vmatpush.bf16.msra.mxu1 %v14665_v44  ;;  %v10690_v35 = vadd.f32 %v10689_v5, %v10677_v16  ;;  %v10702_v26 = vpop.f32.mrf.mxu1  ;;  %v10950_v5 = vsel %vm10942_vm4, %v19477_v45, %v10946_v63 }
 0x5fd   : > { %10921 = vmatpush.bf16.msra.mxu2 %v14793_v57  ;;  %10934 = vmatpush.bf16.msra.mxu3 %v14921_v11 }
 0x5fe   : > { %10896 = vmatmul.bf16.vlgmr.msra.gmra.mxu0 %v17921_v61  ;;  %v10703_v0 = vadd.f32 %v10702_v26, %v10690_v35 }
 0x5ff   : > { %10909 = vmatmul.bf16.vlgmr.msra.gmra.mxu1 %v17989_v56 }
 0x600   : > { %10922 = vmatmul.bf16.vlgmr.msra.gmra.mxu2 %v17996_v54  ;;  %10935 = vmatmul.bf16.vlgmr.msra.gmra.mxu3 %v17994_v33 }
 0x603   : > { %v10715_v47 = vpop.f32.mrf.mxu2  ;;  %v10691_v9 = vpop.f32.mrf.mxu0 }
 0x604   : > { %v10716_v29 = vadd.f32 %v10715_v47, %v10703_v0  ;;  %v10704_v48 = vpop.f32.mrf.mxu1 }
 0x605   : > { %v10728_v17 = vpop.f32.mrf.mxu3 }
 0x606   : > { %v10729_v55 = vadd.f32 %v10728_v17, %v10716_v29 }
 0x60b   : > { %v10717_v2 = vpop.f32.mrf.mxu2 }
 0x60d   : > { %v10730_v59 = vpop.f32.mrf.mxu3 }
 0x61b   : > { %v10741_v49 = vpop.f32.mrf.mxu0 }
 0x61c   : > { %v10742_v61 = vadd.f32 %v10741_v49, %v10729_v55  ;;  %v10754_v14 = vpop.f32.mrf.mxu1 }
 0x61e   : > { %v10755_v56 = vadd.f32 %v10754_v14, %v10742_v61 }
 0x623   : > { %v10767_v3 = vpop.f32.mrf.mxu2  ;;  %v10743_v33 = vpop.f32.mrf.mxu0 }
 0x624   : > { %v10768_v54 = vadd.f32 %v10767_v3, %v10755_v56  ;;  %v10756_v52 = vpop.f32.mrf.mxu1 }
 0x625   : > { %v10780_v50 = vpop.f32.mrf.mxu3 }
 0x626   : > { %v10781_v12 = vadd.f32 %v10780_v50, %v10768_v54 }
 0x62b   : > { %v10769_v30 = vpop.f32.mrf.mxu2 }
 0x62d   : > { %v10782_v1 = vpop.f32.mrf.mxu3 }
 0x63b   : > { %v10793_v43 = vpop.f32.mrf.mxu0 }
 0x63c   : > { %v10806_v53 = vpop.f32.mrf.mxu1  ;;  %v10794_v18 = vadd.f32 %v10793_v43, %v10781_v12 }
 0x63e   : > { %v10807_v10 = vadd.f32 %v10806_v53, %v10794_v18 }
 0x643   : > { %v10819_v19 = vpop.f32.mrf.mxu2  ;;  %v10795_v20 = vpop.f32.mrf.mxu0 }
 0x644   : > { %v10808_v24 = vpop.f32.mrf.mxu1  ;;  %v10820_v27 = vadd.f32 %v10819_v19, %v10807_v10 }
 0x645   : > { %v10832_v8 = vpop.f32.mrf.mxu3 }
 0x646   : > { %v10833_v39 = vadd.f32 %v10832_v8, %v10820_v27 }
 0x64b   : > { %v10821_v23 = vpop.f32.mrf.mxu2 }
 0x64d   : > { %v10834_v31 = vpop.f32.mrf.mxu3 }
 0x65b   : > { %v10845_v22 = vpop.f32.mrf.mxu0 }
 0x65c   : > { %v10858_v16 = vpop.f32.mrf.mxu1  ;;  %v10846_v62 = vadd.f32 %v10845_v22, %v10833_v39 }
 0x65e   : > { %v10859_v34 = vadd.f32 %v10858_v16, %v10846_v62 }
 0x663   : > { %v10871_v42 = vpop.f32.mrf.mxu2  ;;  %v10847_v25 = vpop.f32.mrf.mxu0 }
 0x664   : > { %v10860_v40 = vpop.f32.mrf.mxu1  ;;  %v10872_v28 = vadd.f32 %v10871_v42, %v10859_v34 }
 0x665   : > { %v10884_v36 = vpop.f32.mrf.mxu3 }
 0x666   : > { %v10885_v4 = vadd.f32 %v10884_v36, %v10872_v28 }
 0x66b   : > { %v10873_v32 = vpop.f32.mrf.mxu2 }
 0x66d   : > { %v10886_v60 = vpop.f32.mrf.mxu3 }
 0x67b   : > { %v10897_v46 = vpop.f32.mrf.mxu0 }
 0x67c   : > { %v10910_v58 = vpop.f32.mrf.mxu1  ;;  %v10898_v37 = vadd.f32 %v10897_v46, %v10885_v4 }
 0x67e   : > { %v10911_v15 = vadd.f32 %v10910_v58, %v10898_v37 }
 0x683   : > { %v10923_v6 = vpop.f32.mrf.mxu2  ;;  %v10936_v51 = vpop.f32.mrf.mxu3 }
 0x684   : > { %v10924_v41 = vadd.f32 %v10923_v6, %v10911_v15  ;;  %v10899_v21 = vpop.f32.mrf.mxu0  ;;  %v10912_v13 = vpop.f32.mrf.mxu1 }
 0x686   : > { %v10937_v7 = vadd.f32 %v10936_v51, %v10924_v41 }
 0x688   : > { %vm10943_vm3 = vcmp.ge.f32.partialorder %v10937_v7, 0.0  ;;  %v10947_v38 = vmul.f32 0.01, %v10937_v7 }
 0x68a   : > { %v10951_v44 = vsel %vm10943_vm3, %v10937_v7, %v10947_v38 }
 0x68b   : > { %v10957_v57 = vrot.slane %v10951_v44, 4  ;;  %v10925_v11 = vpop.f32.mrf.mxu2  ;;  %v10938_v35 = vpop.f32.mrf.mxu3 }
 0x68d   : > { %v10960_v26 = vsel %vm10958_vm2, %v10950_v5, %v10957_v57 }
 0x68e   : > { %10964 = vst [vmem:[%s18915_s5 + $0x8] sm:$0xff] %v10960_v26 }
 0x68f PF: > { %p10_p11 = scmp.ge.s32.totalorder %s16183_s16, 4   ;;  %s19681_s12 = smov %s16124_s13 }
 0x690   : > { %s19682_s13 = smov %s16192_s19  ;;  %s19683_s14 = smov %s16183_s16 }
 0x691   :  { %12 = sbr.rel (!%p10_p11) target bundleno = 2 (0x2), region = 123 }

</bundles_post_ra>
